<compile_context>
chip_gen: v5e
topology: v5e:2x2
jax: 0.10.0
libtpu: 0.0.40
codegen_flags: <defaults>
</compile_context>

<pallas_src>
import functools

import jax
import jax.numpy as jnp
from jax.experimental import pallas as pl
from jax.experimental.pallas import tpu as pltpu

LANE = 128
HP = 128        # padded hidden size (real H = 70)
TB_MAX = 128    # cap on the batch tile (vreg-pressure guard)


def _round_up(n, m):
    return (n + m - 1) // m * m


def _choose_tile(B):
    """Pick (batch tile TB, padded batch Bp).

    Prefers >= 2 grid steps (v7x has 2 TensorCores) and a 16-row-aligned tile
    (enables the dual interleaved recurrence sub-chains)."""
    Bp = _round_up(max(B, 8), 8)
    if Bp <= 8:
        return 8, 8
    if Bp <= 16:
        return 8, 16
    tb = min(TB_MAX, _round_up((Bp + 1) // 2, 16))
    return tb, _round_up(Bp, tb)


# --------------------------------------------------------------------------
# Fused kernel
# --------------------------------------------------------------------------
def lstmvae_kernel(
    x_ref,       # (W*TB, Dp)   timestep-major input rows        (bf16)
    eps_ref,     # (TB, Lp)     reparameterization noise          (f32)
    we_in_ref,   # (Dp, G)      encoder input->gate weights       (bf16)
    be_in_ref,   # (1, G)       encoder gate bias (b_ih + b_hh)   (f32)
    whh_e_ref,   # (Hp, G)      encoder recurrent weights         (bf16)
    wml_ref,     # (W*Hp, 2*Lp) fused [mean | log_var] weights    (bf16)
    bml_ref,     # (1, 2*Lp)                                      (f32)
    wd_in_ref,   # (Lp, W*G)    decoder block-diag input proj.    (bf16)
    bd_in_ref,   # (1, W*G)                                       (f32)
    whh_d_ref,   # (Hp, G)      decoder recurrent weights         (bf16)
    wo_ref,      # (W*Hp, ODp)  output linear                     (bf16)
    bo_ref,      # (1, ODp)                                       (f32)
    recon_ref,   # out (TB, ODp)   padded ELU(output(...))
    ml_ref,      # out (TB, 2*Lp)  padded [mu | log_var]
    proj_e_ref,  # scratch VMEM (W*TB, G)  encoder input projections (f32)
    proj_d_ref,  # scratch VMEM (TB, W*G)  decoder input projections (f32)
    hflat_ref,   # scratch VMEM (TB, W*Hp) relu(h_t) flattened       (f32)
):
    TB, Lp = eps_ref.shape
    Hp, G = whh_e_ref.shape           # G = 4*Hp
    W = wd_in_ref.shape[1] // G
    f32, bf16 = jnp.float32, jnp.bfloat16

    # Two independent recurrence sub-chains per tile hide the MXU->EUP->VPU
    # latency chain over the 2*W serial steps (only when sublane-aligned).
    NC = 2 if (TB >= 16 and TB % 16 == 0) else 1
    TBc = TB // NC

    def run_lstm(whh_ref, get_proj):
        whh = whh_ref[...]                               # hoisted: one VMEM->vreg read
        h = [jnp.zeros((TBc, Hp), f32) for _ in range(NC)]
        c = [jnp.zeros((TBc, Hp), f32) for _ in range(NC)]
        for t in range(W):                               # W is small & static
            # independent per-chain MXU pushes (scheduler overlaps them)
            gates = [
                get_proj(t, p) + jnp.dot(h[p].astype(bf16), whh,
                                         preferred_element_type=f32)
                for p in range(NC)
            ]
            for p in range(NC):
                g_p = gates[p]                           # (TBc, 4*Hp), layout [i|f|o|g]
                # per-gate (128-lane) chunks keep vreg live ranges bounded
                i_g = jax.nn.sigmoid(g_p[:, 0 * Hp:1 * Hp])
                f_g = jax.nn.sigmoid(g_p[:, 1 * Hp:2 * Hp])
                o_g = jax.nn.sigmoid(g_p[:, 2 * Hp:3 * Hp])
                g_g = jnp.tanh(g_p[:, 3 * Hp:4 * Hp])
                c[p] = f_g * c[p] + i_g * g_g
                h[p] = o_g * jnp.tanh(c[p])
                # fused ReLU + "flatten(start_dim=1)" store
                hflat_ref[p * TBc:(p + 1) * TBc, t * Hp:(t + 1) * Hp] = (
                    jnp.maximum(h[p], 0.0))

    # ---------------- encoder ----------------
    # All W timesteps' input projections in ONE lane-dense matmul
    # (rows are ordered t*TB + b, so the per-step slice is contiguous).
    proj_e_ref[...] = jnp.dot(x_ref[...], we_in_ref[...],
                              preferred_element_type=f32) + be_in_ref[...]

    def enc_proj(t, p):
        r0 = t * TB + p * TBc
        return proj_e_ref[r0:r0 + TBc, :]

    run_lstm(whh_e_ref, enc_proj)

    # fused mean / log_var linear; ReLU on both matches the reference module
    ml = jnp.maximum(
        jnp.dot(hflat_ref[...].astype(bf16), wml_ref[...],
                preferred_element_type=f32) + bml_ref[...], 0.0)
    ml_ref[...] = ml
    mu, log_var = ml[:, :Lp], ml[:, Lp:]

    # ---------------- reparameterize ----------------
    # padded lanes: mu = log_var = eps = 0  ->  z = 0 there
    z = eps_ref[...] * jnp.exp(0.5 * log_var) + mu

    # ---------------- decoder ----------------
    proj_d_ref[...] = jnp.dot(z.astype(bf16), wd_in_ref[...],
                              preferred_element_type=f32) + bd_in_ref[...]

    def dec_proj(t, p):
        return proj_d_ref[p * TBc:(p + 1) * TBc, t * G:(t + 1) * G]

    run_lstm(whh_d_ref, dec_proj)

    pre = jnp.dot(hflat_ref[...].astype(bf16), wo_ref[...],
                  preferred_element_type=f32) + bo_ref[...]
    # ELU (alpha = 1.0)
    recon_ref[...] = jnp.where(pre > 0.0, pre,
                               jnp.exp(jnp.minimum(pre, 0.0)) - 1.0)


# --------------------------------------------------------------------------
# Wrapper
# --------------------------------------------------------------------------
@functools.partial(jax.jit, static_argnames=("window_size", "input_size", "latent_size"))
def lstmvae_forward(x, eps, packed, *, window_size, input_size, latent_size):
    """x: (B, W, D) f32, eps: (B, W*L) f32 -> (recon (B,W,D), mu, log_var)."""
    B, W, D = x.shape
    assert W == window_size and D == input_size
    L = latent_size

    Hp, G = packed["whh_e"].shape
    Dp = packed["we_in"].shape[0]
    Lp, WG = packed["wd_in"].shape
    WHp, L2p = packed["wml"].shape
    ODp = packed["wo"].shape[1]

    TB, Bp = _choose_tile(B)
    n_tiles = Bp // TB

    # x -> tile-major, timestep-major rows (row = tile*W*TB + t*TB + b), bf16.
    xp = jnp.pad(x, ((0, Bp - B), (0, 0), (0, Dp - D)))            # (Bp, W, Dp)
    xp = xp.reshape(n_tiles, TB, W, Dp).transpose(0, 2, 1, 3)      # (nt, W, TB, Dp)
    x_rows = xp.reshape(n_tiles * W * TB, Dp).astype(jnp.bfloat16)

    eps_pad = jnp.pad(eps, ((0, Bp - B), (0, Lp - W * L)))

    def inv(r, c):   # grid-invariant operand (DMA'd once)
        return pl.BlockSpec((r, c), lambda i: (0, 0))

    in_specs = [
        pl.BlockSpec((W * TB, Dp), lambda i: (i, 0)),   # x rows
        pl.BlockSpec((TB, Lp), lambda i: (i, 0)),       # eps
        inv(Dp, G), inv(1, G), inv(Hp, G),              # encoder
        inv(WHp, L2p), inv(1, L2p),                     # mean | log_var
        inv(Lp, WG), inv(1, WG), inv(Hp, G),            # decoder
        inv(WHp, ODp), inv(1, ODp),                     # output
    ]
    out_specs = (
        pl.BlockSpec((TB, ODp), lambda i: (i, 0)),
        pl.BlockSpec((TB, L2p), lambda i: (i, 0)),
    )

    recon_pad, ml_pad = pl.pallas_call(
        lstmvae_kernel,
        out_shape=(
            jax.ShapeDtypeStruct((Bp, ODp), jnp.float32),
            jax.ShapeDtypeStruct((Bp, L2p), jnp.float32),
        ),
        grid_spec=pltpu.PrefetchScalarGridSpec(
            num_scalar_prefetch=0,
            grid=(n_tiles,),
            in_specs=in_specs,
            out_specs=out_specs,
            scratch_shapes=[
                pltpu.VMEM((W * TB, G), jnp.float32),   # encoder input projections
                pltpu.VMEM((TB, WG), jnp.float32),      # decoder input projections
                pltpu.VMEM((TB, WHp), jnp.float32),     # relu(h_t) flat buffer
            ],
        ),
        compiler_params=pltpu.CompilerParams(
            dimension_semantics=("parallel",),
            vmem_limit_bytes=32 * 1024 * 1024,
        ),
    )(
        x_rows, eps_pad,
        packed["we_in"], packed["be_in"], packed["whh_e"],
        packed["wml"], packed["bml"],
        packed["wd_in"], packed["bd_in"], packed["whh_d"],
        packed["wo"], packed["bo"],
    )

    recon = recon_pad[:B, :W * D].reshape(B, W, D)
    mu = ml_pad[:B, :W * L]
    log_var = ml_pad[:B, Lp:Lp + W * L]
    return recon, mu, log_var


# --------------------------------------------------------------------------
# Parameter packing (PyTorch layout -> lane-aligned, gate-reordered, bf16)
# --------------------------------------------------------------------------
def pack_params(raw, *, input_size, latent_size, window_size, hidden=70):
    D, L, W, H = input_size, latent_size, window_size, hidden
    Hp = HP
    G = 4 * Hp
    Dp = _round_up(D, LANE)
    Lp = _round_up(W * L, LANE)
    ODp = _round_up(W * D, LANE)
    order = (0, 1, 3, 2)          # PyTorch gates (i,f,g,o) -> kernel layout (i,f,o,g)

    def pad_lstm(w_ih, w_hh, b_ih, b_hh, in_dim, in_pad):
        wih = jnp.zeros((in_pad, G), jnp.float32)
        whh = jnp.zeros((Hp, G), jnp.float32)
        b = jnp.zeros((G,), jnp.float32)
        bsum = b_ih + b_hh
        for k, src in enumerate(order):
            wih = wih.at[:in_dim, k * Hp:k * Hp + H].set(w_ih[src * H:(src + 1) * H, :].T)
            whh = whh.at[:H, k * Hp:k * Hp + H].set(w_hh[src * H:(src + 1) * H, :].T)
            b = b.at[k * Hp:k * Hp + H].set(bsum[src * H:(src + 1) * H])
        return wih, whh, b

    def block_diag(w_step, in_dim, rows_pad):
        # z row t*in_dim + l feeds gate columns [t*G, (t+1)*G) (decoder only).
        out = jnp.zeros((rows_pad, W * G), jnp.float32)
        for t in range(W):
            out = out.at[t * in_dim:(t + 1) * in_dim, t * G:(t + 1) * G].set(w_step)
        return out

    def pad_linear(w, bias, out_pad):
        # nn.Linear weight (out_f, W*H) -> padded transposed (W*Hp, out_pad)
        wT = w.T
        out_f = wT.shape[1]
        wp = jnp.zeros((W * Hp, out_pad), jnp.float32)
        for t in range(W):
            wp = wp.at[t * Hp:t * Hp + H, :out_f].set(wT[t * H:(t + 1) * H, :])
        bp = jnp.zeros((out_pad,), jnp.float32).at[:out_f].set(bias)
        return wp, bp

    wih_e, whh_e, b_e = pad_lstm(raw["en_w_ih"], raw["en_w_hh"],
                                 raw["en_b_ih"], raw["en_b_hh"], D, Dp)
    wih_d, whh_d, b_d = pad_lstm(raw["de_w_ih"], raw["de_w_hh"],
                                 raw["de_b_ih"], raw["de_b_hh"], L, L)
    wm, bm = pad_linear(raw["mean_w"], raw["mean_b"], Lp)
    wv, bv = pad_linear(raw["log_var_w"], raw["log_var_b"], Lp)
    wo, bo = pad_linear(raw["out_w"], raw["out_b"], ODp)

    bf16 = jnp.bfloat16
    return {
        "we_in": wih_e.astype(bf16),                            # (Dp, G)
        "be_in": b_e[None, :],                                  # (1, G)   f32
        "whh_e": whh_e.astype(bf16),                            # (Hp, G)
        "wml": jnp.concatenate([wm, wv], axis=1).astype(bf16),  # (W*Hp, 2*Lp)
        "bml": jnp.concatenate([bm, bv])[None, :],              # (1, 2*Lp) f32
        "wd_in": block_diag(wih_d, L, Lp).astype(bf16),         # (Lp, W*G)
        "bd_in": jnp.tile(b_d, W)[None, :],                     # (1, W*G) f32
        "whh_d": whh_d.astype(bf16),                            # (Hp, G)
        "wo": wo.astype(bf16),                                  # (W*Hp, ODp)
        "bo": bo[None, :],                                      # (1, ODp) f32
    }


def init_raw_params(key, *, input_size, latent_size, window_size, hidden=70):
    """Deterministic parameters in PyTorch's native layouts."""
    D, L, W, H = input_size, latent_size, window_size, hidden
    ks = jax.random.split(key, 14)
    u = lambda k, shape, s: jax.random.uniform(k, shape, jnp.float32, -s, s)
    kH = 1.0 / float(H) ** 0.5
    kF = 1.0 / float(H * W) ** 0.5
    return {
        "en_w_ih": u(ks[0], (4 * H, D), kH),
        "en_w_hh": u(ks[1], (4 * H, H), kH),
        "en_b_ih": u(ks[2], (4 * H,), kH),
        "en_b_hh": u(ks[3], (4 * H,), kH),
        "de_w_ih": u(ks[4], (4 * H, L), kH),
        "de_w_hh": u(ks[5], (4 * H, H), kH),
        "de_b_ih": u(ks[6], (4 * H,), kH),
        "de_b_hh": u(ks[7], (4 * H,), kH),
        "mean_w": u(ks[8], (L * W, H * W), kF),
        "mean_b": u(ks[9], (L * W,), kF),
        "log_var_w": u(ks[10], (L * W, H * W), kF),
        "log_var_b": u(ks[11], (L * W,), kF),
        "out_w": u(ks[12], (D * W, H * W), kF),
        "out_b": u(ks[13], (D * W,), kF),
    }


# --------------------------------------------------------------------------
if __name__ == "__main__":
    W, D, L, Hsz = 8, 4, 3, 70      # window, input_size, latent_size, hidden

    root = jax.random.PRNGKey(0)
    k_data, k_p = jax.random.split(root)

    raw = init_raw_params(k_p, input_size=D, latent_size=L, window_size=W, hidden=Hsz)
    packed = pack_params(raw, input_size=D, latent_size=L, window_size=W, hidden=Hsz)

    # B=2  -> single tile, single recurrence chain
    # B=32 -> two grid steps (megacore path) + dual interleaved sub-chains
    for B in (2, 32):
        kx, ke = jax.random.split(jax.random.fold_in(k_data, B))
        x = jax.random.normal(kx, (B, W, D), jnp.float32)
        # reparameterization noise drawn outside the kernel (torch.randn_like eq.)
        eps = jax.random.normal(ke, (B, W * L), jnp.float32)

        recon, mu, log_var = lstmvae_forward(
            x, eps, packed, window_size=W, input_size=D, latent_size=L)
        jax.block_until_ready((recon, mu, log_var))

        assert recon.shape == (B, W, D)
        assert mu.shape == (B, W * L) and log_var.shape == (B, W * L)
        assert bool(jnp.all(jnp.isfinite(recon)))
        assert bool(jnp.all(jnp.isfinite(mu)))
        assert bool(jnp.all(jnp.isfinite(log_var)))

    print("KERNEL_OK")
</pallas_src>

<mosaic_0001>
module attributes {stable_mosaic.version = 11 : i64} {
  func.func @lstmvae_kernel(%arg0: i32, %arg1: memref<64x128xbf16, #tpu.memory_space<vmem>>, %arg2: memref<8x128xf32, #tpu.memory_space<vmem>>, %arg3: memref<128x512xbf16, #tpu.memory_space<vmem>>, %arg4: memref<1x512xf32, #tpu.memory_space<vmem>>, %arg5: memref<128x512xbf16, #tpu.memory_space<vmem>>, %arg6: memref<1024x256xbf16, #tpu.memory_space<vmem>>, %arg7: memref<1x256xf32, #tpu.memory_space<vmem>>, %arg8: memref<128x4096xbf16, #tpu.memory_space<vmem>>, %arg9: memref<1x4096xf32, #tpu.memory_space<vmem>>, %arg10: memref<128x512xbf16, #tpu.memory_space<vmem>>, %arg11: memref<1024x128xbf16, #tpu.memory_space<vmem>>, %arg12: memref<1x128xf32, #tpu.memory_space<vmem>>, %arg13: memref<8x128xf32, #tpu.memory_space<vmem>>, %arg14: memref<8x256xf32, #tpu.memory_space<vmem>>, %arg15: memref<64x512xf32, #tpu.memory_space<vmem>>, %arg16: memref<8x4096xf32, #tpu.memory_space<vmem>>, %arg17: memref<8x1024xf32, #tpu.memory_space<vmem>>) attributes {dimension_semantics = [#tpu.dimension_semantics<parallel>], iteration_bounds = array<i64: 1>, scalar_prefetch = 0 : i64, scratch_operands = 3 : i64, tpu.core_type = #tpu.core_type<tc>, window_params = [{transform_indices = @transform_0, window_bounds = array<i64: 64, 128>}, {transform_indices = @transform_1, window_bounds = array<i64: 8, 128>}, {pipeline_mode = #tpu.pipeline_mode<synchronous>, transform_indices = @transform_2, window_bounds = array<i64: 128, 512>}, {pipeline_mode = #tpu.pipeline_mode<synchronous>, transform_indices = @transform_3, window_bounds = array<i64: 1, 512>}, {pipeline_mode = #tpu.pipeline_mode<synchronous>, transform_indices = @transform_4, window_bounds = array<i64: 128, 512>}, {pipeline_mode = #tpu.pipeline_mode<synchronous>, transform_indices = @transform_5, window_bounds = array<i64: 1024, 256>}, {pipeline_mode = #tpu.pipeline_mode<synchronous>, transform_indices = @transform_6, window_bounds = array<i64: 1, 256>}, {pipeline_mode = #tpu.pipeline_mode<synchronous>, transform_indices = @transform_7, window_bounds = array<i64: 128, 4096>}, {pipeline_mode = #tpu.pipeline_mode<synchronous>, transform_indices = @transform_8, window_bounds = array<i64: 1, 4096>}, {pipeline_mode = #tpu.pipeline_mode<synchronous>, transform_indices = @transform_9, window_bounds = array<i64: 128, 512>}, {pipeline_mode = #tpu.pipeline_mode<synchronous>, transform_indices = @transform_10, window_bounds = array<i64: 1024, 128>}, {pipeline_mode = #tpu.pipeline_mode<synchronous>, transform_indices = @transform_11, window_bounds = array<i64: 1, 128>}, {transform_indices = @transform_12, window_bounds = array<i64: 8, 128>}, {transform_indices = @transform_13, window_bounds = array<i64: 8, 256>}]} {
    %c0 = arith.constant 0 : index
    %c0_0 = arith.constant 0 : index
    %0 = vector.load %arg1[%c0, %c0_0] : memref<64x128xbf16, #tpu.memory_space<vmem>>, vector<64x128xbf16>
    %c0_1 = arith.constant 0 : index
    %c0_2 = arith.constant 0 : index
    %1 = vector.load %arg3[%c0_1, %c0_2] : memref<128x512xbf16, #tpu.memory_space<vmem>>, vector<128x512xbf16>
    %cst = arith.constant dense<0.000000e+00> : vector<64x512xf32>
    %2 = tpu.matmul %0, %1, %cst {dimension_numbers = #tpu.dot_dimension_numbers<[1], [0], [0], [1], [0, 0, 1, 1], [], []>} : vector<64x128xbf16>, vector<128x512xbf16>, vector<64x512xf32> -> vector<64x512xf32>
    %c0_3 = arith.constant 0 : index
    %c0_4 = arith.constant 0 : index
    %3 = vector.load %arg4[%c0_3, %c0_4] : memref<1x512xf32, #tpu.memory_space<vmem>>, vector<1x512xf32>
    %4 = vector.broadcast %3 : vector<1x512xf32> to vector<64x512xf32>
    %5 = arith.addf %2, %4 : vector<64x512xf32>
    %c0_5 = arith.constant 0 : index
    %c0_6 = arith.constant 0 : index
    %6 = vector.load %arg15[%c0_5, %c0_6] : memref<64x512xf32, #tpu.memory_space<vmem>>, vector<64x512xf32>
    tpu.vector_store %arg15[%c0_5, %c0_6], %5 {strides = array<i32>} : memref<64x512xf32, #tpu.memory_space<vmem>>, vector<64x512xf32>,
    %c0_7 = arith.constant 0 : index
    %c0_8 = arith.constant 0 : index
    %7 = vector.load %arg5[%c0_7, %c0_8] : memref<128x512xbf16, #tpu.memory_space<vmem>>, vector<128x512xbf16>
    %cst_9 = arith.constant 0.000000e+00 : f32
    %8 = vector.broadcast %cst_9 : f32 to vector<8x128xf32>
    %cst_10 = arith.constant 0.000000e+00 : f32
    %9 = vector.broadcast %cst_10 : f32 to vector<8x128xf32>
    %c0_11 = arith.constant 0 : index
    %c0_12 = arith.constant 0 : index
    %10 = vector.load %arg15[%c0_11, %c0_12] : memref<64x512xf32, #tpu.memory_space<vmem>>, vector<8x512xf32>
    %11 = arith.truncf %8 : vector<8x128xf32> to vector<8x128xbf16>
    %cst_13 = arith.constant dense<0.000000e+00> : vector<8x512xf32>
    %12 = tpu.matmul %11, %7, %cst_13 {dimension_numbers = #tpu.dot_dimension_numbers<[1], [0], [0], [1], [0, 0, 1, 1], [], []>} : vector<8x128xbf16>, vector<128x512xbf16>, vector<8x512xf32> -> vector<8x512xf32>
    %13 = arith.addf %10, %12 : vector<8x512xf32>
    %14 = vector.extract_strided_slice %13 {offsets = [0, 0], sizes = [8, 128], strides = [1, 1]} : vector<8x512xf32> to vector<8x128xf32>
    %15 = arith.negf %14 : vector<8x128xf32>
    %16 = math.exp %15 : vector<8x128xf32>
    %cst_14 = arith.constant 1.000000e+00 : f32
    %17 = vector.broadcast %cst_14 : f32 to vector<8x128xf32>
    %18 = arith.addf %17, %16 : vector<8x128xf32>
    %19 = arith.divf %17, %18 : vector<8x128xf32>
    %20 = vector.extract_strided_slice %13 {offsets = [0, 128], sizes = [8, 128], strides = [1, 1]} : vector<8x512xf32> to vector<8x128xf32>
    %21 = arith.negf %20 : vector<8x128xf32>
    %22 = math.exp %21 : vector<8x128xf32>
    %cst_15 = arith.constant 1.000000e+00 : f32
    %23 = vector.broadcast %cst_15 : f32 to vector<8x128xf32>
    %24 = arith.addf %23, %22 : vector<8x128xf32>
    %25 = arith.divf %23, %24 : vector<8x128xf32>
    %26 = vector.extract_strided_slice %13 {offsets = [0, 256], sizes = [8, 128], strides = [1, 1]} : vector<8x512xf32> to vector<8x128xf32>
    %27 = arith.negf %26 : vector<8x128xf32>
    %28 = math.exp %27 : vector<8x128xf32>
    %cst_16 = arith.constant 1.000000e+00 : f32
    %29 = vector.broadcast %cst_16 : f32 to vector<8x128xf32>
    %30 = arith.addf %29, %28 : vector<8x128xf32>
    %31 = arith.divf %29, %30 : vector<8x128xf32>
    %32 = vector.extract_strided_slice %13 {offsets = [0, 384], sizes = [8, 128], strides = [1, 1]} : vector<8x512xf32> to vector<8x128xf32>
    %33 = math.tanh %32 : vector<8x128xf32>
    %34 = arith.mulf %25, %9 : vector<8x128xf32>
    %35 = arith.mulf %19, %33 : vector<8x128xf32>
    %36 = arith.addf %34, %35 : vector<8x128xf32>
    %37 = math.tanh %36 : vector<8x128xf32>
    %38 = arith.mulf %31, %37 : vector<8x128xf32>
    %cst_17 = arith.constant 0.000000e+00 : f32
    %39 = vector.broadcast %cst_17 : f32 to vector<8x128xf32>
    %40 = arith.maximumf %38, %39 : vector<8x128xf32>
    %c0_18 = arith.constant 0 : index
    %c0_19 = arith.constant 0 : index
    %41 = vector.load %arg17[%c0_18, %c0_19] : memref<8x1024xf32, #tpu.memory_space<vmem>>, vector<8x128xf32>
    tpu.vector_store %arg17[%c0_18, %c0_19], %40 {strides = array<i32>} : memref<8x1024xf32, #tpu.memory_space<vmem>>, vector<8x128xf32>,
    %c8 = arith.constant 8 : index
    %c0_20 = arith.constant 0 : index
    %42 = vector.load %arg15[%c8, %c0_20] : memref<64x512xf32, #tpu.memory_space<vmem>>, vector<8x512xf32>
    %43 = arith.truncf %38 : vector<8x128xf32> to vector<8x128xbf16>
    %cst_21 = arith.constant dense<0.000000e+00> : vector<8x512xf32>
    %44 = tpu.matmul %43, %7, %cst_21 {dimension_numbers = #tpu.dot_dimension_numbers<[1], [0], [0], [1], [0, 0, 1, 1], [], []>} : vector<8x128xbf16>, vector<128x512xbf16>, vector<8x512xf32> -> vector<8x512xf32>
    %45 = arith.addf %42, %44 : vector<8x512xf32>
    %46 = vector.extract_strided_slice %45 {offsets = [0, 0], sizes = [8, 128], strides = [1, 1]} : vector<8x512xf32> to vector<8x128xf32>
    %47 = arith.negf %46 : vector<8x128xf32>
    %48 = math.exp %47 : vector<8x128xf32>
    %cst_22 = arith.constant 1.000000e+00 : f32
    %49 = vector.broadcast %cst_22 : f32 to vector<8x128xf32>
    %50 = arith.addf %49, %48 : vector<8x128xf32>
    %51 = arith.divf %49, %50 : vector<8x128xf32>
    %52 = vector.extract_strided_slice %45 {offsets = [0, 128], sizes = [8, 128], strides = [1, 1]} : vector<8x512xf32> to vector<8x128xf32>
    %53 = arith.negf %52 : vector<8x128xf32>
    %54 = math.exp %53 : vector<8x128xf32>
    %cst_23 = arith.constant 1.000000e+00 : f32
    %55 = vector.broadcast %cst_23 : f32 to vector<8x128xf32>
    %56 = arith.addf %55, %54 : vector<8x128xf32>
    %57 = arith.divf %55, %56 : vector<8x128xf32>
    %58 = vector.extract_strided_slice %45 {offsets = [0, 256], sizes = [8, 128], strides = [1, 1]} : vector<8x512xf32> to vector<8x128xf32>
    %59 = arith.negf %58 : vector<8x128xf32>
    %60 = math.exp %59 : vector<8x128xf32>
    %cst_24 = arith.constant 1.000000e+00 : f32
    %61 = vector.broadcast %cst_24 : f32 to vector<8x128xf32>
    %62 = arith.addf %61, %60 : vector<8x128xf32>
    %63 = arith.divf %61, %62 : vector<8x128xf32>
    %64 = vector.extract_strided_slice %45 {offsets = [0, 384], sizes = [8, 128], strides = [1, 1]} : vector<8x512xf32> to vector<8x128xf32>
    %65 = math.tanh %64 : vector<8x128xf32>
    %66 = arith.mulf %57, %36 : vector<8x128xf32>
    %67 = arith.mulf %51, %65 : vector<8x128xf32>
    %68 = arith.addf %66, %67 : vector<8x128xf32>
    %69 = math.tanh %68 : vector<8x128xf32>
    %70 = arith.mulf %63, %69 : vector<8x128xf32>
    %cst_25 = arith.constant 0.000000e+00 : f32
    %71 = vector.broadcast %cst_25 : f32 to vector<8x128xf32>
    %72 = arith.maximumf %70, %71 : vector<8x128xf32>
    %c0_26 = arith.constant 0 : index
    %c128 = arith.constant 128 : index
    %73 = vector.load %arg17[%c0_26, %c128] : memref<8x1024xf32, #tpu.memory_space<vmem>>, vector<8x128xf32>
    tpu.vector_store %arg17[%c0_26, %c128], %72 {strides = array<i32>} : memref<8x1024xf32, #tpu.memory_space<vmem>>, vector<8x128xf32>,
    %c16 = arith.constant 16 : index
    %c0_27 = arith.constant 0 : index
    %74 = vector.load %arg15[%c16, %c0_27] : memref<64x512xf32, #tpu.memory_space<vmem>>, vector<8x512xf32>
    %75 = arith.truncf %70 : vector<8x128xf32> to vector<8x128xbf16>
    %cst_28 = arith.constant dense<0.000000e+00> : vector<8x512xf32>
    %76 = tpu.matmul %75, %7, %cst_28 {dimension_numbers = #tpu.dot_dimension_numbers<[1], [0], [0], [1], [0, 0, 1, 1], [], []>} : vector<8x128xbf16>, vector<128x512xbf16>, vector<8x512xf32> -> vector<8x512xf32>
    %77 = arith.addf %74, %76 : vector<8x512xf32>
    %78 = vector.extract_strided_slice %77 {offsets = [0, 0], sizes = [8, 128], strides = [1, 1]} : vector<8x512xf32> to vector<8x128xf32>
    %79 = arith.negf %78 : vector<8x128xf32>
    %80 = math.exp %79 : vector<8x128xf32>
    %cst_29 = arith.constant 1.000000e+00 : f32
    %81 = vector.broadcast %cst_29 : f32 to vector<8x128xf32>
    %82 = arith.addf %81, %80 : vector<8x128xf32>
    %83 = arith.divf %81, %82 : vector<8x128xf32>
    %84 = vector.extract_strided_slice %77 {offsets = [0, 128], sizes = [8, 128], strides = [1, 1]} : vector<8x512xf32> to vector<8x128xf32>
    %85 = arith.negf %84 : vector<8x128xf32>
    %86 = math.exp %85 : vector<8x128xf32>
    %cst_30 = arith.constant 1.000000e+00 : f32
    %87 = vector.broadcast %cst_30 : f32 to vector<8x128xf32>
    %88 = arith.addf %87, %86 : vector<8x128xf32>
    %89 = arith.divf %87, %88 : vector<8x128xf32>
    %90 = vector.extract_strided_slice %77 {offsets = [0, 256], sizes = [8, 128], strides = [1, 1]} : vector<8x512xf32> to vector<8x128xf32>
    %91 = arith.negf %90 : vector<8x128xf32>
    %92 = math.exp %91 : vector<8x128xf32>
    %cst_31 = arith.constant 1.000000e+00 : f32
    %93 = vector.broadcast %cst_31 : f32 to vector<8x128xf32>
    %94 = arith.addf %93, %92 : vector<8x128xf32>
    %95 = arith.divf %93, %94 : vector<8x128xf32>
    %96 = vector.extract_strided_slice %77 {offsets = [0, 384], sizes = [8, 128], strides = [1, 1]} : vector<8x512xf32> to vector<8x128xf32>
    %97 = math.tanh %96 : vector<8x128xf32>
    %98 = arith.mulf %89, %68 : vector<8x128xf32>
    %99 = arith.mulf %83, %97 : vector<8x128xf32>
    %100 = arith.addf %98, %99 : vector<8x128xf32>
    %101 = math.tanh %100 : vector<8x128xf32>
    %102 = arith.mulf %95, %101 : vector<8x128xf32>
    %cst_32 = arith.constant 0.000000e+00 : f32
    %103 = vector.broadcast %cst_32 : f32 to vector<8x128xf32>
    %104 = arith.maximumf %102, %103 : vector<8x128xf32>
    %c0_33 = arith.constant 0 : index
    %c256 = arith.constant 256 : index
    %105 = vector.load %arg17[%c0_33, %c256] : memref<8x1024xf32, #tpu.memory_space<vmem>>, vector<8x128xf32>
    tpu.vector_store %arg17[%c0_33, %c256], %104 {strides = array<i32>} : memref<8x1024xf32, #tpu.memory_space<vmem>>, vector<8x128xf32>,
    %c24 = arith.constant 24 : index
    %c0_34 = arith.constant 0 : index
    %106 = vector.load %arg15[%c24, %c0_34] : memref<64x512xf32, #tpu.memory_space<vmem>>, vector<8x512xf32>
    %107 = arith.truncf %102 : vector<8x128xf32> to vector<8x128xbf16>
    %cst_35 = arith.constant dense<0.000000e+00> : vector<8x512xf32>
    %108 = tpu.matmul %107, %7, %cst_35 {dimension_numbers = #tpu.dot_dimension_numbers<[1], [0], [0], [1], [0, 0, 1, 1], [], []>} : vector<8x128xbf16>, vector<128x512xbf16>, vector<8x512xf32> -> vector<8x512xf32>
    %109 = arith.addf %106, %108 : vector<8x512xf32>
    %110 = vector.extract_strided_slice %109 {offsets = [0, 0], sizes = [8, 128], strides = [1, 1]} : vector<8x512xf32> to vector<8x128xf32>
    %111 = arith.negf %110 : vector<8x128xf32>
    %112 = math.exp %111 : vector<8x128xf32>
    %cst_36 = arith.constant 1.000000e+00 : f32
    %113 = vector.broadcast %cst_36 : f32 to vector<8x128xf32>
    %114 = arith.addf %113, %112 : vector<8x128xf32>
    %115 = arith.divf %113, %114 : vector<8x128xf32>
    %116 = vector.extract_strided_slice %109 {offsets = [0, 128], sizes = [8, 128], strides = [1, 1]} : vector<8x512xf32> to vector<8x128xf32>
    %117 = arith.negf %116 : vector<8x128xf32>
    %118 = math.exp %117 : vector<8x128xf32>
    %cst_37 = arith.constant 1.000000e+00 : f32
    %119 = vector.broadcast %cst_37 : f32 to vector<8x128xf32>
    %120 = arith.addf %119, %118 : vector<8x128xf32>
    %121 = arith.divf %119, %120 : vector<8x128xf32>
    %122 = vector.extract_strided_slice %109 {offsets = [0, 256], sizes = [8, 128], strides = [1, 1]} : vector<8x512xf32> to vector<8x128xf32>
    %123 = arith.negf %122 : vector<8x128xf32>
    %124 = math.exp %123 : vector<8x128xf32>
    %cst_38 = arith.constant 1.000000e+00 : f32
    %125 = vector.broadcast %cst_38 : f32 to vector<8x128xf32>
    %126 = arith.addf %125, %124 : vector<8x128xf32>
    %127 = arith.divf %125, %126 : vector<8x128xf32>
    %128 = vector.extract_strided_slice %109 {offsets = [0, 384], sizes = [8, 128], strides = [1, 1]} : vector<8x512xf32> to vector<8x128xf32>
    %129 = math.tanh %128 : vector<8x128xf32>
    %130 = arith.mulf %121, %100 : vector<8x128xf32>
    %131 = arith.mulf %115, %129 : vector<8x128xf32>
    %132 = arith.addf %130, %131 : vector<8x128xf32>
    %133 = math.tanh %132 : vector<8x128xf32>
    %134 = arith.mulf %127, %133 : vector<8x128xf32>
    %cst_39 = arith.constant 0.000000e+00 : f32
    %135 = vector.broadcast %cst_39 : f32 to vector<8x128xf32>
    %136 = arith.maximumf %134, %135 : vector<8x128xf32>
    %c0_40 = arith.constant 0 : index
    %c384 = arith.constant 384 : index
    %137 = vector.load %arg17[%c0_40, %c384] : memref<8x1024xf32, #tpu.memory_space<vmem>>, vector<8x128xf32>
    tpu.vector_store %arg17[%c0_40, %c384], %136 {strides = array<i32>} : memref<8x1024xf32, #tpu.memory_space<vmem>>, vector<8x128xf32>,
    %c32 = arith.constant 32 : index
    %c0_41 = arith.constant 0 : index
    %138 = vector.load %arg15[%c32, %c0_41] : memref<64x512xf32, #tpu.memory_space<vmem>>, vector<8x512xf32>
    %139 = arith.truncf %134 : vector<8x128xf32> to vector<8x128xbf16>
    %cst_42 = arith.constant dense<0.000000e+00> : vector<8x512xf32>
    %140 = tpu.matmul %139, %7, %cst_42 {dimension_numbers = #tpu.dot_dimension_numbers<[1], [0], [0], [1], [0, 0, 1, 1], [], []>} : vector<8x128xbf16>, vector<128x512xbf16>, vector<8x512xf32> -> vector<8x512xf32>
    %141 = arith.addf %138, %140 : vector<8x512xf32>
    %142 = vector.extract_strided_slice %141 {offsets = [0, 0], sizes = [8, 128], strides = [1, 1]} : vector<8x512xf32> to vector<8x128xf32>
    %143 = arith.negf %142 : vector<8x128xf32>
    %144 = math.exp %143 : vector<8x128xf32>
    %cst_43 = arith.constant 1.000000e+00 : f32
    %145 = vector.broadcast %cst_43 : f32 to vector<8x128xf32>
    %146 = arith.addf %145, %144 : vector<8x128xf32>
    %147 = arith.divf %145, %146 : vector<8x128xf32>
    %148 = vector.extract_strided_slice %141 {offsets = [0, 128], sizes = [8, 128], strides = [1, 1]} : vector<8x512xf32> to vector<8x128xf32>
    %149 = arith.negf %148 : vector<8x128xf32>
    %150 = math.exp %149 : vector<8x128xf32>
    %cst_44 = arith.constant 1.000000e+00 : f32
    %151 = vector.broadcast %cst_44 : f32 to vector<8x128xf32>
    %152 = arith.addf %151, %150 : vector<8x128xf32>
    %153 = arith.divf %151, %152 : vector<8x128xf32>
    %154 = vector.extract_strided_slice %141 {offsets = [0, 256], sizes = [8, 128], strides = [1, 1]} : vector<8x512xf32> to vector<8x128xf32>
    %155 = arith.negf %154 : vector<8x128xf32>
    %156 = math.exp %155 : vector<8x128xf32>
    %cst_45 = arith.constant 1.000000e+00 : f32
    %157 = vector.broadcast %cst_45 : f32 to vector<8x128xf32>
    %158 = arith.addf %157, %156 : vector<8x128xf32>
    %159 = arith.divf %157, %158 : vector<8x128xf32>
    %160 = vector.extract_strided_slice %141 {offsets = [0, 384], sizes = [8, 128], strides = [1, 1]} : vector<8x512xf32> to vector<8x128xf32>
    %161 = math.tanh %160 : vector<8x128xf32>
    %162 = arith.mulf %153, %132 : vector<8x128xf32>
    %163 = arith.mulf %147, %161 : vector<8x128xf32>
    %164 = arith.addf %162, %163 : vector<8x128xf32>
    %165 = math.tanh %164 : vector<8x128xf32>
    %166 = arith.mulf %159, %165 : vector<8x128xf32>
    %cst_46 = arith.constant 0.000000e+00 : f32
    %167 = vector.broadcast %cst_46 : f32 to vector<8x128xf32>
    %168 = arith.maximumf %166, %167 : vector<8x128xf32>
    %c0_47 = arith.constant 0 : index
    %c512 = arith.constant 512 : index
    %169 = vector.load %arg17[%c0_47, %c512] : memref<8x1024xf32, #tpu.memory_space<vmem>>, vector<8x128xf32>
    tpu.vector_store %arg17[%c0_47, %c512], %168 {strides = array<i32>} : memref<8x1024xf32, #tpu.memory_space<vmem>>, vector<8x128xf32>,
    %c40 = arith.constant 40 : index
    %c0_48 = arith.constant 0 : index
    %170 = vector.load %arg15[%c40, %c0_48] : memref<64x512xf32, #tpu.memory_space<vmem>>, vector<8x512xf32>
    %171 = arith.truncf %166 : vector<8x128xf32> to vector<8x128xbf16>
    %cst_49 = arith.constant dense<0.000000e+00> : vector<8x512xf32>
    %172 = tpu.matmul %171, %7, %cst_49 {dimension_numbers = #tpu.dot_dimension_numbers<[1], [0], [0], [1], [0, 0, 1, 1], [], []>} : vector<8x128xbf16>, vector<128x512xbf16>, vector<8x512xf32> -> vector<8x512xf32>
    %173 = arith.addf %170, %172 : vector<8x512xf32>
    %174 = vector.extract_strided_slice %173 {offsets = [0, 0], sizes = [8, 128], strides = [1, 1]} : vector<8x512xf32> to vector<8x128xf32>
    %175 = arith.negf %174 : vector<8x128xf32>
    %176 = math.exp %175 : vector<8x128xf32>
    %cst_50 = arith.constant 1.000000e+00 : f32
    %177 = vector.broadcast %cst_50 : f32 to vector<8x128xf32>
    %178 = arith.addf %177, %176 : vector<8x128xf32>
    %179 = arith.divf %177, %178 : vector<8x128xf32>
    %180 = vector.extract_strided_slice %173 {offsets = [0, 128], sizes = [8, 128], strides = [1, 1]} : vector<8x512xf32> to vector<8x128xf32>
    %181 = arith.negf %180 : vector<8x128xf32>
    %182 = math.exp %181 : vector<8x128xf32>
    %cst_51 = arith.constant 1.000000e+00 : f32
    %183 = vector.broadcast %cst_51 : f32 to vector<8x128xf32>
    %184 = arith.addf %183, %182 : vector<8x128xf32>
    %185 = arith.divf %183, %184 : vector<8x128xf32>
    %186 = vector.extract_strided_slice %173 {offsets = [0, 256], sizes = [8, 128], strides = [1, 1]} : vector<8x512xf32> to vector<8x128xf32>
    %187 = arith.negf %186 : vector<8x128xf32>
    %188 = math.exp %187 : vector<8x128xf32>
    %cst_52 = arith.constant 1.000000e+00 : f32
    %189 = vector.broadcast %cst_52 : f32 to vector<8x128xf32>
    %190 = arith.addf %189, %188 : vector<8x128xf32>
    %191 = arith.divf %189, %190 : vector<8x128xf32>
    %192 = vector.extract_strided_slice %173 {offsets = [0, 384], sizes = [8, 128], strides = [1, 1]} : vector<8x512xf32> to vector<8x128xf32>
    %193 = math.tanh %192 : vector<8x128xf32>
    %194 = arith.mulf %185, %164 : vector<8x128xf32>
    %195 = arith.mulf %179, %193 : vector<8x128xf32>
    %196 = arith.addf %194, %195 : vector<8x128xf32>
    %197 = math.tanh %196 : vector<8x128xf32>
    %198 = arith.mulf %191, %197 : vector<8x128xf32>
    %cst_53 = arith.constant 0.000000e+00 : f32
    %199 = vector.broadcast %cst_53 : f32 to vector<8x128xf32>
    %200 = arith.maximumf %198, %199 : vector<8x128xf32>
    %c0_54 = arith.constant 0 : index
    %c640 = arith.constant 640 : index
    %201 = vector.load %arg17[%c0_54, %c640] : memref<8x1024xf32, #tpu.memory_space<vmem>>, vector<8x128xf32>
    tpu.vector_store %arg17[%c0_54, %c640], %200 {strides = array<i32>} : memref<8x1024xf32, #tpu.memory_space<vmem>>, vector<8x128xf32>,
    %c48 = arith.constant 48 : index
    %c0_55 = arith.constant 0 : index
    %202 = vector.load %arg15[%c48, %c0_55] : memref<64x512xf32, #tpu.memory_space<vmem>>, vector<8x512xf32>
    %203 = arith.truncf %198 : vector<8x128xf32> to vector<8x128xbf16>
    %cst_56 = arith.constant dense<0.000000e+00> : vector<8x512xf32>
    %204 = tpu.matmul %203, %7, %cst_56 {dimension_numbers = #tpu.dot_dimension_numbers<[1], [0], [0], [1], [0, 0, 1, 1], [], []>} : vector<8x128xbf16>, vector<128x512xbf16>, vector<8x512xf32> -> vector<8x512xf32>
    %205 = arith.addf %202, %204 : vector<8x512xf32>
    %206 = vector.extract_strided_slice %205 {offsets = [0, 0], sizes = [8, 128], strides = [1, 1]} : vector<8x512xf32> to vector<8x128xf32>
    %207 = arith.negf %206 : vector<8x128xf32>
    %208 = math.exp %207 : vector<8x128xf32>
    %cst_57 = arith.constant 1.000000e+00 : f32
    %209 = vector.broadcast %cst_57 : f32 to vector<8x128xf32>
    %210 = arith.addf %209, %208 : vector<8x128xf32>
    %211 = arith.divf %209, %210 : vector<8x128xf32>
    %212 = vector.extract_strided_slice %205 {offsets = [0, 128], sizes = [8, 128], strides = [1, 1]} : vector<8x512xf32> to vector<8x128xf32>
    %213 = arith.negf %212 : vector<8x128xf32>
    %214 = math.exp %213 : vector<8x128xf32>
    %cst_58 = arith.constant 1.000000e+00 : f32
    %215 = vector.broadcast %cst_58 : f32 to vector<8x128xf32>
    %216 = arith.addf %215, %214 : vector<8x128xf32>
    %217 = arith.divf %215, %216 : vector<8x128xf32>
    %218 = vector.extract_strided_slice %205 {offsets = [0, 256], sizes = [8, 128], strides = [1, 1]} : vector<8x512xf32> to vector<8x128xf32>
    %219 = arith.negf %218 : vector<8x128xf32>
    %220 = math.exp %219 : vector<8x128xf32>
    %cst_59 = arith.constant 1.000000e+00 : f32
    %221 = vector.broadcast %cst_59 : f32 to vector<8x128xf32>
    %222 = arith.addf %221, %220 : vector<8x128xf32>
    %223 = arith.divf %221, %222 : vector<8x128xf32>
    %224 = vector.extract_strided_slice %205 {offsets = [0, 384], sizes = [8, 128], strides = [1, 1]} : vector<8x512xf32> to vector<8x128xf32>
    %225 = math.tanh %224 : vector<8x128xf32>
    %226 = arith.mulf %217, %196 : vector<8x128xf32>
    %227 = arith.mulf %211, %225 : vector<8x128xf32>
    %228 = arith.addf %226, %227 : vector<8x128xf32>
    %229 = math.tanh %228 : vector<8x128xf32>
    %230 = arith.mulf %223, %229 : vector<8x128xf32>
    %cst_60 = arith.constant 0.000000e+00 : f32
    %231 = vector.broadcast %cst_60 : f32 to vector<8x128xf32>
    %232 = arith.maximumf %230, %231 : vector<8x128xf32>
    %c0_61 = arith.constant 0 : index
    %c768 = arith.constant 768 : index
    %233 = vector.load %arg17[%c0_61, %c768] : memref<8x1024xf32, #tpu.memory_space<vmem>>, vector<8x128xf32>
    tpu.vector_store %arg17[%c0_61, %c768], %232 {strides = array<i32>} : memref<8x1024xf32, #tpu.memory_space<vmem>>, vector<8x128xf32>,
    %c56 = arith.constant 56 : index
    %c0_62 = arith.constant 0 : index
    %234 = vector.load %arg15[%c56, %c0_62] : memref<64x512xf32, #tpu.memory_space<vmem>>, vector<8x512xf32>
    %235 = arith.truncf %230 : vector<8x128xf32> to vector<8x128xbf16>
    %cst_63 = arith.constant dense<0.000000e+00> : vector<8x512xf32>
    %236 = tpu.matmul %235, %7, %cst_63 {dimension_numbers = #tpu.dot_dimension_numbers<[1], [0], [0], [1], [0, 0, 1, 1], [], []>} : vector<8x128xbf16>, vector<128x512xbf16>, vector<8x512xf32> -> vector<8x512xf32>
    %237 = arith.addf %234, %236 : vector<8x512xf32>
    %238 = vector.extract_strided_slice %237 {offsets = [0, 0], sizes = [8, 128], strides = [1, 1]} : vector<8x512xf32> to vector<8x128xf32>
    %239 = arith.negf %238 : vector<8x128xf32>
    %240 = math.exp %239 : vector<8x128xf32>
    %cst_64 = arith.constant 1.000000e+00 : f32
    %241 = vector.broadcast %cst_64 : f32 to vector<8x128xf32>
    %242 = arith.addf %241, %240 : vector<8x128xf32>
    %243 = arith.divf %241, %242 : vector<8x128xf32>
    %244 = vector.extract_strided_slice %237 {offsets = [0, 128], sizes = [8, 128], strides = [1, 1]} : vector<8x512xf32> to vector<8x128xf32>
    %245 = arith.negf %244 : vector<8x128xf32>
    %246 = math.exp %245 : vector<8x128xf32>
    %cst_65 = arith.constant 1.000000e+00 : f32
    %247 = vector.broadcast %cst_65 : f32 to vector<8x128xf32>
    %248 = arith.addf %247, %246 : vector<8x128xf32>
    %249 = arith.divf %247, %248 : vector<8x128xf32>
    %250 = vector.extract_strided_slice %237 {offsets = [0, 256], sizes = [8, 128], strides = [1, 1]} : vector<8x512xf32> to vector<8x128xf32>
    %251 = arith.negf %250 : vector<8x128xf32>
    %252 = math.exp %251 : vector<8x128xf32>
    %cst_66 = arith.constant 1.000000e+00 : f32
    %253 = vector.broadcast %cst_66 : f32 to vector<8x128xf32>
    %254 = arith.addf %253, %252 : vector<8x128xf32>
    %255 = arith.divf %253, %254 : vector<8x128xf32>
    %256 = vector.extract_strided_slice %237 {offsets = [0, 384], sizes = [8, 128], strides = [1, 1]} : vector<8x512xf32> to vector<8x128xf32>
    %257 = math.tanh %256 : vector<8x128xf32>
    %258 = arith.mulf %249, %228 : vector<8x128xf32>
    %259 = arith.mulf %243, %257 : vector<8x128xf32>
    %260 = arith.addf %258, %259 : vector<8x128xf32>
    %261 = math.tanh %260 : vector<8x128xf32>
    %262 = arith.mulf %255, %261 : vector<8x128xf32>
    %cst_67 = arith.constant 0.000000e+00 : f32
    %263 = vector.broadcast %cst_67 : f32 to vector<8x128xf32>
    %264 = arith.maximumf %262, %263 : vector<8x128xf32>
    %c0_68 = arith.constant 0 : index
    %c896 = arith.constant 896 : index
    %265 = vector.load %arg17[%c0_68, %c896] : memref<8x1024xf32, #tpu.memory_space<vmem>>, vector<8x128xf32>
    tpu.vector_store %arg17[%c0_68, %c896], %264 {strides = array<i32>} : memref<8x1024xf32, #tpu.memory_space<vmem>>, vector<8x128xf32>,
    %c0_69 = arith.constant 0 : index
    %c0_70 = arith.constant 0 : index
    %266 = vector.load %arg17[%c0_69, %c0_70] : memref<8x1024xf32, #tpu.memory_space<vmem>>, vector<8x1024xf32>
    %267 = arith.truncf %266 : vector<8x1024xf32> to vector<8x1024xbf16>
    %c0_71 = arith.constant 0 : index
    %c0_72 = arith.constant 0 : index
    %268 = vector.load %arg6[%c0_71, %c0_72] : memref<1024x256xbf16, #tpu.memory_space<vmem>>, vector<1024x256xbf16>
    %cst_73 = arith.constant dense<0.000000e+00> : vector<8x256xf32>
    %269 = tpu.matmul %267, %268, %cst_73 {dimension_numbers = #tpu.dot_dimension_numbers<[1], [0], [0], [1], [0, 0, 1, 1], [], []>} : vector<8x1024xbf16>, vector<1024x256xbf16>, vector<8x256xf32> -> vector<8x256xf32>
    %c0_74 = arith.constant 0 : index
    %c0_75 = arith.constant 0 : index
    %270 = vector.load %arg7[%c0_74, %c0_75] : memref<1x256xf32, #tpu.memory_space<vmem>>, vector<1x256xf32>
    %271 = vector.broadcast %270 : vector<1x256xf32> to vector<8x256xf32>
    %272 = arith.addf %269, %271 : vector<8x256xf32>
    %cst_76 = arith.constant 0.000000e+00 : f32
    %273 = vector.broadcast %cst_76 : f32 to vector<8x256xf32>
    %274 = arith.maximumf %272, %273 : vector<8x256xf32>
    %c0_77 = arith.constant 0 : index
    %c0_78 = arith.constant 0 : index
    %275 = vector.load %arg14[%c0_77, %c0_78] : memref<8x256xf32, #tpu.memory_space<vmem>>, vector<8x256xf32>
    tpu.vector_store %arg14[%c0_77, %c0_78], %274 {strides = array<i32>} : memref<8x256xf32, #tpu.memory_space<vmem>>, vector<8x256xf32>,
    %276 = vector.extract_strided_slice %274 {offsets = [0, 0], sizes = [8, 128], strides = [1, 1]} : vector<8x256xf32> to vector<8x128xf32>
    %277 = vector.extract_strided_slice %274 {offsets = [0, 128], sizes = [8, 128], strides = [1, 1]} : vector<8x256xf32> to vector<8x128xf32>
    %c0_79 = arith.constant 0 : index
    %c0_80 = arith.constant 0 : index
    %278 = vector.load %arg2[%c0_79, %c0_80] : memref<8x128xf32, #tpu.memory_space<vmem>>, vector<8x128xf32>
    %cst_81 = arith.constant 5.000000e-01 : f32
    %279 = vector.broadcast %cst_81 : f32 to vector<8x128xf32>
    %280 = arith.mulf %279, %277 : vector<8x128xf32>
    %281 = math.exp %280 : vector<8x128xf32>
    %282 = arith.mulf %278, %281 : vector<8x128xf32>
    %283 = arith.addf %282, %276 : vector<8x128xf32>
    %284 = arith.truncf %283 : vector<8x128xf32> to vector<8x128xbf16>
    %c0_82 = arith.constant 0 : index
    %c0_83 = arith.constant 0 : index
    %285 = vector.load %arg8[%c0_82, %c0_83] : memref<128x4096xbf16, #tpu.memory_space<vmem>>, vector<128x4096xbf16>
    %cst_84 = arith.constant dense<0.000000e+00> : vector<8x4096xf32>
    %286 = tpu.matmul %284, %285, %cst_84 {dimension_numbers = #tpu.dot_dimension_numbers<[1], [0], [0], [1], [0, 0, 1, 1], [], []>} : vector<8x128xbf16>, vector<128x4096xbf16>, vector<8x4096xf32> -> vector<8x4096xf32>
    %c0_85 = arith.constant 0 : index
    %c0_86 = arith.constant 0 : index
    %287 = vector.load %arg9[%c0_85, %c0_86] : memref<1x4096xf32, #tpu.memory_space<vmem>>, vector<1x4096xf32>
    %288 = vector.broadcast %287 : vector<1x4096xf32> to vector<8x4096xf32>
    %289 = arith.addf %286, %288 : vector<8x4096xf32>
    %c0_87 = arith.constant 0 : index
    %c0_88 = arith.constant 0 : index
    %290 = vector.load %arg16[%c0_87, %c0_88] : memref<8x4096xf32, #tpu.memory_space<vmem>>, vector<8x4096xf32>
    tpu.vector_store %arg16[%c0_87, %c0_88], %289 {strides = array<i32>} : memref<8x4096xf32, #tpu.memory_space<vmem>>, vector<8x4096xf32>,
    %c0_89 = arith.constant 0 : index
    %c0_90 = arith.constant 0 : index
    %291 = vector.load %arg10[%c0_89, %c0_90] : memref<128x512xbf16, #tpu.memory_space<vmem>>, vector<128x512xbf16>
    %cst_91 = arith.constant 0.000000e+00 : f32
    %292 = vector.broadcast %cst_91 : f32 to vector<8x128xf32>
    %cst_92 = arith.constant 0.000000e+00 : f32
    %293 = vector.broadcast %cst_92 : f32 to vector<8x128xf32>
    %c0_93 = arith.constant 0 : index
    %c0_94 = arith.constant 0 : index
    %294 = vector.load %arg16[%c0_93, %c0_94] : memref<8x4096xf32, #tpu.memory_space<vmem>>, vector<8x512xf32>
    %295 = arith.truncf %292 : vector<8x128xf32> to vector<8x128xbf16>
    %cst_95 = arith.constant dense<0.000000e+00> : vector<8x512xf32>
    %296 = tpu.matmul %295, %291, %cst_95 {dimension_numbers = #tpu.dot_dimension_numbers<[1], [0], [0], [1], [0, 0, 1, 1], [], []>} : vector<8x128xbf16>, vector<128x512xbf16>, vector<8x512xf32> -> vector<8x512xf32>
    %297 = arith.addf %294, %296 : vector<8x512xf32>
    %298 = vector.extract_strided_slice %297 {offsets = [0, 0], sizes = [8, 128], strides = [1, 1]} : vector<8x512xf32> to vector<8x128xf32>
    %299 = arith.negf %298 : vector<8x128xf32>
    %300 = math.exp %299 : vector<8x128xf32>
    %cst_96 = arith.constant 1.000000e+00 : f32
    %301 = vector.broadcast %cst_96 : f32 to vector<8x128xf32>
    %302 = arith.addf %301, %300 : vector<8x128xf32>
    %303 = arith.divf %301, %302 : vector<8x128xf32>
    %304 = vector.extract_strided_slice %297 {offsets = [0, 128], sizes = [8, 128], strides = [1, 1]} : vector<8x512xf32> to vector<8x128xf32>
    %305 = arith.negf %304 : vector<8x128xf32>
    %306 = math.exp %305 : vector<8x128xf32>
    %cst_97 = arith.constant 1.000000e+00 : f32
    %307 = vector.broadcast %cst_97 : f32 to vector<8x128xf32>
    %308 = arith.addf %307, %306 : vector<8x128xf32>
    %309 = arith.divf %307, %308 : vector<8x128xf32>
    %310 = vector.extract_strided_slice %297 {offsets = [0, 256], sizes = [8, 128], strides = [1, 1]} : vector<8x512xf32> to vector<8x128xf32>
    %311 = arith.negf %310 : vector<8x128xf32>
    %312 = math.exp %311 : vector<8x128xf32>
    %cst_98 = arith.constant 1.000000e+00 : f32
    %313 = vector.broadcast %cst_98 : f32 to vector<8x128xf32>
    %314 = arith.addf %313, %312 : vector<8x128xf32>
    %315 = arith.divf %313, %314 : vector<8x128xf32>
    %316 = vector.extract_strided_slice %297 {offsets = [0, 384], sizes = [8, 128], strides = [1, 1]} : vector<8x512xf32> to vector<8x128xf32>
    %317 = math.tanh %316 : vector<8x128xf32>
    %318 = arith.mulf %309, %293 : vector<8x128xf32>
    %319 = arith.mulf %303, %317 : vector<8x128xf32>
    %320 = arith.addf %318, %319 : vector<8x128xf32>
    %321 = math.tanh %320 : vector<8x128xf32>
    %322 = arith.mulf %315, %321 : vector<8x128xf32>
    %cst_99 = arith.constant 0.000000e+00 : f32
    %323 = vector.broadcast %cst_99 : f32 to vector<8x128xf32>
    %324 = arith.maximumf %322, %323 : vector<8x128xf32>
    %c0_100 = arith.constant 0 : index
    %c0_101 = arith.constant 0 : index
    %325 = vector.load %arg17[%c0_100, %c0_101] : memref<8x1024xf32, #tpu.memory_space<vmem>>, vector<8x128xf32>
    tpu.vector_store %arg17[%c0_100, %c0_101], %324 {strides = array<i32>} : memref<8x1024xf32, #tpu.memory_space<vmem>>, vector<8x128xf32>,
    %c0_102 = arith.constant 0 : index
    %c512_103 = arith.constant 512 : index
    %326 = vector.load %arg16[%c0_102, %c512_103] : memref<8x4096xf32, #tpu.memory_space<vmem>>, vector<8x512xf32>
    %327 = arith.truncf %322 : vector<8x128xf32> to vector<8x128xbf16>
    %cst_104 = arith.constant dense<0.000000e+00> : vector<8x512xf32>
    %328 = tpu.matmul %327, %291, %cst_104 {dimension_numbers = #tpu.dot_dimension_numbers<[1], [0], [0], [1], [0, 0, 1, 1], [], []>} : vector<8x128xbf16>, vector<128x512xbf16>, vector<8x512xf32> -> vector<8x512xf32>
    %329 = arith.addf %326, %328 : vector<8x512xf32>
    %330 = vector.extract_strided_slice %329 {offsets = [0, 0], sizes = [8, 128], strides = [1, 1]} : vector<8x512xf32> to vector<8x128xf32>
    %331 = arith.negf %330 : vector<8x128xf32>
    %332 = math.exp %331 : vector<8x128xf32>
    %cst_105 = arith.constant 1.000000e+00 : f32
    %333 = vector.broadcast %cst_105 : f32 to vector<8x128xf32>
    %334 = arith.addf %333, %332 : vector<8x128xf32>
    %335 = arith.divf %333, %334 : vector<8x128xf32>
    %336 = vector.extract_strided_slice %329 {offsets = [0, 128], sizes = [8, 128], strides = [1, 1]} : vector<8x512xf32> to vector<8x128xf32>
    %337 = arith.negf %336 : vector<8x128xf32>
    %338 = math.exp %337 : vector<8x128xf32>
    %cst_106 = arith.constant 1.000000e+00 : f32
    %339 = vector.broadcast %cst_106 : f32 to vector<8x128xf32>
    %340 = arith.addf %339, %338 : vector<8x128xf32>
    %341 = arith.divf %339, %340 : vector<8x128xf32>
    %342 = vector.extract_strided_slice %329 {offsets = [0, 256], sizes = [8, 128], strides = [1, 1]} : vector<8x512xf32> to vector<8x128xf32>
    %343 = arith.negf %342 : vector<8x128xf32>
    %344 = math.exp %343 : vector<8x128xf32>
    %cst_107 = arith.constant 1.000000e+00 : f32
    %345 = vector.broadcast %cst_107 : f32 to vector<8x128xf32>
    %346 = arith.addf %345, %344 : vector<8x128xf32>
    %347 = arith.divf %345, %346 : vector<8x128xf32>
    %348 = vector.extract_strided_slice %329 {offsets = [0, 384], sizes = [8, 128], strides = [1, 1]} : vector<8x512xf32> to vector<8x128xf32>
    %349 = math.tanh %348 : vector<8x128xf32>
    %350 = arith.mulf %341, %320 : vector<8x128xf32>
    %351 = arith.mulf %335, %349 : vector<8x128xf32>
    %352 = arith.addf %350, %351 : vector<8x128xf32>
    %353 = math.tanh %352 : vector<8x128xf32>
    %354 = arith.mulf %347, %353 : vector<8x128xf32>
    %cst_108 = arith.constant 0.000000e+00 : f32
    %355 = vector.broadcast %cst_108 : f32 to vector<8x128xf32>
    %356 = arith.maximumf %354, %355 : vector<8x128xf32>
    %c0_109 = arith.constant 0 : index
    %c128_110 = arith.constant 128 : index
    %357 = vector.load %arg17[%c0_109, %c128_110] : memref<8x1024xf32, #tpu.memory_space<vmem>>, vector<8x128xf32>
    tpu.vector_store %arg17[%c0_109, %c128_110], %356 {strides = array<i32>} : memref<8x1024xf32, #tpu.memory_space<vmem>>, vector<8x128xf32>,
    %c0_111 = arith.constant 0 : index
    %c1024 = arith.constant 1024 : index
    %358 = vector.load %arg16[%c0_111, %c1024] : memref<8x4096xf32, #tpu.memory_space<vmem>>, vector<8x512xf32>
    %359 = arith.truncf %354 : vector<8x128xf32> to vector<8x128xbf16>
    %cst_112 = arith.constant dense<0.000000e+00> : vector<8x512xf32>
    %360 = tpu.matmul %359, %291, %cst_112 {dimension_numbers = #tpu.dot_dimension_numbers<[1], [0], [0], [1], [0, 0, 1, 1], [], []>} : vector<8x128xbf16>, vector<128x512xbf16>, vector<8x512xf32> -> vector<8x512xf32>
    %361 = arith.addf %358, %360 : vector<8x512xf32>
    %362 = vector.extract_strided_slice %361 {offsets = [0, 0], sizes = [8, 128], strides = [1, 1]} : vector<8x512xf32> to vector<8x128xf32>
    %363 = arith.negf %362 : vector<8x128xf32>
    %364 = math.exp %363 : vector<8x128xf32>
    %cst_113 = arith.constant 1.000000e+00 : f32
    %365 = vector.broadcast %cst_113 : f32 to vector<8x128xf32>
    %366 = arith.addf %365, %364 : vector<8x128xf32>
    %367 = arith.divf %365, %366 : vector<8x128xf32>
    %368 = vector.extract_strided_slice %361 {offsets = [0, 128], sizes = [8, 128], strides = [1, 1]} : vector<8x512xf32> to vector<8x128xf32>
    %369 = arith.negf %368 : vector<8x128xf32>
    %370 = math.exp %369 : vector<8x128xf32>
    %cst_114 = arith.constant 1.000000e+00 : f32
    %371 = vector.broadcast %cst_114 : f32 to vector<8x128xf32>
    %372 = arith.addf %371, %370 : vector<8x128xf32>
    %373 = arith.divf %371, %372 : vector<8x128xf32>
    %374 = vector.extract_strided_slice %361 {offsets = [0, 256], sizes = [8, 128], strides = [1, 1]} : vector<8x512xf32> to vector<8x128xf32>
    %375 = arith.negf %374 : vector<8x128xf32>
    %376 = math.exp %375 : vector<8x128xf32>
    %cst_115 = arith.constant 1.000000e+00 : f32
    %377 = vector.broadcast %cst_115 : f32 to vector<8x128xf32>
    %378 = arith.addf %377, %376 : vector<8x128xf32>
    %379 = arith.divf %377, %378 : vector<8x128xf32>
    %380 = vector.extract_strided_slice %361 {offsets = [0, 384], sizes = [8, 128], strides = [1, 1]} : vector<8x512xf32> to vector<8x128xf32>
    %381 = math.tanh %380 : vector<8x128xf32>
    %382 = arith.mulf %373, %352 : vector<8x128xf32>
    %383 = arith.mulf %367, %381 : vector<8x128xf32>
    %384 = arith.addf %382, %383 : vector<8x128xf32>
    %385 = math.tanh %384 : vector<8x128xf32>
    %386 = arith.mulf %379, %385 : vector<8x128xf32>
    %cst_116 = arith.constant 0.000000e+00 : f32
    %387 = vector.broadcast %cst_116 : f32 to vector<8x128xf32>
    %388 = arith.maximumf %386, %387 : vector<8x128xf32>
    %c0_117 = arith.constant 0 : index
    %c256_118 = arith.constant 256 : index
    %389 = vector.load %arg17[%c0_117, %c256_118] : memref<8x1024xf32, #tpu.memory_space<vmem>>, vector<8x128xf32>
    tpu.vector_store %arg17[%c0_117, %c256_118], %388 {strides = array<i32>} : memref<8x1024xf32, #tpu.memory_space<vmem>>, vector<8x128xf32>,
    %c0_119 = arith.constant 0 : index
    %c1536 = arith.constant 1536 : index
    %390 = vector.load %arg16[%c0_119, %c1536] : memref<8x4096xf32, #tpu.memory_space<vmem>>, vector<8x512xf32>
    %391 = arith.truncf %386 : vector<8x128xf32> to vector<8x128xbf16>
    %cst_120 = arith.constant dense<0.000000e+00> : vector<8x512xf32>
    %392 = tpu.matmul %391, %291, %cst_120 {dimension_numbers = #tpu.dot_dimension_numbers<[1], [0], [0], [1], [0, 0, 1, 1], [], []>} : vector<8x128xbf16>, vector<128x512xbf16>, vector<8x512xf32> -> vector<8x512xf32>
    %393 = arith.addf %390, %392 : vector<8x512xf32>
    %394 = vector.extract_strided_slice %393 {offsets = [0, 0], sizes = [8, 128], strides = [1, 1]} : vector<8x512xf32> to vector<8x128xf32>
    %395 = arith.negf %394 : vector<8x128xf32>
    %396 = math.exp %395 : vector<8x128xf32>
    %cst_121 = arith.constant 1.000000e+00 : f32
    %397 = vector.broadcast %cst_121 : f32 to vector<8x128xf32>
    %398 = arith.addf %397, %396 : vector<8x128xf32>
    %399 = arith.divf %397, %398 : vector<8x128xf32>
    %400 = vector.extract_strided_slice %393 {offsets = [0, 128], sizes = [8, 128], strides = [1, 1]} : vector<8x512xf32> to vector<8x128xf32>
    %401 = arith.negf %400 : vector<8x128xf32>
    %402 = math.exp %401 : vector<8x128xf32>
    %cst_122 = arith.constant 1.000000e+00 : f32
    %403 = vector.broadcast %cst_122 : f32 to vector<8x128xf32>
    %404 = arith.addf %403, %402 : vector<8x128xf32>
    %405 = arith.divf %403, %404 : vector<8x128xf32>
    %406 = vector.extract_strided_slice %393 {offsets = [0, 256], sizes = [8, 128], strides = [1, 1]} : vector<8x512xf32> to vector<8x128xf32>
    %407 = arith.negf %406 : vector<8x128xf32>
    %408 = math.exp %407 : vector<8x128xf32>
    %cst_123 = arith.constant 1.000000e+00 : f32
    %409 = vector.broadcast %cst_123 : f32 to vector<8x128xf32>
    %410 = arith.addf %409, %408 : vector<8x128xf32>
    %411 = arith.divf %409, %410 : vector<8x128xf32>
    %412 = vector.extract_strided_slice %393 {offsets = [0, 384], sizes = [8, 128], strides = [1, 1]} : vector<8x512xf32> to vector<8x128xf32>
    %413 = math.tanh %412 : vector<8x128xf32>
    %414 = arith.mulf %405, %384 : vector<8x128xf32>
    %415 = arith.mulf %399, %413 : vector<8x128xf32>
    %416 = arith.addf %414, %415 : vector<8x128xf32>
    %417 = math.tanh %416 : vector<8x128xf32>
    %418 = arith.mulf %411, %417 : vector<8x128xf32>
    %cst_124 = arith.constant 0.000000e+00 : f32
    %419 = vector.broadcast %cst_124 : f32 to vector<8x128xf32>
    %420 = arith.maximumf %418, %419 : vector<8x128xf32>
    %c0_125 = arith.constant 0 : index
    %c384_126 = arith.constant 384 : index
    %421 = vector.load %arg17[%c0_125, %c384_126] : memref<8x1024xf32, #tpu.memory_space<vmem>>, vector<8x128xf32>
    tpu.vector_store %arg17[%c0_125, %c384_126], %420 {strides = array<i32>} : memref<8x1024xf32, #tpu.memory_space<vmem>>, vector<8x128xf32>,
    %c0_127 = arith.constant 0 : index
    %c2048 = arith.constant 2048 : index
    %422 = vector.load %arg16[%c0_127, %c2048] : memref<8x4096xf32, #tpu.memory_space<vmem>>, vector<8x512xf32>
    %423 = arith.truncf %418 : vector<8x128xf32> to vector<8x128xbf16>
    %cst_128 = arith.constant dense<0.000000e+00> : vector<8x512xf32>
    %424 = tpu.matmul %423, %291, %cst_128 {dimension_numbers = #tpu.dot_dimension_numbers<[1], [0], [0], [1], [0, 0, 1, 1], [], []>} : vector<8x128xbf16>, vector<128x512xbf16>, vector<8x512xf32> -> vector<8x512xf32>
    %425 = arith.addf %422, %424 : vector<8x512xf32>
    %426 = vector.extract_strided_slice %425 {offsets = [0, 0], sizes = [8, 128], strides = [1, 1]} : vector<8x512xf32> to vector<8x128xf32>
    %427 = arith.negf %426 : vector<8x128xf32>
    %428 = math.exp %427 : vector<8x128xf32>
    %cst_129 = arith.constant 1.000000e+00 : f32
    %429 = vector.broadcast %cst_129 : f32 to vector<8x128xf32>
    %430 = arith.addf %429, %428 : vector<8x128xf32>
    %431 = arith.divf %429, %430 : vector<8x128xf32>
    %432 = vector.extract_strided_slice %425 {offsets = [0, 128], sizes = [8, 128], strides = [1, 1]} : vector<8x512xf32> to vector<8x128xf32>
    %433 = arith.negf %432 : vector<8x128xf32>
    %434 = math.exp %433 : vector<8x128xf32>
    %cst_130 = arith.constant 1.000000e+00 : f32
    %435 = vector.broadcast %cst_130 : f32 to vector<8x128xf32>
    %436 = arith.addf %435, %434 : vector<8x128xf32>
    %437 = arith.divf %435, %436 : vector<8x128xf32>
    %438 = vector.extract_strided_slice %425 {offsets = [0, 256], sizes = [8, 128], strides = [1, 1]} : vector<8x512xf32> to vector<8x128xf32>
    %439 = arith.negf %438 : vector<8x128xf32>
    %440 = math.exp %439 : vector<8x128xf32>
    %cst_131 = arith.constant 1.000000e+00 : f32
    %441 = vector.broadcast %cst_131 : f32 to vector<8x128xf32>
    %442 = arith.addf %441, %440 : vector<8x128xf32>
    %443 = arith.divf %441, %442 : vector<8x128xf32>
    %444 = vector.extract_strided_slice %425 {offsets = [0, 384], sizes = [8, 128], strides = [1, 1]} : vector<8x512xf32> to vector<8x128xf32>
    %445 = math.tanh %444 : vector<8x128xf32>
    %446 = arith.mulf %437, %416 : vector<8x128xf32>
    %447 = arith.mulf %431, %445 : vector<8x128xf32>
    %448 = arith.addf %446, %447 : vector<8x128xf32>
    %449 = math.tanh %448 : vector<8x128xf32>
    %450 = arith.mulf %443, %449 : vector<8x128xf32>
    %cst_132 = arith.constant 0.000000e+00 : f32
    %451 = vector.broadcast %cst_132 : f32 to vector<8x128xf32>
    %452 = arith.maximumf %450, %451 : vector<8x128xf32>
    %c0_133 = arith.constant 0 : index
    %c512_134 = arith.constant 512 : index
    %453 = vector.load %arg17[%c0_133, %c512_134] : memref<8x1024xf32, #tpu.memory_space<vmem>>, vector<8x128xf32>
    tpu.vector_store %arg17[%c0_133, %c512_134], %452 {strides = array<i32>} : memref<8x1024xf32, #tpu.memory_space<vmem>>, vector<8x128xf32>,
    %c0_135 = arith.constant 0 : index
    %c2560 = arith.constant 2560 : index
    %454 = vector.load %arg16[%c0_135, %c2560] : memref<8x4096xf32, #tpu.memory_space<vmem>>, vector<8x512xf32>
    %455 = arith.truncf %450 : vector<8x128xf32> to vector<8x128xbf16>
    %cst_136 = arith.constant dense<0.000000e+00> : vector<8x512xf32>
    %456 = tpu.matmul %455, %291, %cst_136 {dimension_numbers = #tpu.dot_dimension_numbers<[1], [0], [0], [1], [0, 0, 1, 1], [], []>} : vector<8x128xbf16>, vector<128x512xbf16>, vector<8x512xf32> -> vector<8x512xf32>
    %457 = arith.addf %454, %456 : vector<8x512xf32>
    %458 = vector.extract_strided_slice %457 {offsets = [0, 0], sizes = [8, 128], strides = [1, 1]} : vector<8x512xf32> to vector<8x128xf32>
    %459 = arith.negf %458 : vector<8x128xf32>
    %460 = math.exp %459 : vector<8x128xf32>
    %cst_137 = arith.constant 1.000000e+00 : f32
    %461 = vector.broadcast %cst_137 : f32 to vector<8x128xf32>
    %462 = arith.addf %461, %460 : vector<8x128xf32>
    %463 = arith.divf %461, %462 : vector<8x128xf32>
    %464 = vector.extract_strided_slice %457 {offsets = [0, 128], sizes = [8, 128], strides = [1, 1]} : vector<8x512xf32> to vector<8x128xf32>
    %465 = arith.negf %464 : vector<8x128xf32>
    %466 = math.exp %465 : vector<8x128xf32>
    %cst_138 = arith.constant 1.000000e+00 : f32
    %467 = vector.broadcast %cst_138 : f32 to vector<8x128xf32>
    %468 = arith.addf %467, %466 : vector<8x128xf32>
    %469 = arith.divf %467, %468 : vector<8x128xf32>
    %470 = vector.extract_strided_slice %457 {offsets = [0, 256], sizes = [8, 128], strides = [1, 1]} : vector<8x512xf32> to vector<8x128xf32>
    %471 = arith.negf %470 : vector<8x128xf32>
    %472 = math.exp %471 : vector<8x128xf32>
    %cst_139 = arith.constant 1.000000e+00 : f32
    %473 = vector.broadcast %cst_139 : f32 to vector<8x128xf32>
    %474 = arith.addf %473, %472 : vector<8x128xf32>
    %475 = arith.divf %473, %474 : vector<8x128xf32>
    %476 = vector.extract_strided_slice %457 {offsets = [0, 384], sizes = [8, 128], strides = [1, 1]} : vector<8x512xf32> to vector<8x128xf32>
    %477 = math.tanh %476 : vector<8x128xf32>
    %478 = arith.mulf %469, %448 : vector<8x128xf32>
    %479 = arith.mulf %463, %477 : vector<8x128xf32>
    %480 = arith.addf %478, %479 : vector<8x128xf32>
    %481 = math.tanh %480 : vector<8x128xf32>
    %482 = arith.mulf %475, %481 : vector<8x128xf32>
    %cst_140 = arith.constant 0.000000e+00 : f32
    %483 = vector.broadcast %cst_140 : f32 to vector<8x128xf32>
    %484 = arith.maximumf %482, %483 : vector<8x128xf32>
    %c0_141 = arith.constant 0 : index
    %c640_142 = arith.constant 640 : index
    %485 = vector.load %arg17[%c0_141, %c640_142] : memref<8x1024xf32, #tpu.memory_space<vmem>>, vector<8x128xf32>
    tpu.vector_store %arg17[%c0_141, %c640_142], %484 {strides = array<i32>} : memref<8x1024xf32, #tpu.memory_space<vmem>>, vector<8x128xf32>,
    %c0_143 = arith.constant 0 : index
    %c3072 = arith.constant 3072 : index
    %486 = vector.load %arg16[%c0_143, %c3072] : memref<8x4096xf32, #tpu.memory_space<vmem>>, vector<8x512xf32>
    %487 = arith.truncf %482 : vector<8x128xf32> to vector<8x128xbf16>
    %cst_144 = arith.constant dense<0.000000e+00> : vector<8x512xf32>
    %488 = tpu.matmul %487, %291, %cst_144 {dimension_numbers = #tpu.dot_dimension_numbers<[1], [0], [0], [1], [0, 0, 1, 1], [], []>} : vector<8x128xbf16>, vector<128x512xbf16>, vector<8x512xf32> -> vector<8x512xf32>
    %489 = arith.addf %486, %488 : vector<8x512xf32>
    %490 = vector.extract_strided_slice %489 {offsets = [0, 0], sizes = [8, 128], strides = [1, 1]} : vector<8x512xf32> to vector<8x128xf32>
    %491 = arith.negf %490 : vector<8x128xf32>
    %492 = math.exp %491 : vector<8x128xf32>
    %cst_145 = arith.constant 1.000000e+00 : f32
    %493 = vector.broadcast %cst_145 : f32 to vector<8x128xf32>
    %494 = arith.addf %493, %492 : vector<8x128xf32>
    %495 = arith.divf %493, %494 : vector<8x128xf32>
    %496 = vector.extract_strided_slice %489 {offsets = [0, 128], sizes = [8, 128], strides = [1, 1]} : vector<8x512xf32> to vector<8x128xf32>
    %497 = arith.negf %496 : vector<8x128xf32>
    %498 = math.exp %497 : vector<8x128xf32>
    %cst_146 = arith.constant 1.000000e+00 : f32
    %499 = vector.broadcast %cst_146 : f32 to vector<8x128xf32>
    %500 = arith.addf %499, %498 : vector<8x128xf32>
    %501 = arith.divf %499, %500 : vector<8x128xf32>
    %502 = vector.extract_strided_slice %489 {offsets = [0, 256], sizes = [8, 128], strides = [1, 1]} : vector<8x512xf32> to vector<8x128xf32>
    %503 = arith.negf %502 : vector<8x128xf32>
    %504 = math.exp %503 : vector<8x128xf32>
    %cst_147 = arith.constant 1.000000e+00 : f32
    %505 = vector.broadcast %cst_147 : f32 to vector<8x128xf32>
    %506 = arith.addf %505, %504 : vector<8x128xf32>
    %507 = arith.divf %505, %506 : vector<8x128xf32>
    %508 = vector.extract_strided_slice %489 {offsets = [0, 384], sizes = [8, 128], strides = [1, 1]} : vector<8x512xf32> to vector<8x128xf32>
    %509 = math.tanh %508 : vector<8x128xf32>
    %510 = arith.mulf %501, %480 : vector<8x128xf32>
    %511 = arith.mulf %495, %509 : vector<8x128xf32>
    %512 = arith.addf %510, %511 : vector<8x128xf32>
    %513 = math.tanh %512 : vector<8x128xf32>
    %514 = arith.mulf %507, %513 : vector<8x128xf32>
    %cst_148 = arith.constant 0.000000e+00 : f32
    %515 = vector.broadcast %cst_148 : f32 to vector<8x128xf32>
    %516 = arith.maximumf %514, %515 : vector<8x128xf32>
    %c0_149 = arith.constant 0 : index
    %c768_150 = arith.constant 768 : index
    %517 = vector.load %arg17[%c0_149, %c768_150] : memref<8x1024xf32, #tpu.memory_space<vmem>>, vector<8x128xf32>
    tpu.vector_store %arg17[%c0_149, %c768_150], %516 {strides = array<i32>} : memref<8x1024xf32, #tpu.memory_space<vmem>>, vector<8x128xf32>,
    %c0_151 = arith.constant 0 : index
    %c3584 = arith.constant 3584 : index
    %518 = vector.load %arg16[%c0_151, %c3584] : memref<8x4096xf32, #tpu.memory_space<vmem>>, vector<8x512xf32>
    %519 = arith.truncf %514 : vector<8x128xf32> to vector<8x128xbf16>
    %cst_152 = arith.constant dense<0.000000e+00> : vector<8x512xf32>
    %520 = tpu.matmul %519, %291, %cst_152 {dimension_numbers = #tpu.dot_dimension_numbers<[1], [0], [0], [1], [0, 0, 1, 1], [], []>} : vector<8x128xbf16>, vector<128x512xbf16>, vector<8x512xf32> -> vector<8x512xf32>
    %521 = arith.addf %518, %520 : vector<8x512xf32>
    %522 = vector.extract_strided_slice %521 {offsets = [0, 0], sizes = [8, 128], strides = [1, 1]} : vector<8x512xf32> to vector<8x128xf32>
    %523 = arith.negf %522 : vector<8x128xf32>
    %524 = math.exp %523 : vector<8x128xf32>
    %cst_153 = arith.constant 1.000000e+00 : f32
    %525 = vector.broadcast %cst_153 : f32 to vector<8x128xf32>
    %526 = arith.addf %525, %524 : vector<8x128xf32>
    %527 = arith.divf %525, %526 : vector<8x128xf32>
    %528 = vector.extract_strided_slice %521 {offsets = [0, 128], sizes = [8, 128], strides = [1, 1]} : vector<8x512xf32> to vector<8x128xf32>
    %529 = arith.negf %528 : vector<8x128xf32>
    %530 = math.exp %529 : vector<8x128xf32>
    %cst_154 = arith.constant 1.000000e+00 : f32
    %531 = vector.broadcast %cst_154 : f32 to vector<8x128xf32>
    %532 = arith.addf %531, %530 : vector<8x128xf32>
    %533 = arith.divf %531, %532 : vector<8x128xf32>
    %534 = vector.extract_strided_slice %521 {offsets = [0, 256], sizes = [8, 128], strides = [1, 1]} : vector<8x512xf32> to vector<8x128xf32>
    %535 = arith.negf %534 : vector<8x128xf32>
    %536 = math.exp %535 : vector<8x128xf32>
    %cst_155 = arith.constant 1.000000e+00 : f32
    %537 = vector.broadcast %cst_155 : f32 to vector<8x128xf32>
    %538 = arith.addf %537, %536 : vector<8x128xf32>
    %539 = arith.divf %537, %538 : vector<8x128xf32>
    %540 = vector.extract_strided_slice %521 {offsets = [0, 384], sizes = [8, 128], strides = [1, 1]} : vector<8x512xf32> to vector<8x128xf32>
    %541 = math.tanh %540 : vector<8x128xf32>
    %542 = arith.mulf %533, %512 : vector<8x128xf32>
    %543 = arith.mulf %527, %541 : vector<8x128xf32>
    %544 = arith.addf %542, %543 : vector<8x128xf32>
    %545 = math.tanh %544 : vector<8x128xf32>
    %546 = arith.mulf %539, %545 : vector<8x128xf32>
    %cst_156 = arith.constant 0.000000e+00 : f32
    %547 = vector.broadcast %cst_156 : f32 to vector<8x128xf32>
    %548 = arith.maximumf %546, %547 : vector<8x128xf32>
    %c0_157 = arith.constant 0 : index
    %c896_158 = arith.constant 896 : index
    %549 = vector.load %arg17[%c0_157, %c896_158] : memref<8x1024xf32, #tpu.memory_space<vmem>>, vector<8x128xf32>
    tpu.vector_store %arg17[%c0_157, %c896_158], %548 {strides = array<i32>} : memref<8x1024xf32, #tpu.memory_space<vmem>>, vector<8x128xf32>,
    %c0_159 = arith.constant 0 : index
    %c0_160 = arith.constant 0 : index
    %550 = vector.load %arg17[%c0_159, %c0_160] : memref<8x1024xf32, #tpu.memory_space<vmem>>, vector<8x1024xf32>
    %551 = arith.truncf %550 : vector<8x1024xf32> to vector<8x1024xbf16>
    %c0_161 = arith.constant 0 : index
    %c0_162 = arith.constant 0 : index
    %552 = vector.load %arg11[%c0_161, %c0_162] : memref<1024x128xbf16, #tpu.memory_space<vmem>>, vector<1024x128xbf16>
    %cst_163 = arith.constant dense<0.000000e+00> : vector<8x128xf32>
    %553 = tpu.matmul %551, %552, %cst_163 {dimension_numbers = #tpu.dot_dimension_numbers<[1], [0], [0], [1], [0, 0, 1, 1], [], []>} : vector<8x1024xbf16>, vector<1024x128xbf16>, vector<8x128xf32> -> vector<8x128xf32>
    %c0_164 = arith.constant 0 : index
    %c0_165 = arith.constant 0 : index
    %554 = vector.load %arg12[%c0_164, %c0_165] : memref<1x128xf32, #tpu.memory_space<vmem>>, vector<1x128xf32>
    %555 = vector.broadcast %554 : vector<1x128xf32> to vector<8x128xf32>
    %556 = arith.addf %553, %555 : vector<8x128xf32>
    %cst_166 = arith.constant 0.000000e+00 : f32
    %557 = vector.broadcast %cst_166 : f32 to vector<8x128xf32>
    %558 = arith.cmpf ogt, %556, %557 : vector<8x128xf32>
    %cst_167 = arith.constant 0.000000e+00 : f32
    %559 = vector.broadcast %cst_167 : f32 to vector<8x128xf32>
    %560 = arith.minimumf %556, %559 : vector<8x128xf32>
    %561 = math.exp %560 : vector<8x128xf32>
    %cst_168 = arith.constant 1.000000e+00 : f32
    %562 = vector.broadcast %cst_168 : f32 to vector<8x128xf32>
    %563 = arith.subf %561, %562 : vector<8x128xf32>
    %564 = arith.select %558, %556, %563 : vector<8x128xi1>, vector<8x128xf32>
    %c0_169 = arith.constant 0 : index
    %c0_170 = arith.constant 0 : index
    %565 = vector.load %arg13[%c0_169, %c0_170] : memref<8x128xf32, #tpu.memory_space<vmem>>, vector<8x128xf32>
    tpu.vector_store %arg13[%c0_169, %c0_170], %564 {strides = array<i32>} : memref<8x128xf32, #tpu.memory_space<vmem>>, vector<8x128xf32>,
    return
  }
  func.func @transform_0(%arg0: i32) -> (i32, i32) {
    %c0_i32 = arith.constant 0 : i32
    %c0_i32_0 = arith.constant 0 : i32
    return %arg0, %c0_i32 : i32, i32
  }
  func.func @transform_1(%arg0: i32) -> (i32, i32) {
    %c0_i32 = arith.constant 0 : i32
    %c0_i32_0 = arith.constant 0 : i32
    return %arg0, %c0_i32 : i32, i32
  }
  func.func @transform_2(%arg0: i32) -> (i32, i32) {
    %c0_i32 = arith.constant 0 : i32
    %c0_i32_0 = arith.constant 0 : i32
    %c0_i32_1 = arith.constant 0 : i32
    return %c0_i32, %c0_i32_0 : i32, i32
  }
  func.func @transform_3(%arg0: i32) -> (i32, i32) {
    %c0_i32 = arith.constant 0 : i32
    %c0_i32_0 = arith.constant 0 : i32
    %c0_i32_1 = arith.constant 0 : i32
    return %c0_i32, %c0_i32_0 : i32, i32
  }
  func.func @transform_4(%arg0: i32) -> (i32, i32) {
    %c0_i32 = arith.constant 0 : i32
    %c0_i32_0 = arith.constant 0 : i32
    %c0_i32_1 = arith.constant 0 : i32
    return %c0_i32, %c0_i32_0 : i32, i32
  }
  func.func @transform_5(%arg0: i32) -> (i32, i32) {
    %c0_i32 = arith.constant 0 : i32
    %c0_i32_0 = arith.constant 0 : i32
    %c0_i32_1 = arith.constant 0 : i32
    return %c0_i32, %c0_i32_0 : i32, i32
  }
  func.func @transform_6(%arg0: i32) -> (i32, i32) {
    %c0_i32 = arith.constant 0 : i32
    %c0_i32_0 = arith.constant 0 : i32
    %c0_i32_1 = arith.constant 0 : i32
    return %c0_i32, %c0_i32_0 : i32, i32
  }
  func.func @transform_7(%arg0: i32) -> (i32, i32) {
    %c0_i32 = arith.constant 0 : i32
    %c0_i32_0 = arith.constant 0 : i32
    %c0_i32_1 = arith.constant 0 : i32
    return %c0_i32, %c0_i32_0 : i32, i32
  }
  func.func @transform_8(%arg0: i32) -> (i32, i32) {
    %c0_i32 = arith.constant 0 : i32
    %c0_i32_0 = arith.constant 0 : i32
    %c0_i32_1 = arith.constant 0 : i32
    return %c0_i32, %c0_i32_0 : i32, i32
  }
  func.func @transform_9(%arg0: i32) -> (i32, i32) {
    %c0_i32 = arith.constant 0 : i32
    %c0_i32_0 = arith.constant 0 : i32
    %c0_i32_1 = arith.constant 0 : i32
    return %c0_i32, %c0_i32_0 : i32, i32
  }
  func.func @transform_10(%arg0: i32) -> (i32, i32) {
    %c0_i32 = arith.constant 0 : i32
    %c0_i32_0 = arith.constant 0 : i32
    %c0_i32_1 = arith.constant 0 : i32
    return %c0_i32, %c0_i32_0 : i32, i32
  }
  func.func @transform_11(%arg0: i32) -> (i32, i32) {
    %c0_i32 = arith.constant 0 : i32
    %c0_i32_0 = arith.constant 0 : i32
    %c0_i32_1 = arith.constant 0 : i32
    return %c0_i32, %c0_i32_0 : i32, i32
  }
  func.func @transform_12(%arg0: i32) -> (i32, i32) {
    %c0_i32 = arith.constant 0 : i32
    %c0_i32_0 = arith.constant 0 : i32
    return %arg0, %c0_i32 : i32, i32
  }
  func.func @transform_13(%arg0: i32) -> (i32, i32) {
    %c0_i32 = arith.constant 0 : i32
    %c0_i32_0 = arith.constant 0 : i32
    return %arg0, %c0_i32 : i32, i32
  }
}

</mosaic_0001>

<bundles_post_ra>
// kernel: lstmvae_forward.1
= control target key start
LH: loop header
LB: loop body
LE: loop exit
PB: predicated region body
PF: predicated region fallthrough
CT: control target
= control target key end

     0   :  { %19 = vsyncpa [#allocation6], 0  ;;  %s11852_s0 = inlined_call_operand.vmem [shape: bf16[64,128], index: 0, kind: input, shape index: {}]   ;;  %s11853_s1 = inlined_call_operand.vmem [shape: f32[8,128], index: 1, kind: input, shape index: {}]   ;;  %s11854_s2 = inlined_call_operand.hbm [shape: bf16[128,512], index: 2, kind: input, shape index: {}]   ;;  %s11855_s3 = inlined_call_operand.vmem [shape: f32[1,512], index: 3, kind: input, shape index: {}]   ;;  %s11856_s4 = inlined_call_operand.hbm [shape: bf16[128,512], index: 4, kind: input, shape index: {}]   ;;  %s11857_s5 = inlined_call_operand.vmem [shape: bf16[1024,256], index: 5, kind: input, shape index: {}]   ;;  %s11858_s6 = inlined_call_operand.vmem [shape: f32[1,256], index: 6, kind: input, shape index: {}]   ;;  %s11859_s7 = inlined_call_operand.hbm [shape: bf16[128,4096], index: 7, kind: input, shape index: {}]   ;;  %s11860_s8 = inlined_call_operand.vmem [shape: f32[1,4096], index: 8, kind: input, shape index: {}]   ;;  %s11861_s9 = inlined_call_operand.hbm [shape: bf16[128,512], index: 9, kind: input, shape index: {}]   ;;  %s11862_s10 = inlined_call_operand.hbm [shape: bf16[1024,128], index: 10, kind: input, shape index: {}]   ;;  %s11863_s11 = inlined_call_operand.vmem [shape: f32[1,128], index: 11, kind: input, shape index: {}]   ;;  %s11864_s12 = inlined_call_operand.vmem [shape: f32[8,128], index: 12, kind: output, shape index: {0}]   ;;  %s11865_s13 = inlined_call_operand.vmem [shape: f32[8,256], index: 13, kind: output, shape index: {1}]  }
   0x1   :  { %20 = vsyncpa [#allocation8], 0 }
   0x2   :  { %21 = vsyncpa [#allocation11], 0  ;;  %s45_s27 = sshll.u32 %s11856_s4, 4  ;;  %s9811_s28 = smov [#allocation7]   ;;  %s46_s27 = int_to_ptr.hbm [resolvable:$true] %s45_s27 }
   0x3   :  { %s47_s29 = sshll.u32 %s9811_s28, 4  ;;  %s77_s15 = sshll.u32 %s11861_s9, 4  ;;  %s48_s29 = int_to_ptr.vmem [resolvable:$true] %s47_s29  ;;  %s78_s15 = int_to_ptr.hbm [resolvable:$true] %s77_s15 }
   0x4   :  { %s9812_s16 = smov 256   ;;  %s9813_s17 = smov 16  }
   0x5   :  { %53 = dma.hbm_to_vmem [thread:$0]  %s46_s27, 4096, %s48_s29, [#allocation8], %s9812_s16, %s9812_s16, %s9813_s17  }
   0x6   :  { %s9814_s18 = smov [#allocation10]   ;;  %s30_s22 = sshll.u32 %s11854_s2, 4  ;;  %s31_s22 = int_to_ptr.hbm [resolvable:$true] %s30_s22 }
   0x7   :  { %s79_s19 = sshll.u32 %s9814_s18, 4  ;;  %s62_s24 = sshll.u32 %s11859_s7, 4  ;;  %s80_s19 = int_to_ptr.vmem [resolvable:$true] %s79_s19  ;;  %s63_s24 = int_to_ptr.hbm [resolvable:$true] %s62_s24 }
   0x8   :  { %85 = dma.hbm_to_vmem [thread:$0]  %s78_s15, 4096, %s80_s19, [#allocation11], %s9812_s16, %s9812_s16, %s9813_s17  }
   0x9   :  { %s9815_s25 = smov [#allocation5]   ;;  %s9816_s9 = smov [#allocation9]  }
   0xa   :  { %s32_s26 = sshll.u32 %s9815_s25, 4  ;;  %s64_s27 = sshll.u32 %s9816_s9, 4  ;;  %s33_s26 = int_to_ptr.vmem [resolvable:$true] %s32_s26  ;;  %s65_s27 = int_to_ptr.vmem [resolvable:$true] %s64_s27 }
   0xb   :  { %38 = dma.hbm_to_vmem [thread:$0]  %s31_s22, 4096, %s33_s26, [#allocation6], %s9812_s16, %s9812_s16, %s9813_s17  }
   0xc   :  { %s9817_s28 = smov 2048   ;;  %s9818_s29 = smov 128  }
   0xd   :  { %70 = dma.hbm_to_vmem [thread:$0]  %s63_s24, 32768, %s65_s27, [#allocation8], %s9817_s28, %s9817_s28, %s9818_s29  }
   0xe   :  { %s90_s14 = sshll.u32 %s11862_s10, 4  ;;  %s9819_s15 = smov [#allocation12]   ;;  %s91_s14 = int_to_ptr.hbm [resolvable:$true] %s90_s14 }
   0xf   :  { %s92_s18 = sshll.u32 %s9819_s15, 4  ;;  %s9820_s7 = smov 64   ;;  %s93_s18 = int_to_ptr.vmem [resolvable:$true] %s92_s18 }
  0x10   :  { %s9821_s19 = smov 4  }
  0x11   :  { %98 = dma.hbm_to_vmem [thread:$0]  %s91_s14, 8192, %s93_s18, [#allocation11], %s9820_s7, %s9820_s7, %s9821_s19  }
  0x12   :  { %9805 = dma.done.wait [#allocation6], 4096  }
  0x13   :  { %9806 = vsyncadd [#allocation6], 4294963200 }
  0x14   :  { %9807 = dma.done.wait [#allocation8], 36864  }
  0x15   :  { %9808 = vsyncadd [#allocation8], 4294930432 }
  0x16   :  { %9809 = dma.done.wait [#allocation11], 12288  }
  0x17   :  { %9810 = vsyncadd [#allocation11], 4294955008  ;;  %v6751_v0 = vld [vmem:[#allocation5 + $0xe0] sm:$0xf]  ;;  %v8896_v1 = vld [vmem:[#allocation5 + $0xec] sm:$0xf0] }
  0x18   :  { %v8894_v2 = vld [vmem:[#allocation5 + $0xe4] sm:$0xf]  ;;  %v6752_v3 = vor.u32 %v8896_v1, %v6751_v0  ;;  %v6753_v4 = vld [vmem:[#allocation5 + $0xf0] sm:$0xf0]  ;;  %v6759_v5 = vld [vmem:[#allocation5 + $0xe8] sm:$0xf] }
  0x19   :  { %v8897_v6 = vld [vmem:[#allocation5 + $0xf4] sm:$0xf0]  ;;  %v6756_v7 = vor.u32 %v8894_v2, %v6753_v4  ;;  %v8895_v9 = vld [vmem:[#allocation5 + $0xec] sm:$0xf]  ;;  %v6761_v10 = vld [vmem:[#allocation5 + $0xf8] sm:$0xf0] }
  0x1a   :  { %v6760_v8 = vor.u32 %v8897_v6, %v6759_v5  ;;  %v6735_v11 = vld [vmem:[#allocation5 + $0xc0] sm:$0xf]  ;;  %356 = vmatpush.bf16.msra.mxu0 %v6752_v3  ;;  %v6764_v12 = vor.u32 %v8895_v9, %v6761_v10  ;;  %v8892_v13 = vld [vmem:[#allocation5 + $0xcc] sm:$0xf0]  ;;  %v8890_v14 = vld [vmem:[#allocation5 + $0xc4] sm:$0xf] }
  0x1b   :  { %v6737_v15 = vld [vmem:[#allocation5 + $0xd0] sm:$0xf0]  ;;  %385 = vmatpush.bf16.msra.mxu1 %v6756_v7  ;;  %v6736_v16 = vor.u32 %v8892_v13, %v6735_v11  ;;  %v6743_v18 = vld [vmem:[#allocation5 + $0xc8] sm:$0xf]  ;;  %v8893_v19 = vld [vmem:[#allocation5 + $0xd4] sm:$0xf0] }
  0x1c   :  { %414 = vmatpush.bf16.msra.mxu2 %v6760_v8  ;;  %v6740_v17 = vor.u32 %v8890_v14, %v6737_v15  ;;  %v8891_v20 = vld [vmem:[#allocation5 + $0xcc] sm:$0xf]  ;;  %443 = vmatpush.bf16.msra.mxu3 %v6764_v12  ;;  %v6744_v21 = vor.u32 %v8893_v19, %v6743_v18  ;;  %v6745_v22 = vld [vmem:[#allocation5 + $0xd8] sm:$0xf0]  ;;  %v6719_v23 = vld [vmem:[#allocation5 + $0xa0] sm:$0xf] }
  0x1d   :  { %v8888_v24 = vld [vmem:[#allocation5 + $0xac] sm:$0xf0]  ;;  %v6748_v25 = vor.u32 %v8891_v20, %v6745_v22  ;;  %v8886_v26 = vld [vmem:[#allocation5 + $0xa4] sm:$0xf]  ;;  %v6721_v27 = vld [vmem:[#allocation5 + $0xb0] sm:$0xf0] }
  0x1e   :  { %v6727_v28 = vld [vmem:[#allocation5 + $0xa8] sm:$0xf]  ;;  %357 = vmatpush.bf16.msra.mxu0 %v6736_v16  ;;  %v6720_v29 = vor.u32 %v8888_v24, %v6719_v23  ;;  %v8889_v30 = vld [vmem:[#allocation5 + $0xb4] sm:$0xf0]  ;;  %v8887_v31 = vld [vmem:[#allocation5 + $0xac] sm:$0xf]  ;;  %v6724_v33 = vor.u32 %v8886_v26, %v6721_v27 }
  0x1f   :  { %v6729_v32 = vld [vmem:[#allocation5 + $0xb8] sm:$0xf0]  ;;  %386 = vmatpush.bf16.msra.mxu1 %v6740_v17  ;;  %v6728_v34 = vor.u32 %v8889_v30, %v6727_v28  ;;  %v6703_v35 = vld [vmem:[#allocation5 + $0x80] sm:$0xf]  ;;  %v8884_v36 = vld [vmem:[#allocation5 + $0x8c] sm:$0xf0] }
  0x20   :  { %415 = vmatpush.bf16.msra.mxu2 %v6744_v21  ;;  %v8882_v37 = vld [vmem:[#allocation5 + $0x84] sm:$0xf]  ;;  %444 = vmatpush.bf16.msra.mxu3 %v6748_v25  ;;  %v6732_v38 = vor.u32 %v8887_v31, %v6729_v32  ;;  %v6705_v39 = vld [vmem:[#allocation5 + $0x90] sm:$0xf0]  ;;  %v6711_v40 = vld [vmem:[#allocation5 + $0x88] sm:$0xf]  ;;  %v6704_v44 = vor.u32 %v8884_v36, %v6703_v35 }
  0x21   :  { %v8885_v41 = vld [vmem:[#allocation5 + $0x94] sm:$0xf0]  ;;  %v8883_v42 = vld [vmem:[#allocation5 + $0x8c] sm:$0xf]  ;;  %v6713_v43 = vld [vmem:[#allocation5 + $0x98] sm:$0xf0]  ;;  %v6708_v45 = vor.u32 %v8882_v37, %v6705_v39 }
  0x22   :  { %358 = vmatpush.bf16.msra.mxu0 %v6720_v29  ;;  %v6712_v46 = vor.u32 %v8885_v41, %v6711_v40  ;;  %v6687_v47 = vld [vmem:[#allocation5 + $0x60] sm:$0xf]  ;;  %v8880_v48 = vld [vmem:[#allocation5 + $0x6c] sm:$0xf0]  ;;  %v8878_v49 = vld [vmem:[#allocation5 + $0x64] sm:$0xf]  ;;  %v6716_v50 = vor.u32 %v8883_v42, %v6713_v43 }
  0x23   :  { %387 = vmatpush.bf16.msra.mxu1 %v6724_v33  ;;  %v6689_v51 = vld [vmem:[#allocation5 + $0x70] sm:$0xf0]  ;;  %v6695_v52 = vld [vmem:[#allocation5 + $0x68] sm:$0xf]  ;;  %v8881_v53 = vld [vmem:[#allocation5 + $0x74] sm:$0xf0]  ;;  %v6688_v56 = vor.u32 %v8880_v48, %v6687_v47 }
  0x24   :  { %416 = vmatpush.bf16.msra.mxu2 %v6728_v34  ;;  %445 = vmatpush.bf16.msra.mxu3 %v6732_v38  ;;  %v8879_v54 = vld [vmem:[#allocation5 + $0x6c] sm:$0xf]  ;;  %v6697_v55 = vld [vmem:[#allocation5 + $0x78] sm:$0xf0]  ;;  %v6692_v57 = vor.u32 %v8878_v49, %v6689_v51  ;;  %v6696_v58 = vor.u32 %v8881_v53, %v6695_v52  ;;  %v6671_v59 = vld [vmem:[#allocation5 + $0x40] sm:$0xf] }
  0x25   :  { %v8876_v60 = vld [vmem:[#allocation5 + $0x4c] sm:$0xf0]  ;;  %v8874_v61 = vld [vmem:[#allocation5 + $0x44] sm:$0xf]  ;;  %v6700_v62 = vor.u32 %v8879_v54, %v6697_v55  ;;  %v6673_v63 = vld [vmem:[#allocation5 + $0x50] sm:$0xf0] }
  0x26   :  { %359 = vmatpush.bf16.msra.mxu0 %v6704_v44  ;;  %v6679_v0 = vld [vmem:[#allocation5 + $0x48] sm:$0xf]  ;;  %v8877_v1 = vld [vmem:[#allocation5 + $0x54] sm:$0xf0]  ;;  %v8875_v2 = vld [vmem:[#allocation5 + $0x4c] sm:$0xf]  ;;  %v6672_v4 = vor.u32 %v8876_v60, %v6671_v59  ;;  %v6676_v5 = vor.u32 %v8874_v61, %v6673_v63 }
  0x27   :  { %388 = vmatpush.bf16.msra.mxu1 %v6708_v45  ;;  %v6681_v3 = vld [vmem:[#allocation5 + $0x58] sm:$0xf0]  ;;  %v6680_v6 = vor.u32 %v8877_v1, %v6679_v0  ;;  %v6655_v7 = vld [vmem:[#allocation5 + $0x20] sm:$0xf]  ;;  %v8872_v8 = vld [vmem:[#allocation5 + $0x2c] sm:$0xf0] }
  0x28   :  { %417 = vmatpush.bf16.msra.mxu2 %v6712_v46  ;;  %446 = vmatpush.bf16.msra.mxu3 %v6716_v50  ;;  %v8870_v9 = vld [vmem:[#allocation5 + $0x24] sm:$0xf]  ;;  %v6684_v10 = vor.u32 %v8875_v2, %v6681_v3  ;;  %v6657_v11 = vld [vmem:[#allocation5 + $0x30] sm:$0xf0]  ;;  %v6663_v12 = vld [vmem:[#allocation5 + $0x28] sm:$0xf]  ;;  %v6656_v16 = vor.u32 %v8872_v8, %v6655_v7 }
  0x29   :  { %v8873_v13 = vld [vmem:[#allocation5 + $0x34] sm:$0xf0]  ;;  %v8871_v14 = vld [vmem:[#allocation5 + $0x2c] sm:$0xf]  ;;  %v6665_v15 = vld [vmem:[#allocation5 + $0x38] sm:$0xf0]  ;;  %v6660_v17 = vor.u32 %v8870_v9, %v6657_v11 }
  0x2a   :  { %360 = vmatpush.bf16.msra.mxu0 %v6688_v56  ;;  %v6664_v18 = vor.u32 %v8873_v13, %v6663_v12  ;;  %v6639_v19 = vld [vmem:[#allocation5] sm:$0xf]  ;;  %v8868_v20 = vld [vmem:[#allocation5 + $0xc] sm:$0xf0]  ;;  %v8866_v21 = vld [vmem:[#allocation5 + $0x4] sm:$0xf]  ;;  %v6668_v22 = vor.u32 %v8871_v14, %v6665_v15 }
  0x2b   :  { %389 = vmatpush.bf16.msra.mxu1 %v6692_v57  ;;  %v6641_v23 = vld [vmem:[#allocation5 + $0x10] sm:$0xf0]  ;;  %v6647_v24 = vld [vmem:[#allocation5 + $0x8] sm:$0xf]  ;;  %v8869_v25 = vld [vmem:[#allocation5 + $0x14] sm:$0xf0]  ;;  %v6640_v28 = vor.u32 %v8868_v20, %v6639_v19 }
  0x2c   :  { %418 = vmatpush.bf16.msra.mxu2 %v6696_v58  ;;  %447 = vmatpush.bf16.msra.mxu3 %v6700_v62  ;;  %v8867_v26 = vld [vmem:[#allocation5 + $0xc] sm:$0xf]  ;;  %v6649_v27 = vld [vmem:[#allocation5 + $0x18] sm:$0xf0]  ;;  %v6644_v29 = vor.u32 %v8866_v21, %v6641_v23  ;;  %v6648_v30 = vor.u32 %v8869_v25, %v6647_v24  ;;  %v8862_v32 = vld [vmem:[%s11852_s0] sm:$0xff] }
  0x2d   :  { %v6652_v31 = vor.u32 %v8867_v26, %v6649_v27  ;;  %v6879_v33 = vld [vmem:[#allocation7 + $0xe0] sm:$0xf]  ;;  %v8928_v34 = vld [vmem:[#allocation7 + $0xec] sm:$0xf0]  ;;  %v8926_v35 = vld [vmem:[#allocation7 + $0xe4] sm:$0xf] }
  0x2e   :  { %361 = vmatpush.bf16.msra.mxu0 %v6672_v4  ;;  %v9911_v36 = vor.u32 %v8928_v34, %v6879_v33  ;;  %v6881_v37 = vld [vmem:[#allocation7 + $0xf0] sm:$0xf0]  ;;  %v6887_v38 = vld [vmem:[#allocation7 + $0xe8] sm:$0xf]  ;;  %v8929_v39 = vld [vmem:[#allocation7 + $0xf4] sm:$0xf0] }
  0x2f   :  { %390 = vmatpush.bf16.msra.mxu1 %v6676_v5  ;;  %v9913_v40 = vor.u32 %v8926_v35, %v6881_v37  ;;  %v9915_v41 = vor.u32 %v8929_v39, %v6887_v38  ;;  %v8927_v42 = vld [vmem:[#allocation7 + $0xec] sm:$0xf]  ;;  %v6889_v43 = vld [vmem:[#allocation7 + $0xf8] sm:$0xf0]  ;;  %v6863_v44 = vld [vmem:[#allocation7 + $0xc0] sm:$0xf] }
  0x30   :  { %419 = vmatpush.bf16.msra.mxu2 %v6680_v6  ;;  %448 = vmatpush.bf16.msra.mxu3 %v6684_v10  ;;  %v9918_v45 = vor.u32 %v8927_v42, %v6889_v43  ;;  %v8924_v46 = vld [vmem:[#allocation7 + $0xcc] sm:$0xf0]  ;;  %v8922_v47 = vld [vmem:[#allocation7 + $0xc4] sm:$0xf]  ;;  %v6865_v48 = vld [vmem:[#allocation7 + $0xd0] sm:$0xf0] }
  0x31   :  { %v9922_v49 = vor.u32 %v8924_v46, %v6863_v44  ;;  %v9924_v50 = vor.u32 %v8922_v47, %v6865_v48  ;;  %v6871_v51 = vld [vmem:[#allocation7 + $0xc8] sm:$0xf]  ;;  %v8925_v52 = vld [vmem:[#allocation7 + $0xd4] sm:$0xf0]  ;;  %v8923_v53 = vld [vmem:[#allocation7 + $0xcc] sm:$0xf] }
  0x32   :  { %362 = vmatpush.bf16.msra.mxu0 %v6656_v16  ;;  %v9927_v54 = vor.u32 %v8925_v52, %v6871_v51  ;;  %v6873_v55 = vld [vmem:[#allocation7 + $0xd8] sm:$0xf0]  ;;  %v6847_v56 = vld [vmem:[#allocation7 + $0xa0] sm:$0xf]  ;;  %v8920_v57 = vld [vmem:[#allocation7 + $0xac] sm:$0xf0] }
  0x33   :  { %391 = vmatpush.bf16.msra.mxu1 %v6660_v17  ;;  %v9929_v58 = vor.u32 %v8923_v53, %v6873_v55  ;;  %v8918_v59 = vld [vmem:[#allocation7 + $0xa4] sm:$0xf]  ;;  %v6849_v60 = vld [vmem:[#allocation7 + $0xb0] sm:$0xf0]  ;;  %v6855_v61 = vld [vmem:[#allocation7 + $0xa8] sm:$0xf]  ;;  %v9932_v62 = vor.u32 %v8920_v57, %v6847_v56 }
  0x34   :  { %420 = vmatpush.bf16.msra.mxu2 %v6664_v18  ;;  %449 = vmatpush.bf16.msra.mxu3 %v6668_v22  ;;  %v8921_v63 = vld [vmem:[#allocation7 + $0xb4] sm:$0xf0]  ;;  %v8919_v0 = vld [vmem:[#allocation7 + $0xac] sm:$0xf]  ;;  %v6857_v1 = vld [vmem:[#allocation7 + $0xb8] sm:$0xf0]  ;;  %v9936_v2 = vor.u32 %v8918_v59, %v6849_v60 }
  0x35   :  { %v9938_v3 = vor.u32 %v8921_v63, %v6855_v61  ;;  %v6831_v4 = vld [vmem:[#allocation7 + $0x80] sm:$0xf]  ;;  %v8916_v5 = vld [vmem:[#allocation7 + $0x8c] sm:$0xf0]  ;;  %v9941_v6 = vor.u32 %v8919_v0, %v6857_v1  ;;  %v8914_v7 = vld [vmem:[#allocation7 + $0x84] sm:$0xf] }
  0x36   :  { %363 = vmatpush.bf16.msra.mxu0 %v6640_v28  ;;  %v6833_v8 = vld [vmem:[#allocation7 + $0x90] sm:$0xf0]  ;;  %v9944_v9 = vor.u32 %v8916_v5, %v6831_v4  ;;  %v6839_v10 = vld [vmem:[#allocation7 + $0x88] sm:$0xf]  ;;  %v8917_v11 = vld [vmem:[#allocation7 + $0x94] sm:$0xf0] }
  0x37   :  { %392 = vmatpush.bf16.msra.mxu1 %v6644_v29  ;;  %v8863_v12 = vld [vmem:[%s11852_s0 + $0x8] sm:$0xff]  ;;  %v9951_v13 = vor.u32 %v8914_v7, %v6833_v8  ;;  %v6841_v15 = vld [vmem:[#allocation7 + $0x98] sm:$0xf0]  ;;  %v9954_v16 = vor.u32 %v8917_v11, %v6839_v10  ;;  %v6815_v18 = vld [vmem:[#allocation7 + $0x60] sm:$0xf] }
  0x38   :  { %421 = vmatpush.bf16.msra.mxu2 %v6648_v30  ;;  %450 = vmatpush.bf16.msra.mxu3 %v6652_v31  ;;  %v8915_v14 = vld [vmem:[#allocation7 + $0x8c] sm:$0xf]  ;;  %v8912_v19 = vld [vmem:[#allocation7 + $0x6c] sm:$0xf0]  ;;  %v8910_v20 = vld [vmem:[#allocation7 + $0x64] sm:$0xf] }
  0x39   :  { %364 = vmatmul.bf16.vlgmr.msra.gmra.mxu0 %v8862_v32  ;;  %v9957_v17 = vor.u32 %v8915_v14, %v6841_v15  ;;  %v9960_v21 = vor.u32 %v8912_v19, %v6815_v18  ;;  %v6817_v22 = vld [vmem:[#allocation7 + $0x70] sm:$0xf0]  ;;  %v6823_v23 = vld [vmem:[#allocation7 + $0x68] sm:$0xf]  ;;  %v8913_v24 = vld [vmem:[#allocation7 + $0x74] sm:$0xf0] }
  0x3a   :  { %393 = vmatmul.bf16.vlgmr.msra.gmra.mxu1 %v8862_v32  ;;  %700 = vmatpush.bf16.msrb.mxu0 %v9911_v36  ;;  %v9963_v25 = vor.u32 %v8910_v20, %v6817_v22  ;;  %v9965_v26 = vor.u32 %v8913_v24, %v6823_v23  ;;  %v8911_v27 = vld [vmem:[#allocation7 + $0x6c] sm:$0xf]  ;;  %v6825_v28 = vld [vmem:[#allocation7 + $0x78] sm:$0xf0]  ;;  %v6799_v29 = vld [vmem:[#allocation7 + $0x40] sm:$0xf] }
  0x3b   :  { %422 = vmatmul.bf16.vlgmr.msra.gmra.mxu2 %v8862_v32  ;;  %451 = vmatmul.bf16.vlgmr.msra.gmra.mxu3 %v8862_v32  ;;  %v9969_v30 = vor.u32 %v8911_v27, %v6825_v28  ;;  %v8908_v31 = vld [vmem:[#allocation7 + $0x4c] sm:$0xf0]  ;;  %v8906_v32 = vld [vmem:[#allocation7 + $0x44] sm:$0xf]  ;;  %v6801_v33 = vld [vmem:[#allocation7 + $0x50] sm:$0xf0] }
  0x3c   :  { %713 = vmatpush.bf16.msrb.mxu1 %v9913_v40  ;;  %726 = vmatpush.bf16.msrb.mxu2 %v9915_v41  ;;  %v9972_v34 = vor.u32 %v8908_v31, %v6799_v29  ;;  %v9974_v35 = vor.u32 %v8906_v32, %v6801_v33  ;;  %v6807_v37 = vld [vmem:[#allocation7 + $0x48] sm:$0xf]  ;;  %v8909_v38 = vld [vmem:[#allocation7 + $0x54] sm:$0xf0]  ;;  %v8907_v39 = vld [vmem:[#allocation7 + $0x4c] sm:$0xf] }
  0x3d   :  { %739 = vmatpush.bf16.msrb.mxu3 %v9918_v45  ;;  %v6809_v42 = vld [vmem:[#allocation7 + $0x58] sm:$0xf0]  ;;  %v6783_v43 = vld [vmem:[#allocation7 + $0x20] sm:$0xf]  ;;  %v8904_v44 = vld [vmem:[#allocation7 + $0x2c] sm:$0xf0]  ;;  %v9977_v46 = vor.u32 %v8909_v38, %v6807_v37 }
  0x3e   :  { %701 = vmatpush.bf16.msrb.mxu0 %v9922_v49  ;;  %v8902_v47 = vld [vmem:[#allocation7 + $0x24] sm:$0xf]  ;;  %v6785_v48 = vld [vmem:[#allocation7 + $0x30] sm:$0xf0]  ;;  %v9981_v51 = vor.u32 %v8907_v39, %v6809_v42  ;;  %v9983_v52 = vor.u32 %v8904_v44, %v6783_v43  ;;  %v6791_v53 = vld [vmem:[#allocation7 + $0x28] sm:$0xf] }
  0x3f   :  { %v8905_v55 = vld [vmem:[#allocation7 + $0x34] sm:$0xf0]  ;;  %v8903_v56 = vld [vmem:[#allocation7 + $0x2c] sm:$0xf]  ;;  %v9986_v57 = vor.u32 %v8902_v47, %v6785_v48  ;;  %v6793_v59 = vld [vmem:[#allocation7 + $0x38] sm:$0xf0] }
  0x40   :  { %714 = vmatpush.bf16.msrb.mxu1 %v9924_v50  ;;  %727 = vmatpush.bf16.msrb.mxu2 %v9927_v54  ;;  %v6767_v60 = vld [vmem:[#allocation7] sm:$0xf]  ;;  %v8900_v61 = vld [vmem:[#allocation7 + $0xc] sm:$0xf0]  ;;  %v8898_v63 = vld [vmem:[#allocation7 + $0x4] sm:$0xf]  ;;  %v9989_v1 = vor.u32 %v8905_v55, %v6791_v53  ;;  %v9993_v4 = vor.u32 %v8903_v56, %v6793_v59 }
  0x41   :  { %740 = vmatpush.bf16.msrb.mxu3 %v9929_v58  ;;  %v6769_v0 = vld [vmem:[#allocation7 + $0x10] sm:$0xf0]  ;;  %v9995_v5 = vor.u32 %v8900_v61, %v6767_v60  ;;  %v6775_v7 = vld [vmem:[#allocation7 + $0x8] sm:$0xf]  ;;  %v8901_v8 = vld [vmem:[#allocation7 + $0x14] sm:$0xf0] }
  0x42   :  { %702 = vmatpush.bf16.msrb.mxu0 %v9932_v62  ;;  %v8864_v10 = vld [vmem:[%s11852_s0 + $0x10] sm:$0xff]  ;;  %v10001_v11 = vor.u32 %v8898_v63, %v6769_v0  ;;  %v6777_v14 = vld [vmem:[#allocation7 + $0x18] sm:$0xf0]  ;;  %v10004_v15 = vor.u32 %v8901_v8, %v6775_v7  ;;  %v11866_v20 = vmov 0   ;;  %v162_v31 = vld [vmem:[%s11855_s3] sm:$0xf] }
  0x43   :  { %v8865_v19 = vld [vmem:[%s11852_s0 + $0x18] sm:$0xff]  ;;  %v10093_v32 = vperm.slane %v162_v31, 0  ;;  %v10097_v37 = vperm.slane %v162_v31, 1  ;;  %v10107_v47 = vperm.slane %v162_v31, 2  ;;  %v10109_v48 = vperm.slane %v162_v31, 3 }
  0x44   :  { %715 = vmatpush.bf16.msrb.mxu1 %v9936_v2  ;;  %728 = vmatpush.bf16.msrb.mxu2 %v9938_v3 }
  0x45   :  { %741 = vmatpush.bf16.msrb.mxu3 %v9941_v6  ;;  %11875 = vst [vmem:[#allocation19_spill] sm:$0xff] %v10109_v48 }
  0x46   :  { %703 = vmatpush.bf16.msrb.mxu0 %v9944_v9 }
  0x48   :  { %716 = vmatpush.bf16.msrb.mxu1 %v9951_v13  ;;  %729 = vmatpush.bf16.msrb.mxu2 %v9954_v16 }
  0x49   :  { %369 = vmatmul.bf16.gmra.mxu0 %v8863_v12  ;;  %742 = vmatpush.bf16.msrb.mxu3 %v9957_v17 }
  0x4a   :  { %398 = vmatmul.bf16.gmra.mxu1 %v8863_v12  ;;  %704 = vmatpush.bf16.msrb.mxu0 %v9960_v21 }
  0x4b   :  { %427 = vmatmul.bf16.gmra.mxu2 %v8863_v12  ;;  %456 = vmatmul.bf16.gmra.mxu3 %v8863_v12  ;;  %v8899_v12 = vld [vmem:[#allocation7 + $0xc] sm:$0xf] }
  0x4c   :  { %717 = vmatpush.bf16.msrb.mxu1 %v9963_v25  ;;  %730 = vmatpush.bf16.msrb.mxu2 %v9965_v26  ;;  %v10008_v18 = vor.u32 %v8899_v12, %v6777_v14 }
  0x4d   :  { %743 = vmatpush.bf16.msrb.mxu3 %v9969_v30 }
  0x4e   :  { %705 = vmatpush.bf16.msrb.mxu0 %v9972_v34 }
  0x50   :  { %718 = vmatpush.bf16.msrb.mxu1 %v9974_v35  ;;  %731 = vmatpush.bf16.msrb.mxu2 %v9977_v46 }
  0x51   :  { %744 = vmatpush.bf16.msrb.mxu3 %v9981_v51 }
  0x52   :  { %706 = vmatpush.bf16.msrb.mxu0 %v9983_v52 }
  0x54   :  { %719 = vmatpush.bf16.msrb.mxu1 %v9986_v57  ;;  %732 = vmatpush.bf16.msrb.mxu2 %v9989_v1 }
  0x55   :  { %745 = vmatpush.bf16.msrb.mxu3 %v9993_v4 }
  0x56   :  { %707 = vmatpush.bf16.msrb.mxu0 %v9995_v5 }
  0x58   :  { %720 = vmatpush.bf16.msrb.mxu1 %v10001_v11  ;;  %733 = vmatpush.bf16.msrb.mxu2 %v10004_v15 }
  0x59   :  { %374 = vmatmul.bf16.gmra.mxu0 %v8864_v10  ;;  %746 = vmatpush.bf16.msrb.mxu3 %v10008_v18 }
  0x5a   :  { %403 = vmatmul.bf16.gmra.mxu1 %v8864_v10  ;;  %826 = vmatpush.bf16.msra.mxu0 %v9911_v36 }
  0x5b   :  { %432 = vmatmul.bf16.gmra.mxu2 %v8864_v10  ;;  %461 = vmatmul.bf16.gmra.mxu3 %v8864_v10 }
  0x5c   :  { %839 = vmatpush.bf16.msra.mxu1 %v9913_v40  ;;  %852 = vmatpush.bf16.msra.mxu2 %v9915_v41 }
  0x5d   :  { %865 = vmatpush.bf16.msra.mxu3 %v9918_v45 }
  0x5e   :  { %827 = vmatpush.bf16.msra.mxu0 %v9922_v49 }
  0x60   :  { %840 = vmatpush.bf16.msra.mxu1 %v9924_v50  ;;  %853 = vmatpush.bf16.msra.mxu2 %v9927_v54 }
  0x61   :  { %866 = vmatpush.bf16.msra.mxu3 %v9929_v58 }
  0x62   :  { %828 = vmatpush.bf16.msra.mxu0 %v9932_v62 }
  0x64   :  { %841 = vmatpush.bf16.msra.mxu1 %v9936_v2  ;;  %854 = vmatpush.bf16.msra.mxu2 %v9938_v3 }
  0x65   :  { %867 = vmatpush.bf16.msra.mxu3 %v9941_v6 }
  0x66   :  { %829 = vmatpush.bf16.msra.mxu0 %v9944_v9 }
  0x68   :  { %842 = vmatpush.bf16.msra.mxu1 %v9951_v13  ;;  %855 = vmatpush.bf16.msra.mxu2 %v9954_v16 }
  0x69   :  { %379 = vmatmul.bf16.gmra.mxu0 %v8865_v19  ;;  %868 = vmatpush.bf16.msra.mxu3 %v9957_v17 }
  0x6a   :  { %408 = vmatmul.bf16.gmra.mxu1 %v8865_v19  ;;  %830 = vmatpush.bf16.msra.mxu0 %v9960_v21 }
  0x6b   :  { %437 = vmatmul.bf16.gmra.mxu2 %v8865_v19  ;;  %466 = vmatmul.bf16.gmra.mxu3 %v8865_v19 }
  0x6c   :  { %843 = vmatpush.bf16.msra.mxu1 %v9963_v25  ;;  %856 = vmatpush.bf16.msra.mxu2 %v9965_v26 }
  0x6d   :  { %869 = vmatpush.bf16.msra.mxu3 %v9969_v30 }
  0x6e   :  { %831 = vmatpush.bf16.msra.mxu0 %v9972_v34 }
  0x70   :  { %844 = vmatpush.bf16.msra.mxu1 %v9974_v35  ;;  %857 = vmatpush.bf16.msra.mxu2 %v9977_v46 }
  0x71   :  { %870 = vmatpush.bf16.msra.mxu3 %v9981_v51 }
  0x72   :  { %832 = vmatpush.bf16.msra.mxu0 %v9983_v52 }
  0x74   :  { %845 = vmatpush.bf16.msra.mxu1 %v9986_v57  ;;  %858 = vmatpush.bf16.msra.mxu2 %v9989_v1 }
  0x75   :  { %871 = vmatpush.bf16.msra.mxu3 %v9993_v4 }
  0x76   :  { %833 = vmatpush.bf16.msra.mxu0 %v9995_v5 }
  0x78   :  { %846 = vmatpush.bf16.msra.mxu1 %v10001_v11  ;;  %859 = vmatpush.bf16.msra.mxu2 %v10004_v15 }
  0x79   :  { %708 = vmatmul.bf16.vlgmr.msrb.gmra.mxu0 %v11866_v20  ;;  %872 = vmatpush.bf16.msra.mxu3 %v10008_v18 }
  0x7a   :  { %721 = vmatmul.bf16.vlgmr.msrb.gmra.mxu1 %v11866_v20  ;;  %952 = vmatpush.bf16.msrb.mxu0 %v9911_v36 }
  0x7b   :  { %734 = vmatmul.bf16.vlgmr.msrb.gmra.mxu2 %v11866_v20  ;;  %747 = vmatmul.bf16.vlgmr.msrb.gmra.mxu3 %v11866_v20 }
  0x7c   :  { %965 = vmatpush.bf16.msrb.mxu1 %v9913_v40  ;;  %978 = vmatpush.bf16.msrb.mxu2 %v9915_v41 }
  0x7d   :  { %991 = vmatpush.bf16.msrb.mxu3 %v9918_v45 }
  0x7e   :  { %953 = vmatpush.bf16.msrb.mxu0 %v9922_v49 }
  0x80   :  { %966 = vmatpush.bf16.msrb.mxu1 %v9924_v50  ;;  %979 = vmatpush.bf16.msrb.mxu2 %v9927_v54 }
  0x81   :  { %992 = vmatpush.bf16.msrb.mxu3 %v9929_v58 }
  0x82   :  { %954 = vmatpush.bf16.msrb.mxu0 %v9932_v62 }
  0x84   :  { %967 = vmatpush.bf16.msrb.mxu1 %v9936_v2  ;;  %980 = vmatpush.bf16.msrb.mxu2 %v9938_v3 }
  0x85   :  { %993 = vmatpush.bf16.msrb.mxu3 %v9941_v6 }
  0x86   :  { %955 = vmatpush.bf16.msrb.mxu0 %v9944_v9 }
  0x88   :  { %968 = vmatpush.bf16.msrb.mxu1 %v9951_v13  ;;  %981 = vmatpush.bf16.msrb.mxu2 %v9954_v16 }
  0x89   :  { %994 = vmatpush.bf16.msrb.mxu3 %v9957_v17 }
  0x8a   :  { %956 = vmatpush.bf16.msrb.mxu0 %v9960_v21 }
  0x8c   :  { %969 = vmatpush.bf16.msrb.mxu1 %v9963_v25  ;;  %982 = vmatpush.bf16.msrb.mxu2 %v9965_v26 }
  0x8d   :  { %995 = vmatpush.bf16.msrb.mxu3 %v9969_v30 }
  0x8e   :  { %957 = vmatpush.bf16.msrb.mxu0 %v9972_v34 }
  0x90   :  { %970 = vmatpush.bf16.msrb.mxu1 %v9974_v35  ;;  %983 = vmatpush.bf16.msrb.mxu2 %v9977_v46 }
  0x91   :  { %996 = vmatpush.bf16.msrb.mxu3 %v9981_v51 }
  0x92   :  { %958 = vmatpush.bf16.msrb.mxu0 %v9983_v52 }
  0x94   :  { %971 = vmatpush.bf16.msrb.mxu1 %v9986_v57  ;;  %984 = vmatpush.bf16.msrb.mxu2 %v9989_v1 }
  0x95   :  { %997 = vmatpush.bf16.msrb.mxu3 %v9993_v4 }
  0x96   :  { %959 = vmatpush.bf16.msrb.mxu0 %v9995_v5 }
  0x98   :  { %972 = vmatpush.bf16.msrb.mxu1 %v10001_v11  ;;  %985 = vmatpush.bf16.msrb.mxu2 %v10004_v15 }
  0x99   :  { %998 = vmatpush.bf16.msrb.mxu3 %v10008_v18 }
  0xb6   :  { %v365_v22 = vpop.f32.mrf.mxu0 }
  0xb7   :  { %v394_v23 = vpop.f32.mrf.mxu1 }
  0xbe   :  { %v423_v24 = vpop.f32.mrf.mxu2  ;;  %v10084_v27 = vpop.f32.mrf.mxu3 }
  0xbf   :  { %v10086_v28 = vpop.f32.mrf.mxu0  ;;  %v10088_v29 = vpop.f32.mrf.mxu1 }
  0xc6   :  { %v10095_v33 = vpop.f32.mrf.mxu2  ;;  %v10099_v38 = vpop.f32.mrf.mxu3 }
  0xc7   :  { %11872 = vst [vmem:[#allocation16_spill] sm:$0xff] %v10099_v38  ;;  %v370_v39 = vpop.f32.mrf.mxu0  ;;  %v399_v43 = vpop.f32.mrf.mxu1 }
  0xc8   :  { %v10102_v42 = vadd.f32 %v370_v39, %v10093_v32  ;;  %v10105_v44 = vadd.f32 %v399_v43, %v10097_v37 }
  0xca   :  { %11873 = vst [vmem:[#allocation17_spill] sm:$0xff] %v10102_v42 }
  0xcb   :  { %11874 = vst [vmem:[#allocation18_spill] sm:$0xff] %v10105_v44 }
  0xce   :  { %v428_v53 = vpop.f32.mrf.mxu2  ;;  %v457_v56 = vpop.f32.mrf.mxu3 }
  0xcf   :  { %v10112_v55 = vadd.f32 %v428_v53, %v10107_v47  ;;  %v10114_v59 = vpop.f32.mrf.mxu0  ;;  %v10117_v60 = vadd.f32 %v457_v56, %v10109_v48  ;;  %v10119_v61 = vpop.f32.mrf.mxu1 }
  0xd0   :  { %11877 = vst [vmem:[#allocation21_spill] sm:$0xff] %v10114_v59 }
  0xd1   :  { %11876 = vst [vmem:[#allocation20_spill] sm:$0xff] %v10112_v55 }
  0xd2   :  { %11878 = vst [vmem:[#allocation22_spill] sm:$0xff] %v10117_v60 }
  0xd3   :  { %11879 = vst [vmem:[#allocation23_spill] sm:$0xff] %v10119_v61 }
  0xd6   :  { %v10121_v63 = vpop.f32.mrf.mxu2  ;;  %v10123_v0 = vpop.f32.mrf.mxu3 }
  0xd7   :  { %11880 = vst [vmem:[#allocation24_spill] sm:$0xff] %v10121_v63  ;;  %v375_v7 = vpop.f32.mrf.mxu0  ;;  %v404_v10 = vpop.f32.mrf.mxu1 }
  0xd8   :  { %11881 = vst [vmem:[#allocation25_spill] sm:$0xff] %v10123_v0  ;;  %v10126_v8 = vadd.f32 %v375_v7, %v10093_v32  ;;  %v10129_v12 = vadd.f32 %v404_v10, %v10097_v37 }
  0xda   :  { %11882 = vst [vmem:[#allocation26_spill] sm:$0xff] %v10126_v8 }
  0xdb   :  { %11883 = vst [vmem:[#allocation27_spill] sm:$0xff] %v10129_v12 }
  0xde   :  { %v433_v14 = vpop.f32.mrf.mxu2  ;;  %v462_v31 = vpop.f32.mrf.mxu3 }
  0xdf   :  { %v10132_v19 = vadd.f32 %v433_v14, %v10107_v47  ;;  %v10134_v39 = vpop.f32.mrf.mxu0  ;;  %v10137_v43 = vadd.f32 %v462_v31, %v10109_v48  ;;  %v10139_v53 = vpop.f32.mrf.mxu1 }
  0xe0   :  { %11885 = vst [vmem:[#allocation29_spill] sm:$0xff] %v10134_v39 }
  0xe1   :  { %11884 = vst [vmem:[#allocation28_spill] sm:$0xff] %v10132_v19 }
  0xe2   :  { %11886 = vst [vmem:[#allocation30_spill] sm:$0xff] %v10137_v43 }
  0xe3   :  { %11887 = vst [vmem:[#allocation31_spill] sm:$0xff] %v10139_v53 }
  0xe6   :  { %v10141_v56 = vpop.f32.mrf.mxu2  ;;  %v10143_v7 = vpop.f32.mrf.mxu3 }
  0xe7   :  { %11888 = vst [vmem:[#allocation32_spill] sm:$0xff] %v10141_v56  ;;  %v380_v20 = vpop.f32.mrf.mxu0  ;;  %v409_v12 = vpop.f32.mrf.mxu1 }
  0xe8   :  { %11889 = vst [vmem:[#allocation33_spill] sm:$0xff] %v10143_v7  ;;  %v10146_v10 = vadd.f32 %v380_v20, %v10093_v32  ;;  %v10149_v14 = vadd.f32 %v409_v12, %v10097_v37  ;;  %v366_v7 = vadd.f32 %v365_v22, %v10093_v32 }
  0xea   :  { %11890 = vst [vmem:[#allocation34_spill] sm:$0xff] %v10146_v10  ;;  %v395_v10 = vadd.f32 %v394_v23, %v10097_v37 }
  0xeb   :  { %11891 = vst [vmem:[#allocation35_spill] sm:$0xff] %v10149_v14 }
  0xee   :  { %v438_v19 = vpop.f32.mrf.mxu2  ;;  %v467_v31 = vpop.f32.mrf.mxu3 }
  0xef   :  { %v10152_v39 = vadd.f32 %v438_v19, %v10107_v47  ;;  %v10154_v43 = vpop.f32.mrf.mxu0  ;;  %v10157_v53 = vadd.f32 %v467_v31, %v10109_v48  ;;  %v10159_v56 = vpop.f32.mrf.mxu1  ;;  %v424_v31 = vadd.f32 %v423_v24, %v10107_v47  ;;  %v453_v24 = vadd.f32 %v10084_v27, %v10109_v48 }
  0xf0   :  { %11893 = vst [vmem:[#allocation37_spill] sm:$0xff] %v10154_v43 }
  0xf1   :  { %11892 = vst [vmem:[#allocation36_spill] sm:$0xff] %v10152_v39 }
  0xf2   :  { %11894 = vst [vmem:[#allocation38_spill] sm:$0xff] %v10157_v53 }
  0xf3   :  { %11895 = vst [vmem:[#allocation39_spill] sm:$0xff] %v10159_v56 }
  0xf6   :  { %v10162_v20 = vpop.f32.mrf.mxu2  ;;  %v10165_v12 = vpop.f32.mrf.mxu3 }
  0xf7   :  { %11896 = vst [vmem:[#allocation40_spill] sm:$0xff] %v10162_v20  ;;  %v709_v14 = vpop.f32.mrf.mxu0  ;;  %v722_v19 = vpop.f32.mrf.mxu1 }
  0xf8   :  { %11897 = vst [vmem:[#allocation41_spill] sm:$0xff] %v10165_v12  ;;  %v752_v8 = vadd.f32 %v709_v14, %v366_v7  ;;  %v753_v39 = vadd.f32 %v722_v19, %v395_v10 }
  0xfa   :  { %v6893_v0 = vmul.f32 -1.442695, %v752_v8  ;;  %v6894_v63 = vmul.f32 -1.442695, %v753_v39 }
  0xfc   :  { %9423 = vpow2.f32 %v6893_v0 }
  0xfd   :  { %9425 = vpow2.f32 %v6894_v63 }
  0xfe   :  { %v735_v43 = vpop.f32.mrf.mxu2  ;;  %v748_v53 = vpop.f32.mrf.mxu3 }
  0xff   :  { %v754_v56 = vadd.f32 %v735_v43, %v424_v31  ;;  %v711_v22 = vpop.f32.mrf.mxu0  ;;  %v724_v61 = vpop.f32.mrf.mxu1  ;;  %v755_v43 = vadd.f32 %v748_v53, %v453_v24 }
 0x101   :  { %v6895_v20 = vmul.f32 -1.442695, %v754_v56 }
 0x102   :  { %v9424_v59 = vpop.eup %9423 }
 0x103   :  { %v9426_v23 = vpop.eup %9425  ;;  %v759_v60 = vadd.f32 1.0, %v9424_v59  ;;  %9427 = vpow2.f32 %v6895_v20 }
 0x104   :  { %v778_v12 = vadd.f32 1.0, %v9426_v23 }
 0x105   :  { %9429 = vrcp.f32 %v759_v60  ;;  %v771_v59 = vand.u32 2147483648, %v759_v60  ;;  %v769_v22 = vand.u32 2147483647, %v759_v60  ;;  %vm765_vm2 = vweird.f32 %v759_v60 }
 0x106   :  { %9431 = vrcp.f32 %v778_v12  ;;  %v737_v7 = vpop.f32.mrf.mxu2  ;;  %v750_v8 = vpop.f32.mrf.mxu3  ;;  %v790_v20 = vand.u32 2147483648, %v778_v12  ;;  %vm784_vm3 = vweird.f32 %v778_v12 }
 0x107   :  { %v788_v7 = vand.u32 2147483647, %v778_v12  ;;  %vm770_vm5 = vcmp.eq.f32.partialorder %v769_v22, 8.507059e+37 }
 0x108   :  { %v791_v55 = vor.u32 1.1754944e-38, %v790_v20 }
 0x109   :  { %v9428_v39 = vpop.eup %9427  ;;  %vm789_vm7 = vcmp.eq.f32.partialorder %v788_v7, 8.507059e+37 }
 0x10a   :  { %v797_v63 = vadd.f32 1.0, %v9428_v39  ;;  %v772_v39 = vor.u32 1.1754944e-38, %v771_v59 }
 0x10b   :  { %v9430_v0 = vpop.eup %9429 }
 0x10c   :  { %v9432_v10 = vpop.eup %9431  ;;  %v761_v14 = vmul.f32 %v9430_v0, %v759_v60  ;;  %9433 = vrcp.f32 %v797_v63  ;;  %vm766_vm0 = vweird.f32 %v9430_v0  ;;  %vm803_vm9 = vweird.f32 %v797_v63 }
 0x10d   :  { %v780_v61 = vmul.f32 %v9432_v10, %v778_v12  ;;  %9435 = vtanh.f32 %v755_v43  ;;  %vm785_vm1 = vweird.f32 %v9432_v10  ;;  %vm767_vm4 = vmor %vm765_vm2, %vm766_vm0  ;;  %v809_v12 = vand.u32 2147483648, %v797_v63 }
 0x10e   :  { %v762_v56 = vsub.f32 1.0, %v761_v14  ;;  %vm786_vm6 = vmor %vm784_vm3, %vm785_vm1 }
 0x10f   :  { %v781_v19 = vsub.f32 1.0, %v780_v61  ;;  %v810_v20 = vor.u32 1.1754944e-38, %v809_v12 }
 0x110   :  { %v763_v31 = vmul.f32 %v9430_v0, %v762_v56 }
 0x111   :  { %v782_v23 = vmul.f32 %v9432_v10, %v781_v19 }
 0x112   :  { %v9434_v8 = vpop.eup %9433  ;;  %v764_v27 = vadd.f32 %v9430_v0, %v763_v31 }
 0x113   :  { %v799_v53 = vmul.f32 %v9434_v8, %v797_v63  ;;  %v783_v24 = vadd.f32 %v9432_v10, %v782_v23  ;;  %v9436_v43 = vpop.eup %9435  ;;  %vm804_vm8 = vweird.f32 %v9434_v8 }
 0x114   :  { %v768_v14 = vsel %vm767_vm4, %v9430_v0, %v764_v27  ;;  %v807_v0 = vand.u32 2147483647, %v797_v63  ;;  %vm805_vm10 = vmor %vm803_vm9, %vm804_vm8 }
 0x115   :  { %v800_v61 = vsub.f32 1.0, %v799_v53  ;;  %v773_v56 = vsel %vm770_vm5, %v772_v39, %v768_v14  ;;  %v787_v44 = vsel %vm786_vm6, %v9432_v10, %v783_v24  ;;  %v426_v53 = vadd.f32 %v10095_v33, %v10107_v47 }
 0x116   :  { %v792_v19 = vsel %vm789_vm7, %v791_v55, %v787_v44  ;;  %v815_v42 = vmul.f32 %v9436_v43, %v773_v56  ;;  %vm808_vm11 = vcmp.eq.f32.partialorder %v807_v0, 8.507059e+37 }
 0x117   :  { %v801_v38 = vmul.f32 %v9434_v8, %v800_v61  ;;  %v814_v48 = vmul.f32 0.0, %v792_v19 }
 0x119   :  { %v10170_v31 = vadd.f32 %v815_v42, %v814_v48  ;;  %v802_v60 = vadd.f32 %v9434_v8, %v801_v38  ;;  %v368_v38 = vadd.f32 %v10086_v28, %v10093_v32  ;;  %v397_v42 = vadd.f32 %v10088_v29, %v10097_v37 }
 0x11b   :  { %9437 = vtanh.f32 %v10170_v31  ;;  %v806_v59 = vsel %vm805_vm10, %v9434_v8, %v802_v60 }
 0x11c   :  { %v811_v10 = vsel %vm808_vm11, %v810_v20, %v806_v59  ;;  %v11898_v20 = vld [vmem:[#allocation19_spill] sm:$0xff] }
 0x121   :  { %v9438_v22 = vpop.eup %9437 }
 0x122   :  { %v10173_v23 = vmul.f32 %v9438_v22, %v811_v10  ;;  %v11899_v22 = vld [vmem:[#allocation16_spill] sm:$0xff] }
 0x123   :  { %v455_v33 = vadd.f32 %v11899_v22, %v11898_v20 }
 0x124   :  { %v825_v44 = vpack.c.bf16 %v10173_v23, %v10173_v23 }
 0x126   :  { %834 = vmatmul.bf16.vlgmr.msra.gmra.mxu0 %v825_v44  ;;  %847 = vmatmul.bf16.vlgmr.msra.gmra.mxu1 %v825_v44 }
 0x127   :  { %860 = vmatmul.bf16.vlgmr.msra.gmra.mxu2 %v825_v44  ;;  %873 = vmatmul.bf16.vlgmr.msra.gmra.mxu3 %v825_v44 }
 0x128   :  { %1078 = vmatpush.bf16.msra.mxu0 %v9911_v36  ;;  %1091 = vmatpush.bf16.msra.mxu1 %v9913_v40 }
 0x129   :  { %1104 = vmatpush.bf16.msra.mxu2 %v9915_v41  ;;  %1117 = vmatpush.bf16.msra.mxu3 %v9918_v45 }
 0x12c   :  { %1079 = vmatpush.bf16.msra.mxu0 %v9922_v49  ;;  %1092 = vmatpush.bf16.msra.mxu1 %v9924_v50 }
 0x12d   :  { %1105 = vmatpush.bf16.msra.mxu2 %v9927_v54  ;;  %1118 = vmatpush.bf16.msra.mxu3 %v9929_v58 }
 0x130   :  { %1080 = vmatpush.bf16.msra.mxu0 %v9932_v62  ;;  %1093 = vmatpush.bf16.msra.mxu1 %v9936_v2 }
 0x131   :  { %1106 = vmatpush.bf16.msra.mxu2 %v9938_v3  ;;  %1119 = vmatpush.bf16.msra.mxu3 %v9941_v6 }
 0x134   :  { %1081 = vmatpush.bf16.msra.mxu0 %v9944_v9  ;;  %1094 = vmatpush.bf16.msra.mxu1 %v9951_v13 }
 0x135   :  { %1107 = vmatpush.bf16.msra.mxu2 %v9954_v16  ;;  %1120 = vmatpush.bf16.msra.mxu3 %v9957_v17 }
 0x138   :  { %1082 = vmatpush.bf16.msra.mxu0 %v9960_v21  ;;  %1095 = vmatpush.bf16.msra.mxu1 %v9963_v25 }
 0x139   :  { %1108 = vmatpush.bf16.msra.mxu2 %v9965_v26  ;;  %1121 = vmatpush.bf16.msra.mxu3 %v9969_v30 }
 0x13c   :  { %1083 = vmatpush.bf16.msra.mxu0 %v9972_v34  ;;  %1096 = vmatpush.bf16.msra.mxu1 %v9974_v35 }
 0x13d   :  { %1109 = vmatpush.bf16.msra.mxu2 %v9977_v46  ;;  %1122 = vmatpush.bf16.msra.mxu3 %v9981_v51 }
 0x140   :  { %1084 = vmatpush.bf16.msra.mxu0 %v9983_v52  ;;  %1097 = vmatpush.bf16.msra.mxu1 %v9986_v57 }
 0x141   :  { %1110 = vmatpush.bf16.msra.mxu2 %v9989_v1  ;;  %1123 = vmatpush.bf16.msra.mxu3 %v9993_v4 }
 0x144   :  { %1085 = vmatpush.bf16.msra.mxu0 %v9995_v5  ;;  %1098 = vmatpush.bf16.msra.mxu1 %v10001_v11 }
 0x145   :  { %1111 = vmatpush.bf16.msra.mxu2 %v10004_v15  ;;  %1124 = vmatpush.bf16.msra.mxu3 %v10008_v18 }
 0x1a3   :  { %v835_v48 = vpop.f32.mrf.mxu0  ;;  %v848_v55 = vpop.f32.mrf.mxu1 }
 0x1a4   :  { %v878_v63 = vadd.f32 %v835_v48, %v368_v38  ;;  %v879_v7 = vadd.f32 %v848_v55, %v397_v42 }
 0x1a6   :  { %v6896_v8 = vmul.f32 -1.442695, %v878_v63  ;;  %v6897_v27 = vmul.f32 -1.442695, %v879_v7 }
 0x1a8   :  { %9439 = vpow2.f32 %v6896_v8 }
 0x1a9   :  { %9441 = vpow2.f32 %v6897_v27 }
 0x1aa   :  { %v861_v39 = vpop.f32.mrf.mxu2  ;;  %v874_v24 = vpop.f32.mrf.mxu3 }
 0x1ab   :  { %v880_v14 = vadd.f32 %v861_v39, %v426_v53  ;;  %v837_v43 = vpop.f32.mrf.mxu0  ;;  %v850_v61 = vpop.f32.mrf.mxu1  ;;  %v881_v38 = vadd.f32 %v874_v24, %v455_v33 }
 0x1ad   :  { %v6898_v28 = vmul.f32 -1.442695, %v880_v14 }
 0x1ae   :  { %v9440_v56 = vpop.eup %9439 }
 0x1af   :  { %v9442_v19 = vpop.eup %9441  ;;  %v885_v29 = vadd.f32 1.0, %v9440_v56  ;;  %9443 = vpow2.f32 %v6898_v28 }
 0x1b0   :  { %v904_v60 = vadd.f32 1.0, %v9442_v19 }
 0x1b1   :  { %9445 = vrcp.f32 %v885_v29  ;;  %v897_v8 = vand.u32 2147483648, %v885_v29  ;;  %v895_v39 = vand.u32 2147483647, %v885_v29  ;;  %vm891_vm14 = vweird.f32 %v885_v29 }
 0x1b2   :  { %9447 = vrcp.f32 %v904_v60  ;;  %v863_v12 = vpop.f32.mrf.mxu2  ;;  %v876_v0 = vpop.f32.mrf.mxu3  ;;  %v916_v27 = vand.u32 2147483648, %v904_v60  ;;  %v914_v43 = vand.u32 2147483647, %v904_v60  ;;  %vm910_vm15 = vweird.f32 %v904_v60 }
 0x1b3   :  { %v898_v56 = vor.u32 1.1754944e-38, %v897_v8  ;;  %vm896_vm2 = vcmp.eq.f32.partialorder %v895_v39, 8.507059e+37 }
 0x1b4   :  { %v917_v12 = vor.u32 1.1754944e-38, %v916_v27  ;;  %vm915_vm3 = vcmp.eq.f32.partialorder %v914_v43, 8.507059e+37 }
 0x1b5   :  { %v9444_v59 = vpop.eup %9443 }
 0x1b6   :  { %v923_v10 = vadd.f32 1.0, %v9444_v59 }
 0x1b7   :  { %v9446_v44 = vpop.eup %9445 }
 0x1b8   :  { %v9448_v42 = vpop.eup %9447  ;;  %v887_v48 = vmul.f32 %v9446_v44, %v885_v29  ;;  %9449 = vrcp.f32 %v923_v10  ;;  %vm892_vm12 = vweird.f32 %v9446_v44  ;;  %v935_v8 = vand.u32 2147483648, %v923_v10 }
 0x1b9   :  { %v906_v55 = vmul.f32 %v9448_v42, %v904_v60  ;;  %9451 = vtanh.f32 %v881_v38  ;;  %vm911_vm13 = vweird.f32 %v9448_v42  ;;  %vm893_vm0 = vmor %vm891_vm14, %vm892_vm12  ;;  %vm929_vm5 = vweird.f32 %v923_v10 }
 0x1ba   :  { %v888_v63 = vsub.f32 1.0, %v887_v48  ;;  %vm912_vm1 = vmor %vm910_vm15, %vm911_vm13 }
 0x1bb   :  { %v907_v7 = vsub.f32 1.0, %v906_v55 }
 0x1bc   :  { %v889_v53 = vmul.f32 %v9446_v44, %v888_v63 }
 0x1bd   :  { %v908_v14 = vmul.f32 %v9448_v42, %v907_v7 }
 0x1be   :  { %v9450_v61 = vpop.eup %9449  ;;  %v890_v28 = vadd.f32 %v9446_v44, %v889_v53  ;;  %v936_v53 = vor.u32 1.1754944e-38, %v935_v8 }
 0x1bf   :  { %v925_v24 = vmul.f32 %v9450_v61, %v923_v10  ;;  %v909_v19 = vadd.f32 %v9448_v42, %v908_v14  ;;  %v9452_v59 = vpop.eup %9451  ;;  %vm930_vm4 = vweird.f32 %v9450_v61 }
 0x1c0   :  { %v894_v0 = vsel %vm893_vm0, %v9446_v44, %v890_v28  ;;  %v933_v44 = vand.u32 2147483647, %v923_v10  ;;  %vm931_vm6 = vmor %vm929_vm5, %vm930_vm4 }
 0x1c1   :  { %v926_v22 = vsub.f32 1.0, %v925_v24  ;;  %v899_v33 = vsel %vm896_vm2, %v898_v56, %v894_v0  ;;  %v913_v38 = vsel %vm912_vm1, %v9448_v42, %v909_v19  ;;  %v11901_v24 = vld [vmem:[#allocation18_spill] sm:$0xff] }
 0x1c2   :  { %v918_v48 = vsel %vm915_vm3, %v917_v12, %v913_v38  ;;  %v941_v55 = vmul.f32 %v9452_v59, %v899_v33  ;;  %vm934_vm7 = vcmp.eq.f32.partialorder %v933_v44, 8.507059e+37 }
 0x1c3   :  { %v927_v63 = vmul.f32 %v9450_v61, %v926_v22  ;;  %v940_v7 = vmul.f32 %v918_v48, %v10170_v31  ;;  %v11902_v22 = vld [vmem:[#allocation20_spill] sm:$0xff] }
 0x1c5   :  { %v10218_v29 = vadd.f32 %v941_v55, %v940_v7  ;;  %v928_v60 = vadd.f32 %v9450_v61, %v927_v63 }
 0x1c7   :  { %9453 = vtanh.f32 %v10218_v29  ;;  %v932_v27 = vsel %vm931_vm6, %v9450_v61, %v928_v60  ;;  %v11900_v61 = vld [vmem:[#allocation17_spill] sm:$0xff] }
 0x1c8   :  { %v937_v39 = vsel %vm934_vm7, %v936_v53, %v932_v27 }
 0x1cd   :  { %v9454_v42 = vpop.eup %9453 }
 0x1ce   :  { %v10221_v14 = vmul.f32 %v9454_v42, %v937_v39 }
 0x1d0   :  { %v951_v31 = vpack.c.bf16 %v10221_v14, %v10221_v14 }
 0x1d2   :  { %960 = vmatmul.bf16.vlgmr.msrb.gmra.mxu0 %v951_v31  ;;  %973 = vmatmul.bf16.vlgmr.msrb.gmra.mxu1 %v951_v31 }
 0x1d3   :  { %986 = vmatmul.bf16.vlgmr.msrb.gmra.mxu2 %v951_v31  ;;  %999 = vmatmul.bf16.vlgmr.msrb.gmra.mxu3 %v951_v31  ;;  %v11903_v31 = vld [vmem:[#allocation22_spill] sm:$0xff] }
 0x1d4   :  { %1204 = vmatpush.bf16.msrb.mxu0 %v9911_v36  ;;  %1217 = vmatpush.bf16.msrb.mxu1 %v9913_v40 }
 0x1d5   :  { %1230 = vmatpush.bf16.msrb.mxu2 %v9915_v41  ;;  %1243 = vmatpush.bf16.msrb.mxu3 %v9918_v45 }
 0x1d8   :  { %1205 = vmatpush.bf16.msrb.mxu0 %v9922_v49  ;;  %1218 = vmatpush.bf16.msrb.mxu1 %v9924_v50 }
 0x1d9   :  { %1231 = vmatpush.bf16.msrb.mxu2 %v9927_v54  ;;  %1244 = vmatpush.bf16.msrb.mxu3 %v9929_v58 }
 0x1dc   :  { %1206 = vmatpush.bf16.msrb.mxu0 %v9932_v62  ;;  %1219 = vmatpush.bf16.msrb.mxu1 %v9936_v2 }
 0x1dd   :  { %1232 = vmatpush.bf16.msrb.mxu2 %v9938_v3  ;;  %1245 = vmatpush.bf16.msrb.mxu3 %v9941_v6 }
 0x1e0   :  { %1207 = vmatpush.bf16.msrb.mxu0 %v9944_v9  ;;  %1220 = vmatpush.bf16.msrb.mxu1 %v9951_v13 }
 0x1e1   :  { %1233 = vmatpush.bf16.msrb.mxu2 %v9954_v16  ;;  %1246 = vmatpush.bf16.msrb.mxu3 %v9957_v17 }
 0x1e4   :  { %1208 = vmatpush.bf16.msrb.mxu0 %v9960_v21  ;;  %1221 = vmatpush.bf16.msrb.mxu1 %v9963_v25 }
 0x1e5   :  { %1234 = vmatpush.bf16.msrb.mxu2 %v9965_v26  ;;  %1247 = vmatpush.bf16.msrb.mxu3 %v9969_v30 }
 0x1e8   :  { %1209 = vmatpush.bf16.msrb.mxu0 %v9972_v34  ;;  %1222 = vmatpush.bf16.msrb.mxu1 %v9974_v35 }
 0x1e9   :  { %1235 = vmatpush.bf16.msrb.mxu2 %v9977_v46  ;;  %1248 = vmatpush.bf16.msrb.mxu3 %v9981_v51 }
 0x1ec   :  { %1210 = vmatpush.bf16.msrb.mxu0 %v9983_v52  ;;  %1223 = vmatpush.bf16.msrb.mxu1 %v9986_v57 }
 0x1ed   :  { %1236 = vmatpush.bf16.msrb.mxu2 %v9989_v1  ;;  %1249 = vmatpush.bf16.msrb.mxu3 %v9993_v4 }
 0x1f0   :  { %1211 = vmatpush.bf16.msrb.mxu0 %v9995_v5  ;;  %1224 = vmatpush.bf16.msrb.mxu1 %v10001_v11 }
 0x1f1   :  { %1237 = vmatpush.bf16.msrb.mxu2 %v10004_v15  ;;  %1250 = vmatpush.bf16.msrb.mxu3 %v10008_v18 }
 0x24f   :  { %v961_v10 = vpop.f32.mrf.mxu0  ;;  %v974_v43 = vpop.f32.mrf.mxu1 }
 0x250   :  { %v1004_v28 = vadd.f32 %v961_v10, %v11900_v61  ;;  %v1005_v56 = vadd.f32 %v974_v43, %v11901_v24 }
 0x252   :  { %v6899_v19 = vmul.f32 -1.442695, %v1004_v28  ;;  %v6900_v12 = vmul.f32 -1.442695, %v1005_v56 }
 0x254   :  { %9455 = vpow2.f32 %v6899_v19 }
 0x255   :  { %9457 = vpow2.f32 %v6900_v12 }
 0x256   :  { %v987_v0 = vpop.f32.mrf.mxu2  ;;  %v1000_v59 = vpop.f32.mrf.mxu3 }
 0x257   :  { %v1006_v33 = vadd.f32 %v987_v0, %v11902_v22  ;;  %v963_v38 = vpop.f32.mrf.mxu0  ;;  %v976_v48 = vpop.f32.mrf.mxu1  ;;  %v1007_v10 = vadd.f32 %v1000_v59, %v11903_v31 }
 0x259   :  { %v6901_v55 = vmul.f32 -1.442695, %v1006_v33 }
 0x25a   :  { %v9456_v63 = vpop.eup %9455 }
 0x25b   :  { %v9458_v7 = vpop.eup %9457  ;;  %v1011_v60 = vadd.f32 1.0, %v9456_v63  ;;  %9459 = vpow2.f32 %v6901_v55 }
 0x25c   :  { %v1030_v8 = vadd.f32 1.0, %v9458_v7 }
 0x25d   :  { %9461 = vrcp.f32 %v1011_v60  ;;  %v1023_v19 = vand.u32 2147483648, %v1011_v60  ;;  %v1021_v22 = vand.u32 2147483647, %v1011_v60  ;;  %vm1017_vm10 = vweird.f32 %v1011_v60 }
 0x25e   :  { %9463 = vrcp.f32 %v1030_v8  ;;  %v989_v44 = vpop.f32.mrf.mxu2  ;;  %v1002_v27 = vpop.f32.mrf.mxu3  ;;  %v1042_v12 = vand.u32 2147483648, %v1030_v8  ;;  %v1040_v38 = vand.u32 2147483647, %v1030_v8  ;;  %vm1036_vm11 = vweird.f32 %v1030_v8 }
 0x25f   :  { %v1024_v63 = vor.u32 1.1754944e-38, %v1023_v19  ;;  %vm1022_vm14 = vcmp.eq.f32.partialorder %v1021_v22, 8.507059e+37 }
 0x260   :  { %v1043_v44 = vor.u32 1.1754944e-38, %v1042_v12  ;;  %vm1041_vm15 = vcmp.eq.f32.partialorder %v1040_v38, 8.507059e+37 }
 0x261   :  { %v9460_v53 = vpop.eup %9459 }
 0x262   :  { %v1049_v42 = vadd.f32 1.0, %v9460_v53 }
 0x263   :  { %v9462_v39 = vpop.eup %9461 }
 0x264   :  { %v9464_v43 = vpop.eup %9463  ;;  %v1013_v61 = vmul.f32 %v9462_v39, %v1011_v60  ;;  %9465 = vrcp.f32 %v1049_v42  ;;  %vm1018_vm8 = vweird.f32 %v9462_v39  ;;  %v1061_v19 = vand.u32 2147483648, %v1049_v42 }
 0x265   :  { %v1032_v28 = vmul.f32 %v9464_v43, %v1030_v8  ;;  %9467 = vtanh.f32 %v1007_v10  ;;  %vm1037_vm9 = vweird.f32 %v9464_v43  ;;  %vm1019_vm12 = vmor %vm1017_vm10, %vm1018_vm8  ;;  %vm1055_vm1 = vweird.f32 %v1049_v42 }
 0x266   :  { %v1014_v24 = vsub.f32 1.0, %v1013_v61  ;;  %vm1038_vm13 = vmor %vm1036_vm11, %vm1037_vm9  ;;  %v1062_v22 = vor.u32 1.1754944e-38, %v1061_v19 }
 0x267   :  { %v1033_v56 = vsub.f32 1.0, %v1032_v28 }
 0x268   :  { %v1015_v0 = vmul.f32 %v9462_v39, %v1014_v24 }
 0x269   :  { %v1034_v33 = vmul.f32 %v9464_v43, %v1033_v56 }
 0x26a   :  { %v9466_v48 = vpop.eup %9465  ;;  %v1016_v55 = vadd.f32 %v9462_v39, %v1015_v0 }
 0x26b   :  { %v1051_v59 = vmul.f32 %v9466_v48, %v1049_v42  ;;  %v1035_v7 = vadd.f32 %v9464_v43, %v1034_v33  ;;  %v9468_v53 = vpop.eup %9467  ;;  %vm1056_vm0 = vweird.f32 %v9466_v48 }
 0x26c   :  { %v1020_v27 = vsel %vm1019_vm12, %v9462_v39, %v1016_v55  ;;  %v1059_v39 = vand.u32 2147483647, %v1049_v42  ;;  %vm1057_vm2 = vmor %vm1055_vm1, %vm1056_vm0  ;;  %v11905_v42 = vld [vmem:[#allocation21_spill] sm:$0xff]  ;;  %v11906_v55 = vld [vmem:[#allocation23_spill] sm:$0xff] }
 0x26d   :  { %v1052_v31 = vsub.f32 1.0, %v1051_v59  ;;  %v1025_v10 = vsel %vm1022_vm14, %v1024_v63, %v1020_v27  ;;  %v1039_v61 = vsel %vm1038_vm13, %v9464_v43, %v1035_v7  ;;  %v402_v59 = vadd.f32 %v11906_v55, %v10097_v37 }
 0x26e   :  { %v1044_v28 = vsel %vm1041_vm15, %v1043_v44, %v1039_v61  ;;  %v1067_v24 = vmul.f32 %v9468_v53, %v1025_v10  ;;  %vm1060_vm3 = vcmp.eq.f32.partialorder %v1059_v39, 8.507059e+37  ;;  %v11907_v10 = vld [vmem:[#allocation24_spill] sm:$0xff] }
 0x26f   :  { %v1053_v56 = vmul.f32 %v9466_v48, %v1052_v31  ;;  %v1066_v0 = vmul.f32 %v1044_v28, %v10218_v29  ;;  %v431_v61 = vadd.f32 %v11907_v10, %v10107_v47 }
 0x271   :  { %v10262_v60 = vadd.f32 %v1067_v24, %v1066_v0  ;;  %v1054_v8 = vadd.f32 %v9466_v48, %v1053_v56 }
 0x273   :  { %9469 = vtanh.f32 %v10262_v60  ;;  %v1058_v12 = vsel %vm1057_vm2, %v9466_v48, %v1054_v8  ;;  %v373_v48 = vadd.f32 %v11905_v42, %v10093_v32 }
 0x274   :  { %v1063_v33 = vsel %vm1060_vm3, %v1062_v22, %v1058_v12 }
 0x279   :  { %v9470_v43 = vpop.eup %9469 }
 0x27a   :  { %v10265_v38 = vmul.f32 %v9470_v43, %v1063_v33 }
 0x27c   :  { %11904 = vst [vmem:[#allocation19_spill] sm:$0xff] %v10265_v38  ;;  %v1077_v29 = vpack.c.bf16 %v10265_v38, %v10265_v38 }
 0x27e   :  { %1086 = vmatmul.bf16.vlgmr.msra.gmra.mxu0 %v1077_v29  ;;  %1099 = vmatmul.bf16.vlgmr.msra.gmra.mxu1 %v1077_v29 }
 0x27f   :  { %1112 = vmatmul.bf16.vlgmr.msra.gmra.mxu2 %v1077_v29  ;;  %1125 = vmatmul.bf16.vlgmr.msra.gmra.mxu3 %v1077_v29 }
 0x280   :  { %1330 = vmatpush.bf16.msra.mxu0 %v9911_v36  ;;  %1343 = vmatpush.bf16.msra.mxu1 %v9913_v40 }
 0x281   :  { %1356 = vmatpush.bf16.msra.mxu2 %v9915_v41  ;;  %1369 = vmatpush.bf16.msra.mxu3 %v9918_v45 }
 0x284   :  { %1331 = vmatpush.bf16.msra.mxu0 %v9922_v49  ;;  %1344 = vmatpush.bf16.msra.mxu1 %v9924_v50 }
 0x285   :  { %1357 = vmatpush.bf16.msra.mxu2 %v9927_v54  ;;  %1370 = vmatpush.bf16.msra.mxu3 %v9929_v58 }
 0x288   :  { %1332 = vmatpush.bf16.msra.mxu0 %v9932_v62  ;;  %1345 = vmatpush.bf16.msra.mxu1 %v9936_v2 }
 0x289   :  { %1358 = vmatpush.bf16.msra.mxu2 %v9938_v3  ;;  %1371 = vmatpush.bf16.msra.mxu3 %v9941_v6 }
 0x28c   :  { %1333 = vmatpush.bf16.msra.mxu0 %v9944_v9  ;;  %1346 = vmatpush.bf16.msra.mxu1 %v9951_v13 }
 0x28d   :  { %1359 = vmatpush.bf16.msra.mxu2 %v9954_v16  ;;  %1372 = vmatpush.bf16.msra.mxu3 %v9957_v17 }
 0x290   :  { %1334 = vmatpush.bf16.msra.mxu0 %v9960_v21  ;;  %1347 = vmatpush.bf16.msra.mxu1 %v9963_v25 }
 0x291   :  { %1360 = vmatpush.bf16.msra.mxu2 %v9965_v26  ;;  %1373 = vmatpush.bf16.msra.mxu3 %v9969_v30 }
 0x294   :  { %1335 = vmatpush.bf16.msra.mxu0 %v9972_v34  ;;  %1348 = vmatpush.bf16.msra.mxu1 %v9974_v35 }
 0x295   :  { %1361 = vmatpush.bf16.msra.mxu2 %v9977_v46  ;;  %1374 = vmatpush.bf16.msra.mxu3 %v9981_v51 }
 0x298   :  { %1336 = vmatpush.bf16.msra.mxu0 %v9983_v52  ;;  %1349 = vmatpush.bf16.msra.mxu1 %v9986_v57 }
 0x299   :  { %1362 = vmatpush.bf16.msra.mxu2 %v9989_v1  ;;  %1375 = vmatpush.bf16.msra.mxu3 %v9993_v4 }
 0x29c   :  { %1337 = vmatpush.bf16.msra.mxu0 %v9995_v5  ;;  %1350 = vmatpush.bf16.msra.mxu1 %v10001_v11 }
 0x29d   :  { %1363 = vmatpush.bf16.msra.mxu2 %v10004_v15  ;;  %1376 = vmatpush.bf16.msra.mxu3 %v10008_v18 }
 0x2fb   :  { %v1087_v63 = vpop.f32.mrf.mxu0  ;;  %v1100_v7 = vpop.f32.mrf.mxu1 }
 0x2fc   :  { %v1130_v44 = vadd.f32 %v1087_v63, %v373_v48  ;;  %v1131_v27 = vadd.f32 %v1100_v7, %v402_v59  ;;  %v11908_v48 = vld [vmem:[#allocation25_spill] sm:$0xff] }
 0x2fd   :  { %v460_v55 = vadd.f32 %v11908_v48, %v11898_v20 }
 0x2fe   :  { %v6902_v53 = vmul.f32 -1.442695, %v1130_v44  ;;  %v6903_v31 = vmul.f32 -1.442695, %v1131_v27 }
 0x300   :  { %9471 = vpow2.f32 %v6902_v53 }
 0x301   :  { %9473 = vpow2.f32 %v6903_v31 }
 0x302   :  { %v1113_v28 = vpop.f32.mrf.mxu2  ;;  %v1126_v24 = vpop.f32.mrf.mxu3 }
 0x303   :  { %v1132_v56 = vadd.f32 %v1113_v28, %v431_v61  ;;  %v1089_v0 = vpop.f32.mrf.mxu0  ;;  %v1102_v8 = vpop.f32.mrf.mxu1  ;;  %v1133_v7 = vadd.f32 %v1126_v24, %v460_v55 }
 0x305   :  { %v6904_v19 = vmul.f32 -1.442695, %v1132_v56 }
 0x306   :  { %v9472_v39 = vpop.eup %9471 }
 0x307   :  { %v9474_v12 = vpop.eup %9473  ;;  %v1137_v22 = vadd.f32 1.0, %v9472_v39  ;;  %9475 = vpow2.f32 %v6904_v19 }
 0x308   :  { %v1156_v43 = vadd.f32 1.0, %v9474_v12 }
 0x309   :  { %9477 = vrcp.f32 %v1137_v22  ;;  %v1149_v61 = vand.u32 2147483648, %v1137_v22  ;;  %v1147_v0 = vand.u32 2147483647, %v1137_v22  ;;  %vm1143_vm6 = vweird.f32 %v1137_v22 }
 0x30a   :  { %9479 = vrcp.f32 %v1156_v43  ;;  %v1115_v33 = vpop.f32.mrf.mxu2  ;;  %v1128_v29 = vpop.f32.mrf.mxu3  ;;  %v1168_v28 = vand.u32 2147483648, %v1156_v43  ;;  %v1166_v19 = vand.u32 2147483647, %v1156_v43  ;;  %vm1162_vm7 = vweird.f32 %v1156_v43 }
 0x30b   :  { %v1150_v33 = vor.u32 1.1754944e-38, %v1149_v61  ;;  %vm1148_vm10 = vcmp.eq.f32.partialorder %v1147_v0, 8.507059e+37 }
 0x30c   :  { %vm1167_vm11 = vcmp.eq.f32.partialorder %v1166_v19, 8.507059e+37 }
 0x30d   :  { %v9476_v42 = vpop.eup %9475 }
 0x30e   :  { %v1175_v59 = vadd.f32 1.0, %v9476_v42  ;;  %v1169_v42 = vor.u32 1.1754944e-38, %v1168_v28 }
 0x30f   :  { %v9478_v63 = vpop.eup %9477 }
 0x310   :  { %v9480_v44 = vpop.eup %9479  ;;  %v1139_v27 = vmul.f32 %v9478_v63, %v1137_v22  ;;  %9481 = vrcp.f32 %v1175_v59  ;;  %vm1144_vm4 = vweird.f32 %v9478_v63  ;;  %v1187_v61 = vand.u32 2147483648, %v1175_v59 }
 0x311   :  { %v1158_v53 = vmul.f32 %v9480_v44, %v1156_v43  ;;  %9483 = vtanh.f32 %v1133_v7  ;;  %vm1163_vm5 = vweird.f32 %v9480_v44  ;;  %vm1145_vm8 = vmor %vm1143_vm6, %vm1144_vm4  ;;  %vm1181_vm13 = vweird.f32 %v1175_v59 }
 0x312   :  { %v1140_v31 = vsub.f32 1.0, %v1139_v27  ;;  %vm1164_vm9 = vmor %vm1162_vm7, %vm1163_vm5  ;;  %v1188_v0 = vor.u32 1.1754944e-38, %v1187_v61 }
 0x313   :  { %v1159_v10 = vsub.f32 1.0, %v1158_v53 }
 0x314   :  { %v1141_v56 = vmul.f32 %v9478_v63, %v1140_v31 }
 0x315   :  { %v1160_v8 = vmul.f32 %v9480_v44, %v1159_v10 }
 0x316   :  { %v9482_v39 = vpop.eup %9481  ;;  %v1142_v12 = vadd.f32 %v9478_v63, %v1141_v56 }
 0x317   :  { %v1177_v24 = vmul.f32 %v9482_v39, %v1175_v59  ;;  %v1161_v29 = vadd.f32 %v9480_v44, %v1160_v8  ;;  %v9484_v55 = vpop.eup %9483  ;;  %vm1182_vm12 = vweird.f32 %v9482_v39 }
 0x318   :  { %v1146_v48 = vsel %vm1145_vm8, %v9478_v63, %v1142_v12  ;;  %v1185_v63 = vand.u32 2147483647, %v1175_v59  ;;  %vm1183_vm14 = vmor %vm1181_vm13, %vm1182_vm12 }
 0x319   :  { %v1178_v7 = vsub.f32 1.0, %v1177_v24  ;;  %v1151_v27 = vsel %vm1148_vm10, %v1150_v33, %v1146_v48  ;;  %v1165_v53 = vsel %vm1164_vm9, %v9480_v44, %v1161_v29  ;;  %v11911_v24 = vld [vmem:[#allocation27_spill] sm:$0xff] }
 0x31a   :  { %v1170_v31 = vsel %vm1167_vm11, %v1169_v42, %v1165_v53  ;;  %v1193_v10 = vmul.f32 %v9484_v55, %v1151_v27  ;;  %vm1186_vm15 = vcmp.eq.f32.partialorder %v1185_v63, 8.507059e+37 }
 0x31b   :  { %v1179_v38 = vmul.f32 %v9482_v39, %v1178_v7  ;;  %v1192_v56 = vmul.f32 %v1170_v31, %v10262_v60  ;;  %v11912_v7 = vld [vmem:[#allocation28_spill] sm:$0xff] }
 0x31d   :  { %v10310_v22 = vadd.f32 %v1193_v10, %v1192_v56  ;;  %v1180_v43 = vadd.f32 %v9482_v39, %v1179_v38 }
 0x31f   :  { %9485 = vtanh.f32 %v10310_v22  ;;  %v1184_v28 = vsel %vm1183_vm14, %v9482_v39, %v1180_v43  ;;  %v11910_v39 = vld [vmem:[#allocation26_spill] sm:$0xff] }
 0x320   :  { %v1189_v8 = vsel %vm1186_vm15, %v1188_v0, %v1184_v28 }
 0x325   :  { %v9486_v44 = vpop.eup %9485 }
 0x326   :  { %v10313_v19 = vmul.f32 %v9486_v44, %v1189_v8 }
 0x328   :  { %11909 = vst [vmem:[#allocation16_spill] sm:$0xff] %v10313_v19  ;;  %v1203_v60 = vpack.c.bf16 %v10313_v19, %v10313_v19 }
 0x32a   :  { %1212 = vmatmul.bf16.vlgmr.msrb.gmra.mxu0 %v1203_v60  ;;  %1225 = vmatmul.bf16.vlgmr.msrb.gmra.mxu1 %v1203_v60 }
 0x32b   :  { %1238 = vmatmul.bf16.vlgmr.msrb.gmra.mxu2 %v1203_v60  ;;  %1251 = vmatmul.bf16.vlgmr.msrb.gmra.mxu3 %v1203_v60 }
 0x32c   :  { %1456 = vmatpush.bf16.msrb.mxu0 %v9911_v36  ;;  %1469 = vmatpush.bf16.msrb.mxu1 %v9913_v40 }
 0x32d   :  { %1482 = vmatpush.bf16.msrb.mxu2 %v9915_v41  ;;  %1495 = vmatpush.bf16.msrb.mxu3 %v9918_v45 }
 0x330   :  { %1457 = vmatpush.bf16.msrb.mxu0 %v9922_v49  ;;  %1470 = vmatpush.bf16.msrb.mxu1 %v9924_v50 }
 0x331   :  { %1483 = vmatpush.bf16.msrb.mxu2 %v9927_v54  ;;  %1496 = vmatpush.bf16.msrb.mxu3 %v9929_v58 }
 0x334   :  { %1458 = vmatpush.bf16.msrb.mxu0 %v9932_v62  ;;  %1471 = vmatpush.bf16.msrb.mxu1 %v9936_v2 }
 0x335   :  { %1484 = vmatpush.bf16.msrb.mxu2 %v9938_v3  ;;  %1497 = vmatpush.bf16.msrb.mxu3 %v9941_v6 }
 0x338   :  { %1459 = vmatpush.bf16.msrb.mxu0 %v9944_v9  ;;  %1472 = vmatpush.bf16.msrb.mxu1 %v9951_v13 }
 0x339   :  { %1485 = vmatpush.bf16.msrb.mxu2 %v9954_v16  ;;  %1498 = vmatpush.bf16.msrb.mxu3 %v9957_v17 }
 0x33c   :  { %1460 = vmatpush.bf16.msrb.mxu0 %v9960_v21  ;;  %1473 = vmatpush.bf16.msrb.mxu1 %v9963_v25 }
 0x33d   :  { %1486 = vmatpush.bf16.msrb.mxu2 %v9965_v26  ;;  %1499 = vmatpush.bf16.msrb.mxu3 %v9969_v30 }
 0x340   :  { %1461 = vmatpush.bf16.msrb.mxu0 %v9972_v34  ;;  %1474 = vmatpush.bf16.msrb.mxu1 %v9974_v35 }
 0x341   :  { %1487 = vmatpush.bf16.msrb.mxu2 %v9977_v46  ;;  %1500 = vmatpush.bf16.msrb.mxu3 %v9981_v51 }
 0x344   :  { %1462 = vmatpush.bf16.msrb.mxu0 %v9983_v52  ;;  %1475 = vmatpush.bf16.msrb.mxu1 %v9986_v57 }
 0x345   :  { %1488 = vmatpush.bf16.msrb.mxu2 %v9989_v1  ;;  %1501 = vmatpush.bf16.msrb.mxu3 %v9993_v4 }
 0x348   :  { %1463 = vmatpush.bf16.msrb.mxu0 %v9995_v5  ;;  %1476 = vmatpush.bf16.msrb.mxu1 %v10001_v11 }
 0x349   :  { %1489 = vmatpush.bf16.msrb.mxu2 %v10004_v15  ;;  %1502 = vmatpush.bf16.msrb.mxu3 %v10008_v18 }
 0x3a7   :  { %v1213_v38 = vpop.f32.mrf.mxu0  ;;  %v1226_v59 = vpop.f32.mrf.mxu1 }
 0x3a8   :  { %v1256_v12 = vadd.f32 %v1213_v38, %v11910_v39  ;;  %v1257_v33 = vadd.f32 %v1226_v59, %v11911_v24  ;;  %v11913_v38 = vld [vmem:[#allocation30_spill] sm:$0xff] }
 0x3aa   :  { %v6905_v29 = vmul.f32 -1.442695, %v1256_v12  ;;  %v6906_v42 = vmul.f32 -1.442695, %v1257_v33 }
 0x3ac   :  { %9487 = vpow2.f32 %v6905_v29 }
 0x3ad   :  { %9489 = vpow2.f32 %v6906_v42 }
 0x3ae   :  { %v1239_v48 = vpop.f32.mrf.mxu2  ;;  %v1252_v55 = vpop.f32.mrf.mxu3 }
 0x3af   :  { %v1258_v27 = vadd.f32 %v1239_v48, %v11912_v7  ;;  %v1215_v53 = vpop.f32.mrf.mxu0  ;;  %v1228_v31 = vpop.f32.mrf.mxu1  ;;  %v1259_v59 = vadd.f32 %v1252_v55, %v11913_v38 }
 0x3b1   :  { %v6907_v10 = vmul.f32 -1.442695, %v1258_v27 }
 0x3b2   :  { %v9488_v56 = vpop.eup %9487 }
 0x3b3   :  { %v9490_v43 = vpop.eup %9489  ;;  %v1263_v61 = vadd.f32 1.0, %v9488_v56  ;;  %9491 = vpow2.f32 %v6907_v10 }
 0x3b4   :  { %v1282_v63 = vadd.f32 1.0, %v9490_v43 }
 0x3b5   :  { %9493 = vrcp.f32 %v1263_v61  ;;  %v1275_v42 = vand.u32 2147483648, %v1263_v61  ;;  %v1273_v27 = vand.u32 2147483647, %v1263_v61  ;;  %vm1269_vm2 = vweird.f32 %v1263_v61 }
 0x3b6   :  { %9495 = vrcp.f32 %v1282_v63  ;;  %v1241_v28 = vpop.f32.mrf.mxu2  ;;  %v1254_v0 = vpop.f32.mrf.mxu3  ;;  %v1294_v48 = vand.u32 2147483648, %v1282_v63  ;;  %v1292_v31 = vand.u32 2147483647, %v1282_v63  ;;  %vm1288_vm3 = vweird.f32 %v1282_v63 }
 0x3b7   :  { %v1276_v43 = vor.u32 1.1754944e-38, %v1275_v42  ;;  %vm1274_vm6 = vcmp.eq.f32.partialorder %v1273_v27, 8.507059e+37 }
 0x3b8   :  { %v1295_v0 = vor.u32 1.1754944e-38, %v1294_v48  ;;  %vm1293_vm7 = vcmp.eq.f32.partialorder %v1292_v31, 8.507059e+37 }
 0x3b9   :  { %v9492_v44 = vpop.eup %9491 }
 0x3ba   :  { %v1301_v8 = vadd.f32 1.0, %v9492_v44 }
 0x3bb   :  { %v9494_v60 = vpop.eup %9493 }
 0x3bc   :  { %v9496_v39 = vpop.eup %9495  ;;  %v1265_v12 = vmul.f32 %v9494_v60, %v1263_v61  ;;  %9497 = vrcp.f32 %v1301_v8  ;;  %vm1270_vm0 = vweird.f32 %v9494_v60  ;;  %v1313_v42 = vand.u32 2147483648, %v1301_v8 }
 0x3bd   :  { %v1284_v24 = vmul.f32 %v9496_v39, %v1282_v63  ;;  %9499 = vtanh.f32 %v1259_v59  ;;  %vm1289_vm1 = vweird.f32 %v9496_v39  ;;  %vm1271_vm4 = vmor %vm1269_vm2, %vm1270_vm0  ;;  %vm1307_vm9 = vweird.f32 %v1301_v8 }
 0x3be   :  { %v1266_v33 = vsub.f32 1.0, %v1265_v12  ;;  %vm1290_vm5 = vmor %vm1288_vm3, %vm1289_vm1  ;;  %v1314_v27 = vor.u32 1.1754944e-38, %v1313_v42 }
 0x3bf   :  { %v1285_v29 = vsub.f32 1.0, %v1284_v24 }
 0x3c0   :  { %v1267_v7 = vmul.f32 %v9494_v60, %v1266_v33 }
 0x3c1   :  { %v1286_v53 = vmul.f32 %v9496_v39, %v1285_v29 }
 0x3c2   :  { %v9498_v10 = vpop.eup %9497  ;;  %v1268_v56 = vadd.f32 %v9494_v60, %v1267_v7 }
 0x3c3   :  { %v1303_v55 = vmul.f32 %v9498_v10, %v1301_v8  ;;  %v1287_v28 = vadd.f32 %v9496_v39, %v1286_v53  ;;  %v9500_v38 = vpop.eup %9499  ;;  %vm1308_vm8 = vweird.f32 %v9498_v10 }
 0x3c4   :  { %v1272_v44 = vsel %vm1271_vm4, %v9494_v60, %v1268_v56  ;;  %v1311_v60 = vand.u32 2147483647, %v1301_v8  ;;  %vm1309_vm10 = vmor %vm1307_vm9, %vm1308_vm8 }
 0x3c5   :  { %v1304_v59 = vsub.f32 1.0, %v1303_v55  ;;  %v1277_v12 = vsel %vm1274_vm6, %v1276_v43, %v1272_v44  ;;  %v1291_v24 = vsel %vm1290_vm5, %v9496_v39, %v1287_v28 }
 0x3c6   :  { %v1296_v33 = vsel %vm1293_vm7, %v1295_v0, %v1291_v24  ;;  %v1319_v29 = vmul.f32 %v9500_v38, %v1277_v12  ;;  %vm1312_vm11 = vcmp.eq.f32.partialorder %v1311_v60, 8.507059e+37 }
 0x3c7   :  { %v1305_v19 = vmul.f32 %v9498_v10, %v1304_v59  ;;  %v1318_v7 = vmul.f32 %v1296_v33, %v10310_v22 }
 0x3c9   :  { %v10354_v61 = vadd.f32 %v1319_v29, %v1318_v7  ;;  %v1306_v63 = vadd.f32 %v9498_v10, %v1305_v19 }
 0x3cb   :  { %9501 = vtanh.f32 %v10354_v61  ;;  %v1310_v48 = vsel %vm1309_vm10, %v9498_v10, %v1306_v63 }
 0x3cc   :  { %v1315_v53 = vsel %vm1312_vm11, %v1314_v27, %v1310_v48 }
 0x3d1   :  { %v9502_v39 = vpop.eup %9501 }
 0x3d2   :  { %v10357_v31 = vmul.f32 %v9502_v39, %v1315_v53 }
 0x3d4   :  { %v1329_v22 = vpack.c.bf16 %v10357_v31, %v10357_v31 }
 0x3d6   :  { %1338 = vmatmul.bf16.vlgmr.msra.gmra.mxu0 %v1329_v22  ;;  %1351 = vmatmul.bf16.vlgmr.msra.gmra.mxu1 %v1329_v22 }
 0x3d7   :  { %1364 = vmatmul.bf16.vlgmr.msra.gmra.mxu2 %v1329_v22  ;;  %1377 = vmatmul.bf16.vlgmr.msra.gmra.mxu3 %v1329_v22 }
 0x3d8   :  { %1582 = vmatpush.bf16.msra.mxu0 %v9911_v36  ;;  %1595 = vmatpush.bf16.msra.mxu1 %v9913_v40  ;;  %v11914_v36 = vld [vmem:[#allocation29_spill] sm:$0xff] }
 0x3d9   :  { %1608 = vmatpush.bf16.msra.mxu2 %v9915_v41  ;;  %1621 = vmatpush.bf16.msra.mxu3 %v9918_v45  ;;  %v378_v40 = vadd.f32 %v11914_v36, %v10093_v32  ;;  %v11915_v41 = vld [vmem:[#allocation31_spill] sm:$0xff] }
 0x3da   :  { %v407_v45 = vadd.f32 %v11915_v41, %v10097_v37 }
 0x3dc   :  { %1583 = vmatpush.bf16.msra.mxu0 %v9922_v49  ;;  %1596 = vmatpush.bf16.msra.mxu1 %v9924_v50 }
 0x3dd   :  { %1609 = vmatpush.bf16.msra.mxu2 %v9927_v54  ;;  %1622 = vmatpush.bf16.msra.mxu3 %v9929_v58 }
 0x3e0   :  { %1584 = vmatpush.bf16.msra.mxu0 %v9932_v62  ;;  %1597 = vmatpush.bf16.msra.mxu1 %v9936_v2 }
 0x3e1   :  { %1610 = vmatpush.bf16.msra.mxu2 %v9938_v3  ;;  %1623 = vmatpush.bf16.msra.mxu3 %v9941_v6  ;;  %v11916_v3 = vld [vmem:[#allocation32_spill] sm:$0xff] }
 0x3e2   :  { %v436_v6 = vadd.f32 %v11916_v3, %v10107_v47  ;;  %v8945_v3 = vld [vmem:[%s11857_s5 + $0x74] sm:$0xf0] }
 0x3e4   :  { %1585 = vmatpush.bf16.msra.mxu0 %v9944_v9  ;;  %1598 = vmatpush.bf16.msra.mxu1 %v9951_v13 }
 0x3e5   :  { %1611 = vmatpush.bf16.msra.mxu2 %v9954_v16  ;;  %1624 = vmatpush.bf16.msra.mxu3 %v9957_v17 }
 0x3e8   :  { %1586 = vmatpush.bf16.msra.mxu0 %v9960_v21  ;;  %1599 = vmatpush.bf16.msra.mxu1 %v9963_v25 }
 0x3e9   :  { %1612 = vmatpush.bf16.msra.mxu2 %v9965_v26  ;;  %1625 = vmatpush.bf16.msra.mxu3 %v9969_v30 }
 0x3ec   :  { %1587 = vmatpush.bf16.msra.mxu0 %v9972_v34  ;;  %1600 = vmatpush.bf16.msra.mxu1 %v9974_v35 }
 0x3ed   :  { %1613 = vmatpush.bf16.msra.mxu2 %v9977_v46  ;;  %1626 = vmatpush.bf16.msra.mxu3 %v9981_v51 }
 0x3f0   :  { %1588 = vmatpush.bf16.msra.mxu0 %v9983_v52  ;;  %1601 = vmatpush.bf16.msra.mxu1 %v9986_v57  ;;  %v11917_v57 = vld [vmem:[#allocation33_spill] sm:$0xff] }
 0x3f1   :  { %1614 = vmatpush.bf16.msra.mxu2 %v9989_v1  ;;  %1627 = vmatpush.bf16.msra.mxu3 %v9993_v4  ;;  %v465_v1 = vadd.f32 %v11917_v57, %v11898_v20 }
 0x3f4   :  { %1589 = vmatpush.bf16.msra.mxu0 %v9995_v5  ;;  %1602 = vmatpush.bf16.msra.mxu1 %v10001_v11 }
 0x3f5   :  { %1615 = vmatpush.bf16.msra.mxu2 %v10004_v15  ;;  %1628 = vmatpush.bf16.msra.mxu3 %v10008_v18 }
 0x453   :  { %v1339_v49 = vpop.f32.mrf.mxu0  ;;  %v1352_v50 = vpop.f32.mrf.mxu1 }
 0x454   :  { %v1382_v54 = vadd.f32 %v1339_v49, %v378_v40  ;;  %v1383_v58 = vadd.f32 %v1352_v50, %v407_v45 }
 0x456   :  { %v6908_v62 = vmul.f32 -1.442695, %v1382_v54  ;;  %v6909_v2 = vmul.f32 -1.442695, %v1383_v58 }
 0x458   :  { %9503 = vpow2.f32 %v6908_v62 }
 0x459   :  { %9505 = vpow2.f32 %v6909_v2  ;;  %v6975_v2 = vld [vmem:[%s11857_s5 + $0x70] sm:$0xf] }
 0x45a   :  { %v1365_v9 = vpop.f32.mrf.mxu2  ;;  %v1378_v13 = vpop.f32.mrf.mxu3 }
 0x45b   :  { %v1384_v16 = vadd.f32 %v1365_v9, %v436_v6  ;;  %v1341_v17 = vpop.f32.mrf.mxu0  ;;  %v1354_v21 = vpop.f32.mrf.mxu1  ;;  %v1385_v11 = vadd.f32 %v1378_v13, %v465_v1  ;;  %v7039_v6 = vld [vmem:[%s11857_s5 + $0xf0] sm:$0xf]  ;;  %v6976_v9 = vor.u32 %v8945_v3, %v6975_v2  ;;  %v8961_v13 = vld [vmem:[%s11857_s5 + $0xf4] sm:$0xf0]  ;;  %v8991_v2 = vld [vmem:[%s11857_s5 + $0x1e4] sm:$0xf0] }
 0x45c   :  { %v8977_v17 = vld [vmem:[%s11857_s5 + $0x174] sm:$0xf0]  ;;  %v7040_v21 = vor.u32 %v8961_v13, %v7039_v6  ;;  %v6935_v13 = vld [vmem:[%s11857_s5 + $0x20] sm:$0xf] }
 0x45d   :  { %v6910_v25 = vmul.f32 -1.442695, %v1384_v16  ;;  %v7103_v16 = vld [vmem:[%s11857_s5 + $0x170] sm:$0xf] }
 0x45e   :  { %v9504_v26 = vpop.eup %9503 }
 0x45f   :  { %v9506_v30 = vpop.eup %9505  ;;  %v1389_v34 = vadd.f32 1.0, %v9504_v26  ;;  %9507 = vpow2.f32 %v6910_v25  ;;  %v7104_v25 = vor.u32 %v8977_v17, %v7103_v16  ;;  %v6967_v26 = vld [vmem:[%s11857_s5 + $0x60] sm:$0xf]  ;;  %v8935_v16 = vld [vmem:[%s11857_s5 + $0x24] sm:$0xf0] }
 0x460   :  { %v1408_v35 = vadd.f32 1.0, %v9506_v30  ;;  %v8943_v30 = vld [vmem:[%s11857_s5 + $0x64] sm:$0xf0]  ;;  %v6999_v17 = vld [vmem:[%s11857_s5 + $0xa0] sm:$0xf] }
 0x461   :  { %9509 = vrcp.f32 %v1389_v34  ;;  %v1401_v56 = vand.u32 2147483648, %v1389_v34  ;;  %v1399_v28 = vand.u32 2147483647, %v1389_v34  ;;  %vm1395_vm14 = vweird.f32 %v1389_v34 }
 0x462   :  { %9511 = vrcp.f32 %v1408_v35  ;;  %v1367_v46 = vpop.f32.mrf.mxu2  ;;  %v1380_v51 = vpop.f32.mrf.mxu3  ;;  %v1420_v55 = vand.u32 2147483648, %v1408_v35  ;;  %v1418_v44 = vand.u32 2147483647, %v1408_v35  ;;  %vm1414_vm15 = vweird.f32 %v1408_v35 }
 0x463   :  { %v1402_v24 = vor.u32 1.1754944e-38, %v1401_v56  ;;  %vm1400_vm2 = vcmp.eq.f32.partialorder %v1399_v28, 8.507059e+37  ;;  %v8959_v46 = vld [vmem:[%s11857_s5 + $0xe4] sm:$0xf0]  ;;  %v7095_v51 = vld [vmem:[%s11857_s5 + $0x160] sm:$0xf] }
 0x464   :  { %v1421_v29 = vor.u32 1.1754944e-38, %v1420_v55  ;;  %vm1419_vm3 = vcmp.eq.f32.partialorder %v1418_v44, 8.507059e+37  ;;  %v6951_v55 = vld [vmem:[%s11857_s5 + $0x40] sm:$0xf]  ;;  %v8955_v44 = vld [vmem:[%s11857_s5 + $0xc4] sm:$0xf0] }
 0x465   :  { %v9508_v52 = vpop.eup %9507  ;;  %v7015_v28 = vld [vmem:[%s11857_s5 + $0xc0] sm:$0xf] }
 0x466   :  { %v1427_v4 = vadd.f32 1.0, %v9508_v52  ;;  %v8975_v52 = vld [vmem:[%s11857_s5 + $0x164] sm:$0xf0] }
 0x467   :  { %v9510_v5 = vpop.eup %9509  ;;  %v7096_v1 = vor.u32 %v8975_v52, %v7095_v51  ;;  %v8989_v51 = vld [vmem:[%s11857_s5 + $0x1d4] sm:$0xf0]  ;;  %v6927_v52 = vld [vmem:[%s11857_s5 + $0x10] sm:$0xf] }
 0x468   :  { %v9512_v15 = vpop.eup %9511  ;;  %v1391_v18 = vmul.f32 %v9510_v5, %v1389_v34  ;;  %9513 = vrcp.f32 %v1427_v4  ;;  %vm1396_vm12 = vweird.f32 %v9510_v5  ;;  %v1439_v41 = vand.u32 2147483648, %v1427_v4  ;;  %v7031_v34 = vld [vmem:[%s11857_s5 + $0xe0] sm:$0xf] }
 0x469   :  { %v1410_v19 = vmul.f32 %v9512_v15, %v1408_v35  ;;  %9515 = vtanh.f32 %v1385_v11  ;;  %vm1415_vm13 = vweird.f32 %v9512_v15  ;;  %vm1397_vm0 = vmor %vm1395_vm14, %vm1396_vm12  ;;  %vm1433_vm5 = vweird.f32 %v1427_v4  ;;  %v7023_v11 = vld [vmem:[%s11857_s5 + $0xd0] sm:$0xf] }
 0x46a   :  { %v1392_v8 = vsub.f32 1.0, %v1391_v18  ;;  %vm1416_vm1 = vmor %vm1414_vm15, %vm1415_vm13  ;;  %v1437_v45 = vand.u32 2147483647, %v1427_v4  ;;  %v1440_v50 = vor.u32 1.1754944e-38, %v1439_v41  ;;  %v6968_v35 = vor.u32 %v8943_v30, %v6967_v26  ;;  %v8957_v18 = vld [vmem:[%s11857_s5 + $0xd4] sm:$0xf0] }
 0x46b   :  { %v1411_v10 = vsub.f32 1.0, %v1410_v19  ;;  %v7032_v57 = vor.u32 %v8959_v46, %v7031_v34  ;;  %v7087_v19 = vld [vmem:[%s11857_s5 + $0x150] sm:$0xf]  ;;  %v7063_v30 = vld [vmem:[%s11857_s5 + $0x120] sm:$0xf] }
 0x46c   :  { %v1393_v43 = vmul.f32 %v9510_v5, %v1392_v8  ;;  %vm1438_vm7 = vcmp.eq.f32.partialorder %v1437_v45, 8.507059e+37  ;;  %v8973_v8 = vld [vmem:[%s11857_s5 + $0x154] sm:$0xf0]  ;;  %v11918_v41 = vld [vmem:[#allocation34_spill] sm:$0xff]  ;;  %v8967_v34 = vld [vmem:[%s11857_s5 + $0x124] sm:$0xf0] }
 0x46d   :  { %v1412_v0 = vmul.f32 %v9512_v15, %v1411_v10  ;;  %v7024_v10 = vor.u32 %v8957_v18, %v7023_v11  ;;  %v7088_v56 = vor.u32 %v8973_v8, %v7087_v19  ;;  %v7064_v46 = vor.u32 %v8967_v34, %v7063_v30  ;;  %v8949_v18 = vld [vmem:[%s11857_s5 + $0x94] sm:$0xf0]  ;;  %v7055_v19 = vld [vmem:[%s11857_s5 + $0x110] sm:$0xf]  ;;  %v11920_v8 = vld [vmem:[#allocation36_spill] sm:$0xff] }
 0x46e   :  { %v9514_v38 = vpop.eup %9513  ;;  %v1394_v59 = vadd.f32 %v9510_v5, %v1393_v43  ;;  %v8939_v43 = vld [vmem:[%s11857_s5 + $0x44] sm:$0xf0] }
 0x46f   :  { %v1429_v12 = vmul.f32 %v9514_v38, %v1427_v4  ;;  %v1413_v33 = vadd.f32 %v9512_v15, %v1412_v0  ;;  %v9516_v63 = vpop.eup %9515  ;;  %vm1434_vm4 = vweird.f32 %v9514_v38  ;;  %v6959_v4 = vld [vmem:[%s11857_s5 + $0x50] sm:$0xf]  ;;  %v6952_v0 = vor.u32 %v8939_v43, %v6951_v55 }
 0x470   :  { %v1398_v7 = vsel %vm1397_vm0, %v9510_v5, %v1394_v59  ;;  %vm1435_vm6 = vmor %vm1433_vm5, %vm1434_vm4  ;;  %v8941_v5 = vld [vmem:[%s11857_s5 + $0x54] sm:$0xf0]  ;;  %v8971_v59 = vld [vmem:[%s11857_s5 + $0x144] sm:$0xf0] }
 0x471   :  { %v1430_v42 = vsub.f32 1.0, %v1429_v12  ;;  %v1403_v60 = vsel %vm1400_vm2, %v1402_v24, %v1398_v7  ;;  %v1417_v48 = vsel %vm1416_vm1, %v9512_v15, %v1413_v33  ;;  %v6960_v15 = vor.u32 %v8941_v5, %v6959_v4  ;;  %v7167_v33 = vld [vmem:[%s11857_s5 + $0x1f0] sm:$0xf] }
 0x472   :  { %v1422_v27 = vsel %vm1419_vm3, %v1421_v29, %v1417_v48  ;;  %v1445_v39 = vmul.f32 %v9516_v63, %v1403_v60  ;;  %v7016_v12 = vor.u32 %v8955_v44, %v7015_v28  ;;  %v8993_v29 = vld [vmem:[%s11857_s5 + $0x1f4] sm:$0xf0]  ;;  %v6943_v63 = vld [vmem:[%s11857_s5 + $0x30] sm:$0xf]  ;;  %v8987_v44 = vld [vmem:[%s11857_s5 + $0x1c4] sm:$0xf0] }
 0x473   :  { %v1431_v53 = vmul.f32 %v9514_v38, %v1430_v42  ;;  %v1444_v22 = vmul.f32 %v1422_v27, %v10354_v61  ;;  %v7168_v7 = vor.u32 %v8993_v29, %v7167_v33  ;;  %v8937_v42 = vld [vmem:[%s11857_s5 + $0x34] sm:$0xf0]  ;;  %v7007_v60 = vld [vmem:[%s11857_s5 + $0xb0] sm:$0xf]  ;;  %v6983_v33 = vld [vmem:[%s11857_s5 + $0x80] sm:$0xf] }
 0x474   :  { %v8965_v28 = vld [vmem:[%s11857_s5 + $0x114] sm:$0xf0] }
 0x475   :  { %v10402_v36 = vadd.f32 %v1445_v39, %v1444_v22  ;;  %v1432_v40 = vadd.f32 %v9514_v38, %v1431_v53  ;;  %v6944_v39 = vor.u32 %v8937_v42, %v6943_v63  ;;  %v8953_v53 = vld [vmem:[%s11857_s5 + $0xb4] sm:$0xf0]  ;;  %v7071_v22 = vld [vmem:[%s11857_s5 + $0x130] sm:$0xf]  ;;  %v7047_v63 = vld [vmem:[%s11857_s5 + $0x100] sm:$0xf] }
 0x477   :  { %9517 = vtanh.f32 %v10402_v36  ;;  %v1436_v49 = vsel %vm1435_vm6, %v9514_v38, %v1432_v40  ;;  %v7079_v38 = vld [vmem:[%s11857_s5 + $0x140] sm:$0xf]  ;;  %v8969_v40 = vld [vmem:[%s11857_s5 + $0x134] sm:$0xf0] }
 0x478   :  { %v1441_v58 = vsel %vm1438_vm7, %v1440_v50, %v1436_v49  ;;  %v7080_v24 = vor.u32 %v8971_v59, %v7079_v38  ;;  %v11919_v49 = vld [vmem:[#allocation35_spill] sm:$0xff]  ;;  %v7056_v38 = vor.u32 %v8965_v28, %v7055_v19 }
 0x47d   :  { %v9518_v54 = vpop.eup %9517 }
 0x47e   :  { %v10405_v62 = vmul.f32 %v9518_v54, %v1441_v58  ;;  %v7008_v54 = vor.u32 %v8953_v53, %v7007_v60  ;;  %v7072_v58 = vor.u32 %v8969_v40, %v7071_v22 }
 0x480   :  { %v1455_v61 = vpack.c.bf16 %v10405_v62, %v10405_v62 }
 0x482   :  { %1464 = vmatmul.bf16.vlgmr.msrb.gmra.mxu0 %v1455_v61  ;;  %1477 = vmatmul.bf16.vlgmr.msrb.gmra.mxu1 %v1455_v61 }
 0x483   :  { %1490 = vmatmul.bf16.vlgmr.msrb.gmra.mxu2 %v1455_v61  ;;  %1503 = vmatmul.bf16.vlgmr.msrb.gmra.mxu3 %v1455_v61  ;;  %v7159_v61 = vld [vmem:[%s11857_s5 + $0x1e0] sm:$0xf] }
 0x484   :  { %2493 = vmatpush.bf16.msrb.mxu0 %v6976_v9  ;;  %2506 = vmatpush.bf16.msrb.mxu1 %v7040_v21  ;;  %v7160_v3 = vor.u32 %v8991_v2, %v7159_v61  ;;  %v8951_v21 = vld [vmem:[%s11857_s5 + $0xa4] sm:$0xf0] }
 0x485   :  { %2519 = vmatpush.bf16.msrb.mxu2 %v7104_v25  ;;  %2532 = vmatpush.bf16.msrb.mxu3 %v7168_v7  ;;  %v6936_v25 = vor.u32 %v8935_v16, %v6935_v13  ;;  %v7000_v26 = vor.u32 %v8951_v21, %v6999_v17  ;;  %v8947_v7 = vld [vmem:[%s11857_s5 + $0x84] sm:$0xf0] }
 0x486   :  { %v8983_v17 = vld [vmem:[%s11857_s5 + $0x1a4] sm:$0xf0] }
 0x488   :  { %2494 = vmatpush.bf16.msrb.mxu0 %v6968_v35  ;;  %2507 = vmatpush.bf16.msrb.mxu1 %v7032_v57  ;;  %v7151_v35 = vld [vmem:[%s11857_s5 + $0x1d0] sm:$0xf]  ;;  %v8933_v57 = vld [vmem:[%s11857_s5 + $0x14] sm:$0xf0] }
 0x489   :  { %2520 = vmatpush.bf16.msrb.mxu2 %v7096_v1  ;;  %2533 = vmatpush.bf16.msrb.mxu3 %v7160_v3  ;;  %v7152_v5 = vor.u32 %v8989_v51, %v7151_v35  ;;  %v6928_v11 = vor.u32 %v8933_v57, %v6927_v52  ;;  %v11921_v3 = vld [vmem:[#allocation38_spill] sm:$0xff] }
 0x48a   :  { %v7119_v52 = vld [vmem:[%s11857_s5 + $0x190] sm:$0xf] }
 0x48c   :  { %2495 = vmatpush.bf16.msrb.mxu0 %v6960_v15  ;;  %2508 = vmatpush.bf16.msrb.mxu1 %v7024_v10  ;;  %v6991_v15 = vld [vmem:[%s11857_s5 + $0x90] sm:$0xf] }
 0x48d   :  { %2521 = vmatpush.bf16.msrb.mxu2 %v7088_v56  ;;  %v6992_v43 = vor.u32 %v8949_v18, %v6991_v15  ;;  %2534 = vmatpush.bf16.msrb.mxu3 %v7152_v5 }
 0x490   :  { %2496 = vmatpush.bf16.msrb.mxu0 %v6952_v0  ;;  %2509 = vmatpush.bf16.msrb.mxu1 %v7016_v12  ;;  %v7143_v0 = vld [vmem:[%s11857_s5 + $0x1c0] sm:$0xf] }
 0x491   :  { %2522 = vmatpush.bf16.msrb.mxu2 %v7080_v24  ;;  %v7144_v59 = vor.u32 %v8987_v44, %v7143_v0  ;;  %v6919_v12 = vld [vmem:[%s11857_s5] sm:$0xf]  ;;  %v8931_v24 = vld [vmem:[%s11857_s5 + $0x4] sm:$0xf0] }
 0x492   :  { %v6920_v60 = vor.u32 %v8931_v24, %v6919_v12 }
 0x493   :  { %2535 = vmatpush.bf16.msrb.mxu3 %v7144_v59 }
 0x494   :  { %2497 = vmatpush.bf16.msrb.mxu0 %v6944_v39  ;;  %2510 = vmatpush.bf16.msrb.mxu1 %v7008_v54 }
 0x495   :  { %2523 = vmatpush.bf16.msrb.mxu2 %v7072_v58 }
 0x498   :  { %2498 = vmatpush.bf16.msrb.mxu0 %v6936_v25  ;;  %2511 = vmatpush.bf16.msrb.mxu1 %v7000_v26 }
 0x499   :  { %2524 = vmatpush.bf16.msrb.mxu2 %v7064_v46 }
 0x49c   :  { %2499 = vmatpush.bf16.msrb.mxu0 %v6928_v11  ;;  %2512 = vmatpush.bf16.msrb.mxu1 %v6992_v43 }
 0x49d   :  { %2525 = vmatpush.bf16.msrb.mxu2 %v7056_v38 }
 0x4a0   :  { %2500 = vmatpush.bf16.msrb.mxu0 %v6920_v60 }
 0x4ff   :  { %v1465_v48 = vpop.f32.mrf.mxu0  ;;  %v1478_v27 = vpop.f32.mrf.mxu1 }
 0x500   :  { %v1508_v45 = vadd.f32 %v1465_v48, %v11918_v41  ;;  %v1509_v50 = vadd.f32 %v1478_v27, %v11919_v49  ;;  %v6984_v48 = vor.u32 %v8947_v7, %v6983_v33  ;;  %v8963_v27 = vld [vmem:[%s11857_s5 + $0x104] sm:$0xf0]  ;;  %v7135_v49 = vld [vmem:[%s11857_s5 + $0x1b0] sm:$0xf] }
 0x501   :  { %v7048_v22 = vor.u32 %v8963_v27, %v7047_v63 }
 0x502   :  { %v6911_v6 = vmul.f32 -1.442695, %v1508_v45  ;;  %v6912_v9 = vmul.f32 -1.442695, %v1509_v50  ;;  %2513 = vmatpush.bf16.msrb.mxu1 %v6984_v48  ;;  %v8985_v50 = vld [vmem:[%s11857_s5 + $0x1b4] sm:$0xf0] }
 0x503   :  { %2526 = vmatpush.bf16.msrb.mxu2 %v7048_v22  ;;  %v7136_v58 = vor.u32 %v8985_v50, %v7135_v49  ;;  %v9009_v22 = vld [vmem:[%s11857_s5 + $0x274] sm:$0xf0]  ;;  %v7359_v49 = vld [vmem:[%s11857_s5 + $0x370] sm:$0xf] }
 0x504   :  { %9519 = vpow2.f32 %v6911_v6  ;;  %v9041_v50 = vld [vmem:[%s11857_s5 + $0x374] sm:$0xf0] }
 0x505   :  { %9521 = vpow2.f32 %v6912_v9  ;;  %2536 = vmatpush.bf16.msrb.mxu3 %v7136_v58  ;;  %v7127_v9 = vld [vmem:[%s11857_s5 + $0x1a0] sm:$0xf] }
 0x506   :  { %v1491_v1 = vpop.f32.mrf.mxu2  ;;  %v1504_v4 = vpop.f32.mrf.mxu3  ;;  %v7128_v26 = vor.u32 %v8983_v17, %v7127_v9  ;;  %v7287_v9 = vld [vmem:[%s11857_s5 + $0x2e0] sm:$0xf]  ;;  %v9039_v17 = vld [vmem:[%s11857_s5 + $0x364] sm:$0xf0] }
 0x507   :  { %v1510_v10 = vadd.f32 %v1491_v1, %v11920_v8  ;;  %v1467_v56 = vpop.f32.mrf.mxu0  ;;  %v1480_v55 = vpop.f32.mrf.mxu1  ;;  %v1511_v6 = vadd.f32 %v1504_v4, %v11921_v3  ;;  %v8981_v4 = vld [vmem:[%s11857_s5 + $0x194] sm:$0xf0]  ;;  %v7360_v3 = vor.u32 %v9041_v50, %v7359_v49  ;;  %v7319_v49 = vld [vmem:[%s11857_s5 + $0x320] sm:$0xf]  ;;  %v9031_v50 = vld [vmem:[%s11857_s5 + $0x324] sm:$0xf0] }
 0x508   :  { %v7120_v15 = vor.u32 %v8981_v4, %v7119_v52  ;;  %v8979_v56 = vld [vmem:[%s11857_s5 + $0x184] sm:$0xf0]  ;;  %v9037_v52 = vld [vmem:[%s11857_s5 + $0x354] sm:$0xf0]  ;;  %v7207_v4 = vld [vmem:[%s11857_s5 + $0x240] sm:$0xf] }
 0x509   :  { %v6913_v29 = vmul.f32 -1.442695, %v1510_v10  ;;  %2537 = vmatpush.bf16.msrb.mxu3 %v7128_v26  ;;  %v7111_v10 = vld [vmem:[%s11857_s5 + $0x180] sm:$0xf]  ;;  %v7215_v26 = vld [vmem:[%s11857_s5 + $0x250] sm:$0xf] }
 0x50a   :  { %v9520_v42 = vpop.eup %9519  ;;  %v7112_v28 = vor.u32 %v8979_v56, %v7111_v10  ;;  %v819_v10 = vmax.f32 %v10173_v23, 0.0  ;;  %v945_v56 = vmax.f32 %v10221_v14, 0.0  ;;  %v9001_v23 = vld [vmem:[%s11857_s5 + $0x234] sm:$0xf0]  ;;  %v7263_v14 = vld [vmem:[%s11857_s5 + $0x2b0] sm:$0xf] }
 0x50b   :  { %v9522_v39 = vpop.eup %9521  ;;  %v1515_v53 = vadd.f32 1.0, %v9520_v42  ;;  %9523 = vpow2.f32 %v6913_v29 }
 0x50c   :  { %v1534_v40 = vadd.f32 1.0, %v9522_v39  ;;  %v7231_v39 = vld [vmem:[%s11857_s5 + $0x270] sm:$0xf] }
 0x50d   :  { %9525 = vrcp.f32 %v1515_v53  ;;  %v1527_v34 = vand.u32 2147483648, %v1515_v53  ;;  %v1525_v51 = vand.u32 2147483647, %v1515_v53  ;;  %vm1521_vm10 = vweird.f32 %v1515_v53  ;;  %2538 = vmatpush.bf16.msrb.mxu3 %v7120_v15  ;;  %v7271_v15 = vld [vmem:[%s11857_s5 + $0x2c0] sm:$0xf] }
 0x50e   :  { %9527 = vrcp.f32 %v1534_v40  ;;  %v1493_v41 = vpop.f32.mrf.mxu2  ;;  %v1506_v45 = vpop.f32.mrf.mxu3  ;;  %v1546_v35 = vand.u32 2147483648, %v1534_v40  ;;  %v1544_v1 = vand.u32 2147483647, %v1534_v40  ;;  %vm1540_vm11 = vweird.f32 %v1534_v40 }
 0x50f   :  { %v1528_v19 = vor.u32 1.1754944e-38, %v1527_v34  ;;  %vm1526_vm14 = vcmp.eq.f32.partialorder %v1525_v51, 8.507059e+37  ;;  %v9025_v41 = vld [vmem:[%s11857_s5 + $0x2f4] sm:$0xf0]  ;;  %v7232_v58 = vor.u32 %v9009_v22, %v7231_v39  ;;  %v7343_v51 = vld [vmem:[%s11857_s5 + $0x350] sm:$0xf] }
 0x510   :  { %v1547_v55 = vor.u32 1.1754944e-38, %v1546_v35  ;;  %vm1545_vm15 = vcmp.eq.f32.partialorder %v1544_v1, 8.507059e+37  ;;  %v9005_v34 = vld [vmem:[%s11857_s5 + $0x254] sm:$0xf0]  ;;  %v7279_v35 = vld [vmem:[%s11857_s5 + $0x2d0] sm:$0xf] }
 0x511   :  { %v9524_v54 = vpop.eup %9523  ;;  %2539 = vmatpush.bf16.msrb.mxu3 %v7112_v28  ;;  %v11923_v28 = vld [vmem:[#allocation16_spill] sm:$0xff]  ;;  %v8999_v22 = vld [vmem:[%s11857_s5 + $0x224] sm:$0xf0] }
 0x512   :  { %v1553_v61 = vadd.f32 1.0, %v9524_v54 }
 0x513   :  { %v9526_v2 = vpop.eup %9525 }
 0x514   :  { %v9528_v13 = vpop.eup %9527  ;;  %v1517_v16 = vmul.f32 %v9526_v2, %v1515_v53  ;;  %9529 = vrcp.f32 %v1553_v61  ;;  %vm1522_vm8 = vweird.f32 %v9526_v2  ;;  %v1565_v42 = vand.u32 2147483648, %v1553_v61 }
 0x515   :  { %v1536_v21 = vmul.f32 %v9528_v13, %v1534_v40  ;;  %9531 = vtanh.f32 %v1511_v6  ;;  %vm1541_vm9 = vweird.f32 %v9528_v13  ;;  %vm1523_vm12 = vmor %vm1521_vm10, %vm1522_vm8  ;;  %vm1559_vm1 = vweird.f32 %v1553_v61  ;;  %v7295_v40 = vld [vmem:[%s11857_s5 + $0x2f0] sm:$0xf]  ;;  %v9007_v6 = vld [vmem:[%s11857_s5 + $0x264] sm:$0xf0] }
 0x516   :  { %v1518_v25 = vsub.f32 1.0, %v1517_v16  ;;  %vm1542_vm13 = vmor %vm1540_vm11, %vm1541_vm9  ;;  %v1563_v60 = vand.u32 2147483647, %v1553_v61  ;;  %v1566_v27 = vor.u32 1.1754944e-38, %v1565_v42  ;;  %v7351_v16 = vld [vmem:[%s11857_s5 + $0x360] sm:$0xf]  ;;  %v10709_v42 = vpack.c.bf16 %v945_v56, %v945_v56 }
 0x517   :  { %v1537_v30 = vsub.f32 1.0, %v1536_v21 }
 0x518   :  { %v1519_v46 = vmul.f32 %v9526_v2, %v1518_v25  ;;  %vm1564_vm3 = vcmp.eq.f32.partialorder %v1563_v60, 8.507059e+37 }
 0x519   :  { %v1538_v57 = vmul.f32 %v9528_v13, %v1537_v30  ;;  %v7352_v30 = vor.u32 %v9039_v17, %v7351_v16  ;;  %v9029_v16 = vld [vmem:[%s11857_s5 + $0x314] sm:$0xf0] }
 0x51a   :  { %v9530_v5 = vpop.eup %9529  ;;  %v1520_v11 = vadd.f32 %v9526_v2, %v1519_v46  ;;  %v9021_v46 = vld [vmem:[%s11857_s5 + $0x2d4] sm:$0xf0] }
 0x51b   :  { %v1555_v18 = vmul.f32 %v9530_v5, %v1553_v61  ;;  %v1539_v8 = vadd.f32 %v9528_v13, %v1538_v57  ;;  %v9532_v0 = vpop.eup %9531  ;;  %vm1560_vm0 = vweird.f32 %v9530_v5  ;;  %v7296_v61 = vor.u32 %v9025_v41, %v7295_v40  ;;  %v7255_v40 = vld [vmem:[%s11857_s5 + $0x2a0] sm:$0xf]  ;;  %v9015_v41 = vld [vmem:[%s11857_s5 + $0x2a4] sm:$0xf0] }
 0x51c   :  { %v1524_v43 = vsel %vm1523_vm12, %v9526_v2, %v1520_v11  ;;  %vm1561_vm2 = vmor %vm1559_vm1, %vm1560_vm0  ;;  %v7223_v2 = vld [vmem:[%s11857_s5 + $0x260] sm:$0xf]  ;;  %v7216_v57 = vor.u32 %v9005_v34, %v7215_v26  ;;  %v7280_v1 = vor.u32 %v9021_v46, %v7279_v35  ;;  %v9003_v11 = vld [vmem:[%s11857_s5 + $0x244] sm:$0xf0] }
 0x51d   :  { %v1556_v44 = vsub.f32 1.0, %v1555_v18  ;;  %v1529_v38 = vsel %vm1526_vm14, %v1528_v19, %v1524_v43  ;;  %v1543_v59 = vsel %vm1542_vm13, %v9528_v13, %v1539_v8  ;;  %v9023_v13 = vld [vmem:[%s11857_s5 + $0x2e4] sm:$0xf0]  ;;  %v7224_v21 = vor.u32 %v9007_v6, %v7223_v2  ;;  %v7335_v19 = vld [vmem:[%s11857_s5 + $0x340] sm:$0xf] }
 0x51e   :  { %v1548_v12 = vsel %vm1545_vm15, %v1547_v55, %v1543_v59  ;;  %v1571_v24 = vmul.f32 %v9532_v0, %v1529_v38  ;;  %v7288_v25 = vor.u32 %v9023_v13, %v7287_v9  ;;  %v9019_v18 = vld [vmem:[%s11857_s5 + $0x2c4] sm:$0xf0]  ;;  %v11922_v55 = vld [vmem:[#allocation19_spill] sm:$0xff]  ;;  %v1197_v0 = vmax.f32 %v11923_v28, 0.0  ;;  %v7199_v59 = vld [vmem:[%s11857_s5 + $0x230] sm:$0xf] }
 0x51f   :  { %v1557_v33 = vmul.f32 %v9530_v5, %v1556_v44  ;;  %v1570_v29 = vmul.f32 %v1548_v12, %v10402_v36  ;;  %v9035_v8 = vld [vmem:[%s11857_s5 + $0x344] sm:$0xf0]  ;;  %v1071_v43 = vmax.f32 %v11922_v55, 0.0  ;;  %v7208_v44 = vor.u32 %v9003_v11, %v7207_v4  ;;  %v7247_v6 = vld [vmem:[%s11857_s5 + $0x290] sm:$0xf] }
 0x520   :  { %v7272_v38 = vor.u32 %v9019_v18, %v7271_v15  ;;  %v7336_v12 = vor.u32 %v9035_v8, %v7335_v19  ;;  %v7200_v60 = vor.u32 %v9001_v23, %v7199_v59  ;;  %v7320_v2 = vor.u32 %v9031_v50, %v7319_v49  ;;  %v9013_v9 = vld [vmem:[%s11857_s5 + $0x294] sm:$0xf0]  ;;  %v7311_v13 = vld [vmem:[%s11857_s5 + $0x310] sm:$0xf]  ;;  %v8995_v26 = vld [vmem:[%s11857_s5 + $0x204] sm:$0xf0] }
 0x521   :  { %v10606_v7 = vadd.f32 %v1571_v24, %v1570_v29  ;;  %v1558_v63 = vadd.f32 %v9530_v5, %v1557_v33  ;;  %v9017_v24 = vld [vmem:[%s11857_s5 + $0x2b4] sm:$0xf0]  ;;  %v7327_v33 = vld [vmem:[%s11857_s5 + $0x330] sm:$0xf]  ;;  %v10714_v39 = vpack.c.bf16 %v1071_v43, %v1071_v43  ;;  %v7312_v34 = vor.u32 %v9029_v16, %v7311_v13  ;;  %v9011_v35 = vld [vmem:[%s11857_s5 + $0x284] sm:$0xf0] }
 0x522   :  { %v9033_v29 = vld [vmem:[%s11857_s5 + $0x334] sm:$0xf0]  ;;  %v7303_v46 = vld [vmem:[%s11857_s5 + $0x300] sm:$0xf]  ;;  %v7041_v4 = vld [vmem:[%s11857_s5 + $0xf8] sm:$0xf0] }
 0x523   :  { %9533 = vtanh.f32 %v10606_v7  ;;  %v1562_v48 = vsel %vm1561_vm2, %v9530_v5, %v1558_v63  ;;  %v7344_v5 = vor.u32 %v9037_v52, %v7343_v51  ;;  %v10707_v63 = vpack.c.bf16 %v819_v10, %v819_v10  ;;  %v9027_v51 = vld [vmem:[%s11857_s5 + $0x304] sm:$0xf0]  ;;  %v8944_v52 = vld [vmem:[%s11857_s5 + $0x74] sm:$0xf]  ;;  %v7105_v11 = vld [vmem:[%s11857_s5 + $0x178] sm:$0xf0] }
 0x524   :  { %v1567_v36 = vsel %vm1564_vm3, %v1566_v27, %v1562_v48  ;;  %v7264_v48 = vor.u32 %v9017_v24, %v7263_v14  ;;  %v7191_v27 = vld [vmem:[%s11857_s5 + $0x220] sm:$0xf]  ;;  %v1323_v15 = vmax.f32 %v10357_v31, 0.0  ;;  %v1449_v8 = vmax.f32 %v10405_v62, 0.0  ;;  %v6969_v31 = vld [vmem:[%s11857_s5 + $0x68] sm:$0xf0] }
 0x525   :  { %v7304_v56 = vor.u32 %v9027_v51, %v7303_v46  ;;  %v7033_v62 = vld [vmem:[%s11857_s5 + $0xe8] sm:$0xf0]  ;;  %v8938_v50 = vld [vmem:[%s11857_s5 + $0x44] sm:$0xf]  ;;  %v8936_v16 = vld [vmem:[%s11857_s5 + $0x34] sm:$0xf] }
 0x526   :  { %v10812_v59 = vpack.c.bf16 %v1323_v15, %v1323_v15  ;;  %v8934_v51 = vld [vmem:[%s11857_s5 + $0x24] sm:$0xf] }
 0x529   :  { %v9534_v53 = vpop.eup %9533 }
 0x52a   :  { %v10621_v45 = vmul.f32 %v9534_v53, %v1567_v36  ;;  %v10716_v53 = vpack.c.bf16 %v1197_v0, %v1197_v0  ;;  %v7328_v36 = vor.u32 %v9033_v29, %v7327_v33  ;;  %v8942_v0 = vld [vmem:[%s11857_s5 + $0x64] sm:$0xf]  ;;  %v8940_v29 = vld [vmem:[%s11857_s5 + $0x54] sm:$0xf] }
 0x52b   :  { %v6972_v23 = vor.u32 %v8942_v0, %v6969_v31  ;;  %v8930_v0 = vld [vmem:[%s11857_s5 + $0x4] sm:$0xf] }
 0x52c   :  { %v1581_v54 = vpack.c.bf16 %v10621_v45, %v10621_v45  ;;  %v1575_v10 = vmax.f32 %v10621_v45, 0.0  ;;  %v8974_v45 = vld [vmem:[%s11857_s5 + $0x164] sm:$0xf] }
 0x52e   :  { %1590 = vmatmul.bf16.vlgmr.msra.gmra.mxu0 %v1581_v54  ;;  %1603 = vmatmul.bf16.vlgmr.msra.gmra.mxu1 %v1581_v54  ;;  %v10816_v14 = vpack.c.bf16 %v1575_v10, %v1575_v10  ;;  %v8948_v10 = vld [vmem:[%s11857_s5 + $0x94] sm:$0xf] }
 0x52f   :  { %1616 = vmatmul.bf16.vlgmr.msra.gmra.mxu2 %v1581_v54  ;;  %1629 = vmatmul.bf16.vlgmr.msra.gmra.mxu3 %v1581_v54  ;;  %v7192_v54 = vor.u32 %v8999_v22, %v7191_v27  ;;  %v7025_v27 = vld [vmem:[%s11857_s5 + $0xd8] sm:$0xf0] }
 0x530   :  { %2545 = vmatpush.bf16.msra.mxu0 %v7232_v58  ;;  %2558 = vmatpush.bf16.msra.mxu1 %v7296_v61  ;;  %v7256_v58 = vor.u32 %v9015_v41, %v7255_v40  ;;  %v7183_v61 = vld [vmem:[%s11857_s5 + $0x210] sm:$0xf]  ;;  %v7089_v22 = vld [vmem:[%s11857_s5 + $0x158] sm:$0xf0] }
 0x531   :  { %2571 = vmatpush.bf16.msra.mxu2 %v7360_v3  ;;  %v8997_v3 = vld [vmem:[%s11857_s5 + $0x214] sm:$0xf0] }
 0x532   :  { %v7184_v17 = vor.u32 %v8997_v3, %v7183_v61  ;;  %v7017_v61 = vld [vmem:[%s11857_s5 + $0xc8] sm:$0xf0] }
 0x533   :  { %v7081_v3 = vld [vmem:[%s11857_s5 + $0x148] sm:$0xf0] }
 0x534   :  { %2546 = vmatpush.bf16.msra.mxu0 %v7224_v21  ;;  %2559 = vmatpush.bf16.msra.mxu1 %v7288_v25  ;;  %v7248_v21 = vor.u32 %v9013_v9, %v7247_v6  ;;  %v7175_v25 = vld [vmem:[%s11857_s5 + $0x200] sm:$0xf] }
 0x535   :  { %2572 = vmatpush.bf16.msra.mxu2 %v7352_v30  ;;  %v7239_v30 = vld [vmem:[%s11857_s5 + $0x280] sm:$0xf]  ;;  %v7176_v18 = vor.u32 %v8995_v26, %v7175_v25  ;;  %v7009_v25 = vld [vmem:[%s11857_s5 + $0xb8] sm:$0xf0]  ;;  %v8968_v26 = vld [vmem:[%s11857_s5 + $0x134] sm:$0xf] }
 0x536   :  { %v7240_v19 = vor.u32 %v9011_v35, %v7239_v30  ;;  %v7073_v30 = vld [vmem:[%s11857_s5 + $0x138] sm:$0xf0] }
 0x537   :  { %v7076_v46 = vor.u32 %v8968_v26, %v7073_v30  ;;  %v9057_v26 = vld [vmem:[%s11857_s5 + $0x3f4] sm:$0xf0]  ;;  %v7415_v30 = vld [vmem:[%s11857_s5 + $0x3e0] sm:$0xf] }
 0x538   :  { %2547 = vmatpush.bf16.msra.mxu0 %v7216_v57  ;;  %2560 = vmatpush.bf16.msra.mxu1 %v7280_v1  ;;  %v6977_v57 = vld [vmem:[%s11857_s5 + $0x78] sm:$0xf0]  ;;  %v8960_v1 = vld [vmem:[%s11857_s5 + $0xf4] sm:$0xf] }
 0x539   :  { %2573 = vmatpush.bf16.msra.mxu2 %v7344_v5  ;;  %v8976_v5 = vld [vmem:[%s11857_s5 + $0x174] sm:$0xf]  ;;  %v6980_v55 = vor.u32 %v8944_v52, %v6977_v57  ;;  %v7044_v43 = vor.u32 %v8960_v1, %v7041_v4  ;;  %v6937_v52 = vld [vmem:[%s11857_s5 + $0x28] sm:$0xf0]  ;;  %v8950_v57 = vld [vmem:[%s11857_s5 + $0xa4] sm:$0xf] }
 0x53a   :  { %v7108_v28 = vor.u32 %v8976_v5, %v7105_v11  ;;  %v7001_v1 = vld [vmem:[%s11857_s5 + $0xa8] sm:$0xf0]  ;;  %v8966_v4 = vld [vmem:[%s11857_s5 + $0x124] sm:$0xf]  ;;  %v6940_v11 = vor.u32 %v8934_v51, %v6937_v52  ;;  %v9055_v52 = vld [vmem:[%s11857_s5 + $0x3e4] sm:$0xf0] }
 0x53b   :  { %v7065_v5 = vld [vmem:[%s11857_s5 + $0x128] sm:$0xf0]  ;;  %v7004_v15 = vor.u32 %v8950_v57, %v7001_v1  ;;  %v7345_v57 = vld [vmem:[%s11857_s5 + $0x358] sm:$0xf0]  ;;  %v7416_v1 = vor.u32 %v9055_v52, %v7415_v30  ;;  %v9026_v30 = vld [vmem:[%s11857_s5 + $0x304] sm:$0xf] }
 0x53c   :  { %2548 = vmatpush.bf16.msra.mxu0 %v7208_v44  ;;  %2561 = vmatpush.bf16.msra.mxu1 %v7272_v38  ;;  %v8958_v44 = vld [vmem:[%s11857_s5 + $0xe4] sm:$0xf]  ;;  %v7097_v38 = vld [vmem:[%s11857_s5 + $0x168] sm:$0xf0]  ;;  %v7399_v52 = vld [vmem:[%s11857_s5 + $0x3c0] sm:$0xf] }
 0x53d   :  { %2574 = vmatpush.bf16.msra.mxu2 %v7336_v12  ;;  %v10814_v12 = vpack.c.bf16 %v1449_v8, %v1449_v8  ;;  %v7036_v24 = vor.u32 %v8958_v44, %v7033_v62  ;;  %v7100_v33 = vor.u32 %v8974_v45, %v7097_v38  ;;  %v6929_v8 = vld [vmem:[%s11857_s5 + $0x18] sm:$0xf0]  ;;  %v6921_v62 = vld [vmem:[%s11857_s5 + $0x8] sm:$0xf0]  ;;  %v8946_v45 = vld [vmem:[%s11857_s5 + $0x84] sm:$0xf] }
 0x53e   :  { %2501 = vmatmul.bf16.vlgmr.msrb.gmra.mxu0 %v10707_v63  ;;  %2514 = vmatmul.bf16.vlgmr.msrb.gmra.mxu1 %v10709_v42  ;;  %v6985_v38 = vld [vmem:[%s11857_s5 + $0x88] sm:$0xf0] }
 0x53f   :  { %2527 = vmatmul.bf16.vlgmr.msrb.gmra.mxu2 %v10714_v39  ;;  %2540 = vmatmul.bf16.vlgmr.msrb.gmra.mxu3 %v10716_v53 }
 0x540   :  { %2549 = vmatpush.bf16.msra.mxu0 %v7200_v60  ;;  %2562 = vmatpush.bf16.msra.mxu1 %v7264_v48  ;;  %v6961_v60 = vld [vmem:[%s11857_s5 + $0x58] sm:$0xf0]  ;;  %v8956_v48 = vld [vmem:[%s11857_s5 + $0xd4] sm:$0xf] }
 0x541   :  { %2575 = vmatpush.bf16.msra.mxu2 %v7328_v36  ;;  %v8972_v36 = vld [vmem:[%s11857_s5 + $0x154] sm:$0xf]  ;;  %v6964_v40 = vor.u32 %v8940_v29, %v6961_v60  ;;  %v7028_v41 = vor.u32 %v8956_v48, %v7025_v27  ;;  %v7233_v29 = vld [vmem:[%s11857_s5 + $0x278] sm:$0xf0]  ;;  %v6924_v27 = vor.u32 %v8930_v0, %v6921_v62 }
 0x542   :  { %v7092_v49 = vor.u32 %v8972_v36, %v7089_v22  ;;  %v9024_v60 = vld [vmem:[%s11857_s5 + $0x2f4] sm:$0xf]  ;;  %v7297_v48 = vld [vmem:[%s11857_s5 + $0x2f8] sm:$0xf0] }
 0x543   :  { %v9040_v36 = vld [vmem:[%s11857_s5 + $0x374] sm:$0xf]  ;;  %v7361_v22 = vld [vmem:[%s11857_s5 + $0x378] sm:$0xf0] }
 0x544   :  { %2550 = vmatpush.bf16.msra.mxu0 %v7192_v54  ;;  %2563 = vmatpush.bf16.msra.mxu1 %v7256_v58  ;;  %v6953_v54 = vld [vmem:[%s11857_s5 + $0x48] sm:$0xf0]  ;;  %v8954_v58 = vld [vmem:[%s11857_s5 + $0xc4] sm:$0xf]  ;;  %v9000_v0 = vld [vmem:[%s11857_s5 + $0x234] sm:$0xf] }
 0x545   :  { %2576 = vmatpush.bf16.msra.mxu2 %v7320_v2  ;;  %v8970_v2 = vld [vmem:[%s11857_s5 + $0x144] sm:$0xf]  ;;  %v6956_v6 = vor.u32 %v8938_v50, %v6953_v54  ;;  %v7020_v9 = vor.u32 %v8954_v58, %v7017_v61  ;;  %v7300_v50 = vor.u32 %v9024_v60, %v7297_v48  ;;  %v7364_v58 = vor.u32 %v9040_v36, %v7361_v22  ;;  %v7225_v61 = vld [vmem:[%s11857_s5 + $0x268] sm:$0xf0]  ;;  %v9016_v62 = vld [vmem:[%s11857_s5 + $0x2b4] sm:$0xf] }
 0x546   :  { %v7084_v13 = vor.u32 %v8970_v2, %v7081_v3  ;;  %v9006_v54 = vld [vmem:[%s11857_s5 + $0x264] sm:$0xf]  ;;  %v7289_v3 = vld [vmem:[%s11857_s5 + $0x2e8] sm:$0xf0] }
 0x547   :  { %v9022_v2 = vld [vmem:[%s11857_s5 + $0x2e4] sm:$0xf]  ;;  %v7193_v48 = vld [vmem:[%s11857_s5 + $0x228] sm:$0xf0] }
 0x548   :  { %2551 = vmatpush.bf16.msra.mxu0 %v7184_v17  ;;  %2564 = vmatpush.bf16.msra.mxu1 %v7248_v21  ;;  %v6945_v17 = vld [vmem:[%s11857_s5 + $0x38] sm:$0xf0]  ;;  %v8952_v21 = vld [vmem:[%s11857_s5 + $0xb4] sm:$0xf]  ;;  %v7257_v36 = vld [vmem:[%s11857_s5 + $0x2a8] sm:$0xf0] }
 0x549   :  { %2577 = vmatpush.bf16.msra.mxu2 %v7312_v34  ;;  %v6948_v34 = vor.u32 %v8936_v16, %v6945_v17  ;;  %v7012_v35 = vor.u32 %v8952_v21, %v7009_v25  ;;  %v7217_v16 = vld [vmem:[%s11857_s5 + $0x258] sm:$0xf0]  ;;  %v7228_v17 = vor.u32 %v9006_v54, %v7225_v61  ;;  %v7292_v21 = vor.u32 %v9022_v2, %v7289_v3  ;;  %v7423_v25 = vld [vmem:[%s11857_s5 + $0x3f0] sm:$0xf]  ;;  %v9030_v22 = vld [vmem:[%s11857_s5 + $0x324] sm:$0xf] }
 0x54a   :  { %v7424_v51 = vor.u32 %v9057_v26, %v7423_v25  ;;  %v9012_v61 = vld [vmem:[%s11857_s5 + $0x294] sm:$0xf]  ;;  %v7249_v2 = vld [vmem:[%s11857_s5 + $0x298] sm:$0xf0]  ;;  %v9010_v25 = vld [vmem:[%s11857_s5 + $0x284] sm:$0xf] }
 0x54b   :  { %v9028_v3 = vld [vmem:[%s11857_s5 + $0x314] sm:$0xf]  ;;  %v7241_v26 = vld [vmem:[%s11857_s5 + $0x288] sm:$0xf0] }
 0x54c   :  { %2552 = vmatpush.bf16.msra.mxu0 %v7176_v18  ;;  %2565 = vmatpush.bf16.msra.mxu1 %v7240_v19  ;;  %v7068_v18 = vor.u32 %v8966_v4, %v7065_v5  ;;  %v8932_v19 = vld [vmem:[%s11857_s5 + $0x14] sm:$0xf] }
 0x54d   :  { %2578 = vmatpush.bf16.msra.mxu2 %v7304_v56  ;;  %v6993_v56 = vld [vmem:[%s11857_s5 + $0x98] sm:$0xf0]  ;;  %2584 = vmatpush.bf16.msra.mxu3 %v7424_v51 }
 0x54e   :  { %v6996_v31 = vor.u32 %v8948_v10, %v6993_v56  ;;  %v9034_v10 = vld [vmem:[%s11857_s5 + $0x344] sm:$0xf]  ;;  %v7337_v56 = vld [vmem:[%s11857_s5 + $0x348] sm:$0xf0] }
 0x54f   :  { %2553 = vmatmul.bf16.vlgmr.msra.gmra.mxu0 %v10812_v59  ;;  %2566 = vmatmul.bf16.vlgmr.msra.gmra.mxu1 %v10814_v12 }
 0x550   :  { %2597 = vmatpush.bf16.msrb.mxu0 %v6980_v55  ;;  %2610 = vmatpush.bf16.msrb.mxu1 %v7044_v43  ;;  %v8964_v55 = vld [vmem:[%s11857_s5 + $0x114] sm:$0xf]  ;;  %v7057_v43 = vld [vmem:[%s11857_s5 + $0x118] sm:$0xf0] }
 0x551   :  { %2623 = vmatpush.bf16.msrb.mxu2 %v7108_v28  ;;  %v6932_v28 = vor.u32 %v8932_v19, %v6929_v8  ;;  %v7060_v44 = vor.u32 %v8964_v55, %v7057_v43  ;;  %v9018_v19 = vld [vmem:[%s11857_s5 + $0x2c4] sm:$0xf]  ;;  %v7273_v8 = vld [vmem:[%s11857_s5 + $0x2c8] sm:$0xf0]  ;;  %2585 = vmatpush.bf16.msra.mxu3 %v7416_v1  ;;  %v7391_v1 = vld [vmem:[%s11857_s5 + $0x3b0] sm:$0xf] }
 0x552   :  { %2579 = vmatmul.bf16.vlgmr.msra.gmra.mxu2 %v10816_v14 }
 0x554   :  { %2598 = vmatpush.bf16.msrb.mxu0 %v6972_v23  ;;  %2611 = vmatpush.bf16.msrb.mxu1 %v7036_v24  ;;  %v8962_v23 = vld [vmem:[%s11857_s5 + $0x104] sm:$0xf]  ;;  %v7049_v24 = vld [vmem:[%s11857_s5 + $0x108] sm:$0xf0] }
 0x555   :  { %2624 = vmatpush.bf16.msrb.mxu2 %v7100_v33  ;;  %v9008_v33 = vld [vmem:[%s11857_s5 + $0x274] sm:$0xf] }
 0x558   :  { %2599 = vmatpush.bf16.msrb.mxu0 %v6964_v40  ;;  %2612 = vmatpush.bf16.msrb.mxu1 %v7028_v41  ;;  %v6988_v40 = vor.u32 %v8946_v45, %v6985_v38  ;;  %v7052_v41 = vor.u32 %v8962_v23, %v7049_v24  ;;  %v7265_v45 = vld [vmem:[%s11857_s5 + $0x2b8] sm:$0xf0]  ;;  %v9032_v38 = vld [vmem:[%s11857_s5 + $0x334] sm:$0xf] }
 0x559   :  { %2625 = vmatpush.bf16.msrb.mxu2 %v7092_v49  ;;  %v7236_v49 = vor.u32 %v9008_v33, %v7233_v29  ;;  %v7329_v23 = vld [vmem:[%s11857_s5 + $0x338] sm:$0xf0]  ;;  %v7268_v33 = vor.u32 %v9016_v62, %v7265_v45  ;;  %v8998_v29 = vld [vmem:[%s11857_s5 + $0x224] sm:$0xf]  ;;  %v11924_v62 = vld [vmem:[#allocation37_spill] sm:$0xff] }
 0x55a   :  { %v7332_v60 = vor.u32 %v9032_v38, %v7329_v23  ;;  %v383_v45 = vadd.f32 %v11924_v62, %v10093_v32  ;;  %v11925_v38 = vld [vmem:[#allocation39_spill] sm:$0xff]  ;;  %v8984_v32 = vld [vmem:[%s11857_s5 + $0x1b4] sm:$0xf] }
 0x55b   :  { %v412_v23 = vadd.f32 %v11925_v38, %v10097_v37  ;;  %v7137_v37 = vld [vmem:[%s11857_s5 + $0x1b8] sm:$0xf0] }
 0x55c   :  { %2600 = vmatpush.bf16.msrb.mxu0 %v6956_v6  ;;  %2613 = vmatpush.bf16.msrb.mxu1 %v7020_v9  ;;  %v9038_v6 = vld [vmem:[%s11857_s5 + $0x364] sm:$0xf]  ;;  %v7353_v9 = vld [vmem:[%s11857_s5 + $0x368] sm:$0xf0] }
 0x55d   :  { %2626 = vmatpush.bf16.msrb.mxu2 %v7084_v13  ;;  %v9004_v13 = vld [vmem:[%s11857_s5 + $0x254] sm:$0xf] }
 0x55e   :  { %v7220_v4 = vor.u32 %v9004_v13, %v7217_v16  ;;  %v7252_v13 = vor.u32 %v9012_v61, %v7249_v2  ;;  %v8994_v16 = vld [vmem:[%s11857_s5 + $0x204] sm:$0xf] }
 0x560   :  { %2601 = vmatpush.bf16.msrb.mxu0 %v6948_v34  ;;  %2614 = vmatpush.bf16.msrb.mxu1 %v7012_v35  ;;  %v7356_v34 = vor.u32 %v9038_v6, %v7353_v9  ;;  %v9020_v35 = vld [vmem:[%s11857_s5 + $0x2d4] sm:$0xf]  ;;  %v7313_v6 = vld [vmem:[%s11857_s5 + $0x318] sm:$0xf0] }
 0x561   :  { %2627 = vmatpush.bf16.msrb.mxu2 %v7076_v46  ;;  %v7281_v46 = vld [vmem:[%s11857_s5 + $0x2d8] sm:$0xf0] }
 0x562   :  { %v7284_v5 = vor.u32 %v9020_v35, %v7281_v46  ;;  %v7244_v46 = vor.u32 %v9010_v25, %v7241_v26 }
 0x564   :  { %2602 = vmatpush.bf16.msrb.mxu0 %v6940_v11  ;;  %2615 = vmatpush.bf16.msrb.mxu1 %v7004_v15  ;;  %v9053_v11 = vld [vmem:[%s11857_s5 + $0x3d4] sm:$0xf0] }
 0x565   :  { %2628 = vmatpush.bf16.msrb.mxu2 %v7068_v18  ;;  %v7209_v18 = vld [vmem:[%s11857_s5 + $0x248] sm:$0xf0] }
 0x568   :  { %2603 = vmatpush.bf16.msrb.mxu0 %v6932_v28  ;;  %2616 = vmatpush.bf16.msrb.mxu1 %v6996_v31  ;;  %v7276_v28 = vor.u32 %v9018_v19, %v7273_v8  ;;  %v7340_v31 = vor.u32 %v9034_v10, %v7337_v56  ;;  %v8992_v8 = vld [vmem:[%s11857_s5 + $0x1f4] sm:$0xf]  ;;  %v7169_v10 = vld [vmem:[%s11857_s5 + $0x1f8] sm:$0xf0] }
 0x569   :  { %2629 = vmatpush.bf16.msrb.mxu2 %v7060_v44  ;;  %v7201_v44 = vld [vmem:[%s11857_s5 + $0x238] sm:$0xf0]  ;;  %v7172_v56 = vor.u32 %v8992_v8, %v7169_v10 }
 0x56a   :  { %v7204_v24 = vor.u32 %v9000_v0, %v7201_v44  ;;  %v8988_v0 = vld [vmem:[%s11857_s5 + $0x1d4] sm:$0xf] }
 0x56c   :  { %2604 = vmatpush.bf16.msrb.mxu0 %v6924_v27  ;;  %2617 = vmatpush.bf16.msrb.mxu1 %v6988_v40  ;;  %v9014_v27 = vld [vmem:[%s11857_s5 + $0x2a4] sm:$0xf]  ;;  %v7321_v40 = vld [vmem:[%s11857_s5 + $0x328] sm:$0xf0] }
 0x56d   :  { %2630 = vmatpush.bf16.msrb.mxu2 %v7052_v41  ;;  %v7196_v41 = vor.u32 %v8998_v29, %v7193_v48  ;;  %v7324_v54 = vor.u32 %v9030_v22, %v7321_v40  ;;  %v8986_v48 = vld [vmem:[%s11857_s5 + $0x1c4] sm:$0xf] }
 0x56f   :  { %2605 = vmatmul.bf16.vlgmr.msrb.gmra.mxu0 %v10707_v63  ;;  %2618 = vmatmul.bf16.vlgmr.msrb.gmra.mxu1 %v10709_v42  ;;  %v9036_v63 = vld [vmem:[%s11857_s5 + $0x354] sm:$0xf]  ;;  %v9002_v42 = vld [vmem:[%s11857_s5 + $0x244] sm:$0xf] }
 0x570   :  { %2649 = vmatpush.bf16.msra.mxu0 %v7236_v49  ;;  %2662 = vmatpush.bf16.msra.mxu1 %v7300_v50  ;;  %v7348_v15 = vor.u32 %v9036_v63, %v7345_v57  ;;  %v7212_v43 = vor.u32 %v9002_v42, %v7209_v18  ;;  %v7260_v49 = vor.u32 %v9014_v27, %v7257_v36  ;;  %v8996_v50 = vld [vmem:[%s11857_s5 + $0x214] sm:$0xf]  ;;  %v9051_v63 = vld [vmem:[%s11857_s5 + $0x3c4] sm:$0xf0]  ;;  %v7375_v42 = vld [vmem:[%s11857_s5 + $0x390] sm:$0xf] }
 0x571   :  { %2675 = vmatpush.bf16.msra.mxu2 %v7364_v58  ;;  %v7185_v58 = vld [vmem:[%s11857_s5 + $0x218] sm:$0xf0]  ;;  %v7400_v57 = vor.u32 %v9051_v63, %v7399_v52  ;;  %v9043_v18 = vld [vmem:[%s11857_s5 + $0x384] sm:$0xf0]  ;;  %v7145_v27 = vld [vmem:[%s11857_s5 + $0x1c8] sm:$0xf0] }
 0x572   :  { %2631 = vmatmul.bf16.vlgmr.msrb.gmra.mxu2 %v10714_v39  ;;  %v7407_v39 = vld [vmem:[%s11857_s5 + $0x3d0] sm:$0xf]  ;;  %v7188_v9 = vor.u32 %v8996_v50, %v7185_v58  ;;  %v7148_v36 = vor.u32 %v8986_v48, %v7145_v27 }
 0x573   :  { %v7408_v55 = vor.u32 %v9053_v11, %v7407_v39  ;;  %v9045_v39 = vld [vmem:[%s11857_s5 + $0x394] sm:$0xf0] }
 0x574   :  { %2650 = vmatpush.bf16.msra.mxu0 %v7228_v17  ;;  %2663 = vmatpush.bf16.msra.mxu1 %v7292_v21  ;;  %v7316_v17 = vor.u32 %v9028_v3, %v7313_v6  ;;  %v7177_v21 = vld [vmem:[%s11857_s5 + $0x208] sm:$0xf0]  ;;  %v7376_v11 = vor.u32 %v9045_v39, %v7375_v42  ;;  %v8982_v6 = vld [vmem:[%s11857_s5 + $0x1a4] sm:$0xf] }
 0x575   :  { %2676 = vmatpush.bf16.msra.mxu2 %v7356_v34  ;;  %2586 = vmatpush.bf16.msra.mxu3 %v7408_v55  ;;  %v7305_v34 = vld [vmem:[%s11857_s5 + $0x308] sm:$0xf0]  ;;  %v7180_v35 = vor.u32 %v8994_v16, %v7177_v21  ;;  %v8990_v55 = vld [vmem:[%s11857_s5 + $0x1e4] sm:$0xf]  ;;  %v11175_v16 = vld [vmem:[%s11858_s6] sm:$0x3] }
 0x576   :  { %v7308_v51 = vor.u32 %v9026_v30, %v7305_v34  ;;  %v7121_v21 = vld [vmem:[%s11857_s5 + $0x198] sm:$0xf0] }
 0x578   :  { %2651 = vmatpush.bf16.msra.mxu0 %v7220_v4  ;;  %2664 = vmatpush.bf16.msra.mxu1 %v7284_v5  ;;  %v9047_v4 = vld [vmem:[%s11857_s5 + $0x3a4] sm:$0xf0] }
 0x579   :  { %2677 = vmatpush.bf16.msra.mxu2 %v7348_v15  ;;  %2587 = vmatpush.bf16.msra.mxu3 %v7400_v57  ;;  %v7367_v15 = vld [vmem:[%s11857_s5 + $0x380] sm:$0xf] }
 0x57a   :  { %v7368_v19 = vor.u32 %v9043_v18, %v7367_v15 }
 0x57c   :  { %2652 = vmatpush.bf16.msra.mxu0 %v7212_v43  ;;  %2665 = vmatpush.bf16.msra.mxu1 %v7276_v28  ;;  %v7161_v43 = vld [vmem:[%s11857_s5 + $0x1e8] sm:$0xf0] }
 0x57d   :  { %2678 = vmatpush.bf16.msra.mxu2 %v7340_v31  ;;  %v7164_v28 = vor.u32 %v8990_v55, %v7161_v43  ;;  %v7153_v31 = vld [vmem:[%s11857_s5 + $0x1d8] sm:$0xf0] }
 0x57e   :  { %v7156_v44 = vor.u32 %v8988_v0, %v7153_v31 }
 0x580   :  { %2653 = vmatpush.bf16.msra.mxu0 %v7204_v24  ;;  %2666 = vmatpush.bf16.msra.mxu1 %v7268_v33 }
 0x581   :  { %2679 = vmatpush.bf16.msra.mxu2 %v7332_v60 }
 0x584   :  { %2654 = vmatpush.bf16.msra.mxu0 %v7196_v41  ;;  %2667 = vmatpush.bf16.msra.mxu1 %v7260_v49  ;;  %v7140_v41 = vor.u32 %v8984_v32, %v7137_v37  ;;  %v11926_v49 = vld [vmem:[#allocation40_spill] sm:$0xff] }
 0x585   :  { %2680 = vmatpush.bf16.msra.mxu2 %v7324_v54  ;;  %v441_v50 = vadd.f32 %v11926_v49, %v10107_v47 }
 0x588   :  { %2655 = vmatpush.bf16.msra.mxu0 %v7188_v9  ;;  %2668 = vmatpush.bf16.msra.mxu1 %v7252_v13  ;;  %v7129_v9 = vld [vmem:[%s11857_s5 + $0x1a8] sm:$0xf0]  ;;  %v8980_v13 = vld [vmem:[%s11857_s5 + $0x194] sm:$0xf] }
 0x589   :  { %2681 = vmatpush.bf16.msra.mxu2 %v7316_v17  ;;  %v7132_v17 = vor.u32 %v8982_v6, %v7129_v9  ;;  %v7124_v34 = vor.u32 %v8980_v13, %v7121_v21 }
 0x58c   :  { %2656 = vmatpush.bf16.msra.mxu0 %v7180_v35  ;;  %2669 = vmatpush.bf16.msra.mxu1 %v7244_v46  ;;  %v1849_v46 = vperm.slane %v11175_v16, 0 }
 0x58d   :  { %2682 = vmatpush.bf16.msra.mxu2 %v7308_v51 }
 0x58f   :  { %2657 = vmatmul.bf16.vlgmr.msra.gmra.mxu0 %v10812_v59  ;;  %2670 = vmatmul.bf16.vlgmr.msra.gmra.mxu1 %v10814_v12  ;;  %v9049_v59 = vld [vmem:[%s11857_s5 + $0x3b4] sm:$0xf0] }
 0x590   :  { %2683 = vmatmul.bf16.vlgmr.msra.gmra.mxu2 %v10816_v14  ;;  %v7392_v12 = vor.u32 %v9049_v59, %v7391_v1  ;;  %v7383_v14 = vld [vmem:[%s11857_s5 + $0x3a0] sm:$0xf]  ;;  %v8978_v59 = vld [vmem:[%s11857_s5 + $0x184] sm:$0xf] }
 0x591   :  { %v7384_v5 = vor.u32 %v9047_v4, %v7383_v14  ;;  %v11927_v4 = vld [vmem:[#allocation41_spill] sm:$0xff] }
 0x592   :  { %2588 = vmatpush.bf16.msra.mxu3 %v7392_v12  ;;  %v7113_v12 = vld [vmem:[%s11857_s5 + $0x188] sm:$0xf0] }
 0x593   :  { %v7116_v42 = vor.u32 %v8978_v59, %v7113_v12  ;;  %v7425_v59 = vld [vmem:[%s11857_s5 + $0x3f8] sm:$0xf0] }
 0x596   :  { %2589 = vmatpush.bf16.msra.mxu3 %v7384_v5  ;;  %v470_v5 = vadd.f32 %v11927_v4, %v11898_v20 }
 0x59a   :  { %2590 = vmatpush.bf16.msra.mxu3 %v7376_v11 }
 0x59e   :  { %2591 = vmatpush.bf16.msra.mxu3 %v7368_v19 }
 0x5a2   :  { %2636 = vmatpush.bf16.msrb.mxu3 %v7172_v56 }
 0x5a6   :  { %2637 = vmatpush.bf16.msrb.mxu3 %v7164_v28 }
 0x5aa   :  { %2638 = vmatpush.bf16.msrb.mxu3 %v7156_v44 }
 0x5ab   :  { %v1591_v24 = vpop.f32.mrf.mxu0  ;;  %v1604_v33 = vpop.f32.mrf.mxu1 }
 0x5ac   :  { %v1634_v29 = vadd.f32 %v1591_v24, %v383_v45  ;;  %v1635_v60 = vadd.f32 %v1604_v33, %v412_v23 }
 0x5ae   :  { %v6914_v22 = vmul.f32 -1.442695, %v1634_v29  ;;  %v6915_v40 = vmul.f32 -1.442695, %v1635_v60  ;;  %2639 = vmatpush.bf16.msrb.mxu3 %v7148_v36 }
 0x5b0   :  { %9535 = vpow2.f32 %v6914_v22 }
 0x5b1   :  { %9537 = vpow2.f32 %v6915_v40 }
 0x5b2   :  { %v1617_v54 = vpop.f32.mrf.mxu2  ;;  %v1630_v58 = vpop.f32.mrf.mxu3  ;;  %2640 = vmatpush.bf16.msrb.mxu3 %v7140_v41 }
 0x5b3   :  { %v1636_v61 = vadd.f32 %v1617_v54, %v441_v50  ;;  %v1593_v2 = vpop.f32.mrf.mxu0  ;;  %v1606_v3 = vpop.f32.mrf.mxu1  ;;  %v1637_v18 = vadd.f32 %v1630_v58, %v470_v5  ;;  %v9054_v5 = vld [vmem:[%s11857_s5 + $0x3e4] sm:$0xf] }
 0x5b5   :  { %v6916_v47 = vmul.f32 -1.442695, %v1636_v61 }
 0x5b6   :  { %v9536_v25 = vpop.eup %9535  ;;  %2641 = vmatpush.bf16.msrb.mxu3 %v7132_v17 }
 0x5b7   :  { %v9538_v26 = vpop.eup %9537  ;;  %v1641_v30 = vadd.f32 1.0, %v9536_v25  ;;  %9539 = vpow2.f32 %v6916_v47 }
 0x5b8   :  { %v1660_v35 = vadd.f32 1.0, %v9538_v26 }
 0x5b9   :  { %9541 = vrcp.f32 %v1641_v30  ;;  %v1653_v0 = vand.u32 2147483648, %v1641_v30  ;;  %v1651_v38 = vand.u32 2147483647, %v1641_v30  ;;  %vm1647_vm6 = vweird.f32 %v1641_v30 }
 0x5ba   :  { %9543 = vrcp.f32 %v1660_v35  ;;  %v1619_v51 = vpop.f32.mrf.mxu2  ;;  %v1632_v52 = vpop.f32.mrf.mxu3  ;;  %2642 = vmatpush.bf16.msrb.mxu3 %v7124_v34  ;;  %v1672_v62 = vand.u32 2147483648, %v1660_v35  ;;  %v1670_v24 = vand.u32 2147483647, %v1660_v35  ;;  %vm1666_vm7 = vweird.f32 %v1660_v35 }
 0x5bb   :  { %v2502_v63 = vpop.f32.mrf.mxu0  ;;  %v2515_v57 = vpop.f32.mrf.mxu1  ;;  %v1654_v27 = vor.u32 1.1754944e-38, %v1653_v0  ;;  %vm1652_vm10 = vcmp.eq.f32.partialorder %v1651_v38, 8.507059e+37 }
 0x5bc   :  { %v2503_v1 = vadd.f32 %v2502_v63, %v1849_v46  ;;  %v1673_v22 = vor.u32 1.1754944e-38, %v1672_v62  ;;  %vm1671_vm11 = vcmp.eq.f32.partialorder %v1670_v24, 8.507059e+37  ;;  %v9046_v62 = vld [vmem:[%s11857_s5 + $0x3a4] sm:$0xf]  ;;  %v7377_v24 = vld [vmem:[%s11857_s5 + $0x398] sm:$0xf0] }
 0x5bd   :  { %v9540_v14 = vpop.eup %9539 }
 0x5be   :  { %v11189_v39 = vadd.f32 1.0, %v9540_v14  ;;  %v2516_v11 = vadd.f32 %v2515_v57, %v2503_v1  ;;  %2643 = vmatpush.bf16.msrb.mxu3 %v7116_v42  ;;  %v9056_v1 = vld [vmem:[%s11857_s5 + $0x3f4] sm:$0xf]  ;;  %v7417_v42 = vld [vmem:[%s11857_s5 + $0x3e8] sm:$0xf0] }
 0x5bf   :  { %v9542_v15 = vpop.eup %9541  ;;  %v7428_v14 = vor.u32 %v9056_v1, %v7425_v59  ;;  %v9251_v59 = vld [vmem:[#allocation9 + $0x60c] sm:$0xf] }
 0x5c0   :  { %v9544_v19 = vpop.eup %9543  ;;  %v1643_v8 = vmul.f32 %v9542_v15, %v1641_v30  ;;  %9545 = vrcp.f32 %v11189_v39  ;;  %vm1648_vm4 = vweird.f32 %v9542_v15  ;;  %v1691_v21 = vand.u32 2147483648, %v11189_v39 }
 0x5c1   :  { %v1662_v10 = vmul.f32 %v9544_v19, %v1660_v35  ;;  %9547 = vtanh.f32 %v1637_v18  ;;  %vm1667_vm5 = vweird.f32 %v9544_v19  ;;  %vm1649_vm8 = vmor %vm1647_vm6, %vm1648_vm4  ;;  %vm1685_vm13 = vweird.f32 %v11189_v39  ;;  %v7409_v18 = vld [vmem:[%s11857_s5 + $0x3d8] sm:$0xf0] }
 0x5c2   :  { %v1644_v56 = vsub.f32 1.0, %v1643_v8  ;;  %v2528_v55 = vpop.f32.mrf.mxu2  ;;  %v2541_v43 = vpop.f32.mrf.mxu3  ;;  %vm1668_vm9 = vmor %vm1666_vm7, %vm1667_vm5  ;;  %v1689_v26 = vand.u32 2147483647, %v11189_v39  ;;  %v1692_v34 = vor.u32 1.1754944e-38, %v1691_v21  ;;  %v9050_v8 = vld [vmem:[%s11857_s5 + $0x3c4] sm:$0xf] }
 0x5c3   :  { %v1663_v28 = vsub.f32 1.0, %v1662_v10  ;;  %v2529_v31 = vadd.f32 %v2528_v55, %v2516_v11  ;;  %v2504_v20 = vpop.f32.mrf.mxu0  ;;  %v2517_v44 = vpop.f32.mrf.mxu1  ;;  %v7420_v11 = vor.u32 %v9054_v5, %v7417_v42  ;;  %v7401_v10 = vld [vmem:[%s11857_s5 + $0x3c8] sm:$0xf0]  ;;  %v1850_v55 = vperm.slane %v11175_v16, 1  ;;  %v9234_v5 = vld [vmem:[#allocation9 + $0x57c] sm:$0xf0] }
 0x5c4   :  { %v1645_v45 = vmul.f32 %v9542_v15, %v1644_v56  ;;  %vm1690_vm15 = vcmp.eq.f32.partialorder %v1689_v26, 8.507059e+37  ;;  %v7404_v56 = vor.u32 %v9050_v8, %v7401_v10  ;;  %v7385_v16 = vld [vmem:[%s11857_s5 + $0x3a8] sm:$0xf0]  ;;  %v9218_v42 = vld [vmem:[#allocation9 + $0x504] sm:$0xf] }
 0x5c5   :  { %v1664_v23 = vmul.f32 %v9544_v19, %v1663_v28  ;;  %v2542_v33 = vadd.f32 %v2541_v43, %v2529_v31  ;;  %v9048_v43 = vld [vmem:[%s11857_s5 + $0x3b4] sm:$0xf]  ;;  %v7393_v28 = vld [vmem:[%s11857_s5 + $0x3b8] sm:$0xf0]  ;;  %v7388_v38 = vor.u32 %v9046_v62, %v7385_v16  ;;  %v9219_v10 = vld [vmem:[#allocation9 + $0x50c] sm:$0xf] }
 0x5c6   :  { %v9546_v29 = vpop.eup %9545  ;;  %v1646_v60 = vadd.f32 %v9542_v15, %v1645_v45  ;;  %v7396_v31 = vor.u32 %v9048_v43, %v7393_v28  ;;  %v7943_v43 = vld [vmem:[#allocation9 + $0x400] sm:$0xf]  ;;  %v9203_v62 = vld [vmem:[#allocation9 + $0x484] sm:$0xf0] }
 0x5c7   :  { %v1681_v48 = vmul.f32 %v9546_v29, %v11189_v39  ;;  %v1665_v36 = vadd.f32 %v9544_v19, %v1664_v23  ;;  %v9548_v32 = vpop.eup %9547  ;;  %vm1686_vm12 = vweird.f32 %v9546_v29  ;;  %v9044_v23 = vld [vmem:[%s11857_s5 + $0x394] sm:$0xf]  ;;  %v9202_v28 = vld [vmem:[#allocation9 + $0x47c] sm:$0xf0] }
 0x5c8   :  { %v1650_v40 = vsel %vm1649_vm8, %v9542_v15, %v1646_v60  ;;  %vm1687_vm14 = vmor %vm1685_vm13, %vm1686_vm12  ;;  %v9052_v15 = vld [vmem:[%s11857_s5 + $0x3d4] sm:$0xf] }
 0x5c9   :  { %v1682_v37 = vsub.f32 1.0, %v1681_v48  ;;  %v1655_v41 = vsel %vm1652_vm10, %v1654_v27, %v1650_v40  ;;  %v1669_v49 = vsel %vm1668_vm9, %v9544_v19, %v1665_v36  ;;  %v7412_v19 = vor.u32 %v9052_v15, %v7409_v18  ;;  %v7369_v36 = vld [vmem:[%s11857_s5 + $0x388] sm:$0xf0]  ;;  %v8327_v40 = vld [vmem:[#allocation9 + $0x700] sm:$0xf] }
 0x5ca   :  { %v1674_v50 = vsel %vm1671_vm11, %v1673_v22, %v1669_v49  ;;  %v1697_v54 = vmul.f32 %v9548_v32, %v1655_v41  ;;  %v2530_v58 = vpop.f32.mrf.mxu2  ;;  %v2543_v61 = vpop.f32.mrf.mxu3  ;;  %v7380_v48 = vor.u32 %v9044_v23, %v7377_v24  ;;  %v9298_v32 = vld [vmem:[#allocation9 + $0x77c] sm:$0xf0]  ;;  %v8329_v49 = vld [vmem:[#allocation9 + $0x780] sm:$0xf0]  ;;  %v8079_v15 = vld [vmem:[#allocation9 + $0x508] sm:$0xf] }
 0x5cb   :  { %v1683_v2 = vmul.f32 %v9546_v29, %v1682_v37  ;;  %v1696_v3 = vmul.f32 %v1674_v50, %v10606_v7  ;;  %v9282_v37 = vld [vmem:[#allocation9 + $0x704] sm:$0xf]  ;;  %v8328_v41 = vor.u32 %v9298_v32, %v8327_v40  ;;  %v8335_v50 = vld [vmem:[#allocation9 + $0x708] sm:$0xf]  ;;  %v7953_v23 = vld [vmem:[#allocation9 + $0x488] sm:$0xf0] }
 0x5cc   :  { %v2554_v6 = vpop.f32.mrf.mxu0  ;;  %v2567_v9 = vpop.f32.mrf.mxu1  ;;  %v8332_v61 = vor.u32 %v9282_v37, %v8329_v49  ;;  %v9235_v18 = vld [vmem:[#allocation9 + $0x584] sm:$0xf0]  ;;  %v7815_v24 = vld [vmem:[#allocation9 + $0x300] sm:$0xf]  ;;  %v9155_v32 = vld [vmem:[#allocation9 + $0x30c] sm:$0xf] }
 0x5cd   :  { %v1698_v13 = vadd.f32 %v1697_v54, %v1696_v3  ;;  %v2555_v47 = vadd.f32 %v2554_v6, %v2542_v33  ;;  %v1684_v17 = vadd.f32 %v9546_v29, %v1683_v2  ;;  %v9299_v54 = vld [vmem:[#allocation9 + $0x784] sm:$0xf0]  ;;  %v9283_v3 = vld [vmem:[#allocation9 + $0x70c] sm:$0xf]  ;;  %4320 = vmatpush.bf16.msrb.mxu0 %v8328_v41  ;;  %v8080_v8 = vor.u32 %v9235_v18, %v8079_v15  ;;  %v7433_v15 = vld [vmem:[#allocation9 + $0x80] sm:$0xf0] }
 0x5ce   :  { %v8336_v2 = vor.u32 %v9299_v54, %v8335_v50  ;;  %v8337_v6 = vld [vmem:[#allocation9 + $0x788] sm:$0xf0]  ;;  %4333 = vmatpush.bf16.msrb.mxu1 %v8332_v61  ;;  %v9171_v40 = vld [vmem:[#allocation9 + $0x384] sm:$0xf0]  ;;  %v7687_v50 = vld [vmem:[#allocation9 + $0x200] sm:$0xf] }
 0x5cf   :  { %9549 = vtanh.f32 %v1698_v13  ;;  %v2568_v25 = vadd.f32 %v2567_v9, %v2555_v47  ;;  %v1688_v30 = vsel %vm1687_vm14, %v9546_v29, %v1684_v17  ;;  %v8340_v9 = vor.u32 %v9283_v3, %v8337_v6  ;;  %v7825_v41 = vld [vmem:[#allocation9 + $0x388] sm:$0xf0]  ;;  %v9138_v54 = vld [vmem:[#allocation9 + $0x27c] sm:$0xf0]  ;;  %v7695_v3 = vld [vmem:[#allocation9 + $0x208] sm:$0xf] }
 0x5d0   :  { %v1693_v63 = vsel %vm1690_vm15, %v1692_v34, %v1688_v30  ;;  %4346 = vmatpush.bf16.msrb.mxu2 %v8336_v2  ;;  %v8199_v30 = vld [vmem:[#allocation9 + $0x600] sm:$0xf]  ;;  %v7828_v49 = vor.u32 %v9155_v32, %v7825_v41  ;;  %v7688_v61 = vor.u32 %v9138_v54, %v7687_v50  ;;  %v7689_v2 = vld [vmem:[#allocation9 + $0x280] sm:$0xf0]  ;;  %v9139_v6 = vld [vmem:[#allocation9 + $0x284] sm:$0xf0] }
 0x5d1   :  { %v9266_v34 = vld [vmem:[#allocation9 + $0x67c] sm:$0xf0]  ;;  %v7439_v18 = vld [vmem:[#allocation9 + $0x8] sm:$0xf]  ;;  %v9269_v32 = vld [vmem:[#allocation9 + $0x694] sm:$0xf0] }
 0x5d2   :  { %v8225_v41 = vld [vmem:[#allocation9 + $0x698] sm:$0xf0] }
 0x5d4   :  { %v2556_v7 = vpop.f32.mrf.mxu0  ;;  %v2569_v51 = vpop.f32.mrf.mxu1 }
 0x5d5   :  { %v2580_v35 = vpop.f32.mrf.mxu2  ;;  %v9550_v52 = vpop.eup %9549  ;;  %v8200_v7 = vor.u32 %v9266_v34, %v8199_v30  ;;  %v8201_v51 = vld [vmem:[#allocation9 + $0x680] sm:$0xf0]  ;;  %v7559_v34 = vld [vmem:[#allocation9 + $0x100] sm:$0xf] }
 0x5d6   :  { %v11197_v46 = vadd.f32 %v2580_v35, %v2568_v25  ;;  %v1700_v57 = vmul.f32 %v9550_v52, %v1693_v63  ;;  %v9250_v35 = vld [vmem:[#allocation9 + $0x604] sm:$0xf]  ;;  %v8207_v52 = vld [vmem:[#allocation9 + $0x608] sm:$0xf] }
 0x5d7   :  { %v9267_v63 = vld [vmem:[#allocation9 + $0x684] sm:$0xf0]  ;;  %4321 = vmatpush.bf16.msrb.mxu0 %v8200_v7  ;;  %v9090_v7 = vld [vmem:[#allocation9 + $0x104] sm:$0xf] }
 0x5d8   :  { %v1701_v12 = vmax.f32 %v1700_v57, 0.0  ;;  %v8204_v57 = vor.u32 %v9250_v35, %v8201_v51  ;;  %v8208_v1 = vor.u32 %v9267_v63, %v8207_v52  ;;  %v9106_v35 = vld [vmem:[#allocation9 + $0x17c] sm:$0xf0]  ;;  %v7561_v52 = vld [vmem:[#allocation9 + $0x180] sm:$0xf0] }
 0x5d9   :  { %v7560_v51 = vor.u32 %v9106_v35, %v7559_v34  ;;  %v7567_v63 = vld [vmem:[#allocation9 + $0x108] sm:$0xf]  ;;  %v9221_v35 = vld [vmem:[#allocation9 + $0x51c] sm:$0xf] }
 0x5da   :  { %v1718_v4 = vpack.c.bf16 %v1701_v12, %v1701_v12  ;;  %v8209_v12 = vld [vmem:[#allocation9 + $0x688] sm:$0xf0]  ;;  %4334 = vmatpush.bf16.msrb.mxu1 %v8204_v57  ;;  %4347 = vmatpush.bf16.msrb.mxu2 %v8208_v1  ;;  %v9107_v57 = vld [vmem:[#allocation9 + $0x184] sm:$0xf0]  ;;  %v7564_v1 = vor.u32 %v9090_v7, %v7561_v52  ;;  %v8097_v7 = vld [vmem:[#allocation9 + $0x598] sm:$0xf0] }
 0x5db   :  { %v9204_v52 = vld [vmem:[#allocation9 + $0x48c] sm:$0xf0] }
 0x5dc   :  { %2592 = vmatmul.bf16.vlgmr.msra.gmra.mxu3 %v1718_v4 }
 0x5dd   :  { %v2582_v39 = vpop.f32.mrf.mxu2  ;;  %2688 = vmatpush.bf16.msra.mxu3 %v7428_v14  ;;  %v8212_v14 = vor.u32 %v9251_v59, %v8209_v12  ;;  %v7568_v59 = vor.u32 %v9107_v57, %v7567_v63  ;;  %v9091_v12 = vld [vmem:[#allocation9 + $0x10c] sm:$0xf]  ;;  %v9188_v57 = vld [vmem:[#allocation9 + $0x414] sm:$0xf] }
 0x5de   :  { %4348 = vmatpush.bf16.msrb.mxu2 %v8080_v8 }
 0x5e1   :  { %2689 = vmatpush.bf16.msra.mxu3 %v7420_v11  ;;  %v8073_v11 = vld [vmem:[#allocation9 + $0x580] sm:$0xf0] }
 0x5e5   :  { %2690 = vmatpush.bf16.msra.mxu3 %v7412_v19  ;;  %v8076_v19 = vor.u32 %v9218_v42, %v8073_v11  ;;  %v9074_v42 = vld [vmem:[#allocation9 + $0x7c] sm:$0xf0] }
 0x5e7   :  { %4335 = vmatpush.bf16.msrb.mxu1 %v8076_v19  ;;  %v9075_v19 = vld [vmem:[#allocation9 + $0x84] sm:$0xf0] }
 0x5e9   :  { %2691 = vmatpush.bf16.msra.mxu3 %v7404_v56  ;;  %v8081_v56 = vld [vmem:[#allocation9 + $0x588] sm:$0xf0] }
 0x5ec   :  { %v2606_v0 = vpop.f32.mrf.mxu0  ;;  %v2619_v44 = vpop.f32.mrf.mxu1  ;;  %2644 = vmatmul.bf16.vlgmr.msrb.gmra.mxu3 %v10716_v53  ;;  %v9042_v53 = vld [vmem:[%s11857_s5 + $0x384] sm:$0xf] }
 0x5ed   :  { %v2607_v20 = vadd.f32 %v2606_v0, %v1850_v55  ;;  %2692 = vmatpush.bf16.msra.mxu3 %v7396_v31  ;;  %v7372_v22 = vor.u32 %v9042_v53, %v7369_v36  ;;  %v8084_v55 = vor.u32 %v9219_v10, %v8081_v56  ;;  %v9186_v0 = vld [vmem:[#allocation9 + $0x404] sm:$0xf]  ;;  %v7944_v31 = vor.u32 %v9202_v28, %v7943_v43  ;;  %v9059_v56 = vld [vmem:[#allocation9 + $0xc] sm:$0xf]  ;;  %v8343_v43 = vld [vmem:[#allocation9 + $0x710] sm:$0xf] }
 0x5ee   :  { %v7440_v10 = vor.u32 %v9075_v19, %v7439_v18  ;;  %v9172_v18 = vld [vmem:[#allocation9 + $0x38c] sm:$0xf0]  ;;  %v9156_v19 = vld [vmem:[#allocation9 + $0x314] sm:$0xf] }
 0x5ef   :  { %v2620_v45 = vadd.f32 %v2619_v44, %v2607_v20  ;;  %v7945_v20 = vld [vmem:[#allocation9 + $0x480] sm:$0xf0]  ;;  %v7951_v44 = vld [vmem:[#allocation9 + $0x408] sm:$0xf] }
 0x5f0   :  { %v7948_v16 = vor.u32 %v9186_v0, %v7945_v20  ;;  %v9300_v0 = vld [vmem:[#allocation9 + $0x78c] sm:$0xf0]  ;;  %v8345_v20 = vld [vmem:[#allocation9 + $0x790] sm:$0xf0] }
 0x5f1   :  { %2693 = vmatpush.bf16.msra.mxu3 %v7388_v38  ;;  %v9187_v38 = vld [vmem:[#allocation9 + $0x40c] sm:$0xf] }
 0x5f2   :  { %4336 = vmatpush.bf16.msrb.mxu1 %v7948_v16  ;;  %v8351_v16 = vld [vmem:[#allocation9 + $0x718] sm:$0xf] }
 0x5f4   :  { %v2608_v60 = vpop.f32.mrf.mxu0  ;;  %v2621_v27 = vpop.f32.mrf.mxu1 }
 0x5f5   :  { %v2632_v33 = vpop.f32.mrf.mxu2  ;;  %2694 = vmatpush.bf16.msra.mxu3 %v7380_v48  ;;  %v9170_v60 = vld [vmem:[#allocation9 + $0x37c] sm:$0xf0]  ;;  %v9154_v48 = vld [vmem:[#allocation9 + $0x304] sm:$0xf] }
 0x5f6   :  { %v11243_v29 = vadd.f32 %v2632_v33, %v2620_v45  ;;  %v7952_v45 = vor.u32 %v9203_v62, %v7951_v44  ;;  %v7956_v33 = vor.u32 %v9187_v38, %v7953_v23  ;;  %v7817_v27 = vld [vmem:[#allocation9 + $0x380] sm:$0xf0]  ;;  %v7816_v53 = vor.u32 %v9170_v60, %v7815_v24  ;;  %v9285_v38 = vld [vmem:[#allocation9 + $0x71c] sm:$0xf]  ;;  %v9268_v60 = vld [vmem:[#allocation9 + $0x68c] sm:$0xf0] }
 0x5f7   :  { %v7820_v36 = vor.u32 %v9154_v48, %v7817_v27  ;;  %v8344_v44 = vor.u32 %v9300_v0, %v8343_v43  ;;  %v8353_v24 = vld [vmem:[#allocation9 + $0x798] sm:$0xf0] }
 0x5f8   :  { %4349 = vmatpush.bf16.msrb.mxu2 %v7952_v45  ;;  %v9301_v45 = vld [vmem:[#allocation9 + $0x794] sm:$0xf0]  ;;  %v8356_v48 = vor.u32 %v9285_v38, %v8353_v24  ;;  %v9157_v0 = vld [vmem:[#allocation9 + $0x31c] sm:$0xf]  ;;  %v7705_v38 = vld [vmem:[#allocation9 + $0x290] sm:$0xf0] }
 0x5f9   :  { %2695 = vmatpush.bf16.msra.mxu3 %v7372_v22  ;;  %v7823_v22 = vld [vmem:[#allocation9 + $0x308] sm:$0xf]  ;;  %4337 = vmatpush.bf16.msrb.mxu1 %v7820_v36  ;;  %v8352_v23 = vor.u32 %v9301_v45, %v8351_v16  ;;  %v8217_v36 = vld [vmem:[#allocation9 + $0x690] sm:$0xf0]  ;;  %v9141_v24 = vld [vmem:[#allocation9 + $0x294] sm:$0xf0] }
 0x5fa   :  { %v7824_v37 = vor.u32 %v9171_v40, %v7823_v22  ;;  %v8223_v22 = vld [vmem:[#allocation9 + $0x618] sm:$0xf]  ;;  %v9124_v16 = vld [vmem:[#allocation9 + $0x214] sm:$0xf] }
 0x5fb   :  { %v8224_v50 = vor.u32 %v9269_v32, %v8223_v22  ;;  %v7575_v22 = vld [vmem:[#allocation9 + $0x110] sm:$0xf]  ;;  %v9092_v32 = vld [vmem:[#allocation9 + $0x114] sm:$0xf] }
 0x5fc   :  { %2696 = vmatmul.bf16.vlgmr.msra.gmra.mxu3 %v1718_v4  ;;  %v8071_v4 = vld [vmem:[#allocation9 + $0x500] sm:$0xf]  ;;  %4350 = vmatpush.bf16.msrb.mxu2 %v7824_v37  ;;  %v9253_v37 = vld [vmem:[#allocation9 + $0x61c] sm:$0xf] }
 0x5fd   :  { %v2634_v58 = vpop.f32.mrf.mxu2  ;;  %4359 = vmatpush.bf16.msrb.mxu3 %v8340_v9  ;;  %v8072_v39 = vor.u32 %v9234_v5, %v8071_v4  ;;  %v7431_v5 = vld [vmem:[#allocation9] sm:$0xf]  ;;  %v8228_v54 = vor.u32 %v9253_v37, %v8225_v41  ;;  %v7577_v41 = vld [vmem:[#allocation9 + $0x190] sm:$0xf0] }
 0x5fe   :  { %v9122_v58 = vld [vmem:[#allocation9 + $0x204] sm:$0xf]  ;;  %v7432_v11 = vor.u32 %v9074_v42, %v7431_v5  ;;  %v7969_v5 = vld [vmem:[#allocation9 + $0x498] sm:$0xf0] }
 0x5ff   :  { %4322 = vmatpush.bf16.msrb.mxu0 %v8072_v39  ;;  %v7692_v9 = vor.u32 %v9122_v58, %v7689_v2  ;;  %v9058_v39 = vld [vmem:[#allocation9 + $0x4] sm:$0xf]  ;;  %v9236_v2 = vld [vmem:[#allocation9 + $0x58c] sm:$0xf0] }
 0x600   :  { %v7436_v8 = vor.u32 %v9058_v39, %v7433_v15  ;;  %v7831_v15 = vld [vmem:[#allocation9 + $0x310] sm:$0xf] }
 0x601   :  { %4360 = vmatpush.bf16.msrb.mxu3 %v8212_v14  ;;  %4338 = vmatpush.bf16.msrb.mxu1 %v7692_v9  ;;  %v7569_v14 = vld [vmem:[#allocation9 + $0x188] sm:$0xf0]  ;;  %v8089_v9 = vld [vmem:[#allocation9 + $0x590] sm:$0xf0] }
 0x602   :  { %v7572_v4 = vor.u32 %v9091_v12, %v7569_v14  ;;  %v9205_v14 = vld [vmem:[#allocation9 + $0x494] sm:$0xf0] }
 0x603   :  { %4323 = vmatpush.bf16.msrb.mxu0 %v7944_v31  ;;  %v9284_v31 = vld [vmem:[#allocation9 + $0x714] sm:$0xf] }
 0x604   :  { %v8348_v62 = vor.u32 %v9284_v31, %v8345_v20  ;;  %v7841_v31 = vld [vmem:[#allocation9 + $0x398] sm:$0xf0] }
 0x605   :  { %4361 = vmatpush.bf16.msrb.mxu3 %v8084_v55  ;;  %4339 = vmatpush.bf16.msrb.mxu1 %v7564_v1  ;;  %v7441_v55 = vld [vmem:[#allocation9 + $0x88] sm:$0xf0]  ;;  %v7961_v1 = vld [vmem:[#allocation9 + $0x490] sm:$0xf0]  ;;  %v7844_v20 = vor.u32 %v9157_v0, %v7841_v31 }
 0x606   :  { %v7444_v28 = vor.u32 %v9059_v56, %v7441_v55  ;;  %v7964_v12 = vor.u32 %v9188_v57, %v7961_v1  ;;  %v7839_v56 = vld [vmem:[#allocation9 + $0x318] sm:$0xf]  ;;  %v8369_v0 = vld [vmem:[#allocation9 + $0x7a8] sm:$0xf0] }
 0x607   :  { %4324 = vmatpush.bf16.msrb.mxu0 %v7816_v53  ;;  %v9252_v53 = vld [vmem:[#allocation9 + $0x614] sm:$0xf]  ;;  %v9173_v55 = vld [vmem:[#allocation9 + $0x394] sm:$0xf0] }
 0x608   :  { %v8220_v40 = vor.u32 %v9252_v53, %v8217_v36 }
 0x609   :  { %4362 = vmatpush.bf16.msrb.mxu3 %v7956_v33  ;;  %4340 = vmatpush.bf16.msrb.mxu1 %v7436_v8  ;;  %v8215_v33 = vld [vmem:[#allocation9 + $0x610] sm:$0xf]  ;;  %v7832_v8 = vor.u32 %v9172_v18, %v7831_v15  ;;  %v2705_v15 = vld [vmem:[%s11853_s1] sm:$0xff] }
 0x60a   :  { %v8216_v27 = vor.u32 %v9268_v60, %v8215_v33  ;;  %v7708_v33 = vor.u32 %v9124_v16, %v7705_v38  ;;  %v9270_v16 = vld [vmem:[#allocation9 + $0x69c] sm:$0xf0] }
 0x60b   :  { %4325 = vmatpush.bf16.msrb.mxu0 %v7688_v61  ;;  %v8087_v61 = vld [vmem:[#allocation9 + $0x510] sm:$0xf] }
 0x60c   :  { %v11251_v13 = vpop.f32.mrf.mxu0  ;;  %v11253_v47 = vpop.f32.mrf.mxu1 }
 0x60d   :  { %4363 = vmatpush.bf16.msrb.mxu3 %v7828_v49  ;;  %4385 = vmatpush.bf16.msra.mxu1 %v8348_v62  ;;  %v9140_v62 = vld [vmem:[#allocation9 + $0x28c] sm:$0xf0] }
 0x60f   :  { %4326 = vmatpush.bf16.msrb.mxu0 %v7560_v51  ;;  %v8100_v51 = vor.u32 %v9221_v35, %v8097_v7  ;;  %v7455_v35 = vld [vmem:[#allocation9 + $0x18] sm:$0xf] }
 0x610   :  { %v9077_v7 = vld [vmem:[#allocation9 + $0x94] sm:$0xf0] }
 0x611   :  { %4386 = vmatpush.bf16.msra.mxu1 %v8220_v40  ;;  %v9108_v40 = vld [vmem:[#allocation9 + $0x18c] sm:$0xf0]  ;;  %v7456_v57 = vor.u32 %v9077_v7, %v7455_v35  ;;  %v9207_v35 = vld [vmem:[#allocation9 + $0x4a4] sm:$0xf0]  ;;  %v9191_v7 = vld [vmem:[#allocation9 + $0x42c] sm:$0xf] }
 0x612   :  { %v7576_v37 = vor.u32 %v9108_v40, %v7575_v22 }
 0x613   :  { %v11255_v17 = vpop.f32.mrf.mxu2  ;;  %4327 = vmatpush.bf16.msrb.mxu0 %v7432_v11 }
 0x614   :  { %v2660_v21 = vpop.f32.mrf.mxu0  ;;  %v2673_v25 = vpop.f32.mrf.mxu1 }
 0x615   :  { %v7696_v21 = vor.u32 %v9139_v6, %v7695_v3  ;;  %v9123_v25 = vld [vmem:[#allocation9 + $0x20c] sm:$0xf]  ;;  %v9220_v3 = vld [vmem:[#allocation9 + $0x514] sm:$0xf]  ;;  %v8088_v6 = vor.u32 %v9236_v2, %v8087_v61  ;;  %v7580_v61 = vor.u32 %v9092_v32, %v7577_v41  ;;  %v9222_v32 = vld [vmem:[#allocation9 + $0x524] sm:$0xf] }
 0x616   :  { %v8111_v41 = vld [vmem:[#allocation9 + $0x528] sm:$0xf] }
 0x617   :  { %4351 = vmatpush.bf16.msrb.mxu2 %v7696_v21  ;;  %4372 = vmatpush.bf16.msra.mxu0 %v8344_v44  ;;  %v8095_v21 = vld [vmem:[#allocation9 + $0x518] sm:$0xf]  ;;  %v7703_v44 = vld [vmem:[#allocation9 + $0x210] sm:$0xf] }
 0x618   :  { %v7704_v45 = vor.u32 %v9140_v62, %v7703_v44  ;;  %v8231_v62 = vld [vmem:[#allocation9 + $0x620] sm:$0xf] }
 0x61b   :  { %v2686_v26 = vpop.f32.mrf.mxu2  ;;  %4352 = vmatpush.bf16.msrb.mxu2 %v7568_v59  ;;  %4373 = vmatpush.bf16.msra.mxu0 %v8216_v27  ;;  %v7967_v59 = vld [vmem:[#allocation9 + $0x418] sm:$0xf]  ;;  %v7713_v27 = vld [vmem:[#allocation9 + $0x298] sm:$0xf0] }
 0x61c   :  { %v7697_v26 = vld [vmem:[#allocation9 + $0x288] sm:$0xf0]  ;;  %v7968_v39 = vor.u32 %v9205_v14, %v7967_v59 }
 0x61d   :  { %v7700_v30 = vor.u32 %v9123_v25, %v7697_v26  ;;  %v9237_v25 = vld [vmem:[#allocation9 + $0x594] sm:$0xf0] }
 0x61e   :  { %v8096_v34 = vor.u32 %v9237_v25, %v8095_v21  ;;  %v7447_v21 = vld [vmem:[#allocation9 + $0x10] sm:$0xf] }
 0x61f   :  { %4364 = vmatpush.bf16.msrb.mxu3 %v7700_v30  ;;  %4353 = vmatpush.bf16.msrb.mxu2 %v7440_v10  ;;  %v8092_v30 = vor.u32 %v9220_v3, %v8089_v9  ;;  %v7833_v10 = vld [vmem:[#allocation9 + $0x390] sm:$0xf0]  ;;  %v9093_v3 = vld [vmem:[#allocation9 + $0x11c] sm:$0xf]  ;;  %v9076_v25 = vld [vmem:[#allocation9 + $0x8c] sm:$0xf0] }
 0x620   :  { %4374 = vmatpush.bf16.msra.mxu0 %v8088_v6  ;;  %v7836_v43 = vor.u32 %v9156_v19, %v7833_v10  ;;  %v7585_v6 = vld [vmem:[#allocation9 + $0x198] sm:$0xf0]  ;;  %v8359_v19 = vld [vmem:[#allocation9 + $0x720] sm:$0xf]  ;;  %v8361_v10 = vld [vmem:[#allocation9 + $0x7a0] sm:$0xf0] }
 0x621   :  { %4387 = vmatpush.bf16.msra.mxu1 %v8092_v30  ;;  %v7588_v9 = vor.u32 %v9093_v3, %v7585_v6  ;;  %v9060_v30 = vld [vmem:[#allocation9 + $0x14] sm:$0xf]  ;;  %v7975_v3 = vld [vmem:[#allocation9 + $0x420] sm:$0xf] }
 0x622   :  { %v9206_v6 = vld [vmem:[#allocation9 + $0x49c] sm:$0xf0] }
 0x623   :  { %4365 = vmatpush.bf16.msrb.mxu3 %v7572_v4  ;;  %4398 = vmatpush.bf16.msra.mxu2 %v8352_v23  ;;  %v9189_v4 = vld [vmem:[#allocation9 + $0x41c] sm:$0xf]  ;;  %v7711_v23 = vld [vmem:[#allocation9 + $0x218] sm:$0xf] }
 0x624   :  { %v7972_v11 = vor.u32 %v9189_v4, %v7969_v5  ;;  %v7712_v60 = vor.u32 %v9141_v24, %v7711_v23  ;;  %v9254_v23 = vld [vmem:[#allocation9 + $0x624] sm:$0xf] }
 0x625   :  { %4388 = vmatpush.bf16.msra.mxu1 %v7964_v12  ;;  %v8233_v24 = vld [vmem:[#allocation9 + $0x6a0] sm:$0xf0] }
 0x627   :  { %4366 = vmatpush.bf16.msrb.mxu3 %v7444_v28  ;;  %4399 = vmatpush.bf16.msra.mxu2 %v8224_v50  ;;  %v7840_v28 = vor.u32 %v9173_v55, %v7839_v56  ;;  %v9109_v50 = vld [vmem:[#allocation9 + $0x194] sm:$0xf0]  ;;  %v8367_v56 = vld [vmem:[#allocation9 + $0x728] sm:$0xf] }
 0x629   :  { %4389 = vmatpush.bf16.msra.mxu1 %v7836_v43  ;;  %v9303_v43 = vld [vmem:[#allocation9 + $0x7a4] sm:$0xf0] }
 0x62b   :  { %4411 = vmatpush.bf16.msra.mxu3 %v8356_v48  ;;  %4400 = vmatpush.bf16.msra.mxu2 %v8096_v34  ;;  %v9125_v48 = vld [vmem:[#allocation9 + $0x21c] sm:$0xf]  ;;  %v7449_v34 = vld [vmem:[#allocation9 + $0x90] sm:$0xf0] }
 0x62c   :  { %v7716_v36 = vor.u32 %v9125_v48, %v7713_v27  ;;  %v8232_v48 = vor.u32 %v9270_v16, %v8231_v62  ;;  %v8236_v27 = vor.u32 %v9254_v23, %v8233_v24  ;;  %v9094_v16 = vld [vmem:[#allocation9 + $0x124] sm:$0xf]  ;;  %v9111_v23 = vld [vmem:[#allocation9 + $0x1a4] sm:$0xf0]  ;;  %v9095_v24 = vld [vmem:[#allocation9 + $0x12c] sm:$0xf] }
 0x62d   :  { %4390 = vmatpush.bf16.msra.mxu1 %v7708_v33  ;;  %v8239_v33 = vld [vmem:[#allocation9 + $0x628] sm:$0xf] }
 0x62f   :  { %4412 = vmatpush.bf16.msra.mxu3 %v8228_v54  ;;  %4401 = vmatpush.bf16.msra.mxu2 %v7968_v39 }
 0x631   :  { %4391 = vmatpush.bf16.msra.mxu1 %v7580_v61 }
 0x633   :  { %4413 = vmatpush.bf16.msra.mxu3 %v8100_v51  ;;  %4402 = vmatpush.bf16.msra.mxu2 %v7840_v28  ;;  %v7448_v51 = vor.u32 %v9076_v25, %v7447_v21  ;;  %v9287_v28 = vld [vmem:[#allocation9 + $0x72c] sm:$0xf]  ;;  %v9190_v25 = vld [vmem:[#allocation9 + $0x424] sm:$0xf] }
 0x634   :  { %v8372_v38 = vor.u32 %v9287_v28, %v8369_v0  ;;  %v7591_v0 = vld [vmem:[#allocation9 + $0x120] sm:$0xf] }
 0x637   :  { %4414 = vmatpush.bf16.msra.mxu3 %v7972_v11  ;;  %4403 = vmatpush.bf16.msra.mxu2 %v7712_v60  ;;  %v8241_v60 = vld [vmem:[#allocation9 + $0x6a8] sm:$0xf0] }
 0x63b   :  { %4415 = vmatpush.bf16.msra.mxu3 %v7844_v20 }
 0x63f   :  { %4416 = vmatpush.bf16.msra.mxu3 %v7716_v36  ;;  %v9238_v36 = vld [vmem:[#allocation9 + $0x59c] sm:$0xf0] }
 0x643   :  { %4417 = vmatpush.bf16.msra.mxu3 %v7588_v9 }
 0x65f   :  { %v2593_v49 = vpop.f32.mrf.mxu3 }
 0x660   :  { %v11258_v58 = vadd.f32 %v2593_v49, %v11197_v46  ;;  %v7959_v46 = vld [vmem:[#allocation9 + $0x410] sm:$0xf]  ;;  %v7583_v49 = vld [vmem:[#allocation9 + $0x118] sm:$0xf] }
 0x661   :  { %v7960_v63 = vor.u32 %v9204_v52, %v7959_v46  ;;  %v7584_v2 = vor.u32 %v9109_v50, %v7583_v49  ;;  %v7452_v46 = vor.u32 %v9060_v30, %v7449_v34  ;;  %v9061_v52 = vld [vmem:[#allocation9 + $0x1c] sm:$0xf]  ;;  %v9239_v49 = vld [vmem:[#allocation9 + $0x5a4] sm:$0xf0]  ;;  %v9223_v50 = vld [vmem:[#allocation9 + $0x52c] sm:$0xf] }
 0x662   :  { %v2701_v26 = vmax.f32 %v11258_v58, 0.0  ;;  %v9271_v58 = vld [vmem:[#allocation9 + $0x6a4] sm:$0xf0]  ;;  %v8112_v9 = vor.u32 %v9239_v49, %v8111_v41  ;;  %v7977_v30 = vld [vmem:[#allocation9 + $0x4a0] sm:$0xf0] }
 0x663   :  { %4375 = vmatpush.bf16.msra.mxu0 %v7960_v63  ;;  %v7457_v63 = vld [vmem:[#allocation9 + $0x98] sm:$0xf0]  ;;  %4404 = vmatpush.bf16.msra.mxu2 %v7584_v2  ;;  %v8240_v22 = vor.u32 %v9271_v58, %v8239_v33  ;;  %v7983_v34 = vld [vmem:[#allocation9 + $0x428] sm:$0xf]  ;;  %v7601_v33 = vld [vmem:[#allocation9 + $0x1a8] sm:$0xf0] }
 0x664   :  { %2703 = vst [vmem:[%s11865_s13] sm:$0xff] %v2701_v26  ;;  %v7460_v59 = vor.u32 %v9061_v52, %v7457_v63  ;;  %4392 = vmatpush.bf16.msra.mxu1 %v7452_v46  ;;  %v7976_v46 = vor.u32 %v9206_v6, %v7975_v3  ;;  %v7980_v52 = vor.u32 %v9190_v25, %v7977_v30  ;;  %v7847_v63 = vld [vmem:[#allocation9 + $0x320] sm:$0xf]  ;;  %v7473_v41 = vld [vmem:[#allocation9 + $0xa8] sm:$0xf0]  ;;  %v8375_v49 = vld [vmem:[#allocation9 + $0x730] sm:$0xf] }
 0x665   :  { %v7463_v58 = vld [vmem:[#allocation9 + $0x20] sm:$0xf]  ;;  %v8385_v25 = vld [vmem:[#allocation9 + $0x7b8] sm:$0xf0] }
 0x666   :  { %4418 = vmatpush.bf16.msra.mxu3 %v7460_v59  ;;  %v9158_v59 = vld [vmem:[#allocation9 + $0x324] sm:$0xf] }
 0x667   :  { %v2595_v42 = vpop.f32.mrf.mxu3  ;;  %4376 = vmatpush.bf16.msra.mxu0 %v7832_v8  ;;  %4405 = vmatpush.bf16.msra.mxu2 %v7456_v57  ;;  %v9302_v8 = vld [vmem:[#allocation9 + $0x79c] sm:$0xf0]  ;;  %v7984_v57 = vor.u32 %v9207_v35, %v7983_v34 }
 0x668   :  { %v8360_v20 = vor.u32 %v9302_v8, %v8359_v19  ;;  %v9126_v19 = vld [vmem:[#allocation9 + $0x224] sm:$0xf] }
 0x669   :  { %v7721_v8 = vld [vmem:[#allocation9 + $0x2a0] sm:$0xf0] }
 0x66a   :  { %v7724_v28 = vor.u32 %v9126_v19, %v7721_v8  ;;  %v9241_v19 = vld [vmem:[#allocation9 + $0x5b4] sm:$0xf0]  ;;  %v9225_v8 = vld [vmem:[#allocation9 + $0x53c] sm:$0xf] }
 0x66b   :  { %4377 = vmatpush.bf16.msra.mxu0 %v7704_v45  ;;  %v8368_v45 = vor.u32 %v9303_v43, %v8367_v56  ;;  %v9127_v56 = vld [vmem:[#allocation9 + $0x22c] sm:$0xf] }
 0x66f   :  { %v2645_v53 = vpop.f32.mrf.mxu3  ;;  %4378 = vmatpush.bf16.msra.mxu0 %v7576_v37  ;;  %v8105_v37 = vld [vmem:[#allocation9 + $0x5a0] sm:$0xf0] }
 0x670   :  { %v2646_v54 = vadd.f32 %v2645_v53, %v11243_v29  ;;  %v8103_v53 = vld [vmem:[#allocation9 + $0x520] sm:$0xf]  ;;  %v8108_v2 = vor.u32 %v9222_v32, %v8105_v37  ;;  %v9079_v32 = vld [vmem:[#allocation9 + $0xa4] sm:$0xf0]  ;;  %v9063_v37 = vld [vmem:[#allocation9 + $0x2c] sm:$0xf] }
 0x671   :  { %v8104_v61 = vor.u32 %v9238_v36, %v8103_v53  ;;  %v7465_v53 = vld [vmem:[#allocation9 + $0xa0] sm:$0xf0]  ;;  %v7476_v34 = vor.u32 %v9063_v37, %v7473_v41  ;;  %v7735_v41 = vld [vmem:[#allocation9 + $0x230] sm:$0xf] }
 0x672   :  { %v2659_v29 = vadd.f32 %v11251_v13, %v2646_v54  ;;  %v8113_v54 = vld [vmem:[#allocation9 + $0x5a8] sm:$0xf0] }
 0x673   :  { %4379 = vmatpush.bf16.msra.mxu0 %v7448_v51  ;;  %v8116_v21 = vor.u32 %v9223_v50, %v8113_v54  ;;  %v7985_v51 = vld [vmem:[#allocation9 + $0x4a8] sm:$0xf0]  ;;  %v9304_v50 = vld [vmem:[#allocation9 + $0x7ac] sm:$0xf0]  ;;  %v9288_v54 = vld [vmem:[#allocation9 + $0x734] sm:$0xf] }
 0x674   :  { %v2672_v12 = vadd.f32 %v11253_v47, %v2659_v29  ;;  %v9174_v29 = vld [vmem:[#allocation9 + $0x39c] sm:$0xf0]  ;;  %v8376_v35 = vor.u32 %v9304_v50, %v8375_v49  ;;  %v9144_v49 = vld [vmem:[#allocation9 + $0x2ac] sm:$0xf0] }
 0x676   :  { %v2685_v14 = vadd.f32 %v11255_v17, %v2672_v12  ;;  %v9286_v17 = vld [vmem:[#allocation9 + $0x724] sm:$0xf] }
 0x677   :  { %v2647_v1 = vpop.f32.mrf.mxu3  ;;  %v8364_v44 = vor.u32 %v9286_v17, %v8361_v10  ;;  %v7849_v12 = vld [vmem:[#allocation9 + $0x3a0] sm:$0xf0]  ;;  %v7727_v17 = vld [vmem:[#allocation9 + $0x228] sm:$0xf] }
 0x678   :  { %v7988_v1 = vor.u32 %v9191_v7, %v7985_v51  ;;  %v9143_v10 = vld [vmem:[#allocation9 + $0x2a4] sm:$0xf0]  ;;  %v8247_v51 = vld [vmem:[#allocation9 + $0x630] sm:$0xf] }
 0x67f   :  { %v2697_v4 = vpop.f32.mrf.mxu3 }
 0x680   :  { %v2698_v5 = vadd.f32 %v2697_v4, %v2685_v14  ;;  %v7855_v14 = vld [vmem:[#allocation9 + $0x328] sm:$0xf] }
 0x681   :  { %v9175_v4 = vld [vmem:[#allocation9 + $0x3a4] sm:$0xf0] }
 0x682   :  { %v2702_v42 = vmax.f32 %v2698_v5, 0.0  ;;  %v9159_v5 = vld [vmem:[#allocation9 + $0x32c] sm:$0xf] }
 0x684   :  { %2704 = vst [vmem:[%s11865_s13 + $0x8] sm:$0xff] %v2702_v42  ;;  %v2706_v13 = vmul.f32 0.5, %v2702_v42  ;;  %v7857_v42 = vld [vmem:[#allocation9 + $0x3a8] sm:$0xf0] }
 0x686   :  { %v2707_v39 = vmul.f32 1.442695, %v2706_v13  ;;  %v7848_v13 = vor.u32 %v9174_v29, %v7847_v63  ;;  %v9256_v29 = vld [vmem:[#allocation9 + $0x634] sm:$0xf] }
 0x687   :  { %v2699_v11 = vpop.f32.mrf.mxu3 }
 0x688   :  { %9551 = vpow2.f32 %v2707_v39  ;;  %v7852_v39 = vor.u32 %v9158_v59, %v7849_v12  ;;  %v7719_v11 = vld [vmem:[#allocation9 + $0x220] sm:$0xf]  ;;  %v9273_v59 = vld [vmem:[#allocation9 + $0x6b4] sm:$0xf0]  ;;  %v9257_v12 = vld [vmem:[#allocation9 + $0x63c] sm:$0xf] }
 0x68e   :  { %v9552_v47 = vpop.eup %9551 }
 0x68f   :  { %v2709_v18 = vmul.f32 %v9552_v47, %v2705_v15  ;;  %v9142_v15 = vld [vmem:[#allocation9 + $0x29c] sm:$0xf0]  ;;  %v7856_v47 = vor.u32 %v9175_v4, %v7855_v14  ;;  %v8257_v14 = vld [vmem:[#allocation9 + $0x6b8] sm:$0xf0] }
 0x690   :  { %v7720_v43 = vor.u32 %v9142_v15, %v7719_v11  ;;  %v8260_v11 = vor.u32 %v9257_v12, %v8257_v14  ;;  %v9224_v15 = vld [vmem:[#allocation9 + $0x534] sm:$0xf] }
 0x691   :  { %v2710_v55 = vadd.f32 %v2709_v18, %v2701_v26  ;;  %v9255_v26 = vld [vmem:[#allocation9 + $0x62c] sm:$0xf]  ;;  %v7860_v18 = vor.u32 %v9159_v5, %v7857_v42  ;;  %v8119_v42 = vld [vmem:[#allocation9 + $0x530] sm:$0xf] }
 0x692   :  { %v8244_v40 = vor.u32 %v9255_v26, %v8241_v60 }
 0x693   :  { %v11278_v31 = vpack.c.bf16 %v2710_v55, %v2710_v55  ;;  %v7729_v55 = vld [vmem:[#allocation9 + $0x2a8] sm:$0xf0] }
 0x694   :  { %v7732_v62 = vor.u32 %v9127_v56, %v7729_v55  ;;  %v7991_v55 = vld [vmem:[#allocation9 + $0x430] sm:$0xf] }
 0x695   :  { %4328 = vmatmul.bf16.vlgmr.msrb.gmra.mxu0 %v11278_v31  ;;  %4341 = vmatmul.bf16.vlgmr.msrb.gmra.mxu1 %v11278_v31 }
 0x696   :  { %4354 = vmatmul.bf16.vlgmr.msrb.gmra.mxu2 %v11278_v31  ;;  %4367 = vmatmul.bf16.vlgmr.msrb.gmra.mxu3 %v11278_v31 }
 0x697   :  { %4424 = vmatpush.bf16.msrb.mxu0 %v8360_v20  ;;  %4437 = vmatpush.bf16.msrb.mxu1 %v8364_v44  ;;  %v9110_v20 = vld [vmem:[#allocation9 + $0x19c] sm:$0xf0]  ;;  %v7728_v44 = vor.u32 %v9143_v10, %v7727_v17  ;;  %v8129_v17 = vld [vmem:[#allocation9 + $0x5b8] sm:$0xf0] }
 0x698   :  { %4450 = vmatpush.bf16.msrb.mxu2 %v8368_v45  ;;  %4463 = vmatpush.bf16.msrb.mxu3 %v8372_v38  ;;  %v7593_v45 = vld [vmem:[#allocation9 + $0x1a0] sm:$0xf0]  ;;  %v7599_v38 = vld [vmem:[#allocation9 + $0x128] sm:$0xf]  ;;  %v7592_v26 = vor.u32 %v9110_v20, %v7591_v0  ;;  %v8132_v0 = vor.u32 %v9225_v8, %v8129_v17  ;;  %v9192_v20 = vld [vmem:[#allocation9 + $0x434] sm:$0xf] }
 0x699   :  { %v7596_v60 = vor.u32 %v9094_v16, %v7593_v45  ;;  %v7600_v36 = vor.u32 %v9111_v23, %v7599_v38  ;;  %v9209_v16 = vld [vmem:[#allocation9 + $0x4b4] sm:$0xf0]  ;;  %v9193_v45 = vld [vmem:[#allocation9 + $0x43c] sm:$0xf]  ;;  %v9306_v8 = vld [vmem:[#allocation9 + $0x7bc] sm:$0xf0] }
 0x69a   :  { %v8001_v38 = vld [vmem:[#allocation9 + $0x4b8] sm:$0xf0]  ;;  %v9290_v17 = vld [vmem:[#allocation9 + $0x744] sm:$0xf] }
 0x69b   :  { %4425 = vmatpush.bf16.msrb.mxu0 %v8232_v48  ;;  %4438 = vmatpush.bf16.msrb.mxu1 %v8236_v27  ;;  %v9078_v48 = vld [vmem:[#allocation9 + $0x9c] sm:$0xf0]  ;;  %v9062_v27 = vld [vmem:[#allocation9 + $0x24] sm:$0xf] }
 0x69c   :  { %4451 = vmatpush.bf16.msrb.mxu2 %v8240_v22  ;;  %4464 = vmatpush.bf16.msrb.mxu3 %v8244_v40  ;;  %v7604_v22 = vor.u32 %v9095_v24, %v7601_v33  ;;  %v7471_v40 = vld [vmem:[#allocation9 + $0x28] sm:$0xf]  ;;  %v7464_v3 = vor.u32 %v9078_v48, %v7463_v58  ;;  %v7468_v6 = vor.u32 %v9062_v27, %v7465_v53  ;;  %v7863_v33 = vld [vmem:[#allocation9 + $0x330] sm:$0xf]  ;;  %v9160_v48 = vld [vmem:[#allocation9 + $0x334] sm:$0xf] }
 0x69d   :  { %v7472_v30 = vor.u32 %v9079_v32, %v7471_v40  ;;  %v9176_v58 = vld [vmem:[#allocation9 + $0x3ac] sm:$0xf0]  ;;  %v7865_v27 = vld [vmem:[#allocation9 + $0x3b0] sm:$0xf0]  ;;  %v7871_v53 = vld [vmem:[#allocation9 + $0x338] sm:$0xf] }
 0x69e   :  { %v7873_v40 = vld [vmem:[#allocation9 + $0x3b8] sm:$0xf0]  ;;  %v7864_v32 = vor.u32 %v9176_v58, %v7863_v33  ;;  %v7868_v37 = vor.u32 %v9160_v48, %v7865_v27  ;;  %v9258_v58 = vld [vmem:[#allocation9 + $0x644] sm:$0xf]  ;;  %v9275_v48 = vld [vmem:[#allocation9 + $0x6c4] sm:$0xf0] }
 0x69f   :  { %4426 = vmatpush.bf16.msrb.mxu0 %v8104_v61  ;;  %4439 = vmatpush.bf16.msrb.mxu1 %v8108_v2  ;;  %v8377_v61 = vld [vmem:[#allocation9 + $0x7b0] sm:$0xf0]  ;;  %v8383_v2 = vld [vmem:[#allocation9 + $0x738] sm:$0xf]  ;;  %v9259_v27 = vld [vmem:[#allocation9 + $0x64c] sm:$0xf] }
 0x6a0   :  { %4452 = vmatpush.bf16.msrb.mxu2 %v8112_v9  ;;  %4465 = vmatpush.bf16.msrb.mxu3 %v8116_v21  ;;  %v9305_v9 = vld [vmem:[#allocation9 + $0x7b4] sm:$0xf0]  ;;  %v9289_v21 = vld [vmem:[#allocation9 + $0x73c] sm:$0xf]  ;;  %v8380_v7 = vor.u32 %v9288_v54, %v8377_v61  ;;  %v9128_v61 = vld [vmem:[#allocation9 + $0x234] sm:$0xf] }
 0x6a1   :  { %v8388_v63 = vor.u32 %v9289_v21, %v8385_v25  ;;  %v7745_v21 = vld [vmem:[#allocation9 + $0x2b8] sm:$0xf0]  ;;  %v7736_v25 = vor.u32 %v9144_v49, %v7735_v41  ;;  %v9226_v49 = vld [vmem:[#allocation9 + $0x544] sm:$0xf] }
 0x6a3   :  { %4427 = vmatpush.bf16.msrb.mxu0 %v7976_v46  ;;  %4440 = vmatpush.bf16.msrb.mxu1 %v7980_v52  ;;  %v9272_v46 = vld [vmem:[#allocation9 + $0x6ac] sm:$0xf0]  ;;  %v8384_v52 = vor.u32 %v9305_v9, %v8383_v2  ;;  %v7737_v2 = vld [vmem:[#allocation9 + $0x2b0] sm:$0xf0]  ;;  %v9129_v9 = vld [vmem:[#allocation9 + $0x23c] sm:$0xf] }
 0x6a4   :  { %4453 = vmatpush.bf16.msrb.mxu2 %v7984_v57  ;;  %4466 = vmatpush.bf16.msrb.mxu3 %v7988_v1  ;;  %v8249_v57 = vld [vmem:[#allocation9 + $0x6b0] sm:$0xf0]  ;;  %v8255_v1 = vld [vmem:[#allocation9 + $0x638] sm:$0xf]  ;;  %v8248_v4 = vor.u32 %v9272_v46, %v8247_v51  ;;  %v7748_v51 = vor.u32 %v9129_v9, %v7745_v21  ;;  %v8007_v21 = vld [vmem:[#allocation9 + $0x440] sm:$0xf] }
 0x6a5   :  { %4380 = vmatmul.bf16.vlgmr.msra.gmra.mxu0 %v11278_v31  ;;  %4393 = vmatmul.bf16.vlgmr.msra.gmra.mxu1 %v11278_v31  ;;  %v8252_v5 = vor.u32 %v9256_v29, %v8249_v57  ;;  %v9096_v46 = vld [vmem:[#allocation9 + $0x134] sm:$0xf]  ;;  %v9113_v29 = vld [vmem:[#allocation9 + $0x1b4] sm:$0xf0]  ;;  %v9097_v57 = vld [vmem:[#allocation9 + $0x13c] sm:$0xf] }
 0x6a6   :  { %4406 = vmatmul.bf16.vlgmr.msra.gmra.mxu2 %v11278_v31  ;;  %4419 = vmatmul.bf16.vlgmr.msra.gmra.mxu3 %v11278_v31 }
 0x6a7   :  { %4428 = vmatpush.bf16.msrb.mxu0 %v7848_v13  ;;  %4441 = vmatpush.bf16.msrb.mxu1 %v7852_v39  ;;  %v9240_v13 = vld [vmem:[#allocation9 + $0x5ac] sm:$0xf0]  ;;  %v8256_v39 = vor.u32 %v9273_v59, %v8255_v1  ;;  %v7617_v1 = vld [vmem:[#allocation9 + $0x1b8] sm:$0xf0] }
 0x6a8   :  { %4454 = vmatpush.bf16.msrb.mxu2 %v7856_v47  ;;  %4467 = vmatpush.bf16.msrb.mxu3 %v7860_v18  ;;  %v8121_v47 = vld [vmem:[#allocation9 + $0x5b0] sm:$0xf0]  ;;  %v8127_v18 = vld [vmem:[#allocation9 + $0x538] sm:$0xf]  ;;  %v8120_v10 = vor.u32 %v9240_v13, %v8119_v42  ;;  %v7479_v59 = vld [vmem:[#allocation9 + $0x30] sm:$0xf] }
 0x6a9   :  { %v8124_v56 = vor.u32 %v9224_v15, %v8121_v47  ;;  %v7481_v42 = vld [vmem:[#allocation9 + $0xb0] sm:$0xf0]  ;;  %v9081_v15 = vld [vmem:[#allocation9 + $0xb4] sm:$0xf0]  ;;  %v9065_v47 = vld [vmem:[#allocation9 + $0x3c] sm:$0xf] }
 0x6ab   :  { %4429 = vmatpush.bf16.msrb.mxu0 %v7720_v43  ;;  %4442 = vmatpush.bf16.msrb.mxu1 %v7724_v28  ;;  %v9208_v43 = vld [vmem:[#allocation9 + $0x4ac] sm:$0xf0]  ;;  %v8128_v28 = vor.u32 %v9241_v19, %v8127_v18  ;;  %v7489_v18 = vld [vmem:[#allocation9 + $0xb8] sm:$0xf0]  ;;  %v8391_v19 = vld [vmem:[#allocation9 + $0x740] sm:$0xf] }
 0x6ac   :  { %4455 = vmatpush.bf16.msrb.mxu2 %v7728_v44  ;;  %4468 = vmatpush.bf16.msrb.mxu3 %v7732_v62  ;;  %v7993_v44 = vld [vmem:[#allocation9 + $0x4b0] sm:$0xf0]  ;;  %v7999_v62 = vld [vmem:[#allocation9 + $0x438] sm:$0xf]  ;;  %v7992_v23 = vor.u32 %v9208_v43, %v7991_v55 }
 0x6ad   :  { %v7996_v24 = vor.u32 %v9192_v20, %v7993_v44  ;;  %v8401_v20 = vld [vmem:[#allocation9 + $0x7c8] sm:$0xf0] }
 0x6af   :  { %4430 = vmatpush.bf16.msrb.mxu0 %v7592_v26  ;;  %4443 = vmatpush.bf16.msrb.mxu1 %v7596_v60  ;;  %v8000_v26 = vor.u32 %v9209_v16, %v7999_v62  ;;  %v8004_v60 = vor.u32 %v9193_v45, %v8001_v38  ;;  %v7492_v62 = vor.u32 %v9065_v47, %v7489_v18  ;;  %v8263_v38 = vld [vmem:[#allocation9 + $0x640] sm:$0xf] }
 0x6b0   :  { %4456 = vmatpush.bf16.msrb.mxu2 %v7600_v36  ;;  %4469 = vmatpush.bf16.msrb.mxu3 %v7604_v22  ;;  %v9177_v36 = vld [vmem:[#allocation9 + $0x3b4] sm:$0xf0]  ;;  %v9161_v22 = vld [vmem:[#allocation9 + $0x33c] sm:$0xf]  ;;  %v8392_v16 = vor.u32 %v9306_v8, %v8391_v19  ;;  %v7751_v18 = vld [vmem:[#allocation9 + $0x240] sm:$0xf] }
 0x6b1   :  { %v7872_v50 = vor.u32 %v9177_v36, %v7871_v53  ;;  %v7876_v54 = vor.u32 %v9161_v22, %v7873_v40  ;;  %v8273_v53 = vld [vmem:[#allocation9 + $0x6c8] sm:$0xf0]  ;;  %v8135_v40 = vld [vmem:[#allocation9 + $0x540] sm:$0xf] }
 0x6b2   :  { %v8276_v41 = vor.u32 %v9259_v27, %v8273_v53  ;;  %v9146_v19 = vld [vmem:[#allocation9 + $0x2bc] sm:$0xf0] }
 0x6b3   :  { %4431 = vmatpush.bf16.msrb.mxu0 %v7464_v3  ;;  %4444 = vmatpush.bf16.msrb.mxu1 %v7468_v6  ;;  %v7743_v3 = vld [vmem:[#allocation9 + $0x238] sm:$0xf] }
 0x6b4   :  { %4457 = vmatpush.bf16.msrb.mxu2 %v7472_v30  ;;  %4470 = vmatpush.bf16.msrb.mxu3 %v7476_v34  ;;  %v9145_v6 = vld [vmem:[#allocation9 + $0x2b4] sm:$0xf0]  ;;  %v7740_v30 = vor.u32 %v9128_v61, %v7737_v2  ;;  %v7607_v34 = vld [vmem:[#allocation9 + $0x130] sm:$0xf]  ;;  %v9243_v61 = vld [vmem:[#allocation9 + $0x5c4] sm:$0xf0] }
 0x6b5   :  { %v9227_v2 = vld [vmem:[#allocation9 + $0x54c] sm:$0xf] }
 0x6b6   :  { %4432 = vmatmul.bf16.vlgmr.msrb.gmra.mxu0 %v11278_v31  ;;  %4445 = vmatmul.bf16.vlgmr.msrb.gmra.mxu1 %v11278_v31 }
 0x6b7   :  { %4476 = vmatpush.bf16.msra.mxu0 %v8376_v35  ;;  %4489 = vmatpush.bf16.msra.mxu1 %v8380_v7  ;;  %v9112_v35 = vld [vmem:[#allocation9 + $0x1ac] sm:$0xf0]  ;;  %v7744_v7 = vor.u32 %v9145_v6, %v7743_v3  ;;  %v8145_v3 = vld [vmem:[#allocation9 + $0x5c8] sm:$0xf0] }
 0x6b8   :  { %4502 = vmatpush.bf16.msra.mxu2 %v8384_v52  ;;  %4515 = vmatpush.bf16.msra.mxu3 %v8388_v63  ;;  %v7609_v52 = vld [vmem:[#allocation9 + $0x1b0] sm:$0xf0]  ;;  %v7615_v63 = vld [vmem:[#allocation9 + $0x138] sm:$0xf]  ;;  %v7608_v12 = vor.u32 %v9112_v35, %v7607_v34  ;;  %v8148_v34 = vor.u32 %v9227_v2, %v8145_v3  ;;  %v9194_v35 = vld [vmem:[#allocation9 + $0x444] sm:$0xf] }
 0x6b9   :  { %4458 = vmatmul.bf16.vlgmr.msrb.gmra.mxu2 %v11278_v31  ;;  %4471 = vmatmul.bf16.vlgmr.msrb.gmra.mxu3 %v11278_v31  ;;  %v7612_v14 = vor.u32 %v9096_v46, %v7609_v52  ;;  %v7616_v13 = vor.u32 %v9113_v29, %v7615_v63  ;;  %v9211_v46 = vld [vmem:[#allocation9 + $0x4c4] sm:$0xf0]  ;;  %v9195_v52 = vld [vmem:[#allocation9 + $0x44c] sm:$0xf]  ;;  %v9308_v2 = vld [vmem:[#allocation9 + $0x7cc] sm:$0xf0] }
 0x6ba   :  { %v8017_v63 = vld [vmem:[#allocation9 + $0x4c8] sm:$0xf0]  ;;  %v9292_v3 = vld [vmem:[#allocation9 + $0x754] sm:$0xf] }
 0x6bb   :  { %4477 = vmatpush.bf16.msra.mxu0 %v8248_v4  ;;  %4490 = vmatpush.bf16.msra.mxu1 %v8252_v5  ;;  %v9080_v4 = vld [vmem:[#allocation9 + $0xac] sm:$0xf0]  ;;  %v9064_v5 = vld [vmem:[#allocation9 + $0x34] sm:$0xf] }
 0x6bc   :  { %4503 = vmatpush.bf16.msra.mxu2 %v8256_v39  ;;  %4516 = vmatpush.bf16.msra.mxu3 %v8260_v11  ;;  %v7620_v39 = vor.u32 %v9097_v57, %v7617_v1  ;;  %v7487_v11 = vld [vmem:[#allocation9 + $0x38] sm:$0xf]  ;;  %v7480_v55 = vor.u32 %v9080_v4, %v7479_v59  ;;  %v7484_v43 = vor.u32 %v9064_v5, %v7481_v42  ;;  %v7879_v1 = vld [vmem:[#allocation9 + $0x340] sm:$0xf]  ;;  %v9162_v4 = vld [vmem:[#allocation9 + $0x344] sm:$0xf] }
 0x6bd   :  { %v7488_v44 = vor.u32 %v9081_v15, %v7487_v11  ;;  %v9178_v59 = vld [vmem:[#allocation9 + $0x3bc] sm:$0xf0]  ;;  %v7881_v5 = vld [vmem:[#allocation9 + $0x3c0] sm:$0xf0]  ;;  %v7887_v42 = vld [vmem:[#allocation9 + $0x348] sm:$0xf] }
 0x6be   :  { %v7889_v11 = vld [vmem:[#allocation9 + $0x3c8] sm:$0xf0]  ;;  %v7880_v15 = vor.u32 %v9178_v59, %v7879_v1  ;;  %v7884_v47 = vor.u32 %v9162_v4, %v7881_v5  ;;  %v9260_v59 = vld [vmem:[#allocation9 + $0x654] sm:$0xf]  ;;  %v9277_v4 = vld [vmem:[#allocation9 + $0x6d4] sm:$0xf0] }
 0x6bf   :  { %4478 = vmatpush.bf16.msra.mxu0 %v8120_v10  ;;  %4491 = vmatpush.bf16.msra.mxu1 %v8124_v56  ;;  %v8393_v10 = vld [vmem:[#allocation9 + $0x7c0] sm:$0xf0]  ;;  %v8399_v56 = vld [vmem:[#allocation9 + $0x748] sm:$0xf]  ;;  %v9261_v5 = vld [vmem:[#allocation9 + $0x65c] sm:$0xf] }
 0x6c0   :  { %4504 = vmatpush.bf16.msra.mxu2 %v8128_v28  ;;  %4517 = vmatpush.bf16.msra.mxu3 %v8132_v0  ;;  %v9307_v28 = vld [vmem:[#allocation9 + $0x7c4] sm:$0xf0]  ;;  %v9291_v0 = vld [vmem:[#allocation9 + $0x74c] sm:$0xf]  ;;  %v8396_v45 = vor.u32 %v9290_v17, %v8393_v10  ;;  %v9130_v10 = vld [vmem:[#allocation9 + $0x244] sm:$0xf] }
 0x6c1   :  { %v8404_v33 = vor.u32 %v9291_v0, %v8401_v20  ;;  %v7761_v0 = vld [vmem:[#allocation9 + $0x2c8] sm:$0xf0]  ;;  %v7752_v20 = vor.u32 %v9146_v19, %v7751_v18  ;;  %v9228_v19 = vld [vmem:[#allocation9 + $0x554] sm:$0xf] }
 0x6c3   :  { %4479 = vmatpush.bf16.msra.mxu0 %v7992_v23  ;;  %4492 = vmatpush.bf16.msra.mxu1 %v7996_v24  ;;  %v9274_v23 = vld [vmem:[#allocation9 + $0x6bc] sm:$0xf0]  ;;  %v8400_v24 = vor.u32 %v9307_v28, %v8399_v56  ;;  %v7753_v56 = vld [vmem:[#allocation9 + $0x2c0] sm:$0xf0]  ;;  %v9131_v28 = vld [vmem:[#allocation9 + $0x24c] sm:$0xf] }
 0x6c4   :  { %4505 = vmatpush.bf16.msra.mxu2 %v8000_v26  ;;  %4518 = vmatpush.bf16.msra.mxu3 %v8004_v60  ;;  %v8265_v26 = vld [vmem:[#allocation9 + $0x6c0] sm:$0xf0]  ;;  %v8271_v60 = vld [vmem:[#allocation9 + $0x648] sm:$0xf]  ;;  %v8264_v36 = vor.u32 %v9274_v23, %v8263_v38  ;;  %v7764_v38 = vor.u32 %v9131_v28, %v7761_v0  ;;  %v8023_v0 = vld [vmem:[#allocation9 + $0x450] sm:$0xf] }
 0x6c5   :  { %v8268_v22 = vor.u32 %v9258_v58, %v8265_v26  ;;  %v9098_v23 = vld [vmem:[#allocation9 + $0x144] sm:$0xf]  ;;  %v9115_v58 = vld [vmem:[#allocation9 + $0x1c4] sm:$0xf0]  ;;  %v9099_v26 = vld [vmem:[#allocation9 + $0x14c] sm:$0xf] }
 0x6c7   :  { %4480 = vmatpush.bf16.msra.mxu0 %v7864_v32  ;;  %4493 = vmatpush.bf16.msra.mxu1 %v7868_v37  ;;  %v9242_v32 = vld [vmem:[#allocation9 + $0x5bc] sm:$0xf0]  ;;  %v8272_v37 = vor.u32 %v9275_v48, %v8271_v60  ;;  %v7633_v60 = vld [vmem:[#allocation9 + $0x1c8] sm:$0xf0] }
 0x6c8   :  { %4506 = vmatpush.bf16.msra.mxu2 %v7872_v50  ;;  %4519 = vmatpush.bf16.msra.mxu3 %v7876_v54  ;;  %v8137_v50 = vld [vmem:[#allocation9 + $0x5c0] sm:$0xf0]  ;;  %v8143_v54 = vld [vmem:[#allocation9 + $0x548] sm:$0xf]  ;;  %v8136_v6 = vor.u32 %v9242_v32, %v8135_v40  ;;  %v7495_v48 = vld [vmem:[#allocation9 + $0x40] sm:$0xf] }
 0x6c9   :  { %v8140_v9 = vor.u32 %v9226_v49, %v8137_v50  ;;  %v7497_v40 = vld [vmem:[#allocation9 + $0xc0] sm:$0xf0]  ;;  %v9083_v49 = vld [vmem:[#allocation9 + $0xc4] sm:$0xf0]  ;;  %v9067_v50 = vld [vmem:[#allocation9 + $0x4c] sm:$0xf] }
 0x6cb   :  { %4481 = vmatpush.bf16.msra.mxu0 %v7736_v25  ;;  %4494 = vmatpush.bf16.msra.mxu1 %v7740_v30  ;;  %v9210_v25 = vld [vmem:[#allocation9 + $0x4bc] sm:$0xf0]  ;;  %v8144_v30 = vor.u32 %v9243_v61, %v8143_v54  ;;  %v7505_v54 = vld [vmem:[#allocation9 + $0xc8] sm:$0xf0]  ;;  %v8407_v61 = vld [vmem:[#allocation9 + $0x750] sm:$0xf] }
 0x6cc   :  { %4507 = vmatpush.bf16.msra.mxu2 %v7744_v7  ;;  %4520 = vmatpush.bf16.msra.mxu3 %v7748_v51  ;;  %v8009_v7 = vld [vmem:[#allocation9 + $0x4c0] sm:$0xf0]  ;;  %v8015_v51 = vld [vmem:[#allocation9 + $0x448] sm:$0xf]  ;;  %v8008_v29 = vor.u32 %v9210_v25, %v8007_v21 }
 0x6cd   :  { %v8012_v57 = vor.u32 %v9194_v35, %v8009_v7  ;;  %v8417_v35 = vld [vmem:[#allocation9 + $0x7d8] sm:$0xf0] }
 0x6cf   :  { %4482 = vmatpush.bf16.msra.mxu0 %v7608_v12  ;;  %4495 = vmatpush.bf16.msra.mxu1 %v7612_v14  ;;  %v8016_v12 = vor.u32 %v9211_v46, %v8015_v51  ;;  %v8020_v14 = vor.u32 %v9195_v52, %v8017_v63  ;;  %v7508_v51 = vor.u32 %v9067_v50, %v7505_v54  ;;  %v8279_v63 = vld [vmem:[#allocation9 + $0x650] sm:$0xf] }
 0x6d0   :  { %4508 = vmatpush.bf16.msra.mxu2 %v7616_v13  ;;  %4521 = vmatpush.bf16.msra.mxu3 %v7620_v39  ;;  %v9179_v13 = vld [vmem:[#allocation9 + $0x3c4] sm:$0xf0]  ;;  %v9163_v39 = vld [vmem:[#allocation9 + $0x34c] sm:$0xf]  ;;  %v8408_v46 = vor.u32 %v9308_v2, %v8407_v61  ;;  %v7767_v54 = vld [vmem:[#allocation9 + $0x250] sm:$0xf] }
 0x6d1   :  { %v7888_v8 = vor.u32 %v9179_v13, %v7887_v42  ;;  %v7892_v17 = vor.u32 %v9163_v39, %v7889_v11  ;;  %v8289_v42 = vld [vmem:[#allocation9 + $0x6d8] sm:$0xf0]  ;;  %v8151_v11 = vld [vmem:[#allocation9 + $0x550] sm:$0xf] }
 0x6d2   :  { %v8292_v18 = vor.u32 %v9261_v5, %v8289_v42  ;;  %v9148_v61 = vld [vmem:[#allocation9 + $0x2cc] sm:$0xf0] }
 0x6d3   :  { %4483 = vmatpush.bf16.msra.mxu0 %v7480_v55  ;;  %4496 = vmatpush.bf16.msra.mxu1 %v7484_v43  ;;  %v7759_v55 = vld [vmem:[#allocation9 + $0x248] sm:$0xf] }
 0x6d4   :  { %4509 = vmatpush.bf16.msra.mxu2 %v7488_v44  ;;  %4522 = vmatpush.bf16.msra.mxu3 %v7492_v62  ;;  %v9147_v43 = vld [vmem:[#allocation9 + $0x2c4] sm:$0xf0]  ;;  %v7756_v44 = vor.u32 %v9130_v10, %v7753_v56  ;;  %v7623_v62 = vld [vmem:[#allocation9 + $0x140] sm:$0xf]  ;;  %v9245_v10 = vld [vmem:[#allocation9 + $0x5d4] sm:$0xf0] }
 0x6d5   :  { %v9229_v56 = vld [vmem:[#allocation9 + $0x55c] sm:$0xf] }
 0x6d6   :  { %4484 = vmatmul.bf16.vlgmr.msra.gmra.mxu0 %v11278_v31  ;;  %4497 = vmatmul.bf16.vlgmr.msra.gmra.mxu1 %v11278_v31 }
 0x6d7   :  { %4528 = vmatpush.bf16.msrb.mxu0 %v8392_v16  ;;  %4541 = vmatpush.bf16.msrb.mxu1 %v8396_v45  ;;  %v9114_v16 = vld [vmem:[#allocation9 + $0x1bc] sm:$0xf0]  ;;  %v7760_v45 = vor.u32 %v9147_v43, %v7759_v55  ;;  %v8161_v55 = vld [vmem:[#allocation9 + $0x5d8] sm:$0xf0] }
 0x6d8   :  { %4554 = vmatpush.bf16.msrb.mxu2 %v8400_v24  ;;  %4567 = vmatpush.bf16.msrb.mxu3 %v8404_v33  ;;  %v7625_v24 = vld [vmem:[#allocation9 + $0x1c0] sm:$0xf0]  ;;  %v7631_v33 = vld [vmem:[#allocation9 + $0x148] sm:$0xf]  ;;  %v7624_v27 = vor.u32 %v9114_v16, %v7623_v62  ;;  %v8164_v62 = vor.u32 %v9229_v56, %v8161_v55  ;;  %v9196_v16 = vld [vmem:[#allocation9 + $0x454] sm:$0xf] }
 0x6d9   :  { %4510 = vmatmul.bf16.vlgmr.msra.gmra.mxu2 %v11278_v31  ;;  %4523 = vmatmul.bf16.vlgmr.msra.gmra.mxu3 %v11278_v31  ;;  %v7628_v53 = vor.u32 %v9098_v23, %v7625_v24  ;;  %v7632_v32 = vor.u32 %v9115_v58, %v7631_v33  ;;  %v9213_v23 = vld [vmem:[#allocation9 + $0x4d4] sm:$0xf0]  ;;  %v9197_v24 = vld [vmem:[#allocation9 + $0x45c] sm:$0xf]  ;;  %v9310_v56 = vld [vmem:[#allocation9 + $0x7dc] sm:$0xf0] }
 0x6da   :  { %v8033_v33 = vld [vmem:[#allocation9 + $0x4d8] sm:$0xf0]  ;;  %v9294_v55 = vld [vmem:[#allocation9 + $0x764] sm:$0xf] }
 0x6db   :  { %4529 = vmatpush.bf16.msrb.mxu0 %v8264_v36  ;;  %4542 = vmatpush.bf16.msrb.mxu1 %v8268_v22  ;;  %v9082_v36 = vld [vmem:[#allocation9 + $0xbc] sm:$0xf0]  ;;  %v9066_v22 = vld [vmem:[#allocation9 + $0x44] sm:$0xf] }
 0x6dc   :  { %4555 = vmatpush.bf16.msrb.mxu2 %v8272_v37  ;;  %4568 = vmatpush.bf16.msrb.mxu3 %v8276_v41  ;;  %v7636_v37 = vor.u32 %v9099_v26, %v7633_v60  ;;  %v7503_v41 = vld [vmem:[#allocation9 + $0x48] sm:$0xf]  ;;  %v7496_v21 = vor.u32 %v9082_v36, %v7495_v48  ;;  %v7500_v25 = vor.u32 %v9066_v22, %v7497_v40  ;;  %v7895_v60 = vld [vmem:[#allocation9 + $0x350] sm:$0xf]  ;;  %v9164_v36 = vld [vmem:[#allocation9 + $0x354] sm:$0xf] }
 0x6dd   :  { %v7504_v7 = vor.u32 %v9083_v49, %v7503_v41  ;;  %v9180_v48 = vld [vmem:[#allocation9 + $0x3cc] sm:$0xf0]  ;;  %v7897_v22 = vld [vmem:[#allocation9 + $0x3d0] sm:$0xf0]  ;;  %v7903_v40 = vld [vmem:[#allocation9 + $0x358] sm:$0xf] }
 0x6de   :  { %v7905_v41 = vld [vmem:[#allocation9 + $0x3d8] sm:$0xf0]  ;;  %v7896_v49 = vor.u32 %v9180_v48, %v7895_v60  ;;  %v7900_v50 = vor.u32 %v9164_v36, %v7897_v22  ;;  %v9262_v48 = vld [vmem:[#allocation9 + $0x664] sm:$0xf]  ;;  %v9279_v36 = vld [vmem:[#allocation9 + $0x6e4] sm:$0xf0] }
 0x6df   :  { %4530 = vmatpush.bf16.msrb.mxu0 %v8136_v6  ;;  %4543 = vmatpush.bf16.msrb.mxu1 %v8140_v9  ;;  %v8409_v6 = vld [vmem:[#allocation9 + $0x7d0] sm:$0xf0]  ;;  %v8415_v9 = vld [vmem:[#allocation9 + $0x758] sm:$0xf]  ;;  %v9263_v22 = vld [vmem:[#allocation9 + $0x66c] sm:$0xf] }
 0x6e0   :  { %4556 = vmatpush.bf16.msrb.mxu2 %v8144_v30  ;;  %4569 = vmatpush.bf16.msrb.mxu3 %v8148_v34  ;;  %v9309_v30 = vld [vmem:[#allocation9 + $0x7d4] sm:$0xf0]  ;;  %v9293_v34 = vld [vmem:[#allocation9 + $0x75c] sm:$0xf]  ;;  %v8412_v52 = vor.u32 %v9292_v3, %v8409_v6  ;;  %v9132_v6 = vld [vmem:[#allocation9 + $0x254] sm:$0xf] }
 0x6e1   :  { %v8420_v1 = vor.u32 %v9293_v34, %v8417_v35  ;;  %v7777_v34 = vld [vmem:[#allocation9 + $0x2d8] sm:$0xf0]  ;;  %v7768_v35 = vor.u32 %v9148_v61, %v7767_v54  ;;  %v9230_v61 = vld [vmem:[#allocation9 + $0x564] sm:$0xf] }
 0x6e3   :  { %4531 = vmatpush.bf16.msrb.mxu0 %v8008_v29  ;;  %4544 = vmatpush.bf16.msrb.mxu1 %v8012_v57  ;;  %v9276_v29 = vld [vmem:[#allocation9 + $0x6cc] sm:$0xf0]  ;;  %v8416_v57 = vor.u32 %v9309_v30, %v8415_v9  ;;  %v7769_v9 = vld [vmem:[#allocation9 + $0x2d0] sm:$0xf0]  ;;  %v9133_v30 = vld [vmem:[#allocation9 + $0x25c] sm:$0xf] }
 0x6e4   :  { %4557 = vmatpush.bf16.msrb.mxu2 %v8016_v12  ;;  %4570 = vmatpush.bf16.msrb.mxu3 %v8020_v14  ;;  %v8281_v12 = vld [vmem:[#allocation9 + $0x6d0] sm:$0xf0]  ;;  %v8287_v14 = vld [vmem:[#allocation9 + $0x658] sm:$0xf]  ;;  %v8280_v13 = vor.u32 %v9276_v29, %v8279_v63  ;;  %v7780_v63 = vor.u32 %v9133_v30, %v7777_v34 }
 0x6e5   :  { %v8284_v39 = vor.u32 %v9260_v59, %v8281_v12  ;;  %v9100_v29 = vld [vmem:[#allocation9 + $0x154] sm:$0xf]  ;;  %v9117_v59 = vld [vmem:[#allocation9 + $0x1d4] sm:$0xf0]  ;;  %v9101_v12 = vld [vmem:[#allocation9 + $0x15c] sm:$0xf] }
 0x6e7   :  { %4532 = vmatpush.bf16.msrb.mxu0 %v7880_v15  ;;  %4545 = vmatpush.bf16.msrb.mxu1 %v7884_v47  ;;  %v9244_v15 = vld [vmem:[#allocation9 + $0x5cc] sm:$0xf0]  ;;  %v8288_v47 = vor.u32 %v9277_v4, %v8287_v14  ;;  %v7649_v14 = vld [vmem:[#allocation9 + $0x1d8] sm:$0xf0] }
 0x6e8   :  { %4558 = vmatpush.bf16.msrb.mxu2 %v7888_v8  ;;  %4571 = vmatpush.bf16.msrb.mxu3 %v7892_v17  ;;  %v8153_v8 = vld [vmem:[#allocation9 + $0x5d0] sm:$0xf0]  ;;  %v8159_v17 = vld [vmem:[#allocation9 + $0x558] sm:$0xf]  ;;  %v8152_v43 = vor.u32 %v9244_v15, %v8151_v11  ;;  %v7511_v4 = vld [vmem:[#allocation9 + $0x50] sm:$0xf] }
 0x6e9   :  { %v8156_v28 = vor.u32 %v9228_v19, %v8153_v8  ;;  %v7513_v11 = vld [vmem:[#allocation9 + $0xd0] sm:$0xf0]  ;;  %v9085_v19 = vld [vmem:[#allocation9 + $0xd4] sm:$0xf0]  ;;  %v9069_v8 = vld [vmem:[#allocation9 + $0x5c] sm:$0xf] }
 0x6eb   :  { %4533 = vmatpush.bf16.msrb.mxu0 %v7752_v20  ;;  %4546 = vmatpush.bf16.msrb.mxu1 %v7756_v44  ;;  %v9212_v20 = vld [vmem:[#allocation9 + $0x4cc] sm:$0xf0]  ;;  %v8160_v44 = vor.u32 %v9245_v10, %v8159_v17  ;;  %v7521_v17 = vld [vmem:[#allocation9 + $0xd8] sm:$0xf0]  ;;  %v8423_v10 = vld [vmem:[#allocation9 + $0x760] sm:$0xf] }
 0x6ec   :  { %4559 = vmatpush.bf16.msrb.mxu2 %v7760_v45  ;;  %4572 = vmatpush.bf16.msrb.mxu3 %v7764_v38  ;;  %v8025_v45 = vld [vmem:[#allocation9 + $0x4d0] sm:$0xf0]  ;;  %v8031_v38 = vld [vmem:[#allocation9 + $0x458] sm:$0xf]  ;;  %v8024_v58 = vor.u32 %v9212_v20, %v8023_v0 }
 0x6ed   :  { %v8028_v26 = vor.u32 %v9196_v16, %v8025_v45  ;;  %v8433_v16 = vld [vmem:[#allocation9 + $0x7e8] sm:$0xf0] }
 0x6ef   :  { %4534 = vmatpush.bf16.msrb.mxu0 %v7624_v27  ;;  %4547 = vmatpush.bf16.msrb.mxu1 %v7628_v53  ;;  %v8032_v27 = vor.u32 %v9213_v23, %v8031_v38  ;;  %v8036_v53 = vor.u32 %v9197_v24, %v8033_v33  ;;  %v7524_v38 = vor.u32 %v9069_v8, %v7521_v17  ;;  %v8295_v33 = vld [vmem:[#allocation9 + $0x660] sm:$0xf]  ;;  %v9183_v8 = vld [vmem:[#allocation9 + $0x3e4] sm:$0xf0]  ;;  %v9167_v17 = vld [vmem:[#allocation9 + $0x36c] sm:$0xf] }
 0x6f0   :  { %4560 = vmatpush.bf16.msrb.mxu2 %v7632_v32  ;;  %4573 = vmatpush.bf16.msrb.mxu3 %v7636_v37  ;;  %v9181_v32 = vld [vmem:[#allocation9 + $0x3d4] sm:$0xf0]  ;;  %v9165_v37 = vld [vmem:[#allocation9 + $0x35c] sm:$0xf]  ;;  %v8424_v23 = vor.u32 %v9310_v56, %v8423_v10  ;;  %v7921_v10 = vld [vmem:[#allocation9 + $0x3e8] sm:$0xf0] }
 0x6f1   :  { %v7904_v2 = vor.u32 %v9181_v32, %v7903_v40  ;;  %v7908_v3 = vor.u32 %v9165_v37, %v7905_v41  ;;  %v8305_v40 = vld [vmem:[#allocation9 + $0x6e8] sm:$0xf0]  ;;  %v8167_v41 = vld [vmem:[#allocation9 + $0x560] sm:$0xf] }
 0x6f2   :  { %v8308_v54 = vor.u32 %v9263_v22, %v8305_v40 }
 0x6f3   :  { %4535 = vmatpush.bf16.msrb.mxu0 %v7496_v21  ;;  %4548 = vmatpush.bf16.msrb.mxu1 %v7500_v25  ;;  %v7775_v21 = vld [vmem:[#allocation9 + $0x258] sm:$0xf] }
 0x6f4   :  { %4561 = vmatpush.bf16.msrb.mxu2 %v7504_v7  ;;  %4574 = vmatpush.bf16.msrb.mxu3 %v7508_v51  ;;  %v9149_v25 = vld [vmem:[#allocation9 + $0x2d4] sm:$0xf0]  ;;  %v7772_v7 = vor.u32 %v9132_v6, %v7769_v9  ;;  %v7639_v51 = vld [vmem:[#allocation9 + $0x150] sm:$0xf]  ;;  %v9247_v6 = vld [vmem:[#allocation9 + $0x5e4] sm:$0xf0] }
 0x6f5   :  { %v9231_v9 = vld [vmem:[#allocation9 + $0x56c] sm:$0xf] }
 0x6f6   :  { %4536 = vmatmul.bf16.vlgmr.msrb.gmra.mxu0 %v11278_v31  ;;  %4549 = vmatmul.bf16.vlgmr.msrb.gmra.mxu1 %v11278_v31 }
 0x6f7   :  { %4580 = vmatpush.bf16.msra.mxu0 %v8408_v46  ;;  %4593 = vmatpush.bf16.msra.mxu1 %v8412_v52  ;;  %v9116_v46 = vld [vmem:[#allocation9 + $0x1cc] sm:$0xf0]  ;;  %v7776_v52 = vor.u32 %v9149_v25, %v7775_v21  ;;  %v8177_v21 = vld [vmem:[#allocation9 + $0x5e8] sm:$0xf0] }
 0x6f8   :  { %4606 = vmatpush.bf16.msra.mxu2 %v8416_v57  ;;  %4619 = vmatpush.bf16.msra.mxu3 %v8420_v1  ;;  %v7641_v57 = vld [vmem:[#allocation9 + $0x1d0] sm:$0xf0]  ;;  %v7647_v1 = vld [vmem:[#allocation9 + $0x158] sm:$0xf]  ;;  %v7640_v5 = vor.u32 %v9116_v46, %v7639_v51  ;;  %v9214_v51 = vld [vmem:[#allocation9 + $0x4dc] sm:$0xf0] }
 0x6f9   :  { %4562 = vmatmul.bf16.vlgmr.msrb.gmra.mxu2 %v11278_v31  ;;  %4575 = vmatmul.bf16.vlgmr.msrb.gmra.mxu3 %v11278_v31  ;;  %v7644_v42 = vor.u32 %v9100_v29, %v7641_v57  ;;  %v7648_v15 = vor.u32 %v9117_v59, %v7647_v1  ;;  %v8041_v29 = vld [vmem:[#allocation9 + $0x4e0] sm:$0xf0]  ;;  %v8047_v57 = vld [vmem:[#allocation9 + $0x468] sm:$0xf]  ;;  %v9199_v59 = vld [vmem:[#allocation9 + $0x46c] sm:$0xf] }
 0x6fa   :  { %v9215_v1 = vld [vmem:[#allocation9 + $0x4e4] sm:$0xf0] }
 0x6fb   :  { %4581 = vmatpush.bf16.msra.mxu0 %v8280_v13  ;;  %4594 = vmatpush.bf16.msra.mxu1 %v8284_v39  ;;  %v9084_v13 = vld [vmem:[#allocation9 + $0xcc] sm:$0xf0]  ;;  %v9068_v39 = vld [vmem:[#allocation9 + $0x54] sm:$0xf] }
 0x6fc   :  { %4607 = vmatpush.bf16.msra.mxu2 %v8288_v47  ;;  %4620 = vmatpush.bf16.msra.mxu3 %v8292_v18  ;;  %v7652_v47 = vor.u32 %v9101_v12, %v7649_v14  ;;  %v7519_v18 = vld [vmem:[#allocation9 + $0x58] sm:$0xf]  ;;  %v7512_v0 = vor.u32 %v9084_v13, %v7511_v4  ;;  %v7516_v20 = vor.u32 %v9068_v39, %v7513_v11  ;;  %v8049_v12 = vld [vmem:[#allocation9 + $0x4e8] sm:$0xf0]  ;;  %v9166_v11 = vld [vmem:[#allocation9 + $0x364] sm:$0xf] }
 0x6fd   :  { %v7520_v45 = vor.u32 %v9085_v19, %v7519_v18  ;;  %v8048_v13 = vor.u32 %v9215_v1, %v8047_v57  ;;  %v8052_v39 = vor.u32 %v9199_v59, %v8049_v12  ;;  %v9087_v1 = vld [vmem:[#allocation9 + $0xe4] sm:$0xf0]  ;;  %v9071_v59 = vld [vmem:[#allocation9 + $0x6c] sm:$0xf] }
 0x6fe   :  { %v7537_v12 = vld [vmem:[#allocation9 + $0xe8] sm:$0xf0] }
 0x6ff   :  { %4582 = vmatpush.bf16.msra.mxu0 %v8152_v43  ;;  %4595 = vmatpush.bf16.msra.mxu1 %v8156_v28  ;;  %v8425_v43 = vld [vmem:[#allocation9 + $0x7e0] sm:$0xf0]  ;;  %v8431_v28 = vld [vmem:[#allocation9 + $0x768] sm:$0xf] }
 0x700   :  { %4608 = vmatpush.bf16.msra.mxu2 %v8160_v44  ;;  %4621 = vmatpush.bf16.msra.mxu3 %v8164_v62  ;;  %v9311_v44 = vld [vmem:[#allocation9 + $0x7e4] sm:$0xf0]  ;;  %v9295_v62 = vld [vmem:[#allocation9 + $0x76c] sm:$0xf]  ;;  %v8428_v24 = vor.u32 %v9294_v55, %v8425_v43 }
 0x701   :  { %v8436_v60 = vor.u32 %v9295_v62, %v8433_v16  ;;  %v7924_v62 = vor.u32 %v9167_v17, %v7921_v10  ;;  %v9134_v16 = vld [vmem:[#allocation9 + $0x264] sm:$0xf]  ;;  %v9297_v17 = vld [vmem:[#allocation9 + $0x77c] sm:$0xf] }
 0x702   :  { %v8449_v10 = vld [vmem:[#allocation9 + $0x7f8] sm:$0xf0] }
 0x703   :  { %4583 = vmatpush.bf16.msra.mxu0 %v8024_v58  ;;  %4596 = vmatpush.bf16.msra.mxu1 %v8028_v26  ;;  %v9278_v58 = vld [vmem:[#allocation9 + $0x6dc] sm:$0xf0]  ;;  %v8432_v26 = vor.u32 %v9311_v44, %v8431_v28 }
 0x704   :  { %4609 = vmatpush.bf16.msra.mxu2 %v8032_v27  ;;  %4622 = vmatpush.bf16.msra.mxu3 %v8036_v53  ;;  %v8297_v27 = vld [vmem:[#allocation9 + $0x6e0] sm:$0xf0]  ;;  %v8303_v53 = vld [vmem:[#allocation9 + $0x668] sm:$0xf]  ;;  %v8296_v32 = vor.u32 %v9278_v58, %v8295_v33  ;;  %v7793_v33 = vld [vmem:[#allocation9 + $0x2e8] sm:$0xf0] }
 0x705   :  { %v8300_v37 = vor.u32 %v9262_v48, %v8297_v27  ;;  %v11315_v58 = vld [vmem:[%s11860_s8] sm:$0xff] }
 0x706   :  { %v7655_v48 = vld [vmem:[#allocation9 + $0x160] sm:$0xf] }
 0x707   :  { %4584 = vmatpush.bf16.msra.mxu0 %v7896_v49  ;;  %4597 = vmatpush.bf16.msra.mxu1 %v7900_v50  ;;  %v9246_v49 = vld [vmem:[#allocation9 + $0x5dc] sm:$0xf0]  ;;  %v8304_v50 = vor.u32 %v9279_v36, %v8303_v53  ;;  %v2980_v53 = vperm.slane %v11315_v58, 4  ;;  %v2981_v36 = vperm.slane %v11315_v58, 5 }
 0x708   :  { %4610 = vmatpush.bf16.msra.mxu2 %v7904_v2  ;;  %4623 = vmatpush.bf16.msra.mxu3 %v7908_v3  ;;  %v8169_v2 = vld [vmem:[#allocation9 + $0x5e0] sm:$0xf0]  ;;  %v8175_v3 = vld [vmem:[#allocation9 + $0x568] sm:$0xf]  ;;  %v8168_v34 = vor.u32 %v9246_v49, %v8167_v41  ;;  %v9118_v27 = vld [vmem:[#allocation9 + $0x1dc] sm:$0xf0] }
 0x709   :  { %v8176_v46 = vor.u32 %v9247_v6, %v8175_v3  ;;  %v7663_v41 = vld [vmem:[#allocation9 + $0x168] sm:$0xf]  ;;  %v7656_v3 = vor.u32 %v9118_v27, %v7655_v48  ;;  %v8319_v48 = vld [vmem:[#allocation9 + $0x678] sm:$0xf] }
 0x70a   :  { %v9281_v27 = vld [vmem:[#allocation9 + $0x6f4] sm:$0xf0] }
 0x70b   :  { %4585 = vmatpush.bf16.msra.mxu0 %v7768_v35  ;;  %4598 = vmatpush.bf16.msra.mxu1 %v7772_v7  ;;  %v8172_v35 = vor.u32 %v9230_v61, %v8169_v2  ;;  %v8039_v7 = vld [vmem:[#allocation9 + $0x460] sm:$0xf]  ;;  %v9103_v61 = vld [vmem:[#allocation9 + $0x16c] sm:$0xf] }
 0x70c   :  { %4611 = vmatpush.bf16.msra.mxu2 %v7776_v52  ;;  %4624 = vmatpush.bf16.msra.mxu3 %v7780_v63  ;;  %v8180_v52 = vor.u32 %v9231_v9, %v8177_v21  ;;  %v9198_v63 = vld [vmem:[#allocation9 + $0x464] sm:$0xf]  ;;  %v8040_v14 = vor.u32 %v9214_v51, %v8039_v7  ;;  %v7665_v2 = vld [vmem:[#allocation9 + $0x1e8] sm:$0xf0]  ;;  %v7527_v21 = vld [vmem:[#allocation9 + $0x60] sm:$0xf] }
 0x70d   :  { %v8044_v4 = vor.u32 %v9198_v63, %v8041_v29  ;;  %v7535_v63 = vld [vmem:[#allocation9 + $0x68] sm:$0xf]  ;;  %v7668_v57 = vor.u32 %v9103_v61, %v7665_v2  ;;  %v8191_v61 = vld [vmem:[#allocation9 + $0x578] sm:$0xf] }
 0x70e   :  { %v9249_v2 = vld [vmem:[#allocation9 + $0x5f4] sm:$0xf0] }
 0x70f   :  { %4586 = vmatpush.bf16.msra.mxu0 %v7640_v5  ;;  %4599 = vmatpush.bf16.msra.mxu1 %v7644_v42  ;;  %v7911_v5 = vld [vmem:[#allocation9 + $0x360] sm:$0xf] }
 0x710   :  { %4612 = vmatpush.bf16.msra.mxu2 %v7648_v15  ;;  %4625 = vmatpush.bf16.msra.mxu3 %v7652_v47  ;;  %v9182_v42 = vld [vmem:[#allocation9 + $0x3dc] sm:$0xf0]  ;;  %v7913_v15 = vld [vmem:[#allocation9 + $0x3e0] sm:$0xf0]  ;;  %v7919_v47 = vld [vmem:[#allocation9 + $0x368] sm:$0xf] }
 0x711   :  { %v7912_v43 = vor.u32 %v9182_v42, %v7911_v5  ;;  %v7916_v28 = vor.u32 %v9166_v11, %v7913_v15  ;;  %v7920_v44 = vor.u32 %v9183_v8, %v7919_v47  ;;  %v9296_v5 = vld [vmem:[#allocation9 + $0x774] sm:$0xf]  ;;  %v2983_v11 = vperm.slane %v11315_v58, 7  ;;  %v9313_v8 = vld [vmem:[#allocation9 + $0x7f4] sm:$0xf0] }
 0x712   :  { %v11304_v25 = vpop.f32.mrf.mxu0  ;;  %v11306_v30 = vpop.f32.mrf.mxu1  ;;  %v8441_v42 = vld [vmem:[#allocation9 + $0x7f0] sm:$0xf0] }
 0x713   :  { %4587 = vmatpush.bf16.msra.mxu0 %v7512_v0  ;;  %4600 = vmatpush.bf16.msra.mxu1 %v7516_v20  ;;  %v7783_v0 = vld [vmem:[#allocation9 + $0x260] sm:$0xf] }
 0x714   :  { %4613 = vmatpush.bf16.msra.mxu2 %v7520_v45  ;;  %4626 = vmatpush.bf16.msra.mxu3 %v7524_v38  ;;  %v9150_v20 = vld [vmem:[#allocation9 + $0x2dc] sm:$0xf0]  ;;  %v7785_v45 = vld [vmem:[#allocation9 + $0x2e0] sm:$0xf0]  ;;  %v7791_v38 = vld [vmem:[#allocation9 + $0x268] sm:$0xf] }
 0x716   :  { %4588 = vmatmul.bf16.vlgmr.msra.gmra.mxu0 %v11278_v31  ;;  %4601 = vmatmul.bf16.vlgmr.msra.gmra.mxu1 %v11278_v31 }
 0x717   :  { %4632 = vmatpush.bf16.msrb.mxu0 %v8424_v23  ;;  %4645 = vmatpush.bf16.msrb.mxu1 %v8428_v24  ;;  %v9151_v23 = vld [vmem:[#allocation9 + $0x2e4] sm:$0xf0]  ;;  %v9135_v24 = vld [vmem:[#allocation9 + $0x26c] sm:$0xf] }
 0x718   :  { %4658 = vmatpush.bf16.msrb.mxu2 %v8432_v26  ;;  %4671 = vmatpush.bf16.msrb.mxu3 %v8436_v60  ;;  %v7784_v26 = vor.u32 %v9150_v20, %v7783_v0  ;;  %v7788_v60 = vor.u32 %v9134_v16, %v7785_v45  ;;  %v7792_v22 = vor.u32 %v9151_v23, %v7791_v38 }
 0x719   :  { %4614 = vmatmul.bf16.vlgmr.msra.gmra.mxu2 %v11278_v31  ;;  %4627 = vmatmul.bf16.vlgmr.msra.gmra.mxu3 %v11278_v31  ;;  %v11308_v18 = vpop.f32.mrf.mxu2  ;;  %v11310_v19 = vpop.f32.mrf.mxu3  ;;  %v7796_v40 = vor.u32 %v9135_v24, %v7793_v33  ;;  %v8452_v45 = vor.u32 %v9297_v17, %v8449_v10  ;;  %v9168_v17 = vld [vmem:[#allocation9 + $0x374] sm:$0xf] }
 0x71a   :  { %v4331_v56 = vpop.f32.mrf.mxu0  ;;  %v4344_v55 = vpop.f32.mrf.mxu1  ;;  %v7929_v10 = vld [vmem:[#allocation9 + $0x3f0] sm:$0xf0] }
 0x71b   :  { %4633 = vmatpush.bf16.msrb.mxu0 %v8296_v32  ;;  %4646 = vmatpush.bf16.msrb.mxu1 %v8300_v37  ;;  %v9102_v32 = vld [vmem:[#allocation9 + $0x164] sm:$0xf]  ;;  %v7536_v56 = vor.u32 %v9087_v1, %v7535_v63  ;;  %v7540_v55 = vor.u32 %v9071_v59, %v7537_v12  ;;  %v8192_v63 = vor.u32 %v9249_v2, %v8191_v61  ;;  %v8057_v1 = vld [vmem:[#allocation9 + $0x4f0] sm:$0xf0]  ;;  %v8063_v59 = vld [vmem:[#allocation9 + $0x478] sm:$0xf] }
 0x71c   :  { %4659 = vmatpush.bf16.msrb.mxu2 %v8304_v50  ;;  %4672 = vmatpush.bf16.msrb.mxu3 %v8308_v54  ;;  %v7657_v37 = vld [vmem:[#allocation9 + $0x1e0] sm:$0xf0]  ;;  %v9119_v54 = vld [vmem:[#allocation9 + $0x1e4] sm:$0xf0]  ;;  %v9217_v12 = vld [vmem:[#allocation9 + $0x4f4] sm:$0xf0] }
 0x71d   :  { %v7664_v29 = vor.u32 %v9119_v54, %v7663_v41  ;;  %v8320_v41 = vor.u32 %v9281_v27, %v8319_v48  ;;  %v8185_v54 = vld [vmem:[#allocation9 + $0x5f0] sm:$0xf0]  ;;  %v9153_v27 = vld [vmem:[#allocation9 + $0x2f4] sm:$0xf0] }
 0x71e   :  { %v9104_v61 = vld [vmem:[#allocation9 + $0x174] sm:$0xf] }
 0x71f   :  { %4634 = vmatpush.bf16.msrb.mxu0 %v8168_v34  ;;  %4647 = vmatpush.bf16.msrb.mxu1 %v8172_v35  ;;  %v9086_v34 = vld [vmem:[#allocation9 + $0xdc] sm:$0xf0]  ;;  %v7660_v35 = vor.u32 %v9102_v32, %v7657_v37  ;;  %v8183_v32 = vld [vmem:[#allocation9 + $0x570] sm:$0xf]  ;;  %v7673_v2 = vld [vmem:[#allocation9 + $0x1f0] sm:$0xf0] }
 0x720   :  { %4660 = vmatpush.bf16.msrb.mxu2 %v8176_v46  ;;  %4673 = vmatpush.bf16.msrb.mxu3 %v8180_v52  ;;  %v9070_v46 = vld [vmem:[#allocation9 + $0x64] sm:$0xf]  ;;  %v7528_v15 = vor.u32 %v9086_v34, %v7527_v21  ;;  %v9248_v37 = vld [vmem:[#allocation9 + $0x5ec] sm:$0xf0] }
 0x721   :  { %v4357_v49 = vpop.f32.mrf.mxu2  ;;  %v4370_v50 = vpop.f32.mrf.mxu3  ;;  %v7529_v52 = vld [vmem:[#allocation9 + $0xe0] sm:$0xf0] }
 0x722   :  { %v4381_v6 = vpop.f32.mrf.mxu0  ;;  %v4394_v9 = vpop.f32.mrf.mxu1  ;;  %v7532_v47 = vor.u32 %v9070_v46, %v7529_v52  ;;  %v9232_v50 = vld [vmem:[#allocation9 + $0x574] sm:$0xf]  ;;  %v8055_v46 = vld [vmem:[#allocation9 + $0x470] sm:$0xf] }
 0x723   :  { %4635 = vmatpush.bf16.msrb.mxu0 %v8040_v14  ;;  %4648 = vmatpush.bf16.msrb.mxu1 %v8044_v4  ;;  %v11319_v7 = vadd.f32 %v4381_v6, %v2980_v53  ;;  %v11321_v51 = vadd.f32 %v4394_v9, %v2981_v36  ;;  %v8439_v14 = vld [vmem:[#allocation9 + $0x770] sm:$0xf]  ;;  %v9265_v53 = vld [vmem:[#allocation9 + $0x67c] sm:$0xf]  ;;  %v8184_v9 = vor.u32 %v9248_v37, %v8183_v32 }
 0x724   :  { %4661 = vmatpush.bf16.msrb.mxu2 %v8048_v13  ;;  %4674 = vmatpush.bf16.msrb.mxu3 %v8052_v39  ;;  %v9312_v4 = vld [vmem:[#allocation9 + $0x7ec] sm:$0xf0]  ;;  %v8447_v13 = vld [vmem:[#allocation9 + $0x778] sm:$0xf]  ;;  %v2982_v39 = vperm.slane %v11315_v58, 6  ;;  %v8188_v21 = vor.u32 %v9232_v50, %v8185_v54 }
 0x725   :  { %v8448_v16 = vor.u32 %v9313_v8, %v8447_v13  ;;  %v8321_v36 = vld [vmem:[#allocation9 + $0x6f8] sm:$0xf0]  ;;  %v9216_v52 = vld [vmem:[#allocation9 + $0x4ec] sm:$0xf0] }
 0x726   :  { %v8324_v49 = vor.u32 %v9265_v53, %v8321_v36  ;;  %v8193_v6 = vld [vmem:[#allocation9 + $0x5f8] sm:$0xf0]  ;;  %v8056_v13 = vor.u32 %v9216_v52, %v8055_v46  ;;  %v7676_v46 = vor.u32 %v9104_v61, %v7673_v2  ;;  %v9088_v52 = vld [vmem:[#allocation9 + $0xec] sm:$0xf0]  ;;  %v9334_v61 = vld [vmem:[#allocation10 + $0xa4] sm:$0xf] }
 0x727   :  { %4636 = vmatpush.bf16.msrb.mxu0 %v7912_v43  ;;  %4649 = vmatpush.bf16.msrb.mxu1 %v7916_v28  ;;  %v8440_v43 = vor.u32 %v9312_v4, %v8439_v14  ;;  %v8444_v28 = vor.u32 %v9296_v5, %v8441_v42  ;;  %v9201_v14 = vld [vmem:[#allocation9 + $0x47c] sm:$0xf]  ;;  %v8537_v2 = vld [vmem:[#allocation10 + $0xb0] sm:$0xf0] }
 0x728   :  { %4662 = vmatpush.bf16.msrb.mxu2 %v7920_v44  ;;  %4675 = vmatpush.bf16.msrb.mxu3 %v7924_v62  ;;  %v8311_v44 = vld [vmem:[#allocation9 + $0x670] sm:$0xf]  ;;  %v8065_v4 = vld [vmem:[#allocation9 + $0x4f8] sm:$0xf0] }
 0x729   :  { %v4407_v0 = vpop.f32.mrf.mxu2  ;;  %v4420_v20 = vpop.f32.mrf.mxu3  ;;  %v9280_v62 = vld [vmem:[#allocation9 + $0x6ec] sm:$0xf0]  ;;  %v8068_v8 = vor.u32 %v9201_v14, %v8065_v4  ;;  %v9137_v53 = vld [vmem:[#allocation9 + $0x27c] sm:$0xf] }
 0x72a   :  { %v11325_v38 = vadd.f32 %v4407_v0, %v2982_v39  ;;  %v11327_v23 = vadd.f32 %v4420_v20, %v2983_v11  ;;  %v4383_v24 = vpop.f32.mrf.mxu0  ;;  %v4396_v33 = vpop.f32.mrf.mxu1  ;;  %v7927_v11 = vld [vmem:[#allocation9 + $0x370] sm:$0xf]  ;;  %v7932_v20 = vor.u32 %v9168_v17, %v7929_v10  ;;  %v7809_v36 = vld [vmem:[#allocation9 + $0x2f8] sm:$0xf0]  ;;  %v8575_v17 = vld [vmem:[#allocation10 + $0xe8] sm:$0xf] }
 0x72b   :  { %4637 = vmatpush.bf16.msrb.mxu0 %v7784_v26  ;;  %4650 = vmatpush.bf16.msrb.mxu1 %v7788_v60  ;;  %v9264_v26 = vld [vmem:[#allocation9 + $0x674] sm:$0xf]  ;;  %v7812_v54 = vor.u32 %v9137_v53, %v7809_v36  ;;  %v9073_v14 = vld [vmem:[#allocation9 + $0x7c] sm:$0xf]  ;;  %v8559_v53 = vld [vmem:[#allocation10 + $0xc8] sm:$0xf] }
 0x72c   :  { %4663 = vmatpush.bf16.msrb.mxu2 %v7792_v22  ;;  %4676 = vmatpush.bf16.msrb.mxu3 %v7796_v40  ;;  %v8313_v60 = vld [vmem:[#allocation9 + $0x6f0] sm:$0xf0]  ;;  %v8312_v22 = vor.u32 %v9280_v62, %v8311_v44  ;;  %v7799_v44 = vld [vmem:[#allocation9 + $0x270] sm:$0xf]  ;;  %v9341_v36 = vld [vmem:[#allocation10 + $0xd4] sm:$0xf0] }
 0x72d   :  { %v8316_v40 = vor.u32 %v9264_v26, %v8313_v60  ;;  %v9152_v62 = vld [vmem:[#allocation9 + $0x2ec] sm:$0xf0]  ;;  %v9136_v24 = vld [vmem:[#allocation9 + $0x274] sm:$0xf]  ;;  %v7807_v26 = vld [vmem:[#allocation9 + $0x278] sm:$0xf] }
 0x72e   :  { %v7801_v33 = vld [vmem:[#allocation9 + $0x2f0] sm:$0xf0]  ;;  %v7800_v32 = vor.u32 %v9152_v62, %v7799_v44  ;;  %v7808_v50 = vor.u32 %v9153_v27, %v7807_v26  ;;  %v9338_v26 = vld [vmem:[#allocation10 + $0xc4] sm:$0xf] }
 0x72f   :  { %4638 = vmatpush.bf16.msrb.mxu0 %v7656_v3  ;;  %4651 = vmatpush.bf16.msrb.mxu1 %v7660_v35  ;;  %v9233_v3 = vld [vmem:[#allocation9 + $0x57c] sm:$0xf]  ;;  %v7804_v37 = vor.u32 %v9136_v24, %v7801_v33  ;;  %v8553_v27 = vld [vmem:[#allocation10 + $0xd0] sm:$0xf0] }
 0x730   :  { %4664 = vmatpush.bf16.msrb.mxu2 %v7664_v29  ;;  %4677 = vmatpush.bf16.msrb.mxu3 %v7668_v57  ;;  %v8196_v29 = vor.u32 %v9233_v3, %v8193_v6  ;;  %v9200_v57 = vld [vmem:[#allocation9 + $0x474] sm:$0xf]  ;;  %v7679_v3 = vld [vmem:[#allocation9 + $0x178] sm:$0xf] }
 0x731   :  { %v4409_v34 = vpop.f32.mrf.mxu2  ;;  %v4422_v35 = vpop.f32.mrf.mxu3  ;;  %v8060_v39 = vor.u32 %v9200_v57, %v8057_v1  ;;  %v9121_v6 = vld [vmem:[#allocation9 + $0x1f4] sm:$0xf0] }
 0x732   :  { %v7543_v34 = vld [vmem:[#allocation9 + $0x70] sm:$0xf]  ;;  %v7680_v57 = vor.u32 %v9121_v6, %v7679_v3  ;;  %v8543_v3 = vld [vmem:[#allocation10 + $0xa8] sm:$0xf]  ;;  %v9337_v6 = vld [vmem:[#allocation10 + $0xb4] sm:$0xf0] }
 0x733   :  { %4639 = vmatpush.bf16.msrb.mxu0 %v7528_v15  ;;  %4652 = vmatpush.bf16.msrb.mxu1 %v7532_v47  ;;  %v11333_v5 = vpop.f32.mrf.mxu0  ;;  %v11335_v42 = vpop.f32.mrf.mxu1  ;;  %v9184_v15 = vld [vmem:[#allocation9 + $0x3ec] sm:$0xf0]  ;;  %v8064_v47 = vor.u32 %v9217_v12, %v8063_v59  ;;  %v7551_v59 = vld [vmem:[#allocation9 + $0x78] sm:$0xf]  ;;  %v7544_v10 = vor.u32 %v9088_v52, %v7543_v34  ;;  %v11366_v34 = vld [vmem:[%s11860_s8 + $0x8] sm:$0xff] }
 0x734   :  { %4665 = vmatpush.bf16.msrb.mxu2 %v7536_v56  ;;  %4678 = vmatpush.bf16.msrb.mxu3 %v7540_v55  ;;  %11928 = vst [vmem:[#allocation17_spill] sm:$0xff] %v11335_v42  ;;  %v7935_v56 = vld [vmem:[#allocation9 + $0x378] sm:$0xf]  ;;  %v7928_v0 = vor.u32 %v9184_v15, %v7927_v11  ;;  %v8567_v11 = vld [vmem:[#allocation10 + $0xe0] sm:$0xf]  ;;  %v2988_v52 = vperm.slane %v11366_v34, 4 }
 0x735   :  { %v9185_v55 = vld [vmem:[#allocation9 + $0x3f4] sm:$0xf0]  ;;  %v9344_v15 = vld [vmem:[#allocation10 + $0xec] sm:$0xf0] }
 0x736   :  { %4640 = vmatmul.bf16.vlgmr.msrb.gmra.mxu0 %v11278_v31  ;;  %4653 = vmatmul.bf16.vlgmr.msrb.gmra.mxu1 %v11278_v31  ;;  %v9089_v12 = vld [vmem:[#allocation9 + $0xf4] sm:$0xf0]  ;;  %v11341_v44 = vor.u32 %v9344_v15, %v8567_v11 }
 0x737   :  { %4684 = vmatpush.bf16.msra.mxu0 %v8440_v43  ;;  %4697 = vmatpush.bf16.msra.mxu1 %v8444_v28  ;;  %v9169_v43 = vld [vmem:[#allocation9 + $0x37c] sm:$0xf] }
 0x738   :  { %4710 = vmatpush.bf16.msra.mxu2 %v8448_v16  ;;  %4723 = vmatpush.bf16.msra.mxu3 %v8452_v45  ;;  %v7937_v28 = vld [vmem:[#allocation9 + $0x3f8] sm:$0xf0]  ;;  %v7936_v16 = vor.u32 %v9185_v55, %v7935_v56  ;;  %v9345_v55 = vld [vmem:[#allocation10 + $0xf4] sm:$0xf0] }
 0x739   :  { %4666 = vmatmul.bf16.vlgmr.msrb.gmra.mxu2 %v11278_v31  ;;  %4679 = vmatmul.bf16.vlgmr.msrb.gmra.mxu3 %v11278_v31  ;;  %v7940_v45 = vor.u32 %v9169_v43, %v7937_v28  ;;  %v9343_v43 = vld [vmem:[#allocation10 + $0xec] sm:$0xf]  ;;  %v8577_v28 = vld [vmem:[#allocation10 + $0xf8] sm:$0xf0]  ;;  %v11345_v24 = vor.u32 %v9345_v55, %v8575_v17  ;;  %v9328_v55 = vld [vmem:[#allocation10 + $0x6c] sm:$0xf0] }
 0x73a   :  { %v11347_v33 = vor.u32 %v9343_v43, %v8577_v28 }
 0x73b   :  { %4685 = vmatpush.bf16.msra.mxu0 %v8312_v22  ;;  %4698 = vmatpush.bf16.msra.mxu1 %v8316_v40  ;;  %v4435_v22 = vpop.f32.mrf.mxu0  ;;  %v4448_v40 = vpop.f32.mrf.mxu1 }
 0x73c   :  { %4711 = vmatpush.bf16.msra.mxu2 %v8320_v41  ;;  %4724 = vmatpush.bf16.msra.mxu3 %v8324_v49  ;;  %v11337_v60 = vpop.f32.mrf.mxu2  ;;  %v11339_v48 = vpop.f32.mrf.mxu3  ;;  %v7671_v41 = vld [vmem:[#allocation9 + $0x170] sm:$0xf]  ;;  %v9339_v22 = vld [vmem:[#allocation10 + $0xcc] sm:$0xf]  ;;  %v8561_v40 = vld [vmem:[#allocation10 + $0xd8] sm:$0xf0] }
 0x73d   :  { %11929 = vst [vmem:[#allocation18_spill] sm:$0xff] %v11337_v60  ;;  %v9120_v49 = vld [vmem:[#allocation9 + $0x1ec] sm:$0xf0] }
 0x73e   :  { %11930 = vst [vmem:[#allocation20_spill] sm:$0xff] %v11339_v48  ;;  %v7672_v35 = vor.u32 %v9120_v49, %v7671_v41  ;;  %v8535_v41 = vld [vmem:[#allocation10 + $0xa0] sm:$0xf]  ;;  %v9336_v49 = vld [vmem:[#allocation10 + $0xac] sm:$0xf0]  ;;  %v2977_v48 = vperm.slane %v11315_v58, 1 }
 0x73f   :  { %4686 = vmatpush.bf16.msra.mxu0 %v8184_v9  ;;  %4699 = vmatpush.bf16.msra.mxu1 %v8188_v21  ;;  %v9105_v9 = vld [vmem:[#allocation9 + $0x17c] sm:$0xf] }
 0x740   :  { %4712 = vmatpush.bf16.msra.mxu2 %v8192_v63  ;;  %4725 = vmatpush.bf16.msra.mxu3 %v8196_v29  ;;  %v7681_v21 = vld [vmem:[#allocation9 + $0x1f8] sm:$0xf0]  ;;  %v9072_v63 = vld [vmem:[#allocation9 + $0x74] sm:$0xf] }
 0x741   :  { %v7545_v29 = vld [vmem:[#allocation9 + $0xf0] sm:$0xf0]  ;;  %v7684_v1 = vor.u32 %v9105_v9, %v7681_v21  ;;  %v9335_v9 = vld [vmem:[#allocation10 + $0xac] sm:$0xf]  ;;  %v8545_v21 = vld [vmem:[#allocation10 + $0xb8] sm:$0xf0] }
 0x742   :  { %v7548_v56 = vor.u32 %v9072_v63, %v7545_v29  ;;  %v2989_v63 = vperm.slane %v11366_v34, 5  ;;  %v8519_v29 = vld [vmem:[#allocation10 + $0x80] sm:$0xf] }
 0x743   :  { %4687 = vmatpush.bf16.msra.mxu0 %v8056_v13  ;;  %4700 = vmatpush.bf16.msra.mxu1 %v8060_v39  ;;  %v7553_v39 = vld [vmem:[#allocation9 + $0xf8] sm:$0xf0] }
 0x744   :  { %4713 = vmatpush.bf16.msra.mxu2 %v8064_v47  ;;  %4726 = vmatpush.bf16.msra.mxu3 %v8068_v8  ;;  %v4461_v4 = vpop.f32.mrf.mxu2  ;;  %v4474_v13 = vpop.f32.mrf.mxu3  ;;  %v9342_v47 = vld [vmem:[#allocation10 + $0xe4] sm:$0xf]  ;;  %v8569_v8 = vld [vmem:[#allocation10 + $0xf0] sm:$0xf0] }
 0x745   :  { %v11343_v62 = vor.u32 %v9342_v47, %v8569_v8  ;;  %v9333_v4 = vld [vmem:[#allocation10 + $0x94] sm:$0xf0]  ;;  %v9331_v13 = vld [vmem:[#allocation10 + $0x8c] sm:$0xf] }
 0x747   :  { %4688 = vmatpush.bf16.msra.mxu0 %v7928_v0  ;;  %4701 = vmatpush.bf16.msra.mxu1 %v7932_v20  ;;  %v7552_v0 = vor.u32 %v9089_v12, %v7551_v59  ;;  %v7556_v20 = vor.u32 %v9073_v14, %v7553_v39  ;;  %v9330_v59 = vld [vmem:[#allocation10 + $0x84] sm:$0xf]  ;;  %v8521_v12 = vld [vmem:[#allocation10 + $0x90] sm:$0xf0]  ;;  %v8527_v14 = vld [vmem:[#allocation10 + $0x88] sm:$0xf] }
 0x748   :  { %4714 = vmatpush.bf16.msra.mxu2 %v7936_v16  ;;  %4727 = vmatpush.bf16.msra.mxu3 %v7940_v45  ;;  %v8551_v16 = vld [vmem:[#allocation10 + $0xc0] sm:$0xf]  ;;  %v9340_v45 = vld [vmem:[#allocation10 + $0xcc] sm:$0xf0]  ;;  %v8529_v39 = vld [vmem:[#allocation10 + $0x98] sm:$0xf0]  ;;  %v11396_v43 = vor.u32 %v9333_v4, %v8527_v14 }
 0x749   :  { %v11398_v28 = vor.u32 %v9331_v13, %v8529_v39 }
 0x74b   :  { %4689 = vmatpush.bf16.msra.mxu0 %v7800_v32  ;;  %4702 = vmatpush.bf16.msra.mxu1 %v7804_v37  ;;  %v11351_v32 = vor.u32 %v9340_v45, %v8551_v16  ;;  %v11353_v37 = vor.u32 %v9338_v26, %v8553_v27  ;;  %v8511_v16 = vld [vmem:[#allocation10 + $0x68] sm:$0xf]  ;;  %v9329_v45 = vld [vmem:[#allocation10 + $0x74] sm:$0xf0]  ;;  %v9327_v26 = vld [vmem:[#allocation10 + $0x6c] sm:$0xf] }
 0x74c   :  { %4715 = vmatpush.bf16.msra.mxu2 %v7808_v50  ;;  %4728 = vmatpush.bf16.msra.mxu3 %v7812_v54  ;;  %v11357_v50 = vor.u32 %v9341_v36, %v8559_v53  ;;  %v11359_v54 = vor.u32 %v9339_v22, %v8561_v40  ;;  %v8513_v27 = vld [vmem:[#allocation10 + $0x78] sm:$0xf0]  ;;  %v2990_v53 = vperm.slane %v11366_v34, 6  ;;  %v2991_v36 = vperm.slane %v11366_v34, 7 }
 0x74f   :  { %4690 = vmatpush.bf16.msra.mxu0 %v7672_v35  ;;  %4703 = vmatpush.bf16.msra.mxu1 %v7676_v46  ;;  %v11372_v35 = vor.u32 %v9336_v49, %v8535_v41  ;;  %v11374_v46 = vor.u32 %v9334_v61, %v8537_v2  ;;  %v8487_v41 = vld [vmem:[#allocation10 + $0x40] sm:$0xf]  ;;  %v9324_v49 = vld [vmem:[#allocation10 + $0x4c] sm:$0xf0]  ;;  %v11410_v61 = vor.u32 %v9329_v45, %v8511_v16  ;;  %v8479_v16 = vld [vmem:[#allocation10 + $0x28] sm:$0xf] }
 0x750   :  { %4716 = vmatpush.bf16.msra.mxu2 %v7680_v57  ;;  %4729 = vmatpush.bf16.msra.mxu3 %v7684_v1  ;;  %v9332_v57 = vld [vmem:[#allocation10 + $0x8c] sm:$0xf0]  ;;  %v11380_v1 = vor.u32 %v9337_v6, %v8543_v3  ;;  %v11412_v2 = vor.u32 %v9327_v26, %v8513_v27  ;;  %v9322_v3 = vld [vmem:[#allocation10 + $0x44] sm:$0xf]  ;;  %v8489_v6 = vld [vmem:[#allocation10 + $0x50] sm:$0xf0]  ;;  %v11420_v13 = vor.u32 %v9324_v49, %v8487_v41 }
 0x751   :  { %v11384_v47 = vor.u32 %v9332_v57, %v8519_v29  ;;  %v9323_v29 = vld [vmem:[#allocation10 + $0x4c] sm:$0xf]  ;;  %v8497_v57 = vld [vmem:[#allocation10 + $0x58] sm:$0xf0]  ;;  %v11422_v39 = vor.u32 %v9322_v3, %v8489_v6  ;;  %v9321_v45 = vld [vmem:[#allocation10 + $0x34] sm:$0xf0] }
 0x752   :  { %v9319_v26 = vld [vmem:[#allocation10 + $0x2c] sm:$0xf]  ;;  %v8481_v27 = vld [vmem:[#allocation10 + $0x38] sm:$0xf0]  ;;  %v8455_v41 = vld [vmem:[#allocation10] sm:$0xf]  ;;  %v11438_v3 = vor.u32 %v9321_v45, %v8479_v16 }
 0x753   :  { %4691 = vmatpush.bf16.msra.mxu0 %v7544_v10  ;;  %4704 = vmatpush.bf16.msra.mxu1 %v7548_v56  ;;  %v4485_v11 = vpop.f32.mrf.mxu0  ;;  %v4498_v15 = vpop.f32.mrf.mxu1  ;;  %v11392_v10 = vor.u32 %v9330_v59, %v8521_v12  ;;  %v8503_v56 = vld [vmem:[#allocation10 + $0x60] sm:$0xf]  ;;  %v9316_v49 = vld [vmem:[#allocation10 + $0xc] sm:$0xf0]  ;;  %v11440_v6 = vor.u32 %v9319_v26, %v8481_v27  ;;  %v11935_v16 = vmov 0  }
 0x754   :  { %4717 = vmatpush.bf16.msra.mxu2 %v7552_v0  ;;  %4730 = vmatpush.bf16.msra.mxu3 %v7556_v20  ;;  %v11388_v8 = vadd.f32 %v4485_v11, %v2988_v52  ;;  %v11390_v17 = vadd.f32 %v4498_v15, %v2989_v63  ;;  %v9326_v0 = vld [vmem:[#allocation10 + $0x64] sm:$0xf]  ;;  %v8505_v20 = vld [vmem:[#allocation10 + $0x70] sm:$0xf0]  ;;  %v11404_v22 = vor.u32 %v9328_v55, %v8503_v56  ;;  %v9325_v63 = vld [vmem:[#allocation10 + $0x54] sm:$0xf0] }
 0x755   :  { %v11406_v40 = vor.u32 %v9326_v0, %v8505_v20  ;;  %v8471_v11 = vld [vmem:[#allocation10 + $0x20] sm:$0xf]  ;;  %v9320_v15 = vld [vmem:[#allocation10 + $0x2c] sm:$0xf0]  ;;  %v11428_v55 = vor.u32 %v9323_v29, %v8497_v57  ;;  %v9318_v0 = vld [vmem:[#allocation10 + $0x24] sm:$0xf] }
 0x756   :  { %4692 = vmatmul.bf16.vlgmr.msra.gmra.mxu0 %v11278_v31  ;;  %4705 = vmatmul.bf16.vlgmr.msra.gmra.mxu1 %v11278_v31  ;;  %11931 = vst [vmem:[#allocation22_spill] sm:$0xff] %v11388_v8  ;;  %v8473_v20 = vld [vmem:[#allocation10 + $0x30] sm:$0xf0]  ;;  %v9317_v57 = vld [vmem:[#allocation10 + $0x14] sm:$0xf0]  ;;  %v2976_v8 = vperm.slane %v11315_v58, 0 }
 0x757   :  { %4964 = vmatpush.bf16.msrb.mxu0 %v11341_v44  ;;  %4977 = vmatpush.bf16.msrb.mxu1 %v11343_v62  ;;  %11932 = vst [vmem:[#allocation21_spill] sm:$0xff] %v11390_v17 }
 0x758   :  { %4990 = vmatpush.bf16.msrb.mxu2 %v11345_v24  ;;  %5003 = vmatpush.bf16.msrb.mxu3 %v11347_v33 }
 0x759   :  { %4718 = vmatmul.bf16.vlgmr.msra.gmra.mxu2 %v11278_v31  ;;  %4731 = vmatmul.bf16.vlgmr.msra.gmra.mxu3 %v11278_v31  ;;  %v11382_v31 = vor.u32 %v9335_v9, %v8545_v21  ;;  %v8495_v9 = vld [vmem:[#allocation10 + $0x48] sm:$0xf] }
 0x75a   :  { %v11426_v56 = vor.u32 %v9325_v63, %v8495_v9  ;;  %v9314_v9 = vld [vmem:[#allocation10 + $0x4] sm:$0xf] }
 0x75b   :  { %4965 = vmatpush.bf16.msrb.mxu0 %v11351_v32  ;;  %4978 = vmatpush.bf16.msrb.mxu1 %v11353_v37  ;;  %v4487_v14 = vpop.f32.mrf.mxu0  ;;  %v4500_v4 = vpop.f32.mrf.mxu1 }
 0x75c   :  { %4991 = vmatpush.bf16.msrb.mxu2 %v11357_v50  ;;  %5004 = vmatpush.bf16.msrb.mxu3 %v11359_v54  ;;  %v4511_v21 = vpop.f32.mrf.mxu2  ;;  %v4524_v52 = vpop.f32.mrf.mxu3  ;;  %v9315_v14 = vld [vmem:[#allocation10 + $0xc] sm:$0xf]  ;;  %v8465_v4 = vld [vmem:[#allocation10 + $0x18] sm:$0xf0] }
 0x75d   :  { %v11414_v59 = vadd.f32 %v4511_v21, %v2990_v53  ;;  %v11416_v12 = vadd.f32 %v4524_v52, %v2991_v36  ;;  %v11432_v53 = vor.u32 %v9320_v15, %v8471_v11  ;;  %v11434_v36 = vor.u32 %v9318_v0, %v8473_v20  ;;  %v8457_v21 = vld [vmem:[#allocation10 + $0x10] sm:$0xf0]  ;;  %v8463_v52 = vld [vmem:[#allocation10 + $0x8] sm:$0xf] }
 0x75e   :  { %v11444_v11 = vor.u32 %v9316_v49, %v8455_v41  ;;  %v11446_v15 = vor.u32 %v9314_v9, %v8457_v21  ;;  %v11450_v0 = vor.u32 %v9317_v57, %v8463_v52  ;;  %v11452_v20 = vor.u32 %v9315_v14, %v8465_v4 }
 0x75f   :  { %4966 = vmatpush.bf16.msrb.mxu0 %v11372_v35  ;;  %4979 = vmatpush.bf16.msrb.mxu1 %v11374_v46  ;;  %11933 = vst [vmem:[#allocation23_spill] sm:$0xff] %v11414_v59 }
 0x760   :  { %4992 = vmatpush.bf16.msrb.mxu2 %v11380_v1  ;;  %5005 = vmatpush.bf16.msrb.mxu3 %v11382_v31  ;;  %11934 = vst [vmem:[#allocation24_spill] sm:$0xff] %v11416_v12 }
 0x763   :  { %4967 = vmatpush.bf16.msrb.mxu0 %v11384_v47  ;;  %4980 = vmatpush.bf16.msrb.mxu1 %v11392_v10 }
 0x764   :  { %4993 = vmatpush.bf16.msrb.mxu2 %v11396_v43  ;;  %5006 = vmatpush.bf16.msrb.mxu3 %v11398_v28  ;;  %v4513_v63 = vpop.f32.mrf.mxu2  ;;  %v4526_v29 = vpop.f32.mrf.mxu3 }
 0x765   :  { %v2970_v63 = vld [vmem:[%s11860_s8 + $0x10] sm:$0xff] }
 0x766   :  { %v2996_v29 = vperm.slane %v2970_v63, 4  ;;  %v2997_v57 = vperm.slane %v2970_v63, 5 }
 0x767   :  { %4968 = vmatpush.bf16.msrb.mxu0 %v11404_v22  ;;  %4981 = vmatpush.bf16.msrb.mxu1 %v11406_v40 }
 0x768   :  { %4994 = vmatpush.bf16.msrb.mxu2 %v11410_v61  ;;  %5007 = vmatpush.bf16.msrb.mxu3 %v11412_v2 }
 0x76b   :  { %4969 = vmatpush.bf16.msrb.mxu0 %v11420_v13  ;;  %4982 = vmatpush.bf16.msrb.mxu1 %v11422_v39 }
 0x76c   :  { %4995 = vmatpush.bf16.msrb.mxu2 %v11426_v56  ;;  %5008 = vmatpush.bf16.msrb.mxu3 %v11428_v55 }
 0x76f   :  { %4970 = vmatpush.bf16.msrb.mxu0 %v11432_v53  ;;  %4983 = vmatpush.bf16.msrb.mxu1 %v11434_v36 }
 0x770   :  { %4996 = vmatpush.bf16.msrb.mxu2 %v11438_v3  ;;  %5009 = vmatpush.bf16.msrb.mxu3 %v11440_v6 }
 0x773   :  { %4971 = vmatpush.bf16.msrb.mxu0 %v11444_v11  ;;  %4984 = vmatpush.bf16.msrb.mxu1 %v11446_v15  ;;  %v11468_v45 = vpop.f32.mrf.mxu0  ;;  %v11470_v26 = vpop.f32.mrf.mxu1 }
 0x774   :  { %4997 = vmatpush.bf16.msrb.mxu2 %v11450_v0  ;;  %5010 = vmatpush.bf16.msrb.mxu3 %v11452_v20  ;;  %11936 = vst [vmem:[#allocation25_spill] sm:$0xff] %v11468_v45 }
 0x775   :  { %11937 = vst [vmem:[#allocation26_spill] sm:$0xff] %v11470_v26 }
 0x776   :  { %4972 = vmatmul.bf16.vlgmr.msrb.gmra.mxu0 %v11935_v16  ;;  %4985 = vmatmul.bf16.vlgmr.msrb.gmra.mxu1 %v11935_v16 }
 0x777   :  { %5090 = vmatpush.bf16.msra.mxu0 %v11341_v44  ;;  %5103 = vmatpush.bf16.msra.mxu1 %v11343_v62 }
 0x778   :  { %4998 = vmatmul.bf16.vlgmr.msrb.gmra.mxu2 %v11935_v16  ;;  %5011 = vmatmul.bf16.vlgmr.msrb.gmra.mxu3 %v11935_v16 }
 0x779   :  { %5116 = vmatpush.bf16.msra.mxu2 %v11345_v24  ;;  %5129 = vmatpush.bf16.msra.mxu3 %v11347_v33 }
 0x77b   :  { %5091 = vmatpush.bf16.msra.mxu0 %v11351_v32  ;;  %5104 = vmatpush.bf16.msra.mxu1 %v11353_v37  ;;  %v4539_v49 = vpop.f32.mrf.mxu0  ;;  %v4552_v9 = vpop.f32.mrf.mxu1 }
 0x77c   :  { %v11480_v27 = vpop.f32.mrf.mxu2  ;;  %v11482_v41 = vpop.f32.mrf.mxu3  ;;  %v2998_v9 = vperm.slane %v2970_v63, 6 }
 0x77d   :  { %5117 = vmatpush.bf16.msra.mxu2 %v11357_v50  ;;  %5130 = vmatpush.bf16.msra.mxu3 %v11359_v54  ;;  %11938 = vst [vmem:[#allocation27_spill] sm:$0xff] %v11480_v27 }
 0x77e   :  { %11939 = vst [vmem:[#allocation28_spill] sm:$0xff] %v11482_v41 }
 0x77f   :  { %5092 = vmatpush.bf16.msra.mxu0 %v11372_v35  ;;  %5105 = vmatpush.bf16.msra.mxu1 %v11374_v46 }
 0x781   :  { %5118 = vmatpush.bf16.msra.mxu2 %v11380_v1  ;;  %5131 = vmatpush.bf16.msra.mxu3 %v11382_v31 }
 0x783   :  { %5093 = vmatpush.bf16.msra.mxu0 %v11384_v47  ;;  %5106 = vmatpush.bf16.msra.mxu1 %v11392_v10 }
 0x784   :  { %v4565_v21 = vpop.f32.mrf.mxu2  ;;  %v4578_v52 = vpop.f32.mrf.mxu3 }
 0x785   :  { %5119 = vmatpush.bf16.msra.mxu2 %v11396_v43  ;;  %5132 = vmatpush.bf16.msra.mxu3 %v11398_v28  ;;  %v2999_v21 = vperm.slane %v2970_v63, 7 }
 0x787   :  { %5094 = vmatpush.bf16.msra.mxu0 %v11404_v22  ;;  %5107 = vmatpush.bf16.msra.mxu1 %v11406_v40 }
 0x789   :  { %5120 = vmatpush.bf16.msra.mxu2 %v11410_v61  ;;  %5133 = vmatpush.bf16.msra.mxu3 %v11412_v2 }
 0x78b   :  { %5095 = vmatpush.bf16.msra.mxu0 %v11420_v13  ;;  %5108 = vmatpush.bf16.msra.mxu1 %v11422_v39 }
 0x78d   :  { %5121 = vmatpush.bf16.msra.mxu2 %v11426_v56  ;;  %5134 = vmatpush.bf16.msra.mxu3 %v11428_v55 }
 0x78f   :  { %5096 = vmatpush.bf16.msra.mxu0 %v11432_v53  ;;  %5109 = vmatpush.bf16.msra.mxu1 %v11434_v36 }
 0x791   :  { %5122 = vmatpush.bf16.msra.mxu2 %v11438_v3  ;;  %5135 = vmatpush.bf16.msra.mxu3 %v11440_v6 }
 0x793   :  { %5097 = vmatpush.bf16.msra.mxu0 %v11444_v11  ;;  %5110 = vmatpush.bf16.msra.mxu1 %v11446_v15  ;;  %v4589_v14 = vpop.f32.mrf.mxu0  ;;  %v4602_v4 = vpop.f32.mrf.mxu1 }
 0x794   :  { %v11515_v16 = vadd.f32 %v4589_v14, %v2996_v29  ;;  %v11517_v49 = vadd.f32 %v4602_v4, %v2997_v57 }
 0x795   :  { %5123 = vmatpush.bf16.msra.mxu2 %v11450_v0  ;;  %5136 = vmatpush.bf16.msra.mxu3 %v11452_v20 }
 0x796   :  { %11940 = vst [vmem:[#allocation30_spill] sm:$0xff] %v11515_v16 }
 0x797   :  { %5216 = vmatpush.bf16.msrb.mxu0 %v11341_v44  ;;  %5229 = vmatpush.bf16.msrb.mxu1 %v11343_v62  ;;  %11941 = vst [vmem:[#allocation29_spill] sm:$0xff] %v11517_v49 }
 0x799   :  { %5242 = vmatpush.bf16.msrb.mxu2 %v11345_v24  ;;  %5255 = vmatpush.bf16.msrb.mxu3 %v11347_v33 }
 0x79b   :  { %5217 = vmatpush.bf16.msrb.mxu0 %v11351_v32  ;;  %5230 = vmatpush.bf16.msrb.mxu1 %v11353_v37  ;;  %v4591_v14 = vpop.f32.mrf.mxu0  ;;  %v4604_v4 = vpop.f32.mrf.mxu1 }
 0x79c   :  { %v4615_v52 = vpop.f32.mrf.mxu2  ;;  %v4628_v41 = vpop.f32.mrf.mxu3 }
 0x79d   :  { %5243 = vmatpush.bf16.msrb.mxu2 %v11357_v50  ;;  %5256 = vmatpush.bf16.msrb.mxu3 %v11359_v54  ;;  %v11525_v29 = vadd.f32 %v4615_v52, %v2998_v9  ;;  %v11527_v57 = vadd.f32 %v4628_v41, %v2999_v21 }
 0x79f   :  { %5218 = vmatpush.bf16.msrb.mxu0 %v11372_v35  ;;  %5231 = vmatpush.bf16.msrb.mxu1 %v11374_v46  ;;  %11942 = vst [vmem:[#allocation31_spill] sm:$0xff] %v11525_v29 }
 0x7a0   :  { %11943 = vst [vmem:[#allocation32_spill] sm:$0xff] %v11527_v57  ;;  %v2971_v57 = vld [vmem:[%s11860_s8 + $0x18] sm:$0xff] }
 0x7a1   :  { %5244 = vmatpush.bf16.msrb.mxu2 %v11380_v1  ;;  %5257 = vmatpush.bf16.msrb.mxu3 %v11382_v31  ;;  %v3004_v29 = vperm.slane %v2971_v57, 4  ;;  %v3005_v16 = vperm.slane %v2971_v57, 5 }
 0x7a3   :  { %5219 = vmatpush.bf16.msrb.mxu0 %v11384_v47  ;;  %5232 = vmatpush.bf16.msrb.mxu1 %v11392_v10 }
 0x7a4   :  { %v4617_v63 = vpop.f32.mrf.mxu2  ;;  %v4630_v49 = vpop.f32.mrf.mxu3 }
 0x7a5   :  { %5245 = vmatpush.bf16.msrb.mxu2 %v11396_v43  ;;  %5258 = vmatpush.bf16.msrb.mxu3 %v11398_v28 }
 0x7a7   :  { %5220 = vmatpush.bf16.msrb.mxu0 %v11404_v22  ;;  %5233 = vmatpush.bf16.msrb.mxu1 %v11406_v40 }
 0x7a9   :  { %5246 = vmatpush.bf16.msrb.mxu2 %v11410_v61  ;;  %5259 = vmatpush.bf16.msrb.mxu3 %v11412_v2 }
 0x7ab   :  { %5221 = vmatpush.bf16.msrb.mxu0 %v11420_v13  ;;  %5234 = vmatpush.bf16.msrb.mxu1 %v11422_v39 }
 0x7ad   :  { %5247 = vmatpush.bf16.msrb.mxu2 %v11426_v56  ;;  %5260 = vmatpush.bf16.msrb.mxu3 %v11428_v55 }
 0x7af   :  { %5222 = vmatpush.bf16.msrb.mxu0 %v11432_v53  ;;  %5235 = vmatpush.bf16.msrb.mxu1 %v11434_v36 }
 0x7b1   :  { %5248 = vmatpush.bf16.msrb.mxu2 %v11438_v3  ;;  %5261 = vmatpush.bf16.msrb.mxu3 %v11440_v6 }
 0x7b3   :  { %5223 = vmatpush.bf16.msrb.mxu0 %v11444_v11  ;;  %5236 = vmatpush.bf16.msrb.mxu1 %v11446_v15  ;;  %v11545_v41 = vpop.f32.mrf.mxu0  ;;  %v11547_v49 = vpop.f32.mrf.mxu1 }
 0x7b4   :  { %11944 = vst [vmem:[#allocation33_spill] sm:$0xff] %v11545_v41 }
 0x7b5   :  { %5249 = vmatpush.bf16.msrb.mxu2 %v11450_v0  ;;  %5262 = vmatpush.bf16.msrb.mxu3 %v11452_v20  ;;  %11945 = vst [vmem:[#allocation34_spill] sm:$0xff] %v11547_v49  ;;  %v3006_v49 = vperm.slane %v2971_v57, 6 }
 0x7bb   :  { %v4643_v52 = vpop.f32.mrf.mxu0  ;;  %v4656_v14 = vpop.f32.mrf.mxu1 }
 0x7bc   :  { %v11549_v9 = vpop.f32.mrf.mxu2  ;;  %v11551_v21 = vpop.f32.mrf.mxu3 }
 0x7bd   :  { %11946 = vst [vmem:[#allocation35_spill] sm:$0xff] %v11549_v9  ;;  %v3007_v9 = vperm.slane %v2971_v57, 7 }
 0x7be   :  { %11947 = vst [vmem:[#allocation36_spill] sm:$0xff] %v11551_v21 }
 0x7c4   :  { %v4669_v4 = vpop.f32.mrf.mxu2  ;;  %v4682_v63 = vpop.f32.mrf.mxu3 }
 0x7d3   :  { %v4693_v27 = vpop.f32.mrf.mxu0  ;;  %v4706_v26 = vpop.f32.mrf.mxu1 }
 0x7d4   :  { %v11556_v45 = vadd.f32 %v4693_v27, %v3004_v29  ;;  %v11558_v41 = vadd.f32 %v4706_v26, %v3005_v16  ;;  %v4330_v27 = vadd.f32 %v11304_v25, %v2976_v8  ;;  %v4343_v26 = vadd.f32 %v11306_v30, %v2977_v48 }
 0x7d6   :  { %11948 = vst [vmem:[#allocation38_spill] sm:$0xff] %v11556_v45 }
 0x7d7   :  { %11949 = vst [vmem:[#allocation19_spill] sm:$0xff] %v11558_v41 }
 0x7db   :  { %v4695_v4 = vpop.f32.mrf.mxu0  ;;  %v4708_v63 = vpop.f32.mrf.mxu1 }
 0x7dc   :  { %v4719_v12 = vpop.f32.mrf.mxu2  ;;  %v4732_v21 = vpop.f32.mrf.mxu3 }
 0x7dd   :  { %v11560_v52 = vadd.f32 %v4719_v12, %v3006_v49  ;;  %v11562_v14 = vadd.f32 %v4732_v21, %v3007_v9  ;;  %v2978_v12 = vperm.slane %v11315_v58, 2 }
 0x7df   :  { %11950 = vst [vmem:[#allocation16_spill] sm:$0xff] %v11560_v52 }
 0x7e0   :  { %11951 = vst [vmem:[#allocation37_spill] sm:$0xff] %v11562_v14 }
 0x7e4   :  { %v4721_v59 = vpop.f32.mrf.mxu2  ;;  %v4734_v17 = vpop.f32.mrf.mxu3 }
 0x7e5   :  { %v4356_v59 = vadd.f32 %v11308_v18, %v2978_v12 }
 0x7f3   :  { %v4973_v16 = vpop.f32.mrf.mxu0  ;;  %v4986_v29 = vpop.f32.mrf.mxu1 }
 0x7f4   :  { %v5016_v57 = vadd.f32 %v4973_v16, %v4330_v27  ;;  %v5017_v41 = vadd.f32 %v4986_v29, %v4343_v26  ;;  %v2979_v26 = vperm.slane %v11315_v58, 3 }
 0x7f6   :  { %v8581_v49 = vmul.f32 -1.442695, %v5016_v57  ;;  %v8582_v9 = vmul.f32 -1.442695, %v5017_v41  ;;  %v4369_v18 = vadd.f32 %v11310_v19, %v2979_v26 }
 0x7f8   :  { %9553 = vpow2.f32 %v8581_v49 }
 0x7f9   :  { %9555 = vpow2.f32 %v8582_v9 }
 0x7fb   :  { %v4999_v17 = vpop.f32.mrf.mxu2  ;;  %v5012_v21 = vpop.f32.mrf.mxu3 }
 0x7fc   :  { %v5018_v4 = vadd.f32 %v4999_v17, %v4356_v59  ;;  %v4975_v63 = vpop.f32.mrf.mxu0  ;;  %v4988_v14 = vpop.f32.mrf.mxu1  ;;  %v5019_v49 = vadd.f32 %v5012_v21, %v4369_v18 }
 0x7fe   :  { %v8583_v25 = vmul.f32 -1.442695, %v5018_v4  ;;  %v9554_v8 = vpop.eup %9553 }
 0x7ff   :  { %v9556_v30 = vpop.eup %9555  ;;  %v5023_v48 = vadd.f32 1.0, %v9554_v8 }
 0x800   :  { %9557 = vpow2.f32 %v8583_v25  ;;  %v5042_v27 = vadd.f32 1.0, %v9556_v30 }
 0x801   :  { %9559 = vrcp.f32 %v5023_v48  ;;  %v5035_v63 = vand.u32 2147483648, %v5023_v48  ;;  %v5033_v8 = vand.u32 2147483647, %v5023_v48  ;;  %vm5029_vm2 = vweird.f32 %v5023_v48 }
 0x802   :  { %9561 = vrcp.f32 %v5042_v27  ;;  %v5054_v25 = vand.u32 2147483648, %v5042_v27  ;;  %vm5048_vm3 = vweird.f32 %v5042_v27 }
 0x803   :  { %v5001_v41 = vpop.f32.mrf.mxu2  ;;  %v5014_v16 = vpop.f32.mrf.mxu3  ;;  %v5036_v26 = vor.u32 1.1754944e-38, %v5035_v63  ;;  %vm5034_vm5 = vcmp.eq.f32.partialorder %v5033_v8, 8.507059e+37 }
 0x804   :  { %v5052_v41 = vand.u32 2147483647, %v5042_v27  ;;  %v5055_v18 = vor.u32 1.1754944e-38, %v5054_v25 }
 0x806   :  { %v9558_v29 = vpop.eup %9557  ;;  %vm5053_vm7 = vcmp.eq.f32.partialorder %v5052_v41, 8.507059e+37 }
 0x807   :  { %v5061_v57 = vadd.f32 1.0, %v9558_v29  ;;  %v9560_v12 = vpop.eup %9559 }
 0x808   :  { %v9562_v9 = vpop.eup %9561  ;;  %v5025_v14 = vmul.f32 %v9560_v12, %v5023_v48  ;;  %vm5030_vm0 = vweird.f32 %v9560_v12 }
 0x809   :  { %9563 = vrcp.f32 %v5061_v57  ;;  %v5044_v59 = vmul.f32 %v9562_v9, %v5042_v27  ;;  %vm5049_vm1 = vweird.f32 %v9562_v9  ;;  %vm5031_vm4 = vmor %vm5029_vm2, %vm5030_vm0  ;;  %v5073_v27 = vand.u32 2147483648, %v5061_v57 }
 0x80a   :  { %v5026_v17 = vsub.f32 1.0, %v5025_v14  ;;  %9565 = vtanh.f32 %v5019_v49  ;;  %vm5050_vm6 = vmor %vm5048_vm3, %vm5049_vm1  ;;  %vm5067_vm9 = vweird.f32 %v5061_v57 }
 0x80b   :  { %v5045_v4 = vsub.f32 1.0, %v5044_v59  ;;  %v5074_v25 = vor.u32 1.1754944e-38, %v5073_v27 }
 0x80c   :  { %v5027_v58 = vmul.f32 %v9560_v12, %v5026_v17 }
 0x80d   :  { %v5046_v30 = vmul.f32 %v9562_v9, %v5045_v4 }
 0x80e   :  { %v5028_v19 = vadd.f32 %v9560_v12, %v5027_v58 }
 0x80f   :  { %v9564_v16 = vpop.eup %9563  ;;  %v5047_v29 = vadd.f32 %v9562_v9, %v5046_v30 }
 0x810   :  { %v5063_v21 = vmul.f32 %v9564_v16, %v5061_v57  ;;  %v5032_v14 = vsel %vm5031_vm4, %v9560_v12, %v5028_v19  ;;  %v9566_v49 = vpop.eup %9565  ;;  %vm5068_vm8 = vweird.f32 %v9564_v16  ;;  %v5071_v12 = vand.u32 2147483647, %v5061_v57 }
 0x811   :  { %v5037_v17 = vsel %vm5034_vm5, %v5036_v26, %v5032_v14  ;;  %v5051_v52 = vsel %vm5050_vm6, %v9562_v9, %v5047_v29  ;;  %vm5069_vm10 = vmor %vm5067_vm9, %vm5068_vm8 }
 0x812   :  { %v5064_v59 = vsub.f32 1.0, %v5063_v21  ;;  %v5056_v4 = vsel %vm5053_vm7, %v5055_v18, %v5051_v52  ;;  %v5079_v45 = vmul.f32 %v9566_v49, %v5037_v17  ;;  %vm5072_vm11 = vcmp.eq.f32.partialorder %v5071_v12, 8.507059e+37 }
 0x813   :  { %v5078_v42 = vmul.f32 0.0, %v5056_v4 }
 0x814   :  { %v5065_v60 = vmul.f32 %v9564_v16, %v5064_v59 }
 0x815   :  { %v11572_v58 = vadd.f32 %v5079_v45, %v5078_v42 }
 0x816   :  { %v5066_v48 = vadd.f32 %v9564_v16, %v5065_v60 }
 0x817   :  { %9567 = vtanh.f32 %v11572_v58 }
 0x818   :  { %v5070_v63 = vsel %vm5069_vm10, %v9564_v16, %v5066_v48 }
 0x819   :  { %v5075_v9 = vsel %vm5072_vm11, %v5074_v25, %v5070_v63 }
 0x81d   :  { %v9568_v8 = vpop.eup %9567 }
 0x81e   :  { %v11575_v30 = vmul.f32 %v9568_v8, %v5075_v9 }
 0x820   :  { %v5089_v52 = vpack.c.bf16 %v11575_v30, %v11575_v30 }
 0x822   :  { %5098 = vmatmul.bf16.vlgmr.msra.gmra.mxu0 %v5089_v52  ;;  %5111 = vmatmul.bf16.vlgmr.msra.gmra.mxu1 %v5089_v52 }
 0x823   :  { %5124 = vmatmul.bf16.vlgmr.msra.gmra.mxu2 %v5089_v52  ;;  %5137 = vmatmul.bf16.vlgmr.msra.gmra.mxu3 %v5089_v52 }
 0x824   :  { %5342 = vmatpush.bf16.msra.mxu0 %v11341_v44  ;;  %5355 = vmatpush.bf16.msra.mxu1 %v11343_v62 }
 0x825   :  { %5368 = vmatpush.bf16.msra.mxu2 %v11345_v24  ;;  %5381 = vmatpush.bf16.msra.mxu3 %v11347_v33 }
 0x828   :  { %5343 = vmatpush.bf16.msra.mxu0 %v11351_v32  ;;  %5356 = vmatpush.bf16.msra.mxu1 %v11353_v37 }
 0x829   :  { %5369 = vmatpush.bf16.msra.mxu2 %v11357_v50  ;;  %5382 = vmatpush.bf16.msra.mxu3 %v11359_v54 }
 0x82c   :  { %5344 = vmatpush.bf16.msra.mxu0 %v11372_v35  ;;  %5357 = vmatpush.bf16.msra.mxu1 %v11374_v46 }
 0x82d   :  { %5370 = vmatpush.bf16.msra.mxu2 %v11380_v1  ;;  %5383 = vmatpush.bf16.msra.mxu3 %v11382_v31 }
 0x830   :  { %5345 = vmatpush.bf16.msra.mxu0 %v11384_v47  ;;  %5358 = vmatpush.bf16.msra.mxu1 %v11392_v10 }
 0x831   :  { %5371 = vmatpush.bf16.msra.mxu2 %v11396_v43  ;;  %5384 = vmatpush.bf16.msra.mxu3 %v11398_v28 }
 0x834   :  { %5346 = vmatpush.bf16.msra.mxu0 %v11404_v22  ;;  %5359 = vmatpush.bf16.msra.mxu1 %v11406_v40 }
 0x835   :  { %5372 = vmatpush.bf16.msra.mxu2 %v11410_v61  ;;  %5385 = vmatpush.bf16.msra.mxu3 %v11412_v2 }
 0x838   :  { %5347 = vmatpush.bf16.msra.mxu0 %v11420_v13  ;;  %5360 = vmatpush.bf16.msra.mxu1 %v11422_v39 }
 0x839   :  { %5373 = vmatpush.bf16.msra.mxu2 %v11426_v56  ;;  %5386 = vmatpush.bf16.msra.mxu3 %v11428_v55 }
 0x83c   :  { %5348 = vmatpush.bf16.msra.mxu0 %v11432_v53  ;;  %5361 = vmatpush.bf16.msra.mxu1 %v11434_v36 }
 0x83d   :  { %5374 = vmatpush.bf16.msra.mxu2 %v11438_v3  ;;  %5387 = vmatpush.bf16.msra.mxu3 %v11440_v6 }
 0x840   :  { %5349 = vmatpush.bf16.msra.mxu0 %v11444_v11  ;;  %5362 = vmatpush.bf16.msra.mxu1 %v11446_v15 }
 0x841   :  { %5375 = vmatpush.bf16.msra.mxu2 %v11450_v0  ;;  %5388 = vmatpush.bf16.msra.mxu3 %v11452_v20 }
 0x89f   :  { %v5099_v42 = vpop.f32.mrf.mxu0  ;;  %v5112_v60 = vpop.f32.mrf.mxu1 }
 0x8a0   :  { %v5142_v45 = vadd.f32 %v5099_v42, %v11319_v7  ;;  %v5143_v57 = vadd.f32 %v5112_v60, %v11321_v51 }
 0x8a2   :  { %v8584_v41 = vmul.f32 -1.442695, %v5142_v45  ;;  %v8585_v16 = vmul.f32 -1.442695, %v5143_v57 }
 0x8a4   :  { %9569 = vpow2.f32 %v8584_v41 }
 0x8a5   :  { %9571 = vpow2.f32 %v8585_v16 }
 0x8a6   :  { %v5125_v19 = vpop.f32.mrf.mxu2  ;;  %v5138_v21 = vpop.f32.mrf.mxu3 }
 0x8a7   :  { %v5144_v26 = vadd.f32 %v5125_v19, %v11325_v38  ;;  %v5101_v29 = vpop.f32.mrf.mxu0  ;;  %v5114_v18 = vpop.f32.mrf.mxu1  ;;  %v5145_v63 = vadd.f32 %v5138_v21, %v11327_v23 }
 0x8a9   :  { %v8586_v14 = vmul.f32 -1.442695, %v5144_v26 }
 0x8aa   :  { %v9570_v49 = vpop.eup %9569 }
 0x8ab   :  { %v9572_v59 = vpop.eup %9571  ;;  %v5149_v17 = vadd.f32 1.0, %v9570_v49  ;;  %9573 = vpow2.f32 %v8586_v14 }
 0x8ac   :  { %v5168_v4 = vadd.f32 1.0, %v9572_v59 }
 0x8ad   :  { %9575 = vrcp.f32 %v5149_v17  ;;  %v5161_v42 = vand.u32 2147483648, %v5149_v17  ;;  %v5159_v57 = vand.u32 2147483647, %v5149_v17  ;;  %vm5155_vm14 = vweird.f32 %v5149_v17 }
 0x8ae   :  { %9577 = vrcp.f32 %v5168_v4  ;;  %v5127_v7 = vpop.f32.mrf.mxu2  ;;  %v5140_v51 = vpop.f32.mrf.mxu3  ;;  %v5180_v60 = vand.u32 2147483648, %v5168_v4  ;;  %v5178_v16 = vand.u32 2147483647, %v5168_v4  ;;  %vm5174_vm15 = vweird.f32 %v5168_v4 }
 0x8af   :  { %v5162_v21 = vor.u32 1.1754944e-38, %v5161_v42  ;;  %vm5160_vm2 = vcmp.eq.f32.partialorder %v5159_v57, 8.507059e+37  ;;  %v2985_v57 = vperm.slane %v11366_v34, 1 }
 0x8b0   :  { %v5181_v18 = vor.u32 1.1754944e-38, %v5180_v60  ;;  %vm5179_vm3 = vcmp.eq.f32.partialorder %v5178_v16, 8.507059e+37  ;;  %v11952_v16 = vld [vmem:[#allocation17_spill] sm:$0xff] }
 0x8b1   :  { %v9574_v48 = vpop.eup %9573 }
 0x8b2   :  { %v5187_v27 = vadd.f32 1.0, %v9574_v48 }
 0x8b3   :  { %v9576_v12 = vpop.eup %9575 }
 0x8b4   :  { %v9578_v25 = vpop.eup %9577  ;;  %v5151_v8 = vmul.f32 %v9576_v12, %v5149_v17  ;;  %9579 = vrcp.f32 %v5187_v27  ;;  %vm5156_vm12 = vweird.f32 %v9576_v12  ;;  %vm5193_vm5 = vweird.f32 %v5187_v27 }
 0x8b5   :  { %v5170_v38 = vmul.f32 %v9578_v25, %v5168_v4  ;;  %9581 = vtanh.f32 %v5145_v63  ;;  %vm5175_vm13 = vweird.f32 %v9578_v25  ;;  %vm5157_vm0 = vmor %vm5155_vm14, %vm5156_vm12 }
 0x8b6   :  { %v5152_v9 = vsub.f32 1.0, %v5151_v8  ;;  %vm5176_vm1 = vmor %vm5174_vm15, %vm5175_vm13 }
 0x8b7   :  { %v5171_v52 = vsub.f32 1.0, %v5170_v38 }
 0x8b8   :  { %v5153_v45 = vmul.f32 %v9576_v12, %v5152_v9  ;;  %v5199_v9 = vand.u32 2147483648, %v5187_v27 }
 0x8b9   :  { %v5172_v41 = vmul.f32 %v9578_v25, %v5171_v52 }
 0x8ba   :  { %v9580_v19 = vpop.eup %9579  ;;  %v5154_v26 = vadd.f32 %v9576_v12, %v5153_v45  ;;  %v5200_v42 = vor.u32 1.1754944e-38, %v5199_v9 }
 0x8bb   :  { %v5189_v23 = vmul.f32 %v9580_v19, %v5187_v27  ;;  %v5173_v29 = vadd.f32 %v9578_v25, %v5172_v41  ;;  %v9582_v49 = vpop.eup %9581  ;;  %vm5194_vm4 = vweird.f32 %v9580_v19 }
 0x8bc   :  { %v5158_v14 = vsel %vm5157_vm0, %v9576_v12, %v5154_v26  ;;  %v5197_v12 = vand.u32 2147483647, %v5187_v27  ;;  %vm5195_vm6 = vmor %vm5193_vm5, %vm5194_vm4  ;;  %v2984_v27 = vperm.slane %v11366_v34, 0 }
 0x8bd   :  { %v5190_v59 = vsub.f32 1.0, %v5189_v23  ;;  %v5163_v7 = vsel %vm5160_vm2, %v5162_v21, %v5158_v14  ;;  %v5177_v51 = vsel %vm5176_vm1, %v9578_v25, %v5173_v29 }
 0x8be   :  { %v5182_v48 = vsel %vm5179_vm3, %v5181_v18, %v5177_v51  ;;  %v5205_v63 = vmul.f32 %v9582_v49, %v5163_v7  ;;  %vm5198_vm7 = vcmp.eq.f32.partialorder %v5197_v12, 8.507059e+37  ;;  %v4434_v41 = vadd.f32 %v11333_v5, %v2984_v27  ;;  %v11954_v27 = vld [vmem:[#allocation20_spill] sm:$0xff] }
 0x8bf   :  { %v5191_v8 = vmul.f32 %v9580_v19, %v5190_v59  ;;  %v5204_v38 = vmul.f32 %v5182_v48, %v11572_v58  ;;  %v2986_v18 = vperm.slane %v11366_v34, 2  ;;  %v11953_v59 = vld [vmem:[#allocation18_spill] sm:$0xff] }
 0x8c1   :  { %v11616_v17 = vadd.f32 %v5205_v63, %v5204_v38  ;;  %v5192_v4 = vadd.f32 %v9580_v19, %v5191_v8  ;;  %v4460_v7 = vadd.f32 %v11953_v59, %v2986_v18 }
 0x8c3   :  { %9583 = vtanh.f32 %v11616_v17  ;;  %v5196_v52 = vsel %vm5195_vm6, %v9580_v19, %v5192_v4  ;;  %v4447_v19 = vadd.f32 %v11952_v16, %v2985_v57 }
 0x8c4   :  { %v5201_v60 = vsel %vm5198_vm7, %v5200_v42, %v5196_v52  ;;  %v2987_v42 = vperm.slane %v11366_v34, 3 }
 0x8c6   :  { %v4473_v57 = vadd.f32 %v11954_v27, %v2987_v42 }
 0x8c9   :  { %v9584_v25 = vpop.eup %9583 }
 0x8ca   :  { %v11619_v45 = vmul.f32 %v9584_v25, %v5201_v60 }
 0x8cc   :  { %v5215_v58 = vpack.c.bf16 %v11619_v45, %v11619_v45 }
 0x8ce   :  { %5224 = vmatmul.bf16.vlgmr.msrb.gmra.mxu0 %v5215_v58  ;;  %5237 = vmatmul.bf16.vlgmr.msrb.gmra.mxu1 %v5215_v58 }
 0x8cf   :  { %5250 = vmatmul.bf16.vlgmr.msrb.gmra.mxu2 %v5215_v58  ;;  %5263 = vmatmul.bf16.vlgmr.msrb.gmra.mxu3 %v5215_v58 }
 0x8d0   :  { %5468 = vmatpush.bf16.msrb.mxu0 %v11341_v44  ;;  %5481 = vmatpush.bf16.msrb.mxu1 %v11343_v62 }
 0x8d1   :  { %5494 = vmatpush.bf16.msrb.mxu2 %v11345_v24  ;;  %5507 = vmatpush.bf16.msrb.mxu3 %v11347_v33 }
 0x8d4   :  { %5469 = vmatpush.bf16.msrb.mxu0 %v11351_v32  ;;  %5482 = vmatpush.bf16.msrb.mxu1 %v11353_v37 }
 0x8d5   :  { %5495 = vmatpush.bf16.msrb.mxu2 %v11357_v50  ;;  %5508 = vmatpush.bf16.msrb.mxu3 %v11359_v54 }
 0x8d8   :  { %5470 = vmatpush.bf16.msrb.mxu0 %v11372_v35  ;;  %5483 = vmatpush.bf16.msrb.mxu1 %v11374_v46 }
 0x8d9   :  { %5496 = vmatpush.bf16.msrb.mxu2 %v11380_v1  ;;  %5509 = vmatpush.bf16.msrb.mxu3 %v11382_v31 }
 0x8dc   :  { %5471 = vmatpush.bf16.msrb.mxu0 %v11384_v47  ;;  %5484 = vmatpush.bf16.msrb.mxu1 %v11392_v10 }
 0x8dd   :  { %5497 = vmatpush.bf16.msrb.mxu2 %v11396_v43  ;;  %5510 = vmatpush.bf16.msrb.mxu3 %v11398_v28 }
 0x8e0   :  { %5472 = vmatpush.bf16.msrb.mxu0 %v11404_v22  ;;  %5485 = vmatpush.bf16.msrb.mxu1 %v11406_v40 }
 0x8e1   :  { %5498 = vmatpush.bf16.msrb.mxu2 %v11410_v61  ;;  %5511 = vmatpush.bf16.msrb.mxu3 %v11412_v2 }
 0x8e4   :  { %5473 = vmatpush.bf16.msrb.mxu0 %v11420_v13  ;;  %5486 = vmatpush.bf16.msrb.mxu1 %v11422_v39 }
 0x8e5   :  { %5499 = vmatpush.bf16.msrb.mxu2 %v11426_v56  ;;  %5512 = vmatpush.bf16.msrb.mxu3 %v11428_v55 }
 0x8e8   :  { %5474 = vmatpush.bf16.msrb.mxu0 %v11432_v53  ;;  %5487 = vmatpush.bf16.msrb.mxu1 %v11434_v36 }
 0x8e9   :  { %5500 = vmatpush.bf16.msrb.mxu2 %v11438_v3  ;;  %5513 = vmatpush.bf16.msrb.mxu3 %v11440_v6 }
 0x8ec   :  { %5475 = vmatpush.bf16.msrb.mxu0 %v11444_v11  ;;  %5488 = vmatpush.bf16.msrb.mxu1 %v11446_v15 }
 0x8ed   :  { %5501 = vmatpush.bf16.msrb.mxu2 %v11450_v0  ;;  %5514 = vmatpush.bf16.msrb.mxu3 %v11452_v20 }
 0x94b   :  { %v5225_v26 = vpop.f32.mrf.mxu0  ;;  %v5238_v23 = vpop.f32.mrf.mxu1 }
 0x94c   :  { %v5268_v21 = vadd.f32 %v5225_v26, %v4434_v41  ;;  %v5269_v29 = vadd.f32 %v5238_v23, %v4447_v19 }
 0x94e   :  { %v8587_v14 = vmul.f32 -1.442695, %v5268_v21  ;;  %v8588_v49 = vmul.f32 -1.442695, %v5269_v29 }
 0x950   :  { %9585 = vpow2.f32 %v8587_v14 }
 0x951   :  { %9587 = vpow2.f32 %v8588_v49 }
 0x952   :  { %v5251_v51 = vpop.f32.mrf.mxu2  ;;  %v5264_v48 = vpop.f32.mrf.mxu3 }
 0x953   :  { %v5270_v63 = vadd.f32 %v5251_v51, %v4460_v7  ;;  %v5227_v8 = vpop.f32.mrf.mxu0  ;;  %v5240_v38 = vpop.f32.mrf.mxu1  ;;  %v5271_v19 = vadd.f32 %v5264_v48, %v4473_v57 }
 0x955   :  { %v8589_v5 = vmul.f32 -1.442695, %v5270_v63 }
 0x956   :  { %v9586_v4 = vpop.eup %9585 }
 0x957   :  { %v9588_v9 = vpop.eup %9587  ;;  %v5275_v12 = vadd.f32 1.0, %v9586_v4  ;;  %9589 = vpow2.f32 %v8589_v5 }
 0x958   :  { %v5294_v52 = vadd.f32 1.0, %v9588_v9 }
 0x959   :  { %9591 = vrcp.f32 %v5275_v12  ;;  %v5287_v14 = vand.u32 2147483648, %v5275_v12  ;;  %v5285_v59 = vand.u32 2147483647, %v5275_v12  ;;  %vm5281_vm10 = vweird.f32 %v5275_v12 }
 0x95a   :  { %9593 = vrcp.f32 %v5294_v52  ;;  %v5253_v25 = vpop.f32.mrf.mxu2  ;;  %v5266_v60 = vpop.f32.mrf.mxu3  ;;  %v5306_v49 = vand.u32 2147483648, %v5294_v52  ;;  %v5304_v51 = vand.u32 2147483647, %v5294_v52  ;;  %vm5300_vm11 = vweird.f32 %v5294_v52 }
 0x95b   :  { %v5288_v38 = vor.u32 1.1754944e-38, %v5287_v14  ;;  %vm5286_vm14 = vcmp.eq.f32.partialorder %v5285_v59, 8.507059e+37  ;;  %v11955_v59 = vld [vmem:[#allocation22_spill] sm:$0xff] }
 0x95c   :  { %v5307_v4 = vor.u32 1.1754944e-38, %v5306_v49  ;;  %vm5305_vm15 = vcmp.eq.f32.partialorder %v5304_v51, 8.507059e+37  ;;  %v11956_v51 = vld [vmem:[#allocation21_spill] sm:$0xff] }
 0x95d   :  { %v9590_v58 = vpop.eup %9589 }
 0x95e   :  { %v5313_v41 = vadd.f32 1.0, %v9590_v58 }
 0x95f   :  { %v9592_v16 = vpop.eup %9591 }
 0x960   :  { %v9594_v26 = vpop.eup %9593  ;;  %v5277_v23 = vmul.f32 %v9592_v16, %v5275_v12  ;;  %9595 = vrcp.f32 %v5313_v41  ;;  %vm5282_vm8 = vweird.f32 %v9592_v16  ;;  %vm5319_vm1 = vweird.f32 %v5313_v41 }
 0x961   :  { %v5296_v21 = vmul.f32 %v9594_v26, %v5294_v52  ;;  %9597 = vtanh.f32 %v5271_v19  ;;  %vm5301_vm9 = vweird.f32 %v9594_v26  ;;  %vm5283_vm12 = vmor %vm5281_vm10, %vm5282_vm8 }
 0x962   :  { %v5278_v29 = vsub.f32 1.0, %v5277_v23  ;;  %vm5302_vm13 = vmor %vm5300_vm11, %vm5301_vm9 }
 0x963   :  { %v5297_v18 = vsub.f32 1.0, %v5296_v21  ;;  %v5325_v21 = vand.u32 2147483648, %v5313_v41 }
 0x964   :  { %v5279_v34 = vmul.f32 %v9592_v16, %v5278_v29 }
 0x965   :  { %v5298_v7 = vmul.f32 %v9594_v26, %v5297_v18  ;;  %v5326_v18 = vor.u32 1.1754944e-38, %v5325_v21 }
 0x966   :  { %v9596_v63 = vpop.eup %9595  ;;  %v5280_v8 = vadd.f32 %v9592_v16, %v5279_v34 }
 0x967   :  { %v5315_v48 = vmul.f32 %v9596_v63, %v5313_v41  ;;  %v5299_v5 = vadd.f32 %v9594_v26, %v5298_v7  ;;  %v9598_v42 = vpop.eup %9597  ;;  %vm5320_vm0 = vweird.f32 %v9596_v63 }
 0x968   :  { %v5284_v9 = vsel %vm5283_vm12, %v9592_v16, %v5280_v8  ;;  %v5323_v16 = vand.u32 2147483647, %v5313_v41  ;;  %vm5321_vm2 = vmor %vm5319_vm1, %vm5320_vm0 }
 0x969   :  { %v5316_v25 = vsub.f32 1.0, %v5315_v48  ;;  %v5289_v60 = vsel %vm5286_vm14, %v5288_v38, %v5284_v9  ;;  %v5303_v58 = vsel %vm5302_vm13, %v9594_v26, %v5299_v5 }
 0x96a   :  { %v5308_v27 = vsel %vm5305_vm15, %v5307_v4, %v5303_v58  ;;  %v5331_v57 = vmul.f32 %v9598_v42, %v5289_v60  ;;  %vm5324_vm3 = vcmp.eq.f32.partialorder %v5323_v16, 8.507059e+37  ;;  %v11957_v4 = vld [vmem:[#allocation23_spill] sm:$0xff] }
 0x96b   :  { %v5317_v19 = vmul.f32 %v9596_v63, %v5316_v25  ;;  %v5330_v23 = vmul.f32 %v5308_v27, %v11616_v17 }
 0x96d   :  { %v11664_v12 = vadd.f32 %v5331_v57, %v5330_v23  ;;  %v5318_v52 = vadd.f32 %v9596_v63, %v5317_v19 }
 0x96f   :  { %9599 = vtanh.f32 %v11664_v12  ;;  %v5322_v29 = vsel %vm5321_vm2, %v9596_v63, %v5318_v52 }
 0x970   :  { %v5327_v14 = vsel %vm5324_vm3, %v5326_v18, %v5322_v29  ;;  %v11958_v18 = vld [vmem:[#allocation24_spill] sm:$0xff] }
 0x975   :  { %v9600_v26 = vpop.eup %9599 }
 0x976   :  { %v11667_v49 = vmul.f32 %v9600_v26, %v5327_v14 }
 0x978   :  { %v5341_v17 = vpack.c.bf16 %v11667_v49, %v11667_v49 }
 0x97a   :  { %5350 = vmatmul.bf16.vlgmr.msra.gmra.mxu0 %v5341_v17  ;;  %5363 = vmatmul.bf16.vlgmr.msra.gmra.mxu1 %v5341_v17 }
 0x97b   :  { %5376 = vmatmul.bf16.vlgmr.msra.gmra.mxu2 %v5341_v17  ;;  %5389 = vmatmul.bf16.vlgmr.msra.gmra.mxu3 %v5341_v17 }
 0x97c   :  { %5594 = vmatpush.bf16.msra.mxu0 %v11341_v44  ;;  %5607 = vmatpush.bf16.msra.mxu1 %v11343_v62 }
 0x97d   :  { %5620 = vmatpush.bf16.msra.mxu2 %v11345_v24  ;;  %5633 = vmatpush.bf16.msra.mxu3 %v11347_v33 }
 0x980   :  { %5595 = vmatpush.bf16.msra.mxu0 %v11351_v32  ;;  %5608 = vmatpush.bf16.msra.mxu1 %v11353_v37 }
 0x981   :  { %5621 = vmatpush.bf16.msra.mxu2 %v11357_v50  ;;  %5634 = vmatpush.bf16.msra.mxu3 %v11359_v54 }
 0x984   :  { %5596 = vmatpush.bf16.msra.mxu0 %v11372_v35  ;;  %5609 = vmatpush.bf16.msra.mxu1 %v11374_v46 }
 0x985   :  { %5622 = vmatpush.bf16.msra.mxu2 %v11380_v1  ;;  %5635 = vmatpush.bf16.msra.mxu3 %v11382_v31 }
 0x988   :  { %5597 = vmatpush.bf16.msra.mxu0 %v11384_v47  ;;  %5610 = vmatpush.bf16.msra.mxu1 %v11392_v10 }
 0x989   :  { %5623 = vmatpush.bf16.msra.mxu2 %v11396_v43  ;;  %5636 = vmatpush.bf16.msra.mxu3 %v11398_v28 }
 0x98c   :  { %5598 = vmatpush.bf16.msra.mxu0 %v11404_v22  ;;  %5611 = vmatpush.bf16.msra.mxu1 %v11406_v40 }
 0x98d   :  { %5624 = vmatpush.bf16.msra.mxu2 %v11410_v61  ;;  %5637 = vmatpush.bf16.msra.mxu3 %v11412_v2 }
 0x990   :  { %5599 = vmatpush.bf16.msra.mxu0 %v11420_v13  ;;  %5612 = vmatpush.bf16.msra.mxu1 %v11422_v39 }
 0x991   :  { %5625 = vmatpush.bf16.msra.mxu2 %v11426_v56  ;;  %5638 = vmatpush.bf16.msra.mxu3 %v11428_v55 }
 0x994   :  { %5600 = vmatpush.bf16.msra.mxu0 %v11432_v53  ;;  %5613 = vmatpush.bf16.msra.mxu1 %v11434_v36 }
 0x995   :  { %5626 = vmatpush.bf16.msra.mxu2 %v11438_v3  ;;  %5639 = vmatpush.bf16.msra.mxu3 %v11440_v6 }
 0x998   :  { %5601 = vmatpush.bf16.msra.mxu0 %v11444_v11  ;;  %5614 = vmatpush.bf16.msra.mxu1 %v11446_v15 }
 0x999   :  { %5627 = vmatpush.bf16.msra.mxu2 %v11450_v0  ;;  %5640 = vmatpush.bf16.msra.mxu3 %v11452_v20 }
 0x9f7   :  { %v5351_v41 = vpop.f32.mrf.mxu0  ;;  %v5364_v34 = vpop.f32.mrf.mxu1 }
 0x9f8   :  { %v5394_v7 = vadd.f32 %v5351_v41, %v11955_v59  ;;  %v5395_v63 = vadd.f32 %v5364_v34, %v11956_v51 }
 0x9fa   :  { %v8590_v8 = vmul.f32 -1.442695, %v5394_v7  ;;  %v8591_v48 = vmul.f32 -1.442695, %v5395_v63 }
 0x9fc   :  { %9601 = vpow2.f32 %v8590_v8 }
 0x9fd   :  { %9603 = vpow2.f32 %v8591_v48 }
 0x9fe   :  { %v5377_v38 = vpop.f32.mrf.mxu2  ;;  %v5390_v5 = vpop.f32.mrf.mxu3 }
 0x9ff   :  { %v5396_v9 = vadd.f32 %v5377_v38, %v11957_v4  ;;  %v5353_v42 = vpop.f32.mrf.mxu0  ;;  %v5366_v25 = vpop.f32.mrf.mxu1  ;;  %v5397_v26 = vadd.f32 %v5390_v5, %v11958_v18 }
 0xa01   :  { %v8592_v60 = vmul.f32 -1.442695, %v5396_v9 }
 0xa02   :  { %v9602_v58 = vpop.eup %9601 }
 0xa03   :  { %v9604_v27 = vpop.eup %9603  ;;  %v5401_v57 = vadd.f32 1.0, %v9602_v58  ;;  %9605 = vpow2.f32 %v8592_v60 }
 0xa04   :  { %v5420_v19 = vadd.f32 1.0, %v9604_v27 }
 0xa05   :  { %9607 = vrcp.f32 %v5401_v57  ;;  %v5413_v7 = vand.u32 2147483648, %v5401_v57  ;;  %v5411_v8 = vand.u32 2147483647, %v5401_v57  ;;  %vm5407_vm6 = vweird.f32 %v5401_v57 }
 0xa06   :  { %9609 = vrcp.f32 %v5420_v19  ;;  %v5379_v23 = vpop.f32.mrf.mxu2  ;;  %v5392_v52 = vpop.f32.mrf.mxu3  ;;  %v5432_v51 = vand.u32 2147483648, %v5420_v19  ;;  %v5430_v38 = vand.u32 2147483647, %v5420_v19  ;;  %vm5426_vm7 = vweird.f32 %v5420_v19 }
 0xa07   :  { %v5414_v42 = vor.u32 1.1754944e-38, %v5413_v7  ;;  %vm5412_vm10 = vcmp.eq.f32.partialorder %v5411_v8, 8.507059e+37 }
 0xa08   :  { %v5433_v60 = vor.u32 1.1754944e-38, %v5432_v51  ;;  %vm5431_vm11 = vcmp.eq.f32.partialorder %v5430_v38, 8.507059e+37  ;;  %v11959_v38 = vld [vmem:[#allocation25_spill] sm:$0xff] }
 0xa09   :  { %v9606_v21 = vpop.eup %9605 }
 0xa0a   :  { %v5439_v16 = vadd.f32 1.0, %v9606_v21 }
 0xa0b   :  { %v9608_v29 = vpop.eup %9607 }
 0xa0c   :  { %v9610_v14 = vpop.eup %9609  ;;  %v5403_v17 = vmul.f32 %v9608_v29, %v5401_v57  ;;  %9611 = vrcp.f32 %v5439_v16  ;;  %vm5408_vm4 = vweird.f32 %v9608_v29  ;;  %vm5445_vm13 = vweird.f32 %v5439_v16 }
 0xa0d   :  { %v5422_v41 = vmul.f32 %v9610_v14, %v5420_v19  ;;  %9613 = vtanh.f32 %v5397_v26  ;;  %vm5427_vm5 = vweird.f32 %v9610_v14  ;;  %vm5409_vm8 = vmor %vm5407_vm6, %vm5408_vm4 }
 0xa0e   :  { %v5404_v34 = vsub.f32 1.0, %v5403_v17  ;;  %vm5428_vm9 = vmor %vm5426_vm7, %vm5427_vm5 }
 0xa0f   :  { %v5423_v59 = vsub.f32 1.0, %v5422_v41 }
 0xa10   :  { %v5405_v63 = vmul.f32 %v9608_v29, %v5404_v34  ;;  %v5451_v34 = vand.u32 2147483648, %v5439_v16 }
 0xa11   :  { %v5424_v48 = vmul.f32 %v9610_v14, %v5423_v59 }
 0xa12   :  { %v9612_v4 = vpop.eup %9611  ;;  %v5406_v9 = vadd.f32 %v9608_v29, %v5405_v63  ;;  %v5452_v7 = vor.u32 1.1754944e-38, %v5451_v34 }
 0xa13   :  { %v5441_v5 = vmul.f32 %v9612_v4, %v5439_v16  ;;  %v5425_v25 = vadd.f32 %v9610_v14, %v5424_v48  ;;  %v9614_v27 = vpop.eup %9613  ;;  %vm5446_vm12 = vweird.f32 %v9612_v4 }
 0xa14   :  { %v5410_v58 = vsel %vm5409_vm8, %v9608_v29, %v5406_v9  ;;  %v5449_v29 = vand.u32 2147483647, %v5439_v16  ;;  %vm5447_vm14 = vmor %vm5445_vm13, %vm5446_vm12  ;;  %v9683_v16 = vld [vmem:[%s11860_s8 + $0x10] sm:$0xff] }
 0xa15   :  { %v5442_v23 = vsub.f32 1.0, %v5441_v5  ;;  %v5415_v52 = vsel %vm5412_vm10, %v5414_v42, %v5410_v58  ;;  %v5429_v21 = vsel %vm5428_vm9, %v9610_v14, %v5425_v25  ;;  %v2992_v8 = vperm.slane %v9683_v16, 0  ;;  %v11960_v9 = vld [vmem:[#allocation26_spill] sm:$0xff] }
 0xa16   :  { %v5434_v18 = vsel %vm5431_vm11, %v5433_v60, %v5429_v21  ;;  %v5457_v26 = vmul.f32 %v9614_v27, %v5415_v52  ;;  %vm5450_vm15 = vcmp.eq.f32.partialorder %v5449_v29, 8.507059e+37  ;;  %v2993_v48 = vperm.slane %v9683_v16, 1  ;;  %v11961_v21 = vld [vmem:[#allocation27_spill] sm:$0xff] }
 0xa17   :  { %v5443_v17 = vmul.f32 %v9612_v4, %v5442_v23  ;;  %v5456_v41 = vmul.f32 %v5434_v18, %v11664_v12  ;;  %v2994_v27 = vperm.slane %v9683_v16, 2 }
 0xa18   :  { %v4551_v5 = vadd.f32 %v11960_v9, %v2993_v48 }
 0xa19   :  { %v11708_v57 = vadd.f32 %v5457_v26, %v5456_v41  ;;  %v5444_v19 = vadd.f32 %v9612_v4, %v5443_v17  ;;  %v4564_v18 = vadd.f32 %v11961_v21, %v2994_v27 }
 0xa1b   :  { %9615 = vtanh.f32 %v11708_v57  ;;  %v5448_v59 = vsel %vm5447_vm14, %v9612_v4, %v5444_v19  ;;  %v4538_v4 = vadd.f32 %v11959_v38, %v2992_v8 }
 0xa1c   :  { %v5453_v51 = vsel %vm5450_vm15, %v5452_v7, %v5448_v59 }
 0xa21   :  { %v9616_v14 = vpop.eup %9615 }
 0xa22   :  { %v11711_v63 = vmul.f32 %v9616_v14, %v5453_v51 }
 0xa24   :  { %v5467_v12 = vpack.c.bf16 %v11711_v63, %v11711_v63 }
 0xa26   :  { %5476 = vmatmul.bf16.vlgmr.msrb.gmra.mxu0 %v5467_v12  ;;  %5489 = vmatmul.bf16.vlgmr.msrb.gmra.mxu1 %v5467_v12 }
 0xa27   :  { %5502 = vmatmul.bf16.vlgmr.msrb.gmra.mxu2 %v5467_v12  ;;  %5515 = vmatmul.bf16.vlgmr.msrb.gmra.mxu3 %v5467_v12  ;;  %v2995_v12 = vperm.slane %v9683_v16, 3 }
 0xa28   :  { %5720 = vmatpush.bf16.msrb.mxu0 %v11341_v44  ;;  %5733 = vmatpush.bf16.msrb.mxu1 %v11343_v62 }
 0xa29   :  { %5746 = vmatpush.bf16.msrb.mxu2 %v11345_v24  ;;  %5759 = vmatpush.bf16.msrb.mxu3 %v11347_v33 }
 0xa2c   :  { %5721 = vmatpush.bf16.msrb.mxu0 %v11351_v32  ;;  %5734 = vmatpush.bf16.msrb.mxu1 %v11353_v37 }
 0xa2d   :  { %5747 = vmatpush.bf16.msrb.mxu2 %v11357_v50  ;;  %5760 = vmatpush.bf16.msrb.mxu3 %v11359_v54 }
 0xa30   :  { %5722 = vmatpush.bf16.msrb.mxu0 %v11372_v35  ;;  %5735 = vmatpush.bf16.msrb.mxu1 %v11374_v46 }
 0xa31   :  { %5748 = vmatpush.bf16.msrb.mxu2 %v11380_v1  ;;  %5761 = vmatpush.bf16.msrb.mxu3 %v11382_v31 }
 0xa34   :  { %5723 = vmatpush.bf16.msrb.mxu0 %v11384_v47  ;;  %5736 = vmatpush.bf16.msrb.mxu1 %v11392_v10 }
 0xa35   :  { %5749 = vmatpush.bf16.msrb.mxu2 %v11396_v43  ;;  %5762 = vmatpush.bf16.msrb.mxu3 %v11398_v28 }
 0xa38   :  { %5724 = vmatpush.bf16.msrb.mxu0 %v11404_v22  ;;  %5737 = vmatpush.bf16.msrb.mxu1 %v11406_v40 }
 0xa39   :  { %5750 = vmatpush.bf16.msrb.mxu2 %v11410_v61  ;;  %5763 = vmatpush.bf16.msrb.mxu3 %v11412_v2 }
 0xa3c   :  { %5725 = vmatpush.bf16.msrb.mxu0 %v11420_v13  ;;  %5738 = vmatpush.bf16.msrb.mxu1 %v11422_v39 }
 0xa3d   :  { %5751 = vmatpush.bf16.msrb.mxu2 %v11426_v56  ;;  %5764 = vmatpush.bf16.msrb.mxu3 %v11428_v55 }
 0xa40   :  { %5726 = vmatpush.bf16.msrb.mxu0 %v11432_v53  ;;  %5739 = vmatpush.bf16.msrb.mxu1 %v11434_v36 }
 0xa41   :  { %5752 = vmatpush.bf16.msrb.mxu2 %v11438_v3  ;;  %5765 = vmatpush.bf16.msrb.mxu3 %v11440_v6 }
 0xa44   :  { %5727 = vmatpush.bf16.msrb.mxu0 %v11444_v11  ;;  %5740 = vmatpush.bf16.msrb.mxu1 %v11446_v15 }
 0xa45   :  { %5753 = vmatpush.bf16.msrb.mxu2 %v11450_v0  ;;  %5766 = vmatpush.bf16.msrb.mxu3 %v11452_v20 }
 0xaa3   :  { %v5477_v42 = vpop.f32.mrf.mxu0  ;;  %v5490_v25 = vpop.f32.mrf.mxu1 }
 0xaa4   :  { %v5520_v60 = vadd.f32 %v5477_v42, %v4538_v4  ;;  %v5521_v58 = vadd.f32 %v5490_v25, %v4551_v5  ;;  %v11962_v4 = vld [vmem:[#allocation28_spill] sm:$0xff] }
 0xaa5   :  { %v4577_v9 = vadd.f32 %v11962_v4, %v2995_v12 }
 0xaa6   :  { %v8593_v23 = vmul.f32 -1.442695, %v5520_v60  ;;  %v8594_v52 = vmul.f32 -1.442695, %v5521_v58 }
 0xaa8   :  { %9617 = vpow2.f32 %v8593_v23 }
 0xaa9   :  { %9619 = vpow2.f32 %v8594_v52 }
 0xaaa   :  { %v5503_v26 = vpop.f32.mrf.mxu2  ;;  %v5516_v17 = vpop.f32.mrf.mxu3 }
 0xaab   :  { %v5522_v41 = vadd.f32 %v5503_v26, %v4564_v18  ;;  %v5479_v19 = vpop.f32.mrf.mxu0  ;;  %v5492_v34 = vpop.f32.mrf.mxu1  ;;  %v5523_v25 = vadd.f32 %v5516_v17, %v4577_v9 }
 0xaad   :  { %v8595_v29 = vmul.f32 -1.442695, %v5522_v41 }
 0xaae   :  { %v9618_v59 = vpop.eup %9617 }
 0xaaf   :  { %v9620_v7 = vpop.eup %9619  ;;  %v5527_v14 = vadd.f32 1.0, %v9618_v59  ;;  %9621 = vpow2.f32 %v8595_v29 }
 0xab0   :  { %v5546_v51 = vadd.f32 1.0, %v9620_v7 }
 0xab1   :  { %9623 = vrcp.f32 %v5527_v14  ;;  %v5539_v21 = vand.u32 2147483648, %v5527_v14  ;;  %v5537_v26 = vand.u32 2147483647, %v5527_v14  ;;  %vm5533_vm2 = vweird.f32 %v5527_v14 }
 0xab2   :  { %9625 = vrcp.f32 %v5546_v51  ;;  %v5505_v8 = vpop.f32.mrf.mxu2  ;;  %v5518_v48 = vpop.f32.mrf.mxu3  ;;  %v5558_v18 = vand.u32 2147483648, %v5546_v51  ;;  %v5556_v19 = vand.u32 2147483647, %v5546_v51  ;;  %vm5552_vm3 = vweird.f32 %v5546_v51 }
 0xab3   :  { %v5540_v59 = vor.u32 1.1754944e-38, %v5539_v21  ;;  %vm5538_vm6 = vcmp.eq.f32.partialorder %v5537_v26, 8.507059e+37 }
 0xab4   :  { %v5559_v12 = vor.u32 1.1754944e-38, %v5558_v18  ;;  %vm5557_vm7 = vcmp.eq.f32.partialorder %v5556_v19, 8.507059e+37 }
 0xab5   :  { %v9622_v38 = vpop.eup %9621 }
 0xab6   :  { %v5565_v5 = vadd.f32 1.0, %v9622_v38 }
 0xab7   :  { %v9624_v42 = vpop.eup %9623 }
 0xab8   :  { %v9626_v60 = vpop.eup %9625  ;;  %v5529_v58 = vmul.f32 %v9624_v42, %v5527_v14  ;;  %9627 = vrcp.f32 %v5565_v5  ;;  %vm5534_vm0 = vweird.f32 %v9624_v42  ;;  %vm5571_vm9 = vweird.f32 %v5565_v5 }
 0xab9   :  { %v5548_v27 = vmul.f32 %v9626_v60, %v5546_v51  ;;  %9629 = vtanh.f32 %v5523_v25  ;;  %vm5553_vm1 = vweird.f32 %v9626_v60  ;;  %vm5535_vm4 = vmor %vm5533_vm2, %vm5534_vm0 }
 0xaba   :  { %v5530_v23 = vsub.f32 1.0, %v5529_v58  ;;  %vm5554_vm5 = vmor %vm5552_vm3, %vm5553_vm1 }
 0xabb   :  { %v5549_v52 = vsub.f32 1.0, %v5548_v27 }
 0xabc   :  { %v5531_v16 = vmul.f32 %v9624_v42, %v5530_v23 }
 0xabd   :  { %v5550_v41 = vmul.f32 %v9626_v60, %v5549_v52  ;;  %v5577_v52 = vand.u32 2147483648, %v5565_v5 }
 0xabe   :  { %v9628_v34 = vpop.eup %9627  ;;  %v5532_v29 = vadd.f32 %v9624_v42, %v5531_v16 }
 0xabf   :  { %v5567_v17 = vmul.f32 %v9628_v34, %v5565_v5  ;;  %v5551_v7 = vadd.f32 %v9626_v60, %v5550_v41  ;;  %v9630_v48 = vpop.eup %9629  ;;  %vm5572_vm8 = vweird.f32 %v9628_v34  ;;  %v5578_v18 = vor.u32 1.1754944e-38, %v5577_v52 }
 0xac0   :  { %v5536_v8 = vsel %vm5535_vm4, %v9624_v42, %v5532_v29  ;;  %v5575_v42 = vand.u32 2147483647, %v5565_v5  ;;  %vm5573_vm10 = vmor %vm5571_vm9, %vm5572_vm8 }
 0xac1   :  { %v5568_v38 = vsub.f32 1.0, %v5567_v17  ;;  %v5541_v4 = vsel %vm5538_vm6, %v5540_v59, %v5536_v8  ;;  %v5555_v9 = vsel %vm5554_vm5, %v9626_v60, %v5551_v7 }
 0xac2   :  { %v5560_v25 = vsel %vm5557_vm7, %v5559_v12, %v5555_v9  ;;  %v5583_v58 = vmul.f32 %v9630_v48, %v5541_v4  ;;  %vm5576_vm11 = vcmp.eq.f32.partialorder %v5575_v42, 8.507059e+37 }
 0xac3   :  { %v5569_v27 = vmul.f32 %v9628_v34, %v5568_v38  ;;  %v5582_v23 = vmul.f32 %v5560_v25, %v11708_v57 }
 0xac5   :  { %v11755_v14 = vadd.f32 %v5583_v58, %v5582_v23  ;;  %v5570_v51 = vadd.f32 %v9628_v34, %v5569_v27 }
 0xac7   :  { %9631 = vtanh.f32 %v11755_v14  ;;  %v5574_v21 = vsel %vm5573_vm10, %v9628_v34, %v5570_v51 }
 0xac8   :  { %v5579_v16 = vsel %vm5576_vm11, %v5578_v18, %v5574_v21 }
 0xacd   :  { %v9632_v60 = vpop.eup %9631 }
 0xace   :  { %v11758_v26 = vmul.f32 %v9632_v60, %v5579_v16 }
 0xad0   :  { %v5593_v57 = vpack.c.bf16 %v11758_v26, %v11758_v26 }
 0xad2   :  { %5602 = vmatmul.bf16.vlgmr.msra.gmra.mxu0 %v5593_v57  ;;  %5615 = vmatmul.bf16.vlgmr.msra.gmra.mxu1 %v5593_v57 }
 0xad3   :  { %5628 = vmatmul.bf16.vlgmr.msra.gmra.mxu2 %v5593_v57  ;;  %5641 = vmatmul.bf16.vlgmr.msra.gmra.mxu3 %v5593_v57 }
 0xad4   :  { %5846 = vmatpush.bf16.msra.mxu0 %v11341_v44  ;;  %5859 = vmatpush.bf16.msra.mxu1 %v11343_v62 }
 0xad5   :  { %5872 = vmatpush.bf16.msra.mxu2 %v11345_v24  ;;  %5885 = vmatpush.bf16.msra.mxu3 %v11347_v33  ;;  %v11963_v24 = vld [vmem:[#allocation30_spill] sm:$0xff] }
 0xad8   :  { %5847 = vmatpush.bf16.msra.mxu0 %v11351_v32  ;;  %5860 = vmatpush.bf16.msra.mxu1 %v11353_v37  ;;  %v11964_v32 = vld [vmem:[#allocation29_spill] sm:$0xff] }
 0xad9   :  { %5873 = vmatpush.bf16.msra.mxu2 %v11357_v50  ;;  %5886 = vmatpush.bf16.msra.mxu3 %v11359_v54 }
 0xadc   :  { %5848 = vmatpush.bf16.msra.mxu0 %v11372_v35  ;;  %5861 = vmatpush.bf16.msra.mxu1 %v11374_v46 }
 0xadd   :  { %5874 = vmatpush.bf16.msra.mxu2 %v11380_v1  ;;  %5887 = vmatpush.bf16.msra.mxu3 %v11382_v31  ;;  %v11965_v1 = vld [vmem:[#allocation31_spill] sm:$0xff] }
 0xae0   :  { %5849 = vmatpush.bf16.msra.mxu0 %v11384_v47  ;;  %5862 = vmatpush.bf16.msra.mxu1 %v11392_v10 }
 0xae1   :  { %5875 = vmatpush.bf16.msra.mxu2 %v11396_v43  ;;  %5888 = vmatpush.bf16.msra.mxu3 %v11398_v28 }
 0xae4   :  { %5850 = vmatpush.bf16.msra.mxu0 %v11404_v22  ;;  %5863 = vmatpush.bf16.msra.mxu1 %v11406_v40 }
 0xae5   :  { %5876 = vmatpush.bf16.msra.mxu2 %v11410_v61  ;;  %5889 = vmatpush.bf16.msra.mxu3 %v11412_v2 }
 0xae8   :  { %5851 = vmatpush.bf16.msra.mxu0 %v11420_v13  ;;  %5864 = vmatpush.bf16.msra.mxu1 %v11422_v39 }
 0xae9   :  { %5877 = vmatpush.bf16.msra.mxu2 %v11426_v56  ;;  %5890 = vmatpush.bf16.msra.mxu3 %v11428_v55 }
 0xaec   :  { %5852 = vmatpush.bf16.msra.mxu0 %v11432_v53  ;;  %5865 = vmatpush.bf16.msra.mxu1 %v11434_v36  ;;  %v11966_v53 = vld [vmem:[#allocation32_spill] sm:$0xff] }
 0xaed   :  { %5878 = vmatpush.bf16.msra.mxu2 %v11438_v3  ;;  %5891 = vmatpush.bf16.msra.mxu3 %v11440_v6 }
 0xaf0   :  { %5853 = vmatpush.bf16.msra.mxu0 %v11444_v11  ;;  %5866 = vmatpush.bf16.msra.mxu1 %v11446_v15 }
 0xaf1   :  { %5879 = vmatpush.bf16.msra.mxu2 %v11450_v0  ;;  %5892 = vmatpush.bf16.msra.mxu3 %v11452_v20 }
 0xb4f   :  { %v5603_v44 = vpop.f32.mrf.mxu0  ;;  %v5616_v62 = vpop.f32.mrf.mxu1 }
 0xb50   :  { %v5646_v33 = vadd.f32 %v5603_v44, %v11963_v24  ;;  %v5647_v37 = vadd.f32 %v5616_v62, %v11964_v32  ;;  %v9361_v32 = vld [vmem:[#allocation12 + $0x78] sm:$0xff] }
 0xb52   :  { %v8596_v50 = vmul.f32 -1.442695, %v5646_v33  ;;  %v8597_v54 = vmul.f32 -1.442695, %v5647_v37  ;;  %v9353_v33 = vld [vmem:[#allocation12 + $0x38] sm:$0xff] }
 0xb53   :  { %v9369_v37 = vld [vmem:[#allocation12 + $0xb8] sm:$0xff] }
 0xb54   :  { %9633 = vpow2.f32 %v8596_v50  ;;  %v9352_v50 = vld [vmem:[#allocation12 + $0x30] sm:$0xff] }
 0xb55   :  { %9635 = vpow2.f32 %v8597_v54  ;;  %v9360_v54 = vld [vmem:[#allocation12 + $0x70] sm:$0xff] }
 0xb56   :  { %v5629_v35 = vpop.f32.mrf.mxu2  ;;  %v5642_v46 = vpop.f32.mrf.mxu3 }
 0xb57   :  { %v5648_v31 = vadd.f32 %v5629_v35, %v11965_v1  ;;  %v5605_v47 = vpop.f32.mrf.mxu0  ;;  %v5618_v10 = vpop.f32.mrf.mxu1  ;;  %v5649_v36 = vadd.f32 %v5642_v46, %v11966_v53  ;;  %v9368_v35 = vld [vmem:[#allocation12 + $0xb0] sm:$0xff]  ;;  %v9351_v46 = vld [vmem:[#allocation12 + $0x28] sm:$0xff] }
 0xb58   :  { %v9359_v1 = vld [vmem:[#allocation12 + $0x68] sm:$0xff]  ;;  %v11809_v47 = vld [vmem:[%s11860_s8 + $0x18] sm:$0xff] }
 0xb59   :  { %v8598_v43 = vmul.f32 -1.442695, %v5648_v31  ;;  %v9367_v31 = vld [vmem:[#allocation12 + $0xa8] sm:$0xff]  ;;  %v3000_v10 = vperm.slane %v11809_v47, 0 }
 0xb5a   :  { %v9634_v28 = vpop.eup %9633 }
 0xb5b   :  { %v9636_v22 = vpop.eup %9635  ;;  %v5653_v40 = vadd.f32 1.0, %v9634_v28  ;;  %9637 = vpow2.f32 %v8598_v43  ;;  %v3001_v43 = vperm.slane %v11809_v47, 1  ;;  %v9350_v28 = vld [vmem:[#allocation12 + $0x20] sm:$0xff] }
 0xb5c   :  { %v5672_v61 = vadd.f32 1.0, %v9636_v22  ;;  %v9358_v22 = vld [vmem:[#allocation12 + $0x60] sm:$0xff] }
 0xb5d   :  { %9639 = vrcp.f32 %v5653_v40  ;;  %v5665_v20 = vand.u32 2147483648, %v5653_v40  ;;  %v5663_v19 = vand.u32 2147483647, %v5653_v40  ;;  %vm5659_vm14 = vweird.f32 %v5653_v40 }
 0xb5e   :  { %9641 = vrcp.f32 %v5672_v61  ;;  %v5631_v2 = vpop.f32.mrf.mxu2  ;;  %v5644_v13 = vpop.f32.mrf.mxu3  ;;  %v5684_v5 = vand.u32 2147483648, %v5672_v61  ;;  %v5682_v29 = vand.u32 2147483647, %v5672_v61  ;;  %vm5678_vm15 = vweird.f32 %v5672_v61 }
 0xb5f   :  { %v5666_v12 = vor.u32 1.1754944e-38, %v5665_v20  ;;  %vm5664_vm2 = vcmp.eq.f32.partialorder %v5663_v19, 8.507059e+37  ;;  %v11968_v13 = vld [vmem:[#allocation34_spill] sm:$0xff] }
 0xb60   :  { %v5685_v48 = vor.u32 1.1754944e-38, %v5684_v5  ;;  %vm5683_vm3 = vcmp.eq.f32.partialorder %v5682_v29, 8.507059e+37  ;;  %v9348_v19 = vld [vmem:[#allocation12 + $0x10] sm:$0xff] }
 0xb61   :  { %v9638_v39 = vpop.eup %9637  ;;  %v9364_v29 = vld [vmem:[#allocation12 + $0x90] sm:$0xff] }
 0xb62   :  { %v5691_v56 = vadd.f32 1.0, %v9638_v39  ;;  %v4655_v39 = vadd.f32 %v11968_v13, %v3001_v43  ;;  %v9371_v43 = vld [vmem:[#allocation12 + $0xc8] sm:$0xff] }
 0xb63   :  { %v9640_v55 = vpop.eup %9639 }
 0xb64   :  { %v9642_v3 = vpop.eup %9641  ;;  %v5655_v6 = vmul.f32 %v9640_v55, %v5653_v40  ;;  %9643 = vrcp.f32 %v5691_v56  ;;  %vm5660_vm12 = vweird.f32 %v9640_v55  ;;  %v5703_v18 = vand.u32 2147483648, %v5691_v56  ;;  %v9366_v40 = vld [vmem:[#allocation12 + $0xa0] sm:$0xff] }
 0xb65   :  { %v5674_v11 = vmul.f32 %v9642_v3, %v5672_v61  ;;  %9645 = vtanh.f32 %v5649_v36  ;;  %vm5679_vm13 = vweird.f32 %v9642_v3  ;;  %vm5661_vm0 = vmor %vm5659_vm14, %vm5660_vm12  ;;  %vm5697_vm5 = vweird.f32 %v5691_v56  ;;  %v11967_v61 = vld [vmem:[#allocation33_spill] sm:$0xff] }
 0xb66   :  { %v5656_v15 = vsub.f32 1.0, %v5655_v6  ;;  %vm5680_vm1 = vmor %vm5678_vm15, %vm5679_vm13  ;;  %v5701_v60 = vand.u32 2147483647, %v5691_v56  ;;  %v5704_v57 = vor.u32 1.1754944e-38, %v5703_v18  ;;  %v4642_v2 = vadd.f32 %v11967_v61, %v3000_v10 }
 0xb67   :  { %v5675_v0 = vsub.f32 1.0, %v5674_v11  ;;  %v3002_v6 = vperm.slane %v11809_v47, 2  ;;  %v9349_v11 = vld [vmem:[#allocation12 + $0x18] sm:$0xff] }
 0xb68   :  { %v5657_v41 = vmul.f32 %v9640_v55, %v5656_v15  ;;  %vm5702_vm7 = vcmp.eq.f32.partialorder %v5701_v60, 8.507059e+37  ;;  %v9357_v15 = vld [vmem:[#allocation12 + $0x58] sm:$0xff]  ;;  %v3003_v60 = vperm.slane %v11809_v47, 3 }
 0xb69   :  { %v5676_v34 = vmul.f32 %v9642_v3, %v5675_v0  ;;  %v9365_v0 = vld [vmem:[#allocation12 + $0x98] sm:$0xff] }
 0xb6a   :  { %v9644_v17 = vpop.eup %9643  ;;  %v5658_v59 = vadd.f32 %v9640_v55, %v5657_v41  ;;  %v9376_v41 = vld [vmem:[#allocation12 + $0xf0] sm:$0xff] }
 0xb6b   :  { %v5693_v7 = vmul.f32 %v9644_v17, %v5691_v56  ;;  %v5677_v8 = vadd.f32 %v9642_v3, %v5676_v34  ;;  %v9646_v4 = vpop.eup %9645  ;;  %vm5698_vm4 = vweird.f32 %v9644_v17  ;;  %v9377_v56 = vld [vmem:[#allocation12 + $0xf8] sm:$0xff]  ;;  %v9356_v34 = vld [vmem:[#allocation12 + $0x50] sm:$0xff] }
 0xb6c   :  { %v5662_v38 = vsel %vm5661_vm0, %v9640_v55, %v5658_v59  ;;  %vm5699_vm6 = vmor %vm5697_vm5, %vm5698_vm4  ;;  %v11969_v59 = vld [vmem:[#allocation35_spill] sm:$0xff] }
 0xb6d   :  { %v5694_v9 = vsub.f32 1.0, %v5693_v7  ;;  %v5667_v25 = vsel %vm5664_vm2, %v5666_v12, %v5662_v38  ;;  %v5681_v58 = vsel %vm5680_vm1, %v9642_v3, %v5677_v8  ;;  %v4668_v7 = vadd.f32 %v11969_v59, %v3002_v6 }
 0xb6e   :  { %v5686_v27 = vsel %vm5683_vm3, %v5685_v48, %v5681_v58  ;;  %v5709_v23 = vmul.f32 %v9646_v4, %v5667_v25  ;;  %v9355_v25 = vld [vmem:[#allocation12 + $0x48] sm:$0xff] }
 0xb6f   :  { %v5695_v51 = vmul.f32 %v9644_v17, %v5694_v9  ;;  %v5708_v52 = vmul.f32 %v5686_v27, %v11755_v14  ;;  %v9347_v9 = vld [vmem:[#allocation12 + $0x8] sm:$0xff]  ;;  %v9374_v27 = vld [vmem:[#allocation12 + $0xe0] sm:$0xff] }
 0xb70   :  { %v9363_v58 = vld [vmem:[#allocation12 + $0x88] sm:$0xff] }
 0xb71   :  { %v11799_v42 = vadd.f32 %v5709_v23, %v5708_v52  ;;  %v5696_v21 = vadd.f32 %v9644_v17, %v5695_v51 }
 0xb73   :  { %9647 = vtanh.f32 %v11799_v42  ;;  %v5700_v16 = vsel %vm5699_vm6, %v9644_v17, %v5696_v21  ;;  %v9375_v17 = vld [vmem:[#allocation12 + $0xe8] sm:$0xff] }
 0xb74   :  { %v5705_v62 = vsel %vm5702_vm7, %v5704_v57, %v5700_v16  ;;  %v9346_v16 = vld [vmem:[#allocation12] sm:$0xff] }
 0xb75   :  { %v9354_v57 = vld [vmem:[#allocation12 + $0x40] sm:$0xff] }
 0xb79   :  { %v9648_v44 = vpop.eup %9647 }
 0xb7a   :  { %v11802_v24 = vmul.f32 %v9648_v44, %v5705_v62  ;;  %v9362_v44 = vld [vmem:[#allocation12 + $0x80] sm:$0xff] }
 0xb7c   :  { %v5719_v14 = vpack.c.bf16 %v11802_v24, %v11802_v24 }
 0xb7e   :  { %5728 = vmatmul.bf16.vlgmr.msrb.gmra.mxu0 %v5719_v14  ;;  %5741 = vmatmul.bf16.vlgmr.msrb.gmra.mxu1 %v5719_v14 }
 0xb7f   :  { %5754 = vmatmul.bf16.vlgmr.msrb.gmra.mxu2 %v5719_v14  ;;  %5767 = vmatmul.bf16.vlgmr.msrb.gmra.mxu3 %v5719_v14 }
 0xb80   :  { %6499 = vmatpush.bf16.msrb.mxu0 %v9353_v33  ;;  %6512 = vmatpush.bf16.msrb.mxu1 %v9361_v32  ;;  %v9373_v33 = vld [vmem:[#allocation12 + $0xd8] sm:$0xff] }
 0xb81   :  { %6525 = vmatpush.bf16.msrb.mxu2 %v9369_v37  ;;  %6538 = vmatpush.bf16.msrb.mxu3 %v9377_v56  ;;  %v11970_v37 = vld [vmem:[#allocation36_spill] sm:$0xff] }
 0xb84   :  { %6500 = vmatpush.bf16.msrb.mxu0 %v9352_v50  ;;  %6513 = vmatpush.bf16.msrb.mxu1 %v9360_v54  ;;  %v4681_v50 = vadd.f32 %v11970_v37, %v3003_v60  ;;  %v9372_v54 = vld [vmem:[#allocation12 + $0xd0] sm:$0xff]  ;;  %v9383_v60 = vld [vmem:[#allocation12 + $0x128] sm:$0xff]  ;;  %v5335_v37 = vmax.f32 %v11667_v49, 0.0 }
 0xb85   :  { %6526 = vmatpush.bf16.msrb.mxu2 %v9368_v35  ;;  %6539 = vmatpush.bf16.msrb.mxu3 %v9376_v41  ;;  %v9396_v49 = vld [vmem:[#allocation12 + $0x190] sm:$0xff] }
 0xb88   :  { %6501 = vmatpush.bf16.msrb.mxu0 %v9351_v46  ;;  %6514 = vmatpush.bf16.msrb.mxu1 %v9359_v1 }
 0xb89   :  { %6527 = vmatpush.bf16.msrb.mxu2 %v9367_v31  ;;  %6540 = vmatpush.bf16.msrb.mxu3 %v9375_v17 }
 0xb8c   :  { %6502 = vmatpush.bf16.msrb.mxu0 %v9350_v28  ;;  %6515 = vmatpush.bf16.msrb.mxu1 %v9358_v22 }
 0xb8d   :  { %6528 = vmatpush.bf16.msrb.mxu2 %v9366_v40  ;;  %6541 = vmatpush.bf16.msrb.mxu3 %v9374_v27  ;;  %v9385_v27 = vld [vmem:[#allocation12 + $0x138] sm:$0xff] }
 0xb90   :  { %6503 = vmatpush.bf16.msrb.mxu0 %v9349_v11  ;;  %6516 = vmatpush.bf16.msrb.mxu1 %v9357_v15 }
 0xb91   :  { %6529 = vmatpush.bf16.msrb.mxu2 %v9365_v0  ;;  %6542 = vmatpush.bf16.msrb.mxu3 %v9373_v33  ;;  %v5209_v33 = vmax.f32 %v11619_v45, 0.0  ;;  %v9388_v45 = vld [vmem:[#allocation12 + $0x150] sm:$0xff] }
 0xb94   :  { %6504 = vmatpush.bf16.msrb.mxu0 %v9348_v19  ;;  %6517 = vmatpush.bf16.msrb.mxu1 %v9356_v34 }
 0xb95   :  { %6530 = vmatpush.bf16.msrb.mxu2 %v9364_v29  ;;  %6543 = vmatpush.bf16.msrb.mxu3 %v9372_v54 }
 0xb98   :  { %6505 = vmatpush.bf16.msrb.mxu0 %v9347_v9  ;;  %6518 = vmatpush.bf16.msrb.mxu1 %v9355_v25 }
 0xb99   :  { %6531 = vmatpush.bf16.msrb.mxu2 %v9363_v58  ;;  %6544 = vmatpush.bf16.msrb.mxu3 %v9371_v43  ;;  %v9387_v43 = vld [vmem:[#allocation12 + $0x148] sm:$0xff] }
 0xb9c   :  { %6506 = vmatpush.bf16.msrb.mxu0 %v9346_v16  ;;  %6519 = vmatpush.bf16.msrb.mxu1 %v9354_v57  ;;  %v9391_v16 = vld [vmem:[#allocation12 + $0x168] sm:$0xff] }
 0xb9d   :  { %6532 = vmatpush.bf16.msrb.mxu2 %v9362_v44  ;;  %v9399_v57 = vld [vmem:[#allocation12 + $0x1a8] sm:$0xff]  ;;  %v9382_v44 = vld [vmem:[#allocation12 + $0x120] sm:$0xff] }
 0xbfb   :  { %v5729_v55 = vpop.f32.mrf.mxu0  ;;  %v5742_v53 = vpop.f32.mrf.mxu1 }
 0xbfc   :  { %v5772_v36 = vadd.f32 %v5729_v55, %v4642_v2  ;;  %v5773_v3 = vadd.f32 %v5742_v53, %v4655_v39  ;;  %v9370_v55 = vld [vmem:[#allocation12 + $0xc0] sm:$0xff] }
 0xbfd   :  { %6545 = vmatpush.bf16.msrb.mxu3 %v9370_v55 }
 0xbfe   :  { %v8599_v20 = vmul.f32 -1.442695, %v5772_v36  ;;  %v8600_v5 = vmul.f32 -1.442695, %v5773_v3 }
 0xc00   :  { %9649 = vpow2.f32 %v8599_v20 }
 0xc01   :  { %9651 = vpow2.f32 %v8600_v5 }
 0xc02   :  { %v5755_v12 = vpop.f32.mrf.mxu2  ;;  %v5768_v8 = vpop.f32.mrf.mxu3 }
 0xc03   :  { %v5774_v48 = vadd.f32 %v5755_v12, %v4668_v7  ;;  %v5731_v38 = vpop.f32.mrf.mxu0  ;;  %v5744_v4 = vpop.f32.mrf.mxu1  ;;  %v5775_v1 = vadd.f32 %v5768_v8, %v4681_v50  ;;  %v5461_v50 = vmax.f32 %v11711_v63, 0.0  ;;  %v9379_v63 = vld [vmem:[#allocation12 + $0x108] sm:$0xff] }
 0xc05   :  { %v8601_v23 = vmul.f32 -1.442695, %v5774_v48 }
 0xc06   :  { %v9650_v51 = vpop.eup %9649 }
 0xc07   :  { %v9652_v52 = vpop.eup %9651  ;;  %v5779_v21 = vadd.f32 1.0, %v9650_v51  ;;  %9653 = vpow2.f32 %v8601_v23  ;;  %v9393_v23 = vld [vmem:[#allocation12 + $0x178] sm:$0xff] }
 0xc08   :  { %v5798_v18 = vadd.f32 1.0, %v9652_v52  ;;  %v9401_v51 = vld [vmem:[#allocation12 + $0x1b8] sm:$0xff]  ;;  %v9384_v52 = vld [vmem:[#allocation12 + $0x130] sm:$0xff] }
 0xc09   :  { %9655 = vrcp.f32 %v5779_v21  ;;  %v5791_v40 = vand.u32 2147483648, %v5779_v21  ;;  %v5789_v13 = vand.u32 2147483647, %v5779_v21  ;;  %vm5785_vm10 = vweird.f32 %v5779_v21 }
 0xc0a   :  { %9657 = vrcp.f32 %v5798_v18  ;;  %v5757_v62 = vpop.f32.mrf.mxu2  ;;  %v5770_v14 = vpop.f32.mrf.mxu3  ;;  %v5810_v61 = vand.u32 2147483648, %v5798_v18  ;;  %v5808_v56 = vand.u32 2147483647, %v5798_v18  ;;  %vm5804_vm11 = vweird.f32 %v5798_v18 }
 0xc0b   :  { %v5792_v6 = vor.u32 1.1754944e-38, %v5791_v40  ;;  %vm5790_vm14 = vcmp.eq.f32.partialorder %v5789_v13, 8.507059e+37  ;;  %v9390_v62 = vld [vmem:[#allocation12 + $0x160] sm:$0xff]  ;;  %v5083_v14 = vmax.f32 %v11575_v30, 0.0  ;;  %v9380_v30 = vld [vmem:[#allocation12 + $0x110] sm:$0xff]  ;;  %v5713_v13 = vmax.f32 %v11802_v24, 0.0 }
 0xc0c   :  { %v5811_v15 = vor.u32 1.1754944e-38, %v5810_v61  ;;  %vm5809_vm15 = vcmp.eq.f32.partialorder %v5808_v56, 8.507059e+37  ;;  %v9386_v40 = vld [vmem:[#allocation12 + $0x140] sm:$0xff] }
 0xc0d   :  { %v9654_v32 = vpop.eup %9653  ;;  %v5975_v54 = vpack.c.bf16 %v5083_v14, %v5083_v14  ;;  %v9394_v61 = vld [vmem:[#allocation12 + $0x180] sm:$0xff]  ;;  %v5980_v55 = vpack.c.bf16 %v5713_v13, %v5713_v13 }
 0xc0e   :  { %v5817_v35 = vadd.f32 1.0, %v9654_v32  ;;  %v9398_v32 = vld [vmem:[#allocation12 + $0x1a0] sm:$0xff] }
 0xc0f   :  { %v9656_v46 = vpop.eup %9655 }
 0xc10   :  { %v9658_v31 = vpop.eup %9657  ;;  %v5781_v47 = vmul.f32 %v9656_v46, %v5779_v21  ;;  %9659 = vrcp.f32 %v5817_v35  ;;  %vm5786_vm8 = vweird.f32 %v9656_v46  ;;  %v5829_v8 = vand.u32 2147483648, %v5817_v35  ;;  %v9392_v21 = vld [vmem:[#allocation12 + $0x170] sm:$0xff] }
 0xc11   :  { %v5800_v10 = vmul.f32 %v9658_v31, %v5798_v18  ;;  %9661 = vtanh.f32 %v5775_v1  ;;  %vm5805_vm9 = vweird.f32 %v9658_v31  ;;  %vm5787_vm12 = vmor %vm5785_vm10, %vm5786_vm8  ;;  %vm5823_vm1 = vweird.f32 %v5817_v35  ;;  %v9400_v18 = vld [vmem:[#allocation12 + $0x1b0] sm:$0xff]  ;;  %v9389_v1 = vld [vmem:[#allocation12 + $0x158] sm:$0xff] }
 0xc12   :  { %v5782_v28 = vsub.f32 1.0, %v5781_v47  ;;  %vm5806_vm13 = vmor %vm5804_vm11, %vm5805_vm9  ;;  %v5827_v48 = vand.u32 2147483647, %v5817_v35  ;;  %v5830_v4 = vor.u32 1.1754944e-38, %v5829_v8  ;;  %v5978_v47 = vpack.c.bf16 %v5461_v50, %v5461_v50 }
 0xc13   :  { %v5801_v22 = vsub.f32 1.0, %v5800_v10  ;;  %v9397_v10 = vld [vmem:[#allocation12 + $0x198] sm:$0xff] }
 0xc14   :  { %v5783_v2 = vmul.f32 %v9656_v46, %v5782_v28  ;;  %vm5828_vm3 = vcmp.eq.f32.partialorder %v5827_v48, 8.507059e+37  ;;  %v9395_v28 = vld [vmem:[#allocation12 + $0x188] sm:$0xff] }
 0xc15   :  { %v5802_v39 = vmul.f32 %v9658_v31, %v5801_v22  ;;  %v9378_v22 = vld [vmem:[#allocation12 + $0x100] sm:$0xff] }
 0xc16   :  { %v9660_v53 = vpop.eup %9659  ;;  %v5784_v36 = vadd.f32 %v9656_v46, %v5783_v2  ;;  %v5587_v2 = vmax.f32 %v11758_v26, 0.0  ;;  %v9406_v26 = vld [vmem:[#allocation12 + $0x1e0] sm:$0xff] }
 0xc17   :  { %v5819_v3 = vmul.f32 %v9660_v53, %v5817_v35  ;;  %v5803_v11 = vadd.f32 %v9658_v31, %v5802_v39  ;;  %v9662_v20 = vpop.eup %9661  ;;  %vm5824_vm0 = vweird.f32 %v9660_v53  ;;  %v5976_v35 = vpack.c.bf16 %v5209_v33, %v5209_v33  ;;  %v11974_v33 = vld [vmem:[#allocation37_spill] sm:$0xff] }
 0xc18   :  { %v5788_v0 = vsel %vm5787_vm12, %v9656_v46, %v5784_v36  ;;  %vm5825_vm2 = vmor %vm5823_vm1, %vm5824_vm0  ;;  %v9381_v46 = vld [vmem:[#allocation12 + $0x118] sm:$0xff]  ;;  %v5979_v56 = vpack.c.bf16 %v5587_v2, %v5587_v2 }
 0xc19   :  { %v5820_v5 = vsub.f32 1.0, %v5819_v3  ;;  %v5793_v41 = vsel %vm5790_vm14, %v5792_v6, %v5788_v0  ;;  %v5807_v19 = vsel %vm5806_vm13, %v9658_v31, %v5803_v11  ;;  %v5977_v31 = vpack.c.bf16 %v5335_v37, %v5335_v37  ;;  %v9409_v36 = vld [vmem:[#allocation12 + $0x1f8] sm:$0xff]  ;;  %v9408_v3 = vld [vmem:[#allocation12 + $0x1f0] sm:$0xff]  ;;  %v9407_v6 = vld [vmem:[#allocation12 + $0x1e8] sm:$0xff] }
 0xc1a   :  { %v5812_v34 = vsel %vm5809_vm15, %v5811_v15, %v5807_v19  ;;  %v5835_v29 = vmul.f32 %v9662_v20, %v5793_v41  ;;  %v11971_v15 = vld [vmem:[#allocation38_spill] sm:$0xff]  ;;  %v11972_v20 = vld [vmem:[#allocation19_spill] sm:$0xff] }
 0xc1b   :  { %v5821_v17 = vmul.f32 %v9660_v53, %v5820_v5  ;;  %v5834_v59 = vmul.f32 %v5812_v34, %v11799_v42  ;;  %v9405_v41 = vld [vmem:[#allocation12 + $0x1d8] sm:$0xff] }
 0xc1d   :  { %v11820_v7 = vadd.f32 %v5835_v29, %v5834_v59  ;;  %v5822_v12 = vadd.f32 %v9660_v53, %v5821_v17  ;;  %v9404_v29 = vld [vmem:[#allocation12 + $0x1d0] sm:$0xff] }
 0xc1f   :  { %9663 = vtanh.f32 %v11820_v7  ;;  %v5826_v38 = vsel %vm5825_vm2, %v9660_v53, %v5822_v12  ;;  %v11973_v12 = vld [vmem:[#allocation16_spill] sm:$0xff] }
 0xc20   :  { %v5831_v25 = vsel %vm5828_vm3, %v5830_v4, %v5826_v38  ;;  %v9403_v4 = vld [vmem:[#allocation12 + $0x1c8] sm:$0xff] }
 0xc25   :  { %v9664_v9 = vpop.eup %9663 }
 0xc26   :  { %v11823_v58 = vmul.f32 %v9664_v9, %v5831_v25 }
 0xc28   :  { %v5845_v42 = vpack.c.bf16 %v11823_v58, %v11823_v58  ;;  %v5839_v39 = vmax.f32 %v11823_v58, 0.0  ;;  %v9402_v58 = vld [vmem:[#allocation12 + $0x1c0] sm:$0xff] }
 0xc2a   :  { %5854 = vmatmul.bf16.vlgmr.msra.gmra.mxu0 %v5845_v42  ;;  %5867 = vmatmul.bf16.vlgmr.msra.gmra.mxu1 %v5845_v42  ;;  %v5981_v53 = vpack.c.bf16 %v5839_v39, %v5839_v39 }
 0xc2b   :  { %5880 = vmatmul.bf16.vlgmr.msra.gmra.mxu2 %v5845_v42  ;;  %5893 = vmatmul.bf16.vlgmr.msra.gmra.mxu3 %v5845_v42 }
 0xc2c   :  { %6551 = vmatpush.bf16.msra.mxu0 %v9385_v27  ;;  %6564 = vmatpush.bf16.msra.mxu1 %v9393_v23 }
 0xc2d   :  { %6577 = vmatpush.bf16.msra.mxu2 %v9401_v51  ;;  %6590 = vmatpush.bf16.msra.mxu3 %v9409_v36  ;;  %v9422_v51 = vld [vmem:[%s11863_s11] ss:$0 sm:$0xff] }
 0xc30   :  { %6552 = vmatpush.bf16.msra.mxu0 %v9384_v52  ;;  %6565 = vmatpush.bf16.msra.mxu1 %v9392_v21 }
 0xc31   :  { %6578 = vmatpush.bf16.msra.mxu2 %v9400_v18  ;;  %6591 = vmatpush.bf16.msra.mxu3 %v9408_v3 }
 0xc34   :  { %6553 = vmatpush.bf16.msra.mxu0 %v9383_v60  ;;  %6566 = vmatpush.bf16.msra.mxu1 %v9391_v16 }
 0xc35   :  { %6579 = vmatpush.bf16.msra.mxu2 %v9399_v57  ;;  %6592 = vmatpush.bf16.msra.mxu3 %v9407_v6 }
 0xc38   :  { %6554 = vmatpush.bf16.msra.mxu0 %v9382_v44  ;;  %6567 = vmatpush.bf16.msra.mxu1 %v9390_v62 }
 0xc39   :  { %6580 = vmatpush.bf16.msra.mxu2 %v9398_v32  ;;  %6593 = vmatpush.bf16.msra.mxu3 %v9406_v26 }
 0xc3a   :  { %6507 = vmatmul.bf16.vlgmr.msrb.gmra.mxu0 %v5975_v54  ;;  %6520 = vmatmul.bf16.vlgmr.msrb.gmra.mxu1 %v5976_v35 }
 0xc3b   :  { %6533 = vmatmul.bf16.vlgmr.msrb.gmra.mxu2 %v5977_v31  ;;  %6546 = vmatmul.bf16.vlgmr.msrb.gmra.mxu3 %v5978_v47 }
 0xc3c   :  { %6555 = vmatpush.bf16.msra.mxu0 %v9381_v46  ;;  %6568 = vmatpush.bf16.msra.mxu1 %v9389_v1 }
 0xc3d   :  { %6581 = vmatpush.bf16.msra.mxu2 %v9397_v10  ;;  %6594 = vmatpush.bf16.msra.mxu3 %v9405_v41 }
 0xc40   :  { %6556 = vmatpush.bf16.msra.mxu0 %v9380_v30  ;;  %6569 = vmatpush.bf16.msra.mxu1 %v9388_v45 }
 0xc41   :  { %6582 = vmatpush.bf16.msra.mxu2 %v9396_v49  ;;  %6595 = vmatpush.bf16.msra.mxu3 %v9404_v29 }
 0xc44   :  { %6557 = vmatpush.bf16.msra.mxu0 %v9379_v63  ;;  %6570 = vmatpush.bf16.msra.mxu1 %v9387_v43 }
 0xc45   :  { %6583 = vmatpush.bf16.msra.mxu2 %v9395_v28  ;;  %6596 = vmatpush.bf16.msra.mxu3 %v9403_v4 }
 0xc48   :  { %6558 = vmatpush.bf16.msra.mxu0 %v9378_v22  ;;  %6571 = vmatpush.bf16.msra.mxu1 %v9386_v40 }
 0xc49   :  { %6584 = vmatpush.bf16.msra.mxu2 %v9394_v61  ;;  %6597 = vmatpush.bf16.msra.mxu3 %v9402_v58 }
 0xc4b   :  { %6559 = vmatmul.bf16.vlgmr.msra.gmra.mxu0 %v5979_v56  ;;  %6572 = vmatmul.bf16.vlgmr.msra.gmra.mxu1 %v5980_v55 }
 0xc4c   :  { %6585 = vmatmul.bf16.vlgmr.msra.gmra.mxu2 %v5981_v53 }
 0xca7   :  { %v5855_v24 = vpop.f32.mrf.mxu0  ;;  %v5868_v11 = vpop.f32.mrf.mxu1 }
 0xca8   :  { %v5898_v0 = vadd.f32 %v5855_v24, %v11971_v15  ;;  %v5899_v5 = vadd.f32 %v5868_v11, %v11972_v20 }
 0xcaa   :  { %v8602_v19 = vmul.f32 -1.442695, %v5898_v0  ;;  %v8603_v34 = vmul.f32 -1.442695, %v5899_v5 }
 0xcac   :  { %9665 = vpow2.f32 %v8602_v19 }
 0xcad   :  { %9667 = vpow2.f32 %v8603_v34 }
 0xcae   :  { %v5881_v17 = vpop.f32.mrf.mxu2  ;;  %v5894_v59 = vpop.f32.mrf.mxu3 }
 0xcaf   :  { %v5900_v8 = vadd.f32 %v5881_v17, %v11973_v12  ;;  %v5857_v48 = vpop.f32.mrf.mxu0  ;;  %v5870_v38 = vpop.f32.mrf.mxu1  ;;  %v5901_v32 = vadd.f32 %v5894_v59, %v11974_v33 }
 0xcb1   :  { %v8604_v9 = vmul.f32 -1.442695, %v5900_v8 }
 0xcb2   :  { %v9666_v25 = vpop.eup %9665 }
 0xcb3   :  { %v9668_v42 = vpop.eup %9667  ;;  %v5905_v27 = vadd.f32 1.0, %v9666_v25  ;;  %9669 = vpow2.f32 %v8604_v9 }
 0xcb4   :  { %v5924_v23 = vadd.f32 1.0, %v9668_v42 }
 0xcb5   :  { %9671 = vrcp.f32 %v5905_v27  ;;  %v5917_v47 = vand.u32 2147483648, %v5905_v27  ;;  %v5915_v43 = vand.u32 2147483647, %v5905_v27  ;;  %vm5911_vm6 = vweird.f32 %v5905_v27 }
 0xcb6   :  { %9673 = vrcp.f32 %v5924_v23  ;;  %v5883_v52 = vpop.f32.mrf.mxu2  ;;  %v5896_v21 = vpop.f32.mrf.mxu3  ;;  %v5936_v49 = vand.u32 2147483648, %v5924_v23  ;;  %v5934_v22 = vand.u32 2147483647, %v5924_v23  ;;  %vm5930_vm7 = vweird.f32 %v5924_v23 }
 0xcb7   :  { %v6508_v18 = vpop.f32.mrf.mxu0  ;;  %v6521_v60 = vpop.f32.mrf.mxu1  ;;  %v5918_v39 = vor.u32 1.1754944e-38, %v5917_v47  ;;  %vm5916_vm10 = vcmp.eq.f32.partialorder %v5915_v43, 8.507059e+37 }
 0xcb8   :  { %v6509_v16 = vadd.f32 %v9422_v51, %v6508_v18  ;;  %v5937_v55 = vor.u32 1.1754944e-38, %v5936_v49  ;;  %vm5935_vm11 = vcmp.eq.f32.partialorder %v5934_v22, 8.507059e+37 }
 0xcb9   :  { %v9670_v57 = vpop.eup %9669 }
 0xcba   :  { %v11840_v44 = vadd.f32 1.0, %v9670_v57  ;;  %v6522_v62 = vadd.f32 %v6521_v60, %v6509_v16 }
 0xcbb   :  { %v9672_v14 = vpop.eup %9671 }
 0xcbc   :  { %v9674_v37 = vpop.eup %9673  ;;  %v5907_v50 = vmul.f32 %v9672_v14, %v5905_v27  ;;  %9675 = vrcp.f32 %v11840_v44  ;;  %vm5912_vm4 = vweird.f32 %v9672_v14  ;;  %v5955_v59 = vand.u32 2147483648, %v11840_v44 }
 0xcbd   :  { %v5926_v54 = vmul.f32 %v9674_v37, %v5924_v23  ;;  %9677 = vtanh.f32 %v5901_v32  ;;  %vm5931_vm5 = vweird.f32 %v9674_v37  ;;  %vm5913_vm8 = vmor %vm5911_vm6, %vm5912_vm4  ;;  %vm5949_vm13 = vweird.f32 %v11840_v44 }
 0xcbe   :  { %v5908_v35 = vsub.f32 1.0, %v5907_v50  ;;  %v6534_v46 = vpop.f32.mrf.mxu2  ;;  %v6547_v1 = vpop.f32.mrf.mxu3  ;;  %vm5932_vm9 = vmor %vm5930_vm7, %vm5931_vm5  ;;  %v5953_v8 = vand.u32 2147483647, %v11840_v44  ;;  %v5956_v38 = vor.u32 1.1754944e-38, %v5955_v59 }
 0xcbf   :  { %v5927_v31 = vsub.f32 1.0, %v5926_v54  ;;  %v6535_v10 = vadd.f32 %v6534_v46, %v6522_v62  ;;  %v6510_v30 = vpop.f32.mrf.mxu0  ;;  %v6523_v45 = vpop.f32.mrf.mxu1 }
 0xcc0   :  { %v5909_v63 = vmul.f32 %v9672_v14, %v5908_v35  ;;  %vm5954_vm15 = vcmp.eq.f32.partialorder %v5953_v8, 8.507059e+37 }
 0xcc1   :  { %v5928_v28 = vmul.f32 %v9674_v37, %v5927_v31  ;;  %v6548_v40 = vadd.f32 %v6547_v1, %v6535_v10 }
 0xcc2   :  { %v9676_v61 = vpop.eup %9675  ;;  %v5910_v2 = vadd.f32 %v9672_v14, %v5909_v63 }
 0xcc3   :  { %v5945_v13 = vmul.f32 %v9676_v61, %v11840_v44  ;;  %v5929_v56 = vadd.f32 %v9674_v37, %v5928_v28  ;;  %v9678_v36 = vpop.eup %9677  ;;  %vm5950_vm12 = vweird.f32 %v9676_v61 }
 0xcc4   :  { %v5914_v53 = vsel %vm5913_vm8, %v9672_v14, %v5910_v2  ;;  %vm5951_vm14 = vmor %vm5949_vm13, %vm5950_vm12 }
 0xcc5   :  { %v5946_v3 = vsub.f32 1.0, %v5945_v13  ;;  %v5919_v6 = vsel %vm5916_vm10, %v5918_v39, %v5914_v53  ;;  %v5933_v26 = vsel %vm5932_vm9, %v9674_v37, %v5929_v56 }
 0xcc6   :  { %v5938_v24 = vsel %vm5935_vm11, %v5937_v55, %v5933_v26  ;;  %v5961_v11 = vmul.f32 %v9678_v36, %v5919_v6  ;;  %v6536_v15 = vpop.f32.mrf.mxu2  ;;  %v6549_v0 = vpop.f32.mrf.mxu3 }
 0xcc7   :  { %v5947_v20 = vmul.f32 %v9676_v61, %v5946_v3  ;;  %v5960_v5 = vmul.f32 %v5938_v24, %v11820_v7 }
 0xcc8   :  { %v6560_v41 = vpop.f32.mrf.mxu0  ;;  %v6573_v19 = vpop.f32.mrf.mxu1 }
 0xcc9   :  { %v5962_v34 = vadd.f32 %v5961_v11, %v5960_v5  ;;  %v6561_v29 = vadd.f32 %v6560_v41, %v6548_v40  ;;  %v5948_v17 = vadd.f32 %v9676_v61, %v5947_v20 }
 0xccb   :  { %9679 = vtanh.f32 %v5962_v34  ;;  %v6574_v12 = vadd.f32 %v6573_v19, %v6561_v29  ;;  %v5952_v48 = vsel %vm5951_vm14, %v9676_v61, %v5948_v17 }
 0xccc   :  { %v5957_v42 = vsel %vm5954_vm15, %v5956_v38, %v5952_v48 }
 0xccf   :  { %v6586_v4 = vpop.f32.mrf.mxu2 }
 0xcd0   :  { %v6587_v9 = vadd.f32 %v6586_v4, %v6574_v12  ;;  %v6562_v7 = vpop.f32.mrf.mxu0  ;;  %v6575_v25 = vpop.f32.mrf.mxu1 }
 0xcd1   :  { %v9680_v58 = vpop.eup %9679 }
 0xcd2   :  { %v5964_v27 = vmul.f32 %v9680_v58, %v5957_v42 }
 0xcd4   :  { %v5965_v23 = vmax.f32 %v5964_v27, 0.0 }
 0xcd6   :  { %v5982_v51 = vpack.c.bf16 %v5965_v23, %v5965_v23 }
 0xcd7   :  { %v6588_v52 = vpop.f32.mrf.mxu2 }
 0xcd8   :  { %6598 = vmatmul.bf16.vlgmr.msra.gmra.mxu3 %v5982_v51 }
 0xd5b   :  { %v6599_v21 = vpop.f32.mrf.mxu3 }
 0xd5c   :  { %v6600_v18 = vadd.f32 %v6599_v21, %v6587_v9 }
 0xd5e   :  { %v6604_v60 = vmin.f32 %v6600_v18, 0.0  ;;  %vm6603_vm0 = vcmp.gt.f32.partialorder %v6600_v18, 0.0 }
 0xd60   :  { %v6605_v16 = vmul.f32 1.442695, %v6604_v60 }
 0xd62   :  { %9681 = vpow2.f32 %v6605_v16 }
 0xd63   :  { %v6601_v57 = vpop.f32.mrf.mxu3 }
 0xd68   :  { %v9682_v44 = vpop.eup %9681 }
 0xd69   :  { %v8861_v62 = vadd.f32 -1.0, %v9682_v44 }
 0xd6b   :  { %v6608_v14 = vsel %vm6603_vm0, %v6600_v18, %v8861_v62 }
 0xd6c   :  { %6609 = vst [vmem:[%s11864_s12] sm:$0xff] %v6608_v14 }
 0xd6d   :  { %6618 = vsyncpa [#allocation6], 1 }
 0xd6e   :  { %6619 = vsyncpa [#allocation8], 1 }
 0xd6f   :  { %6620 = vsyncpa [#allocation11], 1 }

</bundles_post_ra>
